<compile_context>
chip_gen: v5e
topology: v5e:2x2
jax: 0.10.0
libtpu: 0.0.40
codegen_flags: <defaults>
</compile_context>

<pallas_src>
import jax
import jax.numpy as jnp
from jax import lax
from jax.experimental import pallas as pl
from jax.experimental.pallas import tpu as pltpu

NUM_CLASS = 11
CLS_PAD = 128          # one-hot / fused-weight / output class dim padded lane-dense
EMB_DIM = 512
H1 = 256
H2 = 128
PAD_CLASS = 0
TM = 512               # token-row tile (multiple of 8); grid = n_pad // TM


def vae_kernel(ids_ref, eps_ref,
               wf_ref, b1_ref,
               w2_ref, b2_ref,
               wmu_ref, bmu_ref,
               w3_ref, b3_ref,
               w4_ref, b4_ref,
               wp_ref, bp_ref,
               out_ref):
    ids = ids_ref[...]                                     # (TM, 1) int32
    tm = ids.shape[0]

    # One-hot over a lane-dense padded class axis (K=128).  Row PAD_CLASS of
    # the fused weight is zero, so the padding-token mask of
    # custom_embedding_layer is implicit (pad rows contribute exactly 0).
    onehot = (ids == lax.broadcasted_iota(jnp.int32, (tm, CLS_PAD), 1)
              ).astype(jnp.bfloat16)                       # (TM, 128)

    # Fused embedding + pad-mask + Linear(512, 256), then ReLU.
    h = jnp.dot(onehot, wf_ref[...], preferred_element_type=jnp.float32)
    h = jnp.maximum(h + b1_ref[...], 0.0)                  # (TM, 256) f32

    # Linear(256, 128) + ReLU.
    h = jnp.dot(h.astype(jnp.bfloat16), w2_ref[...],
                preferred_element_type=jnp.float32)
    h = jnp.maximum(h + b2_ref[...], 0.0)                  # (TM, 128) f32

    # mu (the original module applies mu_layer for sigma too -> sigma == mu).
    mu = jnp.dot(h.astype(jnp.bfloat16), wmu_ref[...],
                 preferred_element_type=jnp.float32) + bmu_ref[...]
    std = jnp.exp(0.5 * mu)                                # f32
    latent = mu + std * eps_ref[...]                       # (TM, 128) f32

    # Decoder: Linear(128, 256)+ReLU, Linear(256, 512)+ReLU.
    d = jnp.dot(latent.astype(jnp.bfloat16), w3_ref[...],
                preferred_element_type=jnp.float32)
    d = jnp.maximum(d + b3_ref[...], 0.0)                  # (TM, 256) f32
    d = jnp.dot(d.astype(jnp.bfloat16), w4_ref[...],
                preferred_element_type=jnp.float32)
    d = jnp.maximum(d + b4_ref[...], 0.0)                  # (TM, 512) f32

    # Projection to a lane-dense 128-wide output (cols 11..127 are zero pad).
    out_ref[...] = jnp.dot(d.astype(jnp.bfloat16), wp_ref[...],
                           preferred_element_type=jnp.float32) + bp_ref[...]


def init_params(key):
    """Deterministic parameter init (shapes from the module's __init__).

    Linear weights are stored as (in, out) so the forward computes x @ W + b
    (equivalent to PyTorch's x @ W.T + b with W of shape (out, in))."""
    ks = jax.random.split(key, 14)
    s = 0.02

    def lin(kw, kb, din, dout):
        return (s * jax.random.normal(kw, (din, dout), jnp.float32),
                s * jax.random.normal(kb, (1, dout), jnp.float32))

    wemb = jax.random.normal(ks[0], (NUM_CLASS, EMB_DIM), jnp.float32)
    w1, b1 = lin(ks[1], ks[2], EMB_DIM, H1)
    w2, b2 = lin(ks[3], ks[4], H1, H2)
    wmu, bmu = lin(ks[5], ks[6], H2, H2)
    w3, b3 = lin(ks[7], ks[8], H2, H1)
    w4, b4 = lin(ks[9], ks[10], H1, EMB_DIM)
    wp, bp = lin(ks[11], ks[12], EMB_DIM, NUM_CLASS)
    return dict(wemb=wemb, w1=w1, b1=b1, w2=w2, b2=b2, wmu=wmu, bmu=bmu,
                w3=w3, b3=b3, w4=w4, b4=b4, wp=wp, bp=bp)


def prepare_kernel_params(params):
    """Fuse embedding+mask+first Linear, pad the projection lane-dense, and
    cast all matmul weights to bf16 (biases stay f32)."""
    wemb_eff = params["wemb"].at[PAD_CLASS].set(0.0)       # zero pad-class row
    wf = wemb_eff @ params["w1"]                           # (11, 256) f32
    wf_pad = jnp.zeros((CLS_PAD, H1), jnp.float32).at[:NUM_CLASS].set(wf)

    wp_pad = jnp.zeros((EMB_DIM, CLS_PAD), jnp.float32
                       ).at[:, :NUM_CLASS].set(params["wp"])
    bp_pad = jnp.zeros((1, CLS_PAD), jnp.float32
                       ).at[:, :NUM_CLASS].set(params["bp"])

    bf16 = lambda w: w.astype(jnp.bfloat16)
    return dict(
        wf=bf16(wf_pad), b1=params["b1"],
        w2=bf16(params["w2"]), b2=params["b2"],
        wmu=bf16(params["wmu"]), bmu=params["bmu"],
        w3=bf16(params["w3"]), b3=params["b3"],
        w4=bf16(params["w4"]), b4=params["b4"],
        wp=bf16(wp_pad), bp=bp_pad,
    )


def vae_v1_1_forward(x, params, eps):
    """x: (B, 30, 30) or (30, 30) int class ids.  eps: (B, 900, 128) float32.
    Returns (B, 11, 30, 30) float32 (NCHW)."""
    batch = x.shape[0] if x.ndim >= 3 else 1
    ids = x.reshape(batch, 900).astype(jnp.int32)
    n_tok = batch * 900
    n_pad = ((n_tok + TM - 1) // TM) * TM                  # grid = n_pad // TM

    ids_flat = jnp.zeros((n_pad, 1), jnp.int32).at[:n_tok, 0].set(ids.reshape(-1))
    eps_flat = jnp.zeros((n_pad, H2), jnp.float32).at[:n_tok].set(
        eps.reshape(n_tok, H2))

    kp = prepare_kernel_params(params)

    full = lambda i: (0, 0)
    row = lambda i: (i, 0)

    out_pad = pl.pallas_call(
        vae_kernel,
        out_shape=jax.ShapeDtypeStruct((n_pad, CLS_PAD), jnp.float32),
        grid=(n_pad // TM,),
        in_specs=[
            pl.BlockSpec((TM, 1), row),                    # ids
            pl.BlockSpec((TM, H2), row),                   # eps
            pl.BlockSpec((CLS_PAD, H1), full), pl.BlockSpec((1, H1), full),
            pl.BlockSpec((H1, H2), full),      pl.BlockSpec((1, H2), full),
            pl.BlockSpec((H2, H2), full),      pl.BlockSpec((1, H2), full),
            pl.BlockSpec((H2, H1), full),      pl.BlockSpec((1, H1), full),
            pl.BlockSpec((H1, EMB_DIM), full), pl.BlockSpec((1, EMB_DIM), full),
            pl.BlockSpec((EMB_DIM, CLS_PAD), full), pl.BlockSpec((1, CLS_PAD), full),
        ],
        out_specs=pl.BlockSpec((TM, CLS_PAD), row),
        compiler_params=pltpu.CompilerParams(
            dimension_semantics=("parallel",),
            vmem_limit_bytes=32 * 1024 * 1024),
    )(ids_flat, eps_flat,
      kp["wf"], kp["b1"], kp["w2"], kp["b2"], kp["wmu"], kp["bmu"],
      kp["w3"], kp["b3"], kp["w4"], kp["b4"], kp["wp"], kp["bp"])

    out = out_pad[:n_tok, :NUM_CLASS].reshape(batch, 30, 30, NUM_CLASS)
    return jnp.transpose(out, (0, 3, 1, 2))                # NCHW (B, 11, 30, 30)


def reference_forward(x, params, eps):
    """Pure-JAX fp32 reference mirroring the PyTorch forward exactly."""
    batch = x.shape[0] if x.ndim >= 3 else 1
    ids = x.reshape(batch, 900).astype(jnp.int32)
    emb = params["wemb"][ids]                              # (B, 900, 512)
    emb = jnp.where((ids == PAD_CLASS)[..., None], 0.0, emb)
    h = jax.nn.relu(emb @ params["w1"] + params["b1"])
    h = jax.nn.relu(h @ params["w2"] + params["b2"])
    mu = h @ params["wmu"] + params["bmu"]
    sigma = mu                                             # module quirk
    std = jnp.exp(0.5 * sigma)
    latent = mu + std * eps
    d = jax.nn.relu(latent @ params["w3"] + params["b3"])
    d = jax.nn.relu(d @ params["w4"] + params["b4"])
    out = d @ params["wp"] + params["bp"]
    return jnp.transpose(out.reshape(batch, 30, 30, NUM_CLASS), (0, 3, 1, 2))


if __name__ == "__main__":
    key = jax.random.PRNGKey(0)
    k_param, k_x, k_eps = jax.random.split(key, 3)

    params = init_params(k_param)

    B = 2
    x = jax.random.randint(k_x, (B, 30, 30), 0, NUM_CLASS, dtype=jnp.int32)
    eps = jax.random.normal(k_eps, (B, 900, H2), jnp.float32)

    out = vae_v1_1_forward(x, params, eps)
    out = jax.block_until_ready(out)
    assert out.shape == (B, NUM_CLASS, 30, 30), out.shape

    ref = jax.block_until_ready(reference_forward(x, params, eps))
    assert jnp.allclose(out, ref, rtol=1e-2, atol=1e-2), "mismatch vs reference"

    print("KERNEL_OK")
</pallas_src>

<mosaic_0001>
module attributes {stable_mosaic.version = 11 : i64} {
  func.func @vae_kernel(%arg0: i32, %arg1: memref<512x1xi32, #tpu.memory_space<vmem>>, %arg2: memref<512x128xf32, #tpu.memory_space<vmem>>, %arg3: memref<128x256xbf16, #tpu.memory_space<vmem>>, %arg4: memref<1x256xf32, #tpu.memory_space<vmem>>, %arg5: memref<256x128xbf16, #tpu.memory_space<vmem>>, %arg6: memref<1x128xf32, #tpu.memory_space<vmem>>, %arg7: memref<128x128xbf16, #tpu.memory_space<vmem>>, %arg8: memref<1x128xf32, #tpu.memory_space<vmem>>, %arg9: memref<128x256xbf16, #tpu.memory_space<vmem>>, %arg10: memref<1x256xf32, #tpu.memory_space<vmem>>, %arg11: memref<256x512xbf16, #tpu.memory_space<vmem>>, %arg12: memref<1x512xf32, #tpu.memory_space<vmem>>, %arg13: memref<512x128xbf16, #tpu.memory_space<vmem>>, %arg14: memref<1x128xf32, #tpu.memory_space<vmem>>, %arg15: memref<512x128xf32, #tpu.memory_space<vmem>>) attributes {dimension_semantics = [#tpu.dimension_semantics<parallel>], iteration_bounds = array<i64: 4>, scalar_prefetch = 0 : i64, scratch_operands = 0 : i64, tpu.core_type = #tpu.core_type<tc>, window_params = [{transform_indices = @transform_0, window_bounds = array<i64: 512, 1>}, {transform_indices = @transform_1, window_bounds = array<i64: 512, 128>}, {pipeline_mode = #tpu.pipeline_mode<synchronous>, transform_indices = @transform_2, window_bounds = array<i64: 128, 256>}, {pipeline_mode = #tpu.pipeline_mode<synchronous>, transform_indices = @transform_3, window_bounds = array<i64: 1, 256>}, {pipeline_mode = #tpu.pipeline_mode<synchronous>, transform_indices = @transform_4, window_bounds = array<i64: 256, 128>}, {pipeline_mode = #tpu.pipeline_mode<synchronous>, transform_indices = @transform_5, window_bounds = array<i64: 1, 128>}, {pipeline_mode = #tpu.pipeline_mode<synchronous>, transform_indices = @transform_6, window_bounds = array<i64: 128, 128>}, {pipeline_mode = #tpu.pipeline_mode<synchronous>, transform_indices = @transform_7, window_bounds = array<i64: 1, 128>}, {pipeline_mode = #tpu.pipeline_mode<synchronous>, transform_indices = @transform_8, window_bounds = array<i64: 128, 256>}, {pipeline_mode = #tpu.pipeline_mode<synchronous>, transform_indices = @transform_9, window_bounds = array<i64: 1, 256>}, {pipeline_mode = #tpu.pipeline_mode<synchronous>, transform_indices = @transform_10, window_bounds = array<i64: 256, 512>}, {pipeline_mode = #tpu.pipeline_mode<synchronous>, transform_indices = @transform_11, window_bounds = array<i64: 1, 512>}, {pipeline_mode = #tpu.pipeline_mode<synchronous>, transform_indices = @transform_12, window_bounds = array<i64: 512, 128>}, {pipeline_mode = #tpu.pipeline_mode<synchronous>, transform_indices = @transform_13, window_bounds = array<i64: 1, 128>}, {transform_indices = @transform_14, window_bounds = array<i64: 512, 128>}]} {
    %c0 = arith.constant 0 : index
    %c0_0 = arith.constant 0 : index
    %0 = vector.load %arg1[%c0, %c0_0] : memref<512x1xi32, #tpu.memory_space<vmem>>, vector<512x1xi32>
    %1 = tpu.iota {dimensions = array<i32: 1>} : vector<512x128xi32>
    %2 = vector.broadcast %0 : vector<512x1xi32> to vector<512x128xi32>
    %3 = arith.cmpi eq, %2, %1 : vector<512x128xi32>
    %4 = arith.extui %3 : vector<512x128xi1> to vector<512x128xi32>
    %5 = arith.sitofp %4 : vector<512x128xi32> to vector<512x128xf32>
    %6 = arith.truncf %5 : vector<512x128xf32> to vector<512x128xbf16>
    %c0_1 = arith.constant 0 : index
    %c0_2 = arith.constant 0 : index
    %7 = vector.load %arg3[%c0_1, %c0_2] : memref<128x256xbf16, #tpu.memory_space<vmem>>, vector<128x256xbf16>
    %cst = arith.constant dense<0.000000e+00> : vector<512x256xf32>
    %8 = tpu.matmul %6, %7, %cst {dimension_numbers = #tpu.dot_dimension_numbers<[1], [0], [0], [1], [0, 0, 1, 1], [], []>} : vector<512x128xbf16>, vector<128x256xbf16>, vector<512x256xf32> -> vector<512x256xf32>
    %c0_3 = arith.constant 0 : index
    %c0_4 = arith.constant 0 : index
    %9 = vector.load %arg4[%c0_3, %c0_4] : memref<1x256xf32, #tpu.memory_space<vmem>>, vector<1x256xf32>
    %10 = vector.broadcast %9 : vector<1x256xf32> to vector<512x256xf32>
    %11 = arith.addf %8, %10 : vector<512x256xf32>
    %cst_5 = arith.constant 0.000000e+00 : f32
    %12 = vector.broadcast %cst_5 : f32 to vector<512x256xf32>
    %13 = arith.maximumf %11, %12 : vector<512x256xf32>
    %14 = arith.truncf %13 : vector<512x256xf32> to vector<512x256xbf16>
    %c0_6 = arith.constant 0 : index
    %c0_7 = arith.constant 0 : index
    %15 = vector.load %arg5[%c0_6, %c0_7] : memref<256x128xbf16, #tpu.memory_space<vmem>>, vector<256x128xbf16>
    %cst_8 = arith.constant dense<0.000000e+00> : vector<512x128xf32>
    %16 = tpu.matmul %14, %15, %cst_8 {dimension_numbers = #tpu.dot_dimension_numbers<[1], [0], [0], [1], [0, 0, 1, 1], [], []>} : vector<512x256xbf16>, vector<256x128xbf16>, vector<512x128xf32> -> vector<512x128xf32>
    %c0_9 = arith.constant 0 : index
    %c0_10 = arith.constant 0 : index
    %17 = vector.load %arg6[%c0_9, %c0_10] : memref<1x128xf32, #tpu.memory_space<vmem>>, vector<1x128xf32>
    %18 = vector.broadcast %17 : vector<1x128xf32> to vector<512x128xf32>
    %19 = arith.addf %16, %18 : vector<512x128xf32>
    %cst_11 = arith.constant 0.000000e+00 : f32
    %20 = vector.broadcast %cst_11 : f32 to vector<512x128xf32>
    %21 = arith.maximumf %19, %20 : vector<512x128xf32>
    %22 = arith.truncf %21 : vector<512x128xf32> to vector<512x128xbf16>
    %c0_12 = arith.constant 0 : index
    %c0_13 = arith.constant 0 : index
    %23 = vector.load %arg7[%c0_12, %c0_13] : memref<128x128xbf16, #tpu.memory_space<vmem>>, vector<128x128xbf16>
    %cst_14 = arith.constant dense<0.000000e+00> : vector<512x128xf32>
    %24 = tpu.matmul %22, %23, %cst_14 {dimension_numbers = #tpu.dot_dimension_numbers<[1], [0], [0], [1], [0, 0, 1, 1], [], []>} : vector<512x128xbf16>, vector<128x128xbf16>, vector<512x128xf32> -> vector<512x128xf32>
    %c0_15 = arith.constant 0 : index
    %c0_16 = arith.constant 0 : index
    %25 = vector.load %arg8[%c0_15, %c0_16] : memref<1x128xf32, #tpu.memory_space<vmem>>, vector<1x128xf32>
    %26 = vector.broadcast %25 : vector<1x128xf32> to vector<512x128xf32>
    %27 = arith.addf %24, %26 : vector<512x128xf32>
    %cst_17 = arith.constant 5.000000e-01 : f32
    %28 = vector.broadcast %cst_17 : f32 to vector<512x128xf32>
    %29 = arith.mulf %28, %27 : vector<512x128xf32>
    %30 = math.exp %29 : vector<512x128xf32>
    %c0_18 = arith.constant 0 : index
    %c0_19 = arith.constant 0 : index
    %31 = vector.load %arg2[%c0_18, %c0_19] : memref<512x128xf32, #tpu.memory_space<vmem>>, vector<512x128xf32>
    %32 = arith.mulf %30, %31 : vector<512x128xf32>
    %33 = arith.addf %27, %32 : vector<512x128xf32>
    %34 = arith.truncf %33 : vector<512x128xf32> to vector<512x128xbf16>
    %c0_20 = arith.constant 0 : index
    %c0_21 = arith.constant 0 : index
    %35 = vector.load %arg9[%c0_20, %c0_21] : memref<128x256xbf16, #tpu.memory_space<vmem>>, vector<128x256xbf16>
    %cst_22 = arith.constant dense<0.000000e+00> : vector<512x256xf32>
    %36 = tpu.matmul %34, %35, %cst_22 {dimension_numbers = #tpu.dot_dimension_numbers<[1], [0], [0], [1], [0, 0, 1, 1], [], []>} : vector<512x128xbf16>, vector<128x256xbf16>, vector<512x256xf32> -> vector<512x256xf32>
    %c0_23 = arith.constant 0 : index
    %c0_24 = arith.constant 0 : index
    %37 = vector.load %arg10[%c0_23, %c0_24] : memref<1x256xf32, #tpu.memory_space<vmem>>, vector<1x256xf32>
    %38 = vector.broadcast %37 : vector<1x256xf32> to vector<512x256xf32>
    %39 = arith.addf %36, %38 : vector<512x256xf32>
    %cst_25 = arith.constant 0.000000e+00 : f32
    %40 = vector.broadcast %cst_25 : f32 to vector<512x256xf32>
    %41 = arith.maximumf %39, %40 : vector<512x256xf32>
    %42 = arith.truncf %41 : vector<512x256xf32> to vector<512x256xbf16>
    %c0_26 = arith.constant 0 : index
    %c0_27 = arith.constant 0 : index
    %43 = vector.load %arg11[%c0_26, %c0_27] : memref<256x512xbf16, #tpu.memory_space<vmem>>, vector<256x512xbf16>
    %cst_28 = arith.constant dense<0.000000e+00> : vector<512x512xf32>
    %44 = tpu.matmul %42, %43, %cst_28 {dimension_numbers = #tpu.dot_dimension_numbers<[1], [0], [0], [1], [0, 0, 1, 1], [], []>} : vector<512x256xbf16>, vector<256x512xbf16>, vector<512x512xf32> -> vector<512x512xf32>
    %c0_29 = arith.constant 0 : index
    %c0_30 = arith.constant 0 : index
    %45 = vector.load %arg12[%c0_29, %c0_30] : memref<1x512xf32, #tpu.memory_space<vmem>>, vector<1x512xf32>
    %46 = vector.broadcast %45 : vector<1x512xf32> to vector<512x512xf32>
    %47 = arith.addf %44, %46 : vector<512x512xf32>
    %cst_31 = arith.constant 0.000000e+00 : f32
    %48 = vector.broadcast %cst_31 : f32 to vector<512x512xf32>
    %49 = arith.maximumf %47, %48 : vector<512x512xf32>
    %50 = arith.truncf %49 : vector<512x512xf32> to vector<512x512xbf16>
    %c0_32 = arith.constant 0 : index
    %c0_33 = arith.constant 0 : index
    %51 = vector.load %arg13[%c0_32, %c0_33] : memref<512x128xbf16, #tpu.memory_space<vmem>>, vector<512x128xbf16>
    %cst_34 = arith.constant dense<0.000000e+00> : vector<512x128xf32>
    %52 = tpu.matmul %50, %51, %cst_34 {dimension_numbers = #tpu.dot_dimension_numbers<[1], [0], [0], [1], [0, 0, 1, 1], [], []>} : vector<512x512xbf16>, vector<512x128xbf16>, vector<512x128xf32> -> vector<512x128xf32>
    %c0_35 = arith.constant 0 : index
    %c0_36 = arith.constant 0 : index
    %53 = vector.load %arg14[%c0_35, %c0_36] : memref<1x128xf32, #tpu.memory_space<vmem>>, vector<1x128xf32>
    %54 = vector.broadcast %53 : vector<1x128xf32> to vector<512x128xf32>
    %55 = arith.addf %52, %54 : vector<512x128xf32>
    %c0_37 = arith.constant 0 : index
    %c0_38 = arith.constant 0 : index
    %56 = vector.load %arg15[%c0_37, %c0_38] : memref<512x128xf32, #tpu.memory_space<vmem>>, vector<512x128xf32>
    tpu.vector_store %arg15[%c0_37, %c0_38], %55 {strides = array<i32>} : memref<512x128xf32, #tpu.memory_space<vmem>>, vector<512x128xf32>,
    return
  }
  func.func @transform_0(%arg0: i32) -> (i32, i32) {
    %c0_i32 = arith.constant 0 : i32
    %c0_i32_0 = arith.constant 0 : i32
    return %arg0, %c0_i32 : i32, i32
  }
  func.func @transform_1(%arg0: i32) -> (i32, i32) {
    %c0_i32 = arith.constant 0 : i32
    %c0_i32_0 = arith.constant 0 : i32
    return %arg0, %c0_i32 : i32, i32
  }
  func.func @transform_2(%arg0: i32) -> (i32, i32) {
    %c0_i32 = arith.constant 0 : i32
    %c0_i32_0 = arith.constant 0 : i32
    %c0_i32_1 = arith.constant 0 : i32
    return %c0_i32, %c0_i32_0 : i32, i32
  }
  func.func @transform_3(%arg0: i32) -> (i32, i32) {
    %c0_i32 = arith.constant 0 : i32
    %c0_i32_0 = arith.constant 0 : i32
    %c0_i32_1 = arith.constant 0 : i32
    return %c0_i32, %c0_i32_0 : i32, i32
  }
  func.func @transform_4(%arg0: i32) -> (i32, i32) {
    %c0_i32 = arith.constant 0 : i32
    %c0_i32_0 = arith.constant 0 : i32
    %c0_i32_1 = arith.constant 0 : i32
    return %c0_i32, %c0_i32_0 : i32, i32
  }
  func.func @transform_5(%arg0: i32) -> (i32, i32) {
    %c0_i32 = arith.constant 0 : i32
    %c0_i32_0 = arith.constant 0 : i32
    %c0_i32_1 = arith.constant 0 : i32
    return %c0_i32, %c0_i32_0 : i32, i32
  }
  func.func @transform_6(%arg0: i32) -> (i32, i32) {
    %c0_i32 = arith.constant 0 : i32
    %c0_i32_0 = arith.constant 0 : i32
    %c0_i32_1 = arith.constant 0 : i32
    return %c0_i32, %c0_i32_0 : i32, i32
  }
  func.func @transform_7(%arg0: i32) -> (i32, i32) {
    %c0_i32 = arith.constant 0 : i32
    %c0_i32_0 = arith.constant 0 : i32
    %c0_i32_1 = arith.constant 0 : i32
    return %c0_i32, %c0_i32_0 : i32, i32
  }
  func.func @transform_8(%arg0: i32) -> (i32, i32) {
    %c0_i32 = arith.constant 0 : i32
    %c0_i32_0 = arith.constant 0 : i32
    %c0_i32_1 = arith.constant 0 : i32
    return %c0_i32, %c0_i32_0 : i32, i32
  }
  func.func @transform_9(%arg0: i32) -> (i32, i32) {
    %c0_i32 = arith.constant 0 : i32
    %c0_i32_0 = arith.constant 0 : i32
    %c0_i32_1 = arith.constant 0 : i32
    return %c0_i32, %c0_i32_0 : i32, i32
  }
  func.func @transform_10(%arg0: i32) -> (i32, i32) {
    %c0_i32 = arith.constant 0 : i32
    %c0_i32_0 = arith.constant 0 : i32
    %c0_i32_1 = arith.constant 0 : i32
    return %c0_i32, %c0_i32_0 : i32, i32
  }
  func.func @transform_11(%arg0: i32) -> (i32, i32) {
    %c0_i32 = arith.constant 0 : i32
    %c0_i32_0 = arith.constant 0 : i32
    %c0_i32_1 = arith.constant 0 : i32
    return %c0_i32, %c0_i32_0 : i32, i32
  }
  func.func @transform_12(%arg0: i32) -> (i32, i32) {
    %c0_i32 = arith.constant 0 : i32
    %c0_i32_0 = arith.constant 0 : i32
    %c0_i32_1 = arith.constant 0 : i32
    return %c0_i32, %c0_i32_0 : i32, i32
  }
  func.func @transform_13(%arg0: i32) -> (i32, i32) {
    %c0_i32 = arith.constant 0 : i32
    %c0_i32_0 = arith.constant 0 : i32
    %c0_i32_1 = arith.constant 0 : i32
    return %c0_i32, %c0_i32_0 : i32, i32
  }
  func.func @transform_14(%arg0: i32) -> (i32, i32) {
    %c0_i32 = arith.constant 0 : i32
    %c0_i32_0 = arith.constant 0 : i32
    return %arg0, %c0_i32 : i32, i32
  }
}

</mosaic_0001>

<bundles_post_ra>
// kernel: tpu_custom_call.1
= control target key start
LH: loop header
LB: loop body
LE: loop exit
PB: predicated region body
PF: predicated region fallthrough
CT: control target
= control target key end

     0   :  { %s11550_s0 = inlined_call_operand.vmem [shape: s32[2048,1], index: 0, kind: input, shape index: {}]   ;;  %s11551_s1 = inlined_call_operand.vmem [shape: f32[2048,128], index: 1, kind: input, shape index: {}]   ;;  %s11552_s2 = inlined_call_operand.hbm [shape: bf16[128,256], index: 2, kind: input, shape index: {}]   ;;  %s11553_s3 = inlined_call_operand.vmem [shape: f32[1,256], index: 3, kind: input, shape index: {}]   ;;  %s11554_s4 = inlined_call_operand.hbm [shape: bf16[256,128], index: 4, kind: input, shape index: {}]   ;;  %s11555_s5 = inlined_call_operand.vmem [shape: f32[1,128], index: 5, kind: input, shape index: {}]   ;;  %s11556_s6 = inlined_call_operand.hbm [shape: bf16[128,128], index: 6, kind: input, shape index: {}]   ;;  %s11557_s7 = inlined_call_operand.vmem [shape: f32[1,128], index: 7, kind: input, shape index: {}]   ;;  %s11558_s8 = inlined_call_operand.hbm [shape: bf16[128,256], index: 8, kind: input, shape index: {}]   ;;  %s11559_s9 = inlined_call_operand.vmem [shape: f32[1,256], index: 9, kind: input, shape index: {}]   ;;  %s11560_s10 = inlined_call_operand.hbm [shape: bf16[256,512], index: 10, kind: input, shape index: {}]   ;;  %s11561_s11 = inlined_call_operand.vmem [shape: f32[1,512], index: 11, kind: input, shape index: {}]   ;;  %s11562_s12 = inlined_call_operand.hbm [shape: bf16[512,128], index: 12, kind: input, shape index: {}]   ;;  %s11563_s13 = inlined_call_operand.vmem [shape: f32[1,128], index: 13, kind: input, shape index: {}]   ;;  %s11564_s14 = inlined_call_operand.hbm [shape: f32[2048,128], index: 14, kind: output, shape index: {}]  }
   0x1   :  { %11700 = sst [smem:[#allocation125_spill]] %s11554_s4 }
   0x2   :  { %11701 = sst [smem:[#allocation126_spill]] %s11558_s8 }
   0x3   :  { %11702 = sst [smem:[#allocation127_spill]] %s11564_s14 }
   0x4   :  { %19 = vsyncpa [#allocation3], 0 }
   0x5   :  { %20 = vsyncpa [#allocation6], 0 }
   0x6   :  { %21 = vsyncpa [#allocation9], 0 }
   0x7   :  { %22 = vsyncpa [#allocation12], 0 }
   0x8   :  { %23 = vsyncpa [#allocation4], 0 }
   0x9   :  { %25 = vsyncpa [#allocation4 + $0x1], 0  ;;  %s8440_s29 = smov 0   ;;  %s8442_s30 = smov 0  }
   0xa   :  { %s8444_s15 = smov 0   ;;  %s8446_s16 = smov 0  }
   0xb LB: > { %11703 = sst [smem:[#allocation19_spill]] %s8335_s29  ;;  %s8461_s17 = sadd.s32 4294967295, %s8347_s16   ;;  %s8347_s16 = sphi %s8446_s16, %s12123_s16   ;;  %s8343_s15 = sphi %s8444_s15, %s12126_s15   ;;  %s8339_s30 = sphi %s8442_s30, %s12125_s30   ;;  %s8335_s29 = sphi %s8440_s29, %s12124_s29  }
   0xc   : > { %11704 = sst [smem:[#allocation20_spill]] %s8339_s30  ;;  %s6836_s18 = sadd.s32 4294967294, %s8347_s16  }
   0xd   : > { %11705 = sst [smem:[#allocation21_spill]] %s8343_s15  ;;  %s8465_s19 = sadd.s32 1, %s8347_s16  }
   0xe   : > { %11706 = sst [smem:[#allocation22_spill]] %s8347_s16  ;;  %s342_s20 = sadd.s32 1, %s8343_s15 }
   0xf   : > { %11707 = sst [smem:[#allocation23_spill]] %s8465_s19  ;;  %s339_s21 = ssub.s32 %s8347_s16, %s8465_s19 }
  0x10   : > { %p352_p0 = scmp.ne.s32.totalorder %s8343_s15, %s8339_s30  ;;  %p340_p1 = scmp.eq.s32.totalorder %s339_s21, 0 }
  0x11   : > { %p353_p2 = scmp.eq.s32.totalorder %s8461_s17, 3  ;;  %p358_p3 = scmp.ne.s32.totalorder %s8339_s30, %s8335_s29 }
  0x12   : > { %p359_p4 = scmp.eq.s32.totalorder %s6836_s18, 3  ;;  %p6837_p7 = scmp.ge.s32.totalorder %s8347_s16, 1 }
  0x13   : > { %s8476_s22 = scalar_select %p340_p1, %s8343_s15, %s342_s20  }
  0x14   : > { %p8478_p5 = por %p353_p2, %p352_p0  ;;  %p8482_p6 = por %p359_p4, %p358_p3 }
  0x15   : > { %11708 = sst [smem:[#allocation24_spill]] %s8476_s22  ;;  %p366_p8 = scmp.lt.s32.totalorder %s8347_s16, 5 }
  0x16   : > { %s11709_s23 = scalar_select %p8478_p5, 1, 0 }
  0x17   : > { %s11711_s24 = scalar_select %p8482_p6, 1, 0 }
  0x18   : > { %11710 = sst [smem:[#allocation25_spill]] %s11709_s23  ;;  %p7888_p9 = scmp.eq.s32.totalorder %s8461_s17, 0 }
  0x19   : > { %11712 = sst [smem:[#allocation26_spill]] %s11711_s24  ;;  %p8489_p10 = pnand %p6837_p7, %p366_p8 }
  0x1a   : > { %s11714_s4 = sld [smem:[#allocation125_spill]]  ;;  %s8349_s18 = smov [#allocation5]  }
  0x1b   : > { %p7865_p11 = pneg %p8489_p10  ;;  %s396_s20 = sshll.u32 %s8349_s18, 4  ;;  %s397_s20 = int_to_ptr.vmem [resolvable:$true] %s396_s20 }
  0x1c   : > { %s11716_s8 = sld [smem:[#allocation126_spill]]  ;;  %s11576_s26 = smov 64  }
  0x1d   : > { %p8500_p12 = pnand %p7888_p9, %p7865_p11  ;;  %s8351_s27 = smov 4  }
  0x1e   : > { %s8352_s18 = smov [#allocation8]   ;;  %s377_s16 = sshll.u32 %s11552_s2, 4  ;;  %s378_s16 = int_to_ptr.hbm [resolvable:$true] %s377_s16 }
  0x1f   : > { %s8353_s15 = smov 128   ;;  %s8354_s22 = smov 8  }
  0x20   : > { %s394_s28 = sshll.u32 %s11714_s4, 4  ;;  %s430_s4 = sshll.u32 %s8352_s18, 4  ;;  %s395_s28 = int_to_ptr.hbm [resolvable:$true] %s394_s28  ;;  %s431_s4 = int_to_ptr.vmem [resolvable:$true] %s430_s4 }
  0x21   : > { %7871 = dma.hbm_to_vmem [thread:$0]  (!%p8500_p12), %s395_s28, 2048, %s397_s20, [#allocation6], %s11576_s26, %s11576_s26, %s8351_s27  }
  0x22   : > { %s428_s19 = sshll.u32 %s11716_s8, 4  ;;  %s411_s14 = sshll.u32 %s11556_s6, 4  ;;  %s429_s19 = int_to_ptr.hbm [resolvable:$true] %s428_s19  ;;  %s412_s14 = int_to_ptr.hbm [resolvable:$true] %s411_s14 }
  0x23   : > { %7877 = dma.hbm_to_vmem [thread:$0]  (!%p8500_p12), %s429_s19, 2048, %s431_s4, [#allocation9], %s8353_s15, %s8353_s15, %s8354_s22  }
  0x24   : > { %s8355_s30 = smov [#allocation2]   ;;  %s8356_s29 = smov [#allocation7]  }
  0x25   : > { %s379_s28 = sshll.u32 %s8355_s30, 4  ;;  %s413_s24 = sshll.u32 %s8356_s29, 4  ;;  %s380_s28 = int_to_ptr.vmem [resolvable:$true] %s379_s28  ;;  %s414_s24 = int_to_ptr.vmem [resolvable:$true] %s413_s24 }
  0x26   : > { %7868 = dma.hbm_to_vmem [thread:$0]  (!%p8500_p12), %s378_s16, 2048, %s380_s28, [#allocation3], %s8353_s15, %s8353_s15, %s8354_s22  }
  0x27   : > { %s445_s26 = sshll.u32 %s11560_s10, 4  ;;  %s11717_s4 = smov 64   ;;  %s446_s26 = int_to_ptr.hbm [resolvable:$true] %s445_s26 }
  0x28   : > { %7874 = dma.hbm_to_vmem [thread:$0]  (!%p8500_p12), %s412_s14, 1024, %s414_s24, [#allocation6], %s11717_s4, %s11717_s4, %s8351_s27  }
  0x29   : > { %s8357_s8 = smov [#allocation10]   ;;  %s462_s16 = sshll.u32 %s11562_s12, 4  ;;  %s463_s16 = int_to_ptr.hbm [resolvable:$true] %s462_s16 }
  0x2a   : > { %s447_s30 = sshll.u32 %s8357_s8, 4  ;;  %s8358_s15 = smov 256   ;;  %s448_s30 = int_to_ptr.vmem [resolvable:$true] %s447_s30 }
  0x2b   : > { %s8359_s22 = smov 16   ;;  %s8360_s28 = smov [#allocation11]  }
  0x2c   : > { %7880 = dma.hbm_to_vmem [thread:$0]  (!%p8500_p12), %s446_s26, 8192, %s448_s30, [#allocation9], %s8358_s15, %s8358_s15, %s8359_s22  }
  0x2d   : > { %s464_s29 = sshll.u32 %s8360_s28, 4  ;;  %501 = sbr.rel (%p8489_p10) target bundleno = 3051 (0xbeb), region = 76  ;;  %s465_s29 = int_to_ptr.vmem [resolvable:$true] %s464_s29 }
  0x2e   : > { %7883 = dma.hbm_to_vmem [thread:$0]  (!%p8500_p12), %s463_s16, 4096, %s465_s29, [#allocation12], %s11717_s4, %s11717_s4, %s8351_s27  }
  0x32   : > { %8314 = dma.done.wait (%p7888_p9), [#allocation3], 2048  }
  0x33   : > { %8316 = vsyncadd (%p7888_p9), [#allocation3], 4294965248 }
  0x34   : > { %8318 = dma.done.wait (%p7888_p9), [#allocation6], 3072  }
  0x35   : > { %8320 = vsyncadd (%p7888_p9), [#allocation6], 4294964224 }
  0x36   : > { %8322 = dma.done.wait (%p7888_p9), [#allocation9], 10240  }
  0x37   : > { %8324 = vsyncadd (%p7888_p9), [#allocation9], 4294957056 }
  0x38   : > { %8326 = dma.done.wait (%p7888_p9), [#allocation12], 4096  }
  0x39   : > { %8328 = vsyncadd (%p7888_p9), [#allocation12], 4294963200  ;;  %s6853_s14 = sshll.u32 %s8461_s17, 6  ;;  %v8361_v0 = vmov 0   ;;  %v6979_v25 = vld [vmem:[#allocation2 + $0x70] sm:$0xf] }
  0x3a   : > { %7951 = vset.pattern.permute.xlu2 %v8361_v0  ;;  %7950 = vset.pattern.permute.xlu1 %v8361_v0  ;;  %p579_p13 = scmp.lt.s32.totalorder %s6853_s14, 255  ;;  %v7677_v26 = vld [vmem:[#allocation2 + $0x74] sm:$0xf0]  ;;  %v6971_v31 = vld [vmem:[#allocation2 + $0x60] sm:$0xf]  ;;  %s12064_s23 = sld [smem:[#allocation20_spill]] }
  0x3b   : > { %7949 = vset.pattern.permute.xlu0 %v8361_v0  ;;  %v6980_v27 = vor.u32 %v7677_v26, %v6979_v25  ;;  %v7675_v32 = vld [vmem:[#allocation2 + $0x64] sm:$0xf0]  ;;  %v6963_v34 = vld [vmem:[#allocation2 + $0x50] sm:$0xf]  ;;  %v7673_v35 = vld [vmem:[#allocation2 + $0x54] sm:$0xf0] }
  0x3c   : > { %s12128_s14 = smov (!%p579_p13, %s6853_s14), 255  ;;  %v6972_v33 = vor.u32 %v7675_v32, %v6971_v31  ;;  %v6964_v38 = vor.u32 %v7673_v35, %v6963_v34  ;;  %v6955_v40 = vld [vmem:[#allocation2 + $0x40] sm:$0xf]  ;;  %v7671_v41 = vld [vmem:[#allocation2 + $0x44] sm:$0xf0]  ;;  %s12118_s26 = sld [smem:[#allocation127_spill]] }
  0x3d   : > { %s6854_s25 = sshll.u32 %s12128_s14, 3  ;;  %7815 = vmatpush.bf16.msra.mxu3 %v6980_v27  ;;  %1175 = vmatpush.bf16.msra.mxu0 %v6980_v27  ;;  %v6956_v42 = vor.u32 %v7671_v41, %v6955_v40  ;;  %v6947_v43 = vld [vmem:[#allocation2 + $0x30] sm:$0xf]  ;;  %v7669_v44 = vld [vmem:[#allocation2 + $0x34] sm:$0xf0]  ;;  %s7814_s14 = sshll.u32 %s8461_s17, 9 }
  0x3e   : > { %s8567_s27 = scalar_lea.vmem %s11550_s0, %s6854_s25  ;;  %v6948_v47 = vor.u32 %v7669_v44, %v6947_v43  ;;  %v6939_v49 = vld [vmem:[#allocation2 + $0x20] sm:$0xf]  ;;  %v7667_v50 = vld [vmem:[#allocation2 + $0x24] sm:$0xf0]  ;;  %v6931_v52 = vld [vmem:[#allocation2 + $0x10] sm:$0xf]  ;;  %s9216_s16 = scalar_lea.vmem %s11551_s1, %s6854_s25 }
  0x3f   : > { %v643_v1 = vld [vmem:[%s8567_s27 + $0x1a0] sm:$0xff]  ;;  %v641_v2 = vld [vmem:[%s8567_s27 + $0x190] sm:$0xff]  ;;  %v644_v4 = vld [vmem:[%s8567_s27 + $0x1a8] sm:$0xff]  ;;  %v6940_v51 = vor.u32 %v7667_v50, %v6939_v49 }
  0x40   : > { %v639_v3 = vld [vmem:[%s8567_s27 + $0x180] sm:$0xff]  ;;  %814 = vperm.xlu2 %7951, %v643_v1   ;;  %808 = vperm.xlu1 %7950, %v641_v2   ;;  %v642_v5 = vld [vmem:[%s8567_s27 + $0x198] sm:$0xff]  ;;  %v640_v6 = vld [vmem:[%s8567_s27 + $0x188] sm:$0xff] }
  0x41   : > { %802 = vperm.xlu0 %7949, %v639_v3   ;;  %v647_v7 = vld [vmem:[%s8567_s27 + $0x1c0] sm:$0xff]  ;;  %v646_v8 = vld [vmem:[%s8567_s27 + $0x1b8] sm:$0xff]  ;;  %v645_v9 = vld [vmem:[%s8567_s27 + $0x1b0] sm:$0xff]  ;;  %7816 = vmatpush.bf16.msra.mxu3 %v6972_v33 }
  0x42   : > { %v650_v10 = vld [vmem:[%s8567_s27 + $0x1d8] sm:$0xff]  ;;  %v649_v11 = vld [vmem:[%s8567_s27 + $0x1d0] sm:$0xff]  ;;  %v648_v12 = vld [vmem:[%s8567_s27 + $0x1c8] sm:$0xff]  ;;  %1176 = vmatpush.bf16.msra.mxu0 %v6972_v33 }
  0x43   : > { %v653_v13 = vld [vmem:[%s8567_s27 + $0x1f0] sm:$0xff]  ;;  %v652_v14 = vld [vmem:[%s8567_s27 + $0x1e8] sm:$0xff]  ;;  %v651_v15 = vld [vmem:[%s8567_s27 + $0x1e0] sm:$0xff] }
  0x44   : > { %v592_v16 = vld [vmem:[%s8567_s27 + $0x8] sm:$0xff]  ;;  %v591_v17 = vld [vmem:[%s8567_s27] sm:$0xff]  ;;  %v654_v18 = vld [vmem:[%s8567_s27 + $0x1f8] sm:$0xff] }
  0x45   : > { %v595_v19 = vld [vmem:[%s8567_s27 + $0x20] sm:$0xff]  ;;  %v594_v20 = vld [vmem:[%s8567_s27 + $0x18] sm:$0xff]  ;;  %v593_v21 = vld [vmem:[%s8567_s27 + $0x10] sm:$0xff]  ;;  %7817 = vmatpush.bf16.msra.mxu3 %v6964_v38 }
  0x46   : > { %v598_v22 = vld [vmem:[%s8567_s27 + $0x38] sm:$0xff]  ;;  %v597_v23 = vld [vmem:[%s8567_s27 + $0x30] sm:$0xff]  ;;  %v596_v24 = vld [vmem:[%s8567_s27 + $0x28] sm:$0xff]  ;;  %1177 = vmatpush.bf16.msra.mxu0 %v6964_v38 }
  0x47   : > { %v601_v28 = vld [vmem:[%s8567_s27 + $0x50] sm:$0xff]  ;;  %v600_v29 = vld [vmem:[%s8567_s27 + $0x48] sm:$0xff]  ;;  %v599_v30 = vld [vmem:[%s8567_s27 + $0x40] sm:$0xff] }
  0x48   : > { %817 = vperm.xlu2 %7951, %v644_v4   ;;  %811 = vperm.xlu1 %7950, %v642_v5   ;;  %v604_v36 = vld [vmem:[%s8567_s27 + $0x68] sm:$0xff]  ;;  %v603_v37 = vld [vmem:[%s8567_s27 + $0x60] sm:$0xff]  ;;  %v602_v39 = vld [vmem:[%s8567_s27 + $0x58] sm:$0xff] }
  0x49   : > { %805 = vperm.xlu0 %7949, %v640_v6   ;;  %v607_v45 = vld [vmem:[%s8567_s27 + $0x80] sm:$0xff]  ;;  %v606_v46 = vld [vmem:[%s8567_s27 + $0x78] sm:$0xff]  ;;  %7818 = vmatpush.bf16.msra.mxu3 %v6956_v42  ;;  %v605_v48 = vld [vmem:[%s8567_s27 + $0x70] sm:$0xff] }
  0x4a   : > { %1178 = vmatpush.bf16.msra.mxu0 %v6956_v42  ;;  %v7665_v53 = vld [vmem:[#allocation2 + $0x14] sm:$0xf0]  ;;  %v609_v55 = vld [vmem:[%s8567_s27 + $0x90] sm:$0xff]  ;;  %v608_v57 = vld [vmem:[%s8567_s27 + $0x88] sm:$0xff] }
  0x4b   : > { %v610_v54 = vld [vmem:[%s8567_s27 + $0x98] sm:$0xff]  ;;  %v6932_v56 = vor.u32 %v7665_v53, %v6931_v52  ;;  %v6923_v58 = vld [vmem:[#allocation2] sm:$0xf]  ;;  %v7663_v59 = vld [vmem:[#allocation2 + $0x4] sm:$0xf0] }
  0x4c   : > { %v6924_v60 = vor.u32 %v7663_v59, %v6923_v58  ;;  %v7676_v61 = vld [vmem:[#allocation2 + $0x74] sm:$0xf]  ;;  %v6981_v62 = vld [vmem:[#allocation2 + $0x78] sm:$0xf0]  ;;  %v612_v0 = vld [vmem:[%s8567_s27 + $0xa8] sm:$0xff] }
  0x4d   : > { %7819 = vmatpush.bf16.msra.mxu3 %v6948_v47  ;;  %v613_v63 = vld [vmem:[%s8567_s27 + $0xb0] sm:$0xff]  ;;  %v6984_v1 = vor.u32 %v7676_v61, %v6981_v62  ;;  %v611_v2 = vld [vmem:[%s8567_s27 + $0xa0] sm:$0xff]  ;;  %v6973_v4 = vld [vmem:[#allocation2 + $0x68] sm:$0xf0] }
  0x4e   : > { %1179 = vmatpush.bf16.msra.mxu0 %v6948_v47  ;;  %v7674_v3 = vld [vmem:[#allocation2 + $0x64] sm:$0xf]  ;;  %v7672_v6 = vld [vmem:[#allocation2 + $0x54] sm:$0xf]  ;;  %v622_v31 = vld [vmem:[%s8567_s27 + $0xf8] sm:$0xff] }
  0x4f   : > { %1344 = vmatpush.bf16.msra.mxu1 %v6984_v1  ;;  %v6976_v5 = vor.u32 %v7674_v3, %v6973_v4  ;;  %v621_v32 = vld [vmem:[%s8567_s27 + $0xf0] sm:$0xff]  ;;  %v620_v34 = vld [vmem:[%s8567_s27 + $0xe8] sm:$0xff]  ;;  %v627_v50 = vld [vmem:[%s8567_s27 + $0x120] sm:$0xff] }
  0x50   : > { %826 = vperm.xlu2 %7951, %v647_v7   ;;  %823 = vperm.xlu1 %7950, %v646_v8   ;;  %v6965_v7 = vld [vmem:[#allocation2 + $0x58] sm:$0xf0]  ;;  %v616_v8 = vld [vmem:[%s8567_s27 + $0xc8] sm:$0xff]  ;;  %v625_v43 = vld [vmem:[%s8567_s27 + $0x110] sm:$0xff] }
  0x51   : > { %820 = vperm.xlu0 %7949, %v645_v9   ;;  %7820 = vmatpush.bf16.msra.mxu3 %v6940_v51  ;;  %v615_v9 = vld [vmem:[%s8567_s27 + $0xc0] sm:$0xff]  ;;  %v624_v44 = vld [vmem:[%s8567_s27 + $0x108] sm:$0xff]  ;;  %v626_v52 = vld [vmem:[%s8567_s27 + $0x118] sm:$0xff] }
  0x52   : > { %1180 = vmatpush.bf16.msra.mxu0 %v6940_v51  ;;  %v628_v49 = vld [vmem:[%s8567_s27 + $0x128] sm:$0xff]  ;;  %v630_v58 = vld [vmem:[%s8567_s27 + $0x138] sm:$0xff]  ;;  %v629_v59 = vld [vmem:[%s8567_s27 + $0x130] sm:$0xff] }
  0x53   : > { %1345 = vmatpush.bf16.msra.mxu1 %v6976_v5 }
  0x55   : > { %7821 = vmatpush.bf16.msra.mxu3 %v6932_v56 }
  0x56   : > { %1181 = vmatpush.bf16.msra.mxu0 %v6932_v56  ;;  %v7700_v56 = vld [vmem:[#allocation7 + $0x30] sm:$0xff] }
  0x58   : > { %835 = vperm.xlu2 %7951, %v650_v10   ;;  %832 = vperm.xlu1 %7950, %v649_v11   ;;  %v6968_v10 = vor.u32 %v7672_v6, %v6965_v7  ;;  %v614_v11 = vld [vmem:[%s8567_s27 + $0xb8] sm:$0xff] }
  0x59   : > { %829 = vperm.xlu0 %7949, %v648_v12   ;;  %7822 = vmatpush.bf16.msra.mxu3 %v6924_v60 }
  0x5a   : > { %1182 = vmatpush.bf16.msra.mxu0 %v6924_v60  ;;  %1346 = vmatpush.bf16.msra.mxu1 %v6968_v10 }
  0x5d   : > { %7823 = vmatpush.bf16.msrb.mxu3 %v6984_v1  ;;  %v633_v1 = vld [vmem:[%s8567_s27 + $0x150] sm:$0xff] }
  0x60   : > { %844 = vperm.xlu2 %7951, %v653_v13   ;;  %841 = vperm.xlu1 %7950, %v652_v14   ;;  %v7670_v13 = vld [vmem:[#allocation2 + $0x44] sm:$0xf]  ;;  %v6957_v14 = vld [vmem:[#allocation2 + $0x48] sm:$0xf0] }
  0x61   : > { %838 = vperm.xlu0 %7949, %v651_v15   ;;  %7824 = vmatpush.bf16.msrb.mxu3 %v6976_v5  ;;  %v6960_v15 = vor.u32 %v7670_v13, %v6957_v14  ;;  %v638_v13 = vld [vmem:[%s8567_s27 + $0x178] sm:$0xff] }
  0x63   : > { %1347 = vmatpush.bf16.msra.mxu1 %v6960_v15 }
  0x65   : > { %7825 = vmatpush.bf16.msrb.mxu3 %v6968_v10  ;;  %v635_v10 = vld [vmem:[%s8567_s27 + $0x160] sm:$0xff] }
  0x68   : > { %661 = vperm.xlu2 %7951, %v592_v16   ;;  %658 = vperm.xlu1 %7950, %v591_v17   ;;  %v7668_v16 = vld [vmem:[#allocation2 + $0x34] sm:$0xf]  ;;  %v6949_v17 = vld [vmem:[#allocation2 + $0x38] sm:$0xf0] }
  0x69   : > { %847 = vperm.xlu0 %7949, %v654_v18   ;;  %v619_v18 = vld [vmem:[%s8567_s27 + $0xe0] sm:$0xff]  ;;  %7826 = vmatpush.bf16.msrb.mxu3 %v6960_v15 }
  0x70   : > { %670 = vperm.xlu2 %7951, %v595_v19   ;;  %667 = vperm.xlu1 %7950, %v594_v20   ;;  %v618_v19 = vld [vmem:[%s8567_s27 + $0xd8] sm:$0xff]  ;;  %v6952_v20 = vor.u32 %v7668_v16, %v6949_v17 }
  0x71   : > { %664 = vperm.xlu0 %7949, %v593_v21   ;;  %v617_v21 = vld [vmem:[%s8567_s27 + $0xd0] sm:$0xff] }
  0x72   : > { %1348 = vmatpush.bf16.msra.mxu1 %v6952_v20  ;;  %7827 = vmatpush.bf16.msrb.mxu3 %v6952_v20 }
  0x78   : > { %679 = vperm.xlu2 %7951, %v598_v22   ;;  %676 = vperm.xlu1 %7950, %v597_v23   ;;  %v7666_v22 = vld [vmem:[#allocation2 + $0x24] sm:$0xf]  ;;  %v6941_v23 = vld [vmem:[#allocation2 + $0x28] sm:$0xf0] }
  0x79   : > { %673 = vperm.xlu0 %7949, %v596_v24   ;;  %v6944_v26 = vor.u32 %v7666_v22, %v6941_v23  ;;  %v7685_v22 = vld [vmem:[#allocation5 + $0x38] sm:$0xff] }
  0x7a   : > { %1837 = vmatpush.bf16.msra.mxu2 %v7685_v22 }
  0x7b   : > { %1349 = vmatpush.bf16.msra.mxu1 %v6944_v26  ;;  %7828 = vmatpush.bf16.msrb.mxu3 %v6944_v26  ;;  %v7701_v26 = vld [vmem:[#allocation7 + $0x38] sm:$0xff] }
  0x7c   : > { %2339 = vmatpush.bf16.msrb.mxu0 %v7701_v26 }
  0x80   : > { %688 = vperm.xlu2 %7951, %v601_v28   ;;  %685 = vperm.xlu1 %7950, %v600_v29   ;;  %v655_v28 = vlaneseq  ;;  %v7664_v29 = vld [vmem:[#allocation2 + $0x14] sm:$0xf] }
  0x81   : > { %682 = vperm.xlu0 %7949, %v599_v30   ;;  %v6933_v30 = vld [vmem:[#allocation2 + $0x18] sm:$0xf0]  ;;  %2340 = vmatpush.bf16.msrb.mxu0 %v7700_v56 }
  0x82   : > { %v6936_v33 = vor.u32 %v7664_v29, %v6933_v30  ;;  %v8621_v35 = vand.u32 127, %v655_v28  ;;  %v7682_v28 = vld [vmem:[#allocation5 + $0x20] sm:$0xff] }
  0x84   : > { %1350 = vmatpush.bf16.msra.mxu1 %v6936_v33  ;;  %7829 = vmatpush.bf16.msrb.mxu3 %v6936_v33  ;;  %v1089_v33 = vld [vmem:[%s11553_s3] sm:$0x3] }
  0x88   : > { %697 = vperm.xlu2 %7951, %v604_v36   ;;  %694 = vperm.xlu1 %7950, %v603_v37   ;;  %v7662_v36 = vld [vmem:[#allocation2 + $0x4] sm:$0xf]  ;;  %v6925_v37 = vld [vmem:[#allocation2 + $0x8] sm:$0xf0] }
  0x89   : > { %691 = vperm.xlu0 %7949, %v602_v39   ;;  %v6928_v39 = vor.u32 %v7662_v36, %v6925_v37  ;;  %v7679_v36 = vld [vmem:[#allocation5 + $0x8] sm:$0xff]  ;;  %v8759_v37 = vperm.slane %v1089_v33, 0 }
  0x8b   : > { %1351 = vmatpush.bf16.msra.mxu1 %v6928_v39  ;;  %7830 = vmatpush.bf16.msrb.mxu3 %v6928_v39 }
  0x90   : > { %706 = vperm.xlu2 %7951, %v607_v45   ;;  %703 = vperm.xlu1 %7950, %v606_v46   ;;  %v8362_v45 = vmov 1.0|1.0   ;;  %v623_v46 = vld [vmem:[%s8567_s27 + $0x100] sm:$0xff] }
  0x91   : > { %700 = vperm.xlu0 %7949, %v605_v48  }
  0x98   : > { %715 = vperm.xlu2 %7951, %v610_v54   ;;  %712 = vperm.xlu1 %7950, %v609_v55  }
  0x99   : > { %709 = vperm.xlu0 %7949, %v608_v57   ;;  %v631_v57 = vld [vmem:[%s8567_s27 + $0x140] sm:$0xff] }
  0x9a   : > { %v8611_v12 = vpop.permute.xlu2 %814 }
  0x9b   : > { %vm901_vm12 = vcmp.eq.s32.totalorder %v8611_v12, %v8621_v35 }
  0xa0   : > { %724 = vperm.xlu2 %7951, %v613_v63   ;;  %721 = vperm.xlu1 %7950, %v612_v0   ;;  %v634_v0 = vld [vmem:[%s8567_s27 + $0x158] sm:$0xff] }
  0xa1   : > { %718 = vperm.xlu0 %7949, %v611_v2   ;;  %v632_v2 = vld [vmem:[%s8567_s27 + $0x148] sm:$0xff] }
  0xa2   : > { %v8616_v24 = vpop.permute.xlu2 %817 }
  0xa3   : > { %vm902_vm13 = vcmp.eq.s32.totalorder %v8616_v24, %v8621_v35 }
  0xa4   : > { %vm8677_vm14 = vmpackc.low %vm902_vm13, %vm901_vm12 }
  0xa8   : > { %733 = vperm.xlu2 %7951, %v616_v8   ;;  %730 = vperm.xlu1 %7950, %v615_v9   ;;  %v637_v8 = vld [vmem:[%s8567_s27 + $0x170] sm:$0xff]  ;;  %v636_v9 = vld [vmem:[%s8567_s27 + $0x168] sm:$0xff]  ;;  %s6698_s27 = scalar_lea.hbm %s12118_s26, %s7814_s14 }
  0xa9   : > { %727 = vperm.xlu0 %7949, %v614_v11   ;;  %s6701_s18 = sshll.u32 %s6698_s27, 4  ;;  %s6702_s18 = int_to_ptr.hbm [resolvable:$true] %s6701_s18 }
  0xaa   : > { %v8623_v41 = vpop.permute.xlu2 %826  ;;  %s8283_s4 = sshra.s32 %s6702_s18, 4  ;;  %s8284_s4 = int_to_ptr.hbm [resolvable:$true] %s8283_s4 }
  0xab   : > { %s8285_s8 = scalar_lea.hbm %s8284_s4, 512  ;;  %p8290_p3 = scmp.lt.s32.totalorder %s8284_s4, %s12118_s26 }
  0xac   : > { %p8286_p0 = scmp.ne.s32.totalorder %s8284_s4, %s8285_s8 }
  0xae   : > { %p8287_p1 = pnand %p8286_p0, %p8478_p5 }
  0xb0   : > { %742 = vperm.xlu2 %7951, %v619_v18   ;;  %739 = vperm.xlu1 %7950, %v618_v19   ;;  %p8288_p2 = pneg %p8287_p1 }
  0xb1   : > { %736 = vperm.xlu0 %7949, %v617_v21  }
  0xb2   : > { %v809_v25 = vpop.permute.xlu1 %808  ;;  %v836_v51 = vpop.permute.xlu2 %835 }
  0xb3   : > { %v803_v27 = vpop.permute.xlu0 %802  ;;  %vm908_vm3 = vcmp.eq.s32.totalorder %v836_v51, %v8621_v35  ;;  %vm899_vm4 = vcmp.eq.s32.totalorder %v809_v25, %v8621_v35  ;;  %v7684_v25 = vld [vmem:[#allocation5 + $0x30] sm:$0xff] }
  0xb4   : > { %vm897_vm0 = vcmp.eq.s32.totalorder %v803_v27, %v8621_v35  ;;  %1838 = vmatpush.bf16.msra.mxu2 %v7684_v25  ;;  %v7683_v27 = vld [vmem:[#allocation5 + $0x28] sm:$0xff] }
  0xb8   : > { %751 = vperm.xlu2 %7951, %v622_v31   ;;  %748 = vperm.xlu1 %7950, %v621_v32   ;;  %v7681_v31 = vld [vmem:[#allocation5 + $0x18] sm:$0xff]  ;;  %v7680_v32 = vld [vmem:[#allocation5 + $0x10] sm:$0xff] }
  0xb9   : > { %745 = vperm.xlu0 %7949, %v620_v34   ;;  %1839 = vmatpush.bf16.msra.mxu2 %v7683_v27 }
  0xba   : > { %v812_v38 = vpop.permute.xlu1 %811  ;;  %v845_v60 = vpop.permute.xlu2 %844 }
  0xbb   : > { %v806_v40 = vpop.permute.xlu0 %805  ;;  %vm900_vm5 = vcmp.eq.s32.totalorder %v812_v38, %v8621_v35  ;;  %v7678_v38 = vld [vmem:[#allocation5] sm:$0xff] }
  0xbc   : > { %vm898_vm1 = vcmp.eq.s32.totalorder %v806_v40, %v8621_v35  ;;  %vm8654_vm8 = vmpackc.low %vm900_vm5, %vm899_vm4 }
  0xbd   : > { %vm8627_vm2 = vmpackc.low %vm898_vm1, %vm897_vm0  ;;  %vm911_vm1 = vcmp.eq.s32.totalorder %v845_v60, %v8621_v35  ;;  %1840 = vmatpush.bf16.msra.mxu2 %v7682_v28  ;;  %v8776_v60 = vperm.slane %v1089_v33, 1 }
  0xbe   : > { %7034 = vmatmul.msk.bf16.vlgmr.msra.gmra.mxu3 %vm8627_vm2, %v8362_v45 }
  0xbf   : > { %7831 = vmatpush.bf16.msra.mxu3 %v7685_v22 }
  0xc0   : > { %760 = vperm.xlu2 %7951, %v625_v43   ;;  %757 = vperm.xlu1 %7950, %v624_v44  }
  0xc1   : > { %754 = vperm.xlu0 %7949, %v623_v46   ;;  %1841 = vmatpush.bf16.msra.mxu2 %v7681_v31 }
  0xc2   : > { %v8637_v47 = vpop.permute.xlu1 %823  ;;  %v662_v3 = vpop.permute.xlu2 %661 }
  0xc3   : > { %v8639_v48 = vpop.permute.xlu0 %820  ;;  %vm850_vm15 = vcmp.eq.s32.totalorder %v662_v3, %v8621_v35  ;;  %7832 = vmatpush.bf16.msra.mxu3 %v7684_v25 }
  0xc4   : > { %vm903_vm12 = vcmp.eq.s32.totalorder %v8639_v48, %v8621_v35 }
  0xc5   : > { %1842 = vmatpush.bf16.msra.mxu2 %v7680_v32 }
  0xc7   : > { %7833 = vmatpush.bf16.msra.mxu3 %v7683_v27 }
  0xc8   : > { %769 = vperm.xlu2 %7951, %v628_v49   ;;  %766 = vperm.xlu1 %7950, %v627_v50  }
  0xc9   : > { %763 = vperm.xlu0 %7949, %v626_v52   ;;  %1843 = vmatpush.bf16.msra.mxu2 %v7679_v36 }
  0xca   : > { %v833_v53 = vpop.permute.xlu1 %832  ;;  %v671_v16 = vpop.permute.xlu2 %670 }
  0xcb   : > { %vm907_vm6 = vcmp.eq.s32.totalorder %v833_v53, %v8621_v35  ;;  %v8648_v54 = vpop.permute.xlu0 %829  ;;  %7834 = vmatpush.bf16.msra.mxu3 %v7682_v28 }
  0xcc   : > { %vm8650_vm7 = vmpackc.low %vm908_vm3, %vm907_vm6 }
  0xcd   : > { %1844 = vmatpush.bf16.msra.mxu2 %v7678_v38 }
  0xce   : > { %7036 = vmatmul.msk.bf16.gmra.mxu3 %vm8654_vm8, %v8362_v45 }
  0xcf   : > { %7835 = vmatpush.bf16.msra.mxu3 %v7681_v31 }
  0xd0   : > { %778 = vperm.xlu2 %7951, %v631_v57   ;;  %775 = vperm.xlu1 %7950, %v630_v58  }
  0xd1   : > { %772 = vperm.xlu0 %7949, %v629_v59  }
  0xd2   : > { %v842_v61 = vpop.permute.xlu1 %841  ;;  %v680_v19 = vpop.permute.xlu2 %679 }
  0xd3   : > { %vm910_vm9 = vcmp.eq.s32.totalorder %v842_v61, %v8621_v35  ;;  %v839_v62 = vpop.permute.xlu0 %838  ;;  %7836 = vmatpush.bf16.msra.mxu3 %v7680_v32 }
  0xd4   : > { %vm909_vm10 = vcmp.eq.s32.totalorder %v839_v62, %v8621_v35 }
  0xd5   : > { %vm8666_vm11 = vmpackc.low %vm910_vm9, %vm909_vm10  ;;  %vm904_vm10 = vcmp.eq.s32.totalorder %v8637_v47, %v8621_v35 }
  0xd7   : > { %7837 = vmatpush.bf16.msra.mxu3 %v7679_v36 }
  0xd8   : > { %787 = vperm.xlu2 %7951, %v634_v0   ;;  %784 = vperm.xlu1 %7950, %v633_v1  }
  0xd9   : > { %781 = vperm.xlu0 %7949, %v632_v2  }
  0xda   : > { %v659_v4 = vpop.permute.xlu1 %658  ;;  %v689_v24 = vpop.permute.xlu2 %688 }
  0xdb   : > { %v848_v6 = vpop.permute.xlu0 %847  ;;  %vm849_vm0 = vcmp.eq.s32.totalorder %v659_v4, %v8621_v35  ;;  %7838 = vmatpush.bf16.msra.mxu3 %v7678_v38 }
  0xdc   : > { %vm912_vm3 = vcmp.eq.s32.totalorder %v848_v6, %v8621_v35  ;;  %vm6985_vm4 = vmpackc.low %vm850_vm15, %vm849_vm0 }
  0xdd   : > { %vm8685_vm5 = vmpackc.low %vm912_vm3, %vm911_vm1  ;;  %6986 = vmatmul.msk.bf16.vlgmr.msra.gmra.mxu0 %vm6985_vm4, %v8362_v45  ;;  %7050 = vmatmul.msk.bf16.vlgmr.msra.gmra.mxu1 %vm6985_vm4, %v8362_v45  ;;  %vm905_vm1 = vcmp.eq.s32.totalorder %v8623_v41, %v8621_v35  ;;  %vm906_vm3 = vcmp.eq.s32.totalorder %v8648_v54, %v8621_v35  ;;  %vm853_vm4 = vcmp.eq.s32.totalorder %v671_v16, %v8621_v35 }
  0xde   : > { %7038 = vmatmul.msk.bf16.gmra.mxu3 %vm8677_vm14, %v8362_v45  ;;  %vm8704_vm15 = vmpackc.low %vm904_vm10, %vm903_vm12  ;;  %vm856_vm12 = vcmp.eq.s32.totalorder %v680_v19, %v8621_v35 }
  0xe0   : > { %796 = vperm.xlu2 %7951, %v637_v8   ;;  %793 = vperm.xlu1 %7950, %v636_v9  }
  0xe1   : > { %790 = vperm.xlu0 %7949, %v635_v10  }
  0xe2   : > { %v668_v12 = vpop.permute.xlu1 %667  ;;  %v698_v30 = vpop.permute.xlu2 %697 }
  0xe3   : > { %v665_v11 = vpop.permute.xlu0 %664  ;;  %vm852_vm9 = vcmp.eq.s32.totalorder %v668_v12, %v8621_v35 }
  0xe4   : > { %vm851_vm6 = vcmp.eq.s32.totalorder %v665_v11, %v8621_v35 }
  0xe5   : > { %vm6987_vm13 = vmpackc.low %vm852_vm9, %vm851_vm6 }
  0xe6   : > { %vm8719_vm9 = vmpackc.low %vm906_vm3, %vm905_vm1 }
  0xe9   : > { %799 = vperm.xlu0 %7949, %v638_v13  }
  0xea   : > { %v677_v18 = vpop.permute.xlu1 %676  ;;  %v707_v50 = vpop.permute.xlu2 %706 }
  0xeb   : > { %v674_v15 = vpop.permute.xlu0 %673  ;;  %vm855_vm10 = vcmp.eq.s32.totalorder %v677_v18, %v8621_v35 }
  0xec   : > { %vm854_vm0 = vcmp.eq.s32.totalorder %v674_v15, %v8621_v35 }
  0xed   : > { %6988 = vmatmul.msk.bf16.gmra.mxu0 %vm6987_vm13, %v8362_v45  ;;  %7052 = vmatmul.msk.bf16.gmra.mxu1 %vm6987_vm13, %v8362_v45  ;;  %vm6989_vm6 = vmpackc.low %vm854_vm0, %vm853_vm4 }
  0xee   : > { %7040 = vmatmul.msk.bf16.gmra.mxu3 %vm8704_vm15, %v8362_v45  ;;  %vm6991_vm13 = vmpackc.low %vm856_vm12, %vm855_vm10 }
  0xf2   : > { %v686_v21 = vpop.permute.xlu1 %685  ;;  %v716_v15 = vpop.permute.xlu2 %715 }
  0xf3   : > { %v683_v20 = vpop.permute.xlu0 %682  ;;  %vm858_vm1 = vcmp.eq.s32.totalorder %v686_v21, %v8621_v35 }
  0xf4   : > { %vm857_vm0 = vcmp.eq.s32.totalorder %v683_v20, %v8621_v35 }
  0xf5   : > { %vm6993_vm3 = vmpackc.low %vm858_vm1, %vm857_vm0 }
  0xfa   : > { %v695_v29 = vpop.permute.xlu1 %694 }
  0xfb   : > { %v692_v23 = vpop.permute.xlu0 %691  ;;  %vm861_vm12 = vcmp.eq.s32.totalorder %v695_v29, %v8621_v35 }
  0xfc   : > { %vm860_vm4 = vcmp.eq.s32.totalorder %v692_v23, %v8621_v35 }
  0xfd   : > { %6990 = vmatmul.msk.bf16.gmra.mxu0 %vm6989_vm6, %v8362_v45  ;;  %7054 = vmatmul.msk.bf16.gmra.mxu1 %vm6989_vm6, %v8362_v45  ;;  %vm859_vm6 = vcmp.eq.s32.totalorder %v689_v24, %v8621_v35 }
  0xfe   : > { %7042 = vmatmul.msk.bf16.gmra.mxu3 %vm8719_vm9, %v8362_v45  ;;  %vm6995_vm10 = vmpackc.low %vm860_vm4, %vm859_vm6  ;;  %vm865_vm6 = vcmp.eq.s32.totalorder %v707_v50, %v8621_v35 }
 0x102   : > { %v704_v40 = vpop.permute.xlu1 %703 }
 0x103   : > { %v701_v39 = vpop.permute.xlu0 %700  ;;  %vm864_vm1 = vcmp.eq.s32.totalorder %v704_v40, %v8621_v35 }
 0x10a   : > { %v713_v11 = vpop.permute.xlu1 %712 }
 0x10b   : > { %v710_v49 = vpop.permute.xlu0 %709 }
 0x10c   : > { %vm866_vm4 = vcmp.eq.s32.totalorder %v710_v49, %v8621_v35 }
 0x10d   : > { %6992 = vmatmul.msk.bf16.gmra.mxu0 %vm6991_vm13, %v8362_v45  ;;  %7056 = vmatmul.msk.bf16.gmra.mxu1 %vm6991_vm13, %v8362_v45  ;;  %vm862_vm13 = vcmp.eq.s32.totalorder %v698_v30, %v8621_v35 }
 0x10e   : > { %7044 = vmatmul.msk.bf16.gmra.mxu3 %vm8650_vm7, %v8362_v45  ;;  %vm6997_vm0 = vmpackc.low %vm862_vm13, %vm861_vm12 }
 0x112   : > { %v722_v14 = vpop.permute.xlu1 %721 }
 0x113   : > { %v719_v38 = vpop.permute.xlu0 %718  ;;  %vm870_vm13 = vcmp.eq.s32.totalorder %v722_v14, %v8621_v35 }
 0x11d   : > { %6994 = vmatmul.msk.bf16.gmra.mxu0 %vm6993_vm3, %v8362_v45  ;;  %7058 = vmatmul.msk.bf16.gmra.mxu1 %vm6993_vm3, %v8362_v45 }
 0x11e   : > { %7046 = vmatmul.msk.bf16.gmra.mxu3 %vm8666_vm11, %v8362_v45 }
 0x12d   : > { %6996 = vmatmul.msk.bf16.gmra.mxu0 %vm6995_vm10, %v8362_v45  ;;  %7060 = vmatmul.msk.bf16.gmra.mxu1 %vm6995_vm10, %v8362_v45  ;;  %vm7001_vm10 = vmpackc.low %vm866_vm4, %vm865_vm6 }
 0x12e   : > { %7048 = vmatmul.msk.bf16.gmra.mxu3 %vm8685_vm5, %v8362_v45 }
 0x13d   : > { %6998 = vmatmul.msk.bf16.gmra.mxu0 %vm6997_vm0, %v8362_v45  ;;  %7062 = vmatmul.msk.bf16.gmra.mxu1 %vm6997_vm0, %v8362_v45 }
 0x13e   : > { %7098 = vmatmul.msk.bf16.vlgmr.msrb.gmra.mxu3 %vm8627_vm2, %v8362_v45  ;;  %vm863_vm2 = vcmp.eq.s32.totalorder %v701_v39, %v8621_v35 }
 0x13f   : > { %vm6999_vm3 = vmpackc.low %vm864_vm1, %vm863_vm2 }
 0x141   : > { %v1304_v34 = vpop.f32.mrf.mxu3 }
 0x142   : > { %v1305_v41 = vadd.f32 %v1304_v34, %v8759_v37 }
 0x144   : > { %v1609_v44 = vmax.f32 %v1305_v41, 0.0 }
 0x149   : > { %v1306_v42 = vpop.f32.mrf.mxu3 }
 0x14a   : > { %v1307_v43 = vadd.f32 %v1306_v42, %v8759_v37 }
 0x14c   : > { %v1611_v46 = vmax.f32 %v1307_v43, 0.0 }
 0x14d   : > { %7000 = vmatmul.msk.bf16.gmra.mxu0 %vm6999_vm3, %v8362_v45  ;;  %7064 = vmatmul.msk.bf16.gmra.mxu1 %vm6999_vm3, %v8362_v45 }
 0x14e   : > { %v8767_v47 = vpack.c.bf16 %v1611_v46, %v1609_v44  ;;  %7100 = vmatmul.msk.bf16.gmra.mxu3 %vm8654_vm8, %v8362_v45  ;;  %vm867_vm8 = vcmp.eq.s32.totalorder %v713_v11, %v8621_v35 }
 0x151   : > { %v1309_v48 = vpop.f32.mrf.mxu3 }
 0x152   : > { %v1310_v51 = vadd.f32 %v1309_v48, %v8759_v37 }
 0x154   : > { %v1613_v58 = vmax.f32 %v1310_v51, 0.0 }
 0x159   : > { %v1311_v52 = vpop.f32.mrf.mxu3 }
 0x15a   : > { %v1312_v53 = vadd.f32 %v1311_v52, %v8759_v37  ;;  %v1184_v54 = vpop.f32.mrf.mxu0  ;;  %v1353_v57 = vpop.f32.mrf.mxu1 }
 0x15b   : > { %v1185_v62 = vadd.f32 %v1184_v54, %v8759_v37  ;;  %v1354_v0 = vadd.f32 %v1353_v57, %v8776_v60 }
 0x15c   : > { %v1615_v59 = vmax.f32 %v1312_v53, 0.0 }
 0x15d   : > { %7002 = vmatmul.msk.bf16.gmra.mxu0 %vm7001_vm10, %v8362_v45  ;;  %7066 = vmatmul.msk.bf16.gmra.mxu1 %vm7001_vm10, %v8362_v45  ;;  %v1513_v8 = vmax.f32 %v1185_v62, 0.0  ;;  %v1514_v9 = vmax.f32 %v1354_v0, 0.0 }
 0x15e   : > { %7102 = vmatmul.msk.bf16.gmra.mxu3 %vm8677_vm14, %v8362_v45  ;;  %v8783_v61 = vpack.c.bf16 %v1615_v59, %v1613_v58  ;;  %vm868_vm14 = vcmp.eq.s32.totalorder %v716_v15, %v8621_v35  ;;  %v7699_v15 = vld [vmem:[#allocation7 + $0x28] sm:$0xff] }
 0x15f   : > { %vm7003_vm12 = vmpackc.low %vm868_vm14, %vm867_vm8  ;;  %2341 = vmatpush.bf16.msrb.mxu0 %v7699_v15 }
 0x161   : > { %v1314_v1 = vpop.f32.mrf.mxu3 }
 0x162   : > { %v1186_v2 = vpop.f32.mrf.mxu0  ;;  %v1355_v3 = vpop.f32.mrf.mxu1  ;;  %v1315_v16 = vadd.f32 %v1314_v1, %v8759_v37 }
 0x163   : > { %v1187_v4 = vadd.f32 %v1186_v2, %v8759_v37  ;;  %v1356_v6 = vadd.f32 %v1355_v3, %v8776_v60  ;;  %v728_v2 = vpop.permute.xlu0 %727 }
 0x164   : > { %v1617_v22 = vmax.f32 %v1315_v16, 0.0 }
 0x165   : > { %v1515_v10 = vmax.f32 %v1187_v4, 0.0  ;;  %v1516_v5 = vmax.f32 %v1356_v6, 0.0  ;;  %v725_v4 = vpop.permute.xlu2 %724 }
 0x166   : > { %vm871_vm2 = vcmp.eq.s32.totalorder %v725_v4, %v8621_v35 }
 0x167   : > { %v8789_v12 = vpack.c.bf16 %v1516_v5, %v1514_v9  ;;  %v1641_v13 = vpack.c.bf16 %v1515_v10, %v1513_v8 }
 0x169   : > { %v1316_v18 = vpop.f32.mrf.mxu3  ;;  %1845 = vmatmul.bf16.vlgmr.msra.gmra.mxu2 %v1641_v13 }
 0x16a   : > { %v1317_v19 = vadd.f32 %v1316_v18, %v8759_v37  ;;  %v1189_v20 = vpop.f32.mrf.mxu0  ;;  %v1358_v21 = vpop.f32.mrf.mxu1 }
 0x16b   : > { %v1190_v25 = vadd.f32 %v1189_v20, %v8759_v37  ;;  %v1359_v26 = vadd.f32 %v1358_v21, %v8776_v60 }
 0x16c   : > { %v1619_v23 = vmax.f32 %v1317_v19, 0.0 }
 0x16d   : > { %7004 = vmatmul.msk.bf16.gmra.mxu0 %vm7003_vm12, %v8362_v45  ;;  %7068 = vmatmul.msk.bf16.gmra.mxu1 %vm7003_vm12, %v8362_v45  ;;  %v1517_v32 = vmax.f32 %v1190_v25, 0.0  ;;  %v1518_v33 = vmax.f32 %v1359_v26, 0.0 }
 0x16e   : > { %7104 = vmatmul.msk.bf16.gmra.mxu3 %vm8704_vm15, %v8362_v45  ;;  %v8800_v24 = vpack.c.bf16 %v1619_v23, %v1617_v22  ;;  %vm869_vm15 = vcmp.eq.s32.totalorder %v719_v38, %v8621_v35 }
 0x16f   : > { %vm7005_vm0 = vmpackc.low %vm870_vm13, %vm869_vm15 }
 0x171   : > { %v1319_v27 = vpop.f32.mrf.mxu3 }
 0x172   : > { %v1191_v28 = vpop.f32.mrf.mxu0  ;;  %v1360_v29 = vpop.f32.mrf.mxu1  ;;  %v1320_v41 = vadd.f32 %v1319_v27, %v8759_v37 }
 0x173   : > { %v1192_v30 = vadd.f32 %v1191_v28, %v8759_v37  ;;  %v1361_v31 = vadd.f32 %v1360_v29, %v8776_v60  ;;  %v731_v29 = vpop.permute.xlu1 %730 }
 0x174   : > { %v1621_v48 = vmax.f32 %v1320_v41, 0.0 }
 0x175   : > { %v1519_v34 = vmax.f32 %v1192_v30, 0.0  ;;  %v1520_v36 = vmax.f32 %v1361_v31, 0.0 }
 0x177   : > { %v1643_v39 = vpack.c.bf16 %v1519_v34, %v1517_v32  ;;  %v8806_v40 = vpack.c.bf16 %v1520_v36, %v1518_v33  ;;  %v734_v32 = vpop.permute.xlu2 %733 }
 0x178   : > { %vm874_vm3 = vcmp.eq.s32.totalorder %v734_v32, %v8621_v35 }
 0x179   : > { %v1321_v42 = vpop.f32.mrf.mxu3  ;;  %1850 = vmatmul.bf16.gmra.mxu2 %v1643_v39 }
 0x17a   : > { %v1322_v43 = vadd.f32 %v1321_v42, %v8759_v37  ;;  %v1194_v44 = vpop.f32.mrf.mxu0  ;;  %v1363_v46 = vpop.f32.mrf.mxu1  ;;  %v7693_v42 = vld [vmem:[#allocation5 + $0x78] sm:$0xff] }
 0x17b   : > { %v1195_v51 = vadd.f32 %v1194_v44, %v8759_v37  ;;  %v1364_v52 = vadd.f32 %v1363_v46, %v8776_v60  ;;  %2006 = vmatpush.bf16.msrb.mxu3 %v7693_v42 }
 0x17c   : > { %v1623_v49 = vmax.f32 %v1322_v43, 0.0 }
 0x17d   : > { %7006 = vmatmul.msk.bf16.gmra.mxu0 %vm7005_vm0, %v8362_v45  ;;  %7070 = vmatmul.msk.bf16.gmra.mxu1 %vm7005_vm0, %v8362_v45  ;;  %v1521_v56 = vmax.f32 %v1195_v51, 0.0  ;;  %v1522_v62 = vmax.f32 %v1364_v52, 0.0 }
 0x17e   : > { %7106 = vmatmul.msk.bf16.gmra.mxu3 %vm8719_vm9, %v8362_v45  ;;  %v8817_v50 = vpack.c.bf16 %v1623_v49, %v1621_v48  ;;  %vm872_vm9 = vcmp.eq.s32.totalorder %v728_v2, %v8621_v35 }
 0x17f   : > { %vm7007_vm1 = vmpackc.low %vm872_vm9, %vm871_vm2 }
 0x181   : > { %v1324_v53 = vpop.f32.mrf.mxu3 }
 0x182   : > { %v1196_v54 = vpop.f32.mrf.mxu0  ;;  %v1365_v57 = vpop.f32.mrf.mxu1  ;;  %v1325_v6 = vadd.f32 %v1324_v53, %v8759_v37 }
 0x183   : > { %v1197_v58 = vadd.f32 %v1196_v54, %v8759_v37  ;;  %v1366_v59 = vadd.f32 %v1365_v57, %v8776_v60 }
 0x184   : > { %v1625_v11 = vmax.f32 %v1325_v6, 0.0 }
 0x185   : > { %v1523_v0 = vmax.f32 %v1197_v58, 0.0  ;;  %v1524_v1 = vmax.f32 %v1366_v59, 0.0  ;;  %v737_v59 = vpop.permute.xlu0 %736 }
 0x187   : > { %v1645_v17 = vpack.c.bf16 %v1523_v0, %v1521_v56  ;;  %v8823_v3 = vpack.c.bf16 %v1524_v1, %v1522_v62  ;;  %v740_v56 = vpop.permute.xlu1 %739 }
 0x188   : > { %vm876_vm6 = vcmp.eq.s32.totalorder %v740_v56, %v8621_v35 }
 0x189   : > { %v1326_v8 = vpop.f32.mrf.mxu3  ;;  %1855 = vmatmul.bf16.gmra.mxu2 %v1645_v17 }
 0x18a   : > { %v1327_v9 = vadd.f32 %v1326_v8, %v8759_v37  ;;  %v1199_v10 = vpop.f32.mrf.mxu0  ;;  %v1368_v5 = vpop.f32.mrf.mxu1 }
 0x18b   : > { %v1200_v18 = vadd.f32 %v1199_v10, %v8759_v37  ;;  %v1369_v19 = vadd.f32 %v1368_v5, %v8776_v60  ;;  %v7692_v10 = vld [vmem:[#allocation5 + $0x70] sm:$0xff] }
 0x18c   : > { %v1627_v13 = vmax.f32 %v1327_v9, 0.0  ;;  %2007 = vmatpush.bf16.msrb.mxu3 %v7692_v10  ;;  %v7269_v10 = vld [vmem:[#allocation8 + $0x78] sm:$0xf0] }
 0x18d   : > { %7008 = vmatmul.msk.bf16.gmra.mxu0 %vm7007_vm1, %v8362_v45  ;;  %7072 = vmatmul.msk.bf16.gmra.mxu1 %vm7007_vm1, %v8362_v45  ;;  %v1525_v26 = vmax.f32 %v1200_v18, 0.0  ;;  %v1526_v27 = vmax.f32 %v1369_v19, 0.0 }
 0x18e   : > { %7108 = vmatmul.msk.bf16.gmra.mxu3 %vm8650_vm7, %v8362_v45  ;;  %v8834_v16 = vpack.c.bf16 %v1627_v13, %v1625_v11  ;;  %vm873_vm7 = vcmp.eq.s32.totalorder %v731_v29, %v8621_v35 }
 0x18f   : > { %vm7009_vm4 = vmpackc.low %vm874_vm3, %vm873_vm7 }
 0x191   : > { %v1329_v20 = vpop.f32.mrf.mxu3 }
 0x192   : > { %v1201_v21 = vpop.f32.mrf.mxu0  ;;  %v1370_v22 = vpop.f32.mrf.mxu1  ;;  %v1330_v33 = vadd.f32 %v1329_v20, %v8759_v37 }
 0x193   : > { %v1202_v23 = vadd.f32 %v1201_v21, %v8759_v37  ;;  %v1371_v25 = vadd.f32 %v1370_v22, %v8776_v60 }
 0x194   : > { %v1629_v39 = vmax.f32 %v1330_v33, 0.0 }
 0x195   : > { %v1527_v28 = vmax.f32 %v1202_v23, 0.0  ;;  %v1528_v55 = vmax.f32 %v1371_v25, 0.0 }
 0x197   : > { %v1647_v30 = vpack.c.bf16 %v1527_v28, %v1525_v26  ;;  %v8840_v31 = vpack.c.bf16 %v1528_v55, %v1526_v27  ;;  %v746_v26 = vpop.permute.xlu0 %745  ;;  %v743_v55 = vpop.permute.xlu2 %742 }
 0x198   : > { %vm877_vm8 = vcmp.eq.s32.totalorder %v743_v55, %v8621_v35 }
 0x199   : > { %v1331_v34 = vpop.f32.mrf.mxu3  ;;  %1860 = vmatmul.bf16.gmra.mxu2 %v1647_v30 }
 0x19a   : > { %v1332_v36 = vadd.f32 %v1331_v34, %v8759_v37  ;;  %v1204_v38 = vpop.f32.mrf.mxu0  ;;  %v1373_v14 = vpop.f32.mrf.mxu1 }
 0x19b   : > { %v1205_v44 = vadd.f32 %v1204_v38, %v8759_v37  ;;  %v1374_v46 = vadd.f32 %v1373_v14, %v8776_v60  ;;  %v7691_v14 = vld [vmem:[#allocation5 + $0x68] sm:$0xff] }
 0x19c   : > { %v1631_v41 = vmax.f32 %v1332_v36, 0.0  ;;  %2008 = vmatpush.bf16.msrb.mxu3 %v7691_v14 }
 0x19d   : > { %7010 = vmatmul.msk.bf16.gmra.mxu0 %vm7009_vm4, %v8362_v45  ;;  %7074 = vmatmul.msk.bf16.gmra.mxu1 %vm7009_vm4, %v8362_v45  ;;  %v1529_v54 = vmax.f32 %v1205_v44, 0.0  ;;  %v1530_v57 = vmax.f32 %v1374_v46, 0.0 }
 0x19e   : > { %7110 = vmatmul.msk.bf16.gmra.mxu3 %vm8666_vm11, %v8362_v45  ;;  %v8851_v43 = vpack.c.bf16 %v1631_v41, %v1629_v39  ;;  %vm875_vm11 = vcmp.eq.s32.totalorder %v737_v59, %v8621_v35  ;;  %v7698_v39 = vld [vmem:[#allocation7 + $0x20] sm:$0xff] }
 0x19f   : > { %vm7011_vm10 = vmpackc.low %vm876_vm6, %vm875_vm11  ;;  %2342 = vmatpush.bf16.msrb.mxu0 %v7698_v39  ;;  %v752_v56 = vpop.permute.xlu2 %751 }
 0x1a0   : > { %vm880_vm15 = vcmp.eq.s32.totalorder %v752_v56, %v8621_v35 }
 0x1a1   : > { %v1334_v48 = vpop.f32.mrf.mxu3 }
 0x1a2   : > { %v1206_v49 = vpop.f32.mrf.mxu0  ;;  %v1375_v51 = vpop.f32.mrf.mxu1  ;;  %v1335_v1 = vadd.f32 %v1334_v48, %v8759_v37 }
 0x1a3   : > { %v1207_v52 = vadd.f32 %v1206_v49, %v8759_v37  ;;  %v1376_v53 = vadd.f32 %v1375_v51, %v8776_v60 }
 0x1a4   : > { %v1633_v8 = vmax.f32 %v1335_v1, 0.0 }
 0x1a5   : > { %v1531_v58 = vmax.f32 %v1207_v52, 0.0  ;;  %v1532_v63 = vmax.f32 %v1376_v53, 0.0 }
 0x1a7   : > { %v1649_v62 = vpack.c.bf16 %v1531_v58, %v1529_v54  ;;  %v8857_v0 = vpack.c.bf16 %v1532_v63, %v1530_v57  ;;  %v749_v58 = vpop.permute.xlu1 %748 }
 0x1a8   : > { %vm879_vm12 = vcmp.eq.s32.totalorder %v749_v58, %v8621_v35 }
 0x1a9   : > { %v1336_v2 = vpop.f32.mrf.mxu3  ;;  %1865 = vmatmul.bf16.gmra.mxu2 %v1649_v62  ;;  %vm7015_vm13 = vmpackc.low %vm880_vm15, %vm879_vm12 }
 0x1aa   : > { %v1337_v17 = vadd.f32 %v1336_v2, %v8759_v37  ;;  %v1209_v4 = vpop.f32.mrf.mxu0  ;;  %v1378_v6 = vpop.f32.mrf.mxu1 }
 0x1ab   : > { %v1210_v11 = vadd.f32 %v1209_v4, %v8759_v37  ;;  %v1379_v13 = vadd.f32 %v1378_v6, %v8776_v60 }
 0x1ac   : > { %v1635_v9 = vmax.f32 %v1337_v17, 0.0 }
 0x1ad   : > { %7012 = vmatmul.msk.bf16.gmra.mxu0 %vm7011_vm10, %v8362_v45  ;;  %7076 = vmatmul.msk.bf16.gmra.mxu1 %vm7011_vm10, %v8362_v45  ;;  %v1533_v22 = vmax.f32 %v1210_v11, 0.0  ;;  %v1534_v23 = vmax.f32 %v1379_v13, 0.0  ;;  %v7267_v13 = vld [vmem:[#allocation8 + $0x70] sm:$0xf] }
 0x1ae   : > { %7112 = vmatmul.msk.bf16.gmra.mxu3 %vm8685_vm5, %v8362_v45  ;;  %v8868_v5 = vpack.c.bf16 %v1635_v9, %v1633_v8  ;;  %vm878_vm5 = vcmp.eq.s32.totalorder %v746_v26, %v8621_v35  ;;  %v7716_v9 = vld [vmem:[#allocation8 + $0x74] sm:$0xf] }
 0x1af   : > { %vm7013_vm14 = vmpackc.low %vm878_vm5, %vm877_vm8  ;;  %v7272_v11 = vor.u32 %v7716_v9, %v7269_v10 }
 0x1b1   : > { %v1339_v15 = vpop.f32.mrf.mxu3  ;;  %3195 = vmatpush.bf16.msrb.mxu2 %v7272_v11 }
 0x1b2   : > { %v1211_v18 = vpop.f32.mrf.mxu0  ;;  %v1380_v19 = vpop.f32.mrf.mxu1  ;;  %v1340_v29 = vadd.f32 %v1339_v15, %v8759_v37  ;;  %v7717_v15 = vld [vmem:[#allocation8 + $0x74] sm:$0xf0] }
 0x1b3   : > { %v1212_v20 = vadd.f32 %v1211_v18, %v8759_v37  ;;  %v1381_v21 = vadd.f32 %v1380_v19, %v8776_v60  ;;  %v7690_v18 = vld [vmem:[#allocation5 + $0x60] sm:$0xff] }
 0x1b4   : > { %v1637_v36 = vmax.f32 %v1340_v29, 0.0  ;;  %2009 = vmatpush.bf16.msrb.mxu3 %v7690_v18 }
 0x1b5   : > { %v1535_v25 = vmax.f32 %v1212_v20, 0.0  ;;  %v1536_v7 = vmax.f32 %v1381_v21, 0.0  ;;  %v7268_v20 = vor.u32 %v7717_v15, %v7267_v13 }
 0x1b7   : > { %v1651_v27 = vpack.c.bf16 %v1535_v25, %v1533_v22  ;;  %v8874_v28 = vpack.c.bf16 %v1536_v7, %v1534_v23  ;;  %3026 = vmatpush.bf16.msrb.mxu1 %v7268_v20  ;;  %v7688_v20 = vld [vmem:[#allocation5 + $0x50] sm:$0xff] }
 0x1b9   : > { %v1341_v30 = vpop.f32.mrf.mxu3  ;;  %1870 = vmatmul.bf16.gmra.mxu2 %v1651_v27 }
 0x1ba   : > { %v1342_v32 = vadd.f32 %v1341_v30, %v8759_v37  ;;  %v1214_v33 = vpop.f32.mrf.mxu0  ;;  %v1383_v34 = vpop.f32.mrf.mxu1 }
 0x1bb   : > { %v1215_v42 = vadd.f32 %v1214_v33, %v8759_v37  ;;  %v1384_v44 = vadd.f32 %v1383_v34, %v8776_v60  ;;  %v758_v33 = vpop.permute.xlu1 %757 }
 0x1bc   : > { %v1639_v38 = vmax.f32 %v1342_v32, 0.0  ;;  %v755_v32 = vpop.permute.xlu0 %754  ;;  %vm882_vm9 = vcmp.eq.s32.totalorder %v758_v33, %v8621_v35 }
 0x1bd   : > { %7014 = vmatmul.msk.bf16.gmra.mxu0 %vm7013_vm14, %v8362_v45  ;;  %7078 = vmatmul.msk.bf16.gmra.mxu1 %vm7013_vm14, %v8362_v45  ;;  %v1537_v53 = vmax.f32 %v1215_v42, 0.0  ;;  %v1538_v54 = vmax.f32 %v1384_v44, 0.0  ;;  %vm881_vm0 = vcmp.eq.s32.totalorder %v755_v32, %v8621_v35 }
 0x1be   : > { %1965 = vmatmul.bf16.vlgmr.msra.gmra.mxu3 %v8767_v47  ;;  %v8883_v41 = vpack.c.bf16 %v1639_v38, %v1637_v36  ;;  %vm7017_vm2 = vmpackc.low %vm882_vm9, %vm881_vm0 }
 0x1c1   : > { %v1473_v46 = vpop.f32.mrf.mxu3 }
 0x1c2   : > { %v1216_v48 = vpop.f32.mrf.mxu0  ;;  %v1385_v49 = vpop.f32.mrf.mxu1  ;;  %v1474_v62 = vadd.f32 %v1473_v46, %v8776_v60 }
 0x1c3   : > { %v1217_v51 = vadd.f32 %v1216_v48, %v8759_v37  ;;  %v1386_v52 = vadd.f32 %v1385_v49, %v8776_v60  ;;  %v7689_v49 = vld [vmem:[#allocation5 + $0x58] sm:$0xff] }
 0x1c4   : > { %v1610_v6 = vmax.f32 %v1474_v62, 0.0  ;;  %2010 = vmatpush.bf16.msrb.mxu3 %v7689_v49 }
 0x1c5   : > { %v1539_v47 = vmax.f32 %v1217_v51, 0.0  ;;  %v1540_v57 = vmax.f32 %v1386_v52, 0.0 }
 0x1c7   : > { %v1653_v63 = vpack.c.bf16 %v1539_v47, %v1537_v53  ;;  %v8889_v59 = vpack.c.bf16 %v1540_v57, %v1538_v54 }
 0x1c8   : > { %2011 = vmatpush.bf16.msrb.mxu3 %v7688_v20 }
 0x1c9   : > { %v1475_v1 = vpop.f32.mrf.mxu3  ;;  %1875 = vmatmul.bf16.gmra.mxu2 %v1653_v63 }
 0x1ca   : > { %v1476_v2 = vadd.f32 %v1475_v1, %v8776_v60  ;;  %v1219_v17 = vpop.f32.mrf.mxu0  ;;  %v1388_v4 = vpop.f32.mrf.mxu1 }
 0x1cb   : > { %v1220_v21 = vadd.f32 %v1219_v17, %v8759_v37  ;;  %v1389_v22 = vadd.f32 %v1388_v4, %v8776_v60 }
 0x1cc   : > { %v1612_v8 = vmax.f32 %v1476_v2, 0.0 }
 0x1cd   : > { %7016 = vmatmul.msk.bf16.gmra.mxu0 %vm7015_vm13, %v8362_v45  ;;  %7080 = vmatmul.msk.bf16.gmra.mxu1 %vm7015_vm13, %v8362_v45  ;;  %v1542_v55 = vmax.f32 %v1389_v22, 0.0 }
 0x1ce   : > { %1970 = vmatmul.bf16.gmra.mxu3 %v8783_v61  ;;  %v8898_v19 = vpack.c.bf16 %v1612_v8, %v1610_v6  ;;  %v1541_v61 = vmax.f32 %v1220_v21, 0.0  ;;  %v761_v6 = vpop.permute.xlu2 %760  ;;  %v7697_v21 = vld [vmem:[#allocation7 + $0x18] sm:$0xff] }
 0x1cf   : > { %vm883_vm7 = vcmp.eq.s32.totalorder %v761_v6, %v8621_v35  ;;  %2343 = vmatpush.bf16.msrb.mxu0 %v7697_v21 }
 0x1d1   : > { %v1478_v23 = vpop.f32.mrf.mxu3 }
 0x1d2   : > { %v1221_v25 = vpop.f32.mrf.mxu0  ;;  %v1390_v7 = vpop.f32.mrf.mxu1  ;;  %v1479_v38 = vadd.f32 %v1478_v23, %v8776_v60 }
 0x1d3   : > { %v1222_v26 = vadd.f32 %v1221_v25, %v8759_v37  ;;  %v1391_v27 = vadd.f32 %v1390_v7, %v8776_v60 }
 0x1d4   : > { %v1614_v46 = vmax.f32 %v1479_v38, 0.0 }
 0x1d5   : > { %v1543_v29 = vmax.f32 %v1222_v26, 0.0  ;;  %v1544_v30 = vmax.f32 %v1391_v27, 0.0 }
 0x1d7   : > { %v1655_v34 = vpack.c.bf16 %v1543_v29, %v1541_v61  ;;  %v8904_v36 = vpack.c.bf16 %v1544_v30, %v1542_v55 }
 0x1d9   : > { %v1480_v14 = vpop.f32.mrf.mxu3  ;;  %1880 = vmatmul.bf16.gmra.mxu2 %v1655_v34  ;;  %v767_v34 = vpop.permute.xlu1 %766 }
 0x1da   : > { %v1481_v39 = vadd.f32 %v1480_v14, %v8776_v60  ;;  %v1224_v42 = vpop.f32.mrf.mxu0  ;;  %v1393_v44 = vpop.f32.mrf.mxu1  ;;  %vm885_vm4 = vcmp.eq.s32.totalorder %v767_v34, %v8621_v35 }
 0x1db   : > { %v1225_v52 = vadd.f32 %v1224_v42, %v8759_v37  ;;  %v1394_v53 = vadd.f32 %v1393_v44, %v8776_v60 }
 0x1dc   : > { %v1616_v48 = vmax.f32 %v1481_v39, 0.0  ;;  %v770_v39 = vpop.permute.xlu2 %769 }
 0x1dd   : > { %7018 = vmatmul.msk.bf16.gmra.mxu0 %vm7017_vm2, %v8362_v45  ;;  %7082 = vmatmul.msk.bf16.gmra.mxu1 %vm7017_vm2, %v8362_v45  ;;  %v1545_v56 = vmax.f32 %v1225_v52, 0.0  ;;  %v1546_v62 = vmax.f32 %v1394_v53, 0.0  ;;  %vm886_vm11 = vcmp.eq.s32.totalorder %v770_v39, %v8621_v35 }
 0x1de   : > { %1975 = vmatmul.bf16.gmra.mxu3 %v8800_v24  ;;  %v8913_v51 = vpack.c.bf16 %v1616_v48, %v1614_v46  ;;  %v764_v24 = vpop.permute.xlu0 %763  ;;  %vm7021_vm6 = vmpackc.low %vm886_vm11, %vm885_vm4 }
 0x1df   : > { %vm884_vm1 = vcmp.eq.s32.totalorder %v764_v24, %v8621_v35 }
 0x1e0   : > { %vm7019_vm3 = vmpackc.low %vm884_vm1, %vm883_vm7 }
 0x1e1   : > { %v1483_v54 = vpop.f32.mrf.mxu3  ;;  %v776_v21 = vpop.permute.xlu1 %775 }
 0x1e2   : > { %v1226_v47 = vpop.f32.mrf.mxu0  ;;  %v1395_v57 = vpop.f32.mrf.mxu1  ;;  %v1484_v8 = vadd.f32 %v1483_v54, %v8776_v60  ;;  %v7714_v54 = vld [vmem:[#allocation8 + $0x64] sm:$0xf]  ;;  %vm888_vm5 = vcmp.eq.s32.totalorder %v776_v21, %v8621_v35 }
 0x1e3   : > { %v1227_v58 = vadd.f32 %v1226_v47, %v8759_v37  ;;  %v1396_v63 = vadd.f32 %v1395_v57, %v8776_v60  ;;  %v7261_v47 = vld [vmem:[#allocation8 + $0x68] sm:$0xf0] }
 0x1e4   : > { %v1618_v15 = vmax.f32 %v1484_v8, 0.0 }
 0x1e5   : > { %v1547_v1 = vmax.f32 %v1227_v58, 0.0  ;;  %v1548_v2 = vmax.f32 %v1396_v63, 0.0  ;;  %v7264_v58 = vor.u32 %v7714_v54, %v7261_v47  ;;  %v7259_v63 = vld [vmem:[#allocation8 + $0x60] sm:$0xf] }
 0x1e6   : > { %v773_v20 = vpop.permute.xlu0 %772 }
 0x1e7   : > { %v1657_v17 = vpack.c.bf16 %v1547_v1, %v1545_v56  ;;  %v8919_v4 = vpack.c.bf16 %v1548_v2, %v1546_v62  ;;  %v7715_v56 = vld [vmem:[#allocation8 + $0x64] sm:$0xf0]  ;;  %3196 = vmatpush.bf16.msrb.mxu2 %v7264_v58  ;;  %vm887_vm10 = vcmp.eq.s32.totalorder %v773_v20, %v8621_v35 }
 0x1e8   : > { %v7260_v62 = vor.u32 %v7715_v56, %v7259_v63  ;;  %v7687_v1 = vld [vmem:[#allocation5 + $0x48] sm:$0xff]  ;;  %vm7023_vm8 = vmpackc.low %vm888_vm5, %vm887_vm10 }
 0x1e9   : > { %v1485_v9 = vpop.f32.mrf.mxu3  ;;  %1885 = vmatmul.bf16.gmra.mxu2 %v1657_v17  ;;  %2012 = vmatpush.bf16.msrb.mxu3 %v7687_v1 }
 0x1ea   : > { %v1486_v10 = vadd.f32 %v1485_v9, %v8776_v60  ;;  %v1229_v11 = vpop.f32.mrf.mxu0  ;;  %v1398_v13 = vpop.f32.mrf.mxu1  ;;  %3027 = vmatpush.bf16.msrb.mxu1 %v7260_v62 }
 0x1eb   : > { %v1230_v23 = vadd.f32 %v1229_v11, %v8759_v37  ;;  %v1399_v25 = vadd.f32 %v1398_v13, %v8776_v60  ;;  %v779_v62 = vpop.permute.xlu2 %778 }
 0x1ec   : > { %v1620_v18 = vmax.f32 %v1486_v10, 0.0  ;;  %v8932_v61 = vpop.f32.mrf.mxu2  ;;  %vm889_vm12 = vcmp.eq.s32.totalorder %v779_v62, %v8621_v35 }
 0x1ed   : > { %7020 = vmatmul.msk.bf16.gmra.mxu0 %vm7019_vm3, %v8362_v45  ;;  %7084 = vmatmul.msk.bf16.gmra.mxu1 %vm7019_vm3, %v8362_v45  ;;  %v1550_v30 = vmax.f32 %v1399_v25, 0.0 }
 0x1ee   : > { %1980 = vmatmul.bf16.gmra.mxu3 %v8817_v50  ;;  %v8928_v22 = vpack.c.bf16 %v1620_v18, %v1618_v15  ;;  %v1549_v50 = vmax.f32 %v1230_v23, 0.0  ;;  %v782_v58 = vpop.permute.xlu0 %781 }
 0x1ef   : > { %vm890_vm14 = vcmp.eq.s32.totalorder %v782_v58, %v8621_v35 }
 0x1f0   : > { %vm7025_vm15 = vmpackc.low %vm890_vm14, %vm889_vm12 }
 0x1f1   : > { %v1488_v7 = vpop.f32.mrf.mxu3 }
 0x1f2   : > { %v1231_v26 = vpop.f32.mrf.mxu0  ;;  %v1400_v27 = vpop.f32.mrf.mxu1  ;;  %v1489_v42 = vadd.f32 %v1488_v7, %v8776_v60 }
 0x1f3   : > { %v1232_v55 = vadd.f32 %v1231_v26, %v8759_v37  ;;  %v1401_v29 = vadd.f32 %v1400_v27, %v8776_v60 }
 0x1f4   : > { %v1622_v52 = vmax.f32 %v1489_v42, 0.0  ;;  %v8942_v57 = vpop.f32.mrf.mxu2 }
 0x1f5   : > { %v1551_v32 = vmax.f32 %v1232_v55, 0.0  ;;  %v1552_v33 = vmax.f32 %v1401_v29, 0.0 }
 0x1f7   : > { %v1659_v38 = vpack.c.bf16 %v1551_v32, %v1549_v50  ;;  %v8936_v14 = vpack.c.bf16 %v1552_v33, %v1550_v30  ;;  %v7686_v33 = vld [vmem:[#allocation5 + $0x40] sm:$0xff] }
 0x1f8   : > { %2013 = vmatpush.bf16.msrb.mxu3 %v7686_v33  ;;  %v7712_v33 = vld [vmem:[#allocation8 + $0x54] sm:$0xf] }
 0x1f9   : > { %v1490_v44 = vpop.f32.mrf.mxu3  ;;  %1890 = vmatmul.bf16.gmra.mxu2 %v1659_v38 }
 0x1fa   : > { %v1491_v46 = vadd.f32 %v1490_v44, %v8776_v60  ;;  %v1234_v48 = vpop.f32.mrf.mxu0  ;;  %v1403_v49 = vpop.f32.mrf.mxu1 }
 0x1fb   : > { %v1235_v24 = vadd.f32 %v1234_v48, %v8759_v37  ;;  %v1404_v17 = vadd.f32 %v1403_v49, %v8776_v60 }
 0x1fc   : > { %v1624_v53 = vmax.f32 %v1491_v46, 0.0  ;;  %v8953_v23 = vpop.f32.mrf.mxu2 }
 0x1fd   : > { %7022 = vmatmul.msk.bf16.gmra.mxu0 %vm7021_vm6, %v8362_v45  ;;  %7086 = vmatmul.msk.bf16.gmra.mxu1 %vm7021_vm6, %v8362_v45  ;;  %v1553_v13 = vmax.f32 %v1235_v24, 0.0 }
 0x1fe   : > { %1985 = vmatmul.bf16.gmra.mxu3 %v8834_v16  ;;  %v8947_v2 = vpack.c.bf16 %v1624_v53, %v1622_v52  ;;  %v1554_v16 = vmax.f32 %v1404_v17, 0.0 }
 0x201   : > { %v1493_v6 = vpop.f32.mrf.mxu3 }
 0x202   : > { %v1236_v8 = vpop.f32.mrf.mxu0  ;;  %v1405_v9 = vpop.f32.mrf.mxu1  ;;  %v1494_v26 = vadd.f32 %v1493_v6, %v8776_v60 }
 0x203   : > { %v1237_v10 = vadd.f32 %v1236_v8, %v8759_v37  ;;  %v1406_v11 = vadd.f32 %v1405_v9, %v8776_v60 }
 0x204   : > { %v1626_v30 = vmax.f32 %v1494_v26, 0.0  ;;  %v8966_v38 = vpop.f32.mrf.mxu2 }
 0x205   : > { %v1555_v15 = vmax.f32 %v1237_v10, 0.0  ;;  %v1556_v18 = vmax.f32 %v1406_v11, 0.0  ;;  %v7696_v11 = vld [vmem:[#allocation7 + $0x10] sm:$0xff] }
 0x206   : > { %2344 = vmatpush.bf16.msrb.mxu0 %v7696_v11 }
 0x207   : > { %v1661_v25 = vpack.c.bf16 %v1555_v15, %v1553_v13  ;;  %v8955_v7 = vpack.c.bf16 %v1556_v18, %v1554_v16 }
 0x209   : > { %v1495_v27 = vpop.f32.mrf.mxu3  ;;  %1895 = vmatmul.bf16.gmra.mxu2 %v1661_v25 }
 0x20a   : > { %v1496_v55 = vadd.f32 %v1495_v27, %v8776_v60  ;;  %v1239_v29 = vpop.f32.mrf.mxu0  ;;  %v1408_v50 = vpop.f32.mrf.mxu1 }
 0x20b   : > { %v1240_v39 = vadd.f32 %v1239_v29, %v8759_v37  ;;  %v1409_v42 = vadd.f32 %v1408_v50, %v8776_v60  ;;  %v785_v27 = vpop.permute.xlu1 %784  ;;  %v788_v29 = vpop.permute.xlu2 %787 }
 0x20c   : > { %v1628_v32 = vmax.f32 %v1496_v55, 0.0  ;;  %v8978_v8 = vpop.f32.mrf.mxu2  ;;  %vm891_vm13 = vcmp.eq.s32.totalorder %v785_v27, %v8621_v35  ;;  %vm892_vm0 = vcmp.eq.s32.totalorder %v788_v29, %v8621_v35 }
 0x20d   : > { %7024 = vmatmul.msk.bf16.gmra.mxu0 %vm7023_vm8, %v8362_v45  ;;  %7088 = vmatmul.msk.bf16.gmra.mxu1 %vm7023_vm8, %v8362_v45  ;;  %v1557_v53 = vmax.f32 %v1240_v39, 0.0  ;;  %v1558_v54 = vmax.f32 %v1409_v42, 0.0  ;;  %v7253_v39 = vld [vmem:[#allocation8 + $0x58] sm:$0xf0]  ;;  %vm7027_vm9 = vmpackc.low %vm892_vm0, %vm891_vm13 }
 0x20e   : > { %1990 = vmatmul.bf16.gmra.mxu3 %v8851_v43  ;;  %v8964_v34 = vpack.c.bf16 %v1628_v32, %v1626_v30  ;;  %v7256_v42 = vor.u32 %v7712_v33, %v7253_v39 }
 0x210   : > { %3197 = vmatpush.bf16.msrb.mxu2 %v7256_v42 }
 0x211   : > { %v1498_v44 = vpop.f32.mrf.mxu3 }
 0x212   : > { %v1241_v46 = vpop.f32.mrf.mxu0  ;;  %v1410_v48 = vpop.f32.mrf.mxu1  ;;  %v1499_v1 = vadd.f32 %v1498_v44, %v8776_v60 }
 0x213   : > { %v1242_v49 = vadd.f32 %v1241_v46, %v8759_v37  ;;  %v1411_v52 = vadd.f32 %v1410_v48, %v8776_v60  ;;  %v7251_v48 = vld [vmem:[#allocation8 + $0x50] sm:$0xf]  ;;  %v797_v33 = vpop.permute.xlu2 %796 }
 0x214   : > { %v1630_v9 = vmax.f32 %v1499_v1, 0.0  ;;  %v8987_v21 = vpop.f32.mrf.mxu2  ;;  %vm895_vm4 = vcmp.eq.s32.totalorder %v797_v33, %v8621_v35 }
 0x215   : > { %v1559_v43 = vmax.f32 %v1242_v49, 0.0  ;;  %v1560_v47 = vmax.f32 %v1411_v52, 0.0  ;;  %v7713_v49 = vld [vmem:[#allocation8 + $0x54] sm:$0xf0] }
 0x216   : > { %v7252_v52 = vor.u32 %v7713_v49, %v7251_v48 }
 0x217   : > { %v1663_v63 = vpack.c.bf16 %v1559_v43, %v1557_v53  ;;  %v8972_v56 = vpack.c.bf16 %v1560_v47, %v1558_v54 }
 0x218   : > { %3028 = vmatpush.bf16.msrb.mxu1 %v7252_v52 }
 0x219   : > { %v1500_v24 = vpop.f32.mrf.mxu3  ;;  %1900 = vmatmul.bf16.gmra.mxu2 %v1663_v63 }
 0x21a   : > { %v1501_v17 = vadd.f32 %v1500_v24, %v8776_v60  ;;  %v1244_v6 = vpop.f32.mrf.mxu0  ;;  %v791_v24 = vpop.permute.xlu0 %790 }
 0x21b   : > { %v1245_v16 = vadd.f32 %v1244_v6, %v8759_v37  ;;  %vm893_vm2 = vcmp.eq.s32.totalorder %v791_v24, %v8621_v35  ;;  %v7243_v24 = vld [vmem:[#allocation8 + $0x40] sm:$0xf] }
 0x21c   : > { %v1632_v10 = vmax.f32 %v1501_v17, 0.0  ;;  %v8998_v54 = vpop.f32.mrf.mxu2  ;;  %v794_v17 = vpop.permute.xlu1 %793 }
 0x21d   : > { %7026 = vmatmul.msk.bf16.gmra.mxu0 %vm7025_vm15, %v8362_v45  ;;  %7090 = vmatmul.msk.bf16.gmra.mxu1 %vm7025_vm15, %v8362_v45  ;;  %v1561_v25 = vmax.f32 %v1245_v16, 0.0  ;;  %vm894_vm1 = vcmp.eq.s32.totalorder %v794_v17, %v8621_v35  ;;  %v7711_v17 = vld [vmem:[#allocation8 + $0x44] sm:$0xf0] }
 0x21e   : > { %1995 = vmatmul.bf16.gmra.mxu3 %v8868_v5  ;;  %v8983_v13 = vpack.c.bf16 %v1632_v10, %v1630_v9  ;;  %vm7029_vm7 = vmpackc.low %vm894_vm1, %vm893_vm2 }
 0x221   : > { %v1503_v15 = vpop.f32.mrf.mxu3 }
 0x222   : > { %v1246_v18 = vpop.f32.mrf.mxu0  ;;  %v1504_v50 = vadd.f32 %v1503_v15, %v8776_v60 }
 0x223   : > { %v1247_v20 = vadd.f32 %v1246_v18, %v8759_v37 }
 0x224   : > { %v1634_v44 = vmax.f32 %v1504_v50, 0.0  ;;  %v9005_v9 = vpop.f32.mrf.mxu2 }
 0x225   : > { %v1563_v26 = vmax.f32 %v1247_v20, 0.0 }
 0x227   : > { %v1665_v55 = vpack.c.bf16 %v1563_v26, %v1561_v25 }
 0x229   : > { %v1505_v5 = vpop.f32.mrf.mxu3  ;;  %1905 = vmatmul.bf16.gmra.mxu2 %v1665_v55 }
 0x22a   : > { %v1506_v30 = vadd.f32 %v1505_v5, %v8776_v60  ;;  %v1249_v32 = vpop.f32.mrf.mxu0 }
 0x22b   : > { %v1250_v43 = vadd.f32 %v1249_v32, %v8759_v37 }
 0x22c   : > { %v1636_v46 = vmax.f32 %v1506_v30, 0.0  ;;  %v9016_v55 = vpop.f32.mrf.mxu2  ;;  %v800_v30 = vpop.permute.xlu0 %799 }
 0x22d   : > { %7028 = vmatmul.msk.bf16.gmra.mxu0 %vm7027_vm9, %v8362_v45  ;;  %7092 = vmatmul.msk.bf16.gmra.mxu1 %vm7027_vm9, %v8362_v45  ;;  %v1565_v62 = vmax.f32 %v1250_v43, 0.0  ;;  %vm896_vm3 = vcmp.eq.s32.totalorder %v800_v30, %v8621_v35 }
 0x22e   : > { %2000 = vmatmul.bf16.gmra.mxu3 %v8883_v41  ;;  %v8996_v53 = vpack.c.bf16 %v1636_v46, %v1634_v44  ;;  %vm7031_vm11 = vmpackc.low %vm896_vm3, %vm895_vm4  ;;  %v7695_v44 = vld [vmem:[#allocation7 + $0x8] sm:$0xff] }
 0x22f   : > { %2345 = vmatpush.bf16.msrb.mxu0 %v7695_v44 }
 0x231   : > { %v1508_v47 = vpop.f32.mrf.mxu3 }
 0x232   : > { %v1251_v58 = vpop.f32.mrf.mxu0  ;;  %v1509_v41 = vadd.f32 %v1508_v47, %v8776_v60 }
 0x233   : > { %v1252_v63 = vadd.f32 %v1251_v58, %v8759_v37 }
 0x234   : > { %v1638_v15 = vmax.f32 %v1509_v41, 0.0  ;;  %v9023_v42 = vpop.f32.mrf.mxu2 }
 0x235   : > { %v1567_v1 = vmax.f32 %v1252_v63, 0.0 }
 0x237   : > { %v1667_v6 = vpack.c.bf16 %v1567_v1, %v1565_v62  ;;  %v7710_v62 = vld [vmem:[#allocation8 + $0x44] sm:$0xf] }
 0x239   : > { %v1510_v10 = vpop.f32.mrf.mxu3  ;;  %1910 = vmatmul.bf16.gmra.mxu2 %v1667_v6  ;;  %v7244_v6 = vor.u32 %v7711_v17, %v7243_v24 }
 0x23a   : > { %v1511_v11 = vadd.f32 %v1510_v10, %v8776_v60  ;;  %v1254_v16 = vpop.f32.mrf.mxu0 }
 0x23b   : > { %v1255_v25 = vadd.f32 %v1254_v16, %v8759_v37  ;;  %3029 = vmatpush.bf16.msrb.mxu1 %v7244_v6 }
 0x23c   : > { %v1640_v18 = vmax.f32 %v1511_v11, 0.0  ;;  %v9032_v47 = vpop.f32.mrf.mxu2 }
 0x23d   : > { %7030 = vmatmul.msk.bf16.gmra.mxu0 %vm7029_vm7, %v8362_v45  ;;  %7094 = vmatmul.msk.bf16.gmra.mxu1 %vm7029_vm7, %v8362_v45  ;;  %v1569_v50 = vmax.f32 %v1255_v25, 0.0 }
 0x23e   : > { %2014 = vmatmul.bf16.vlgmr.msrb.gmra.mxu3 %v8789_v12  ;;  %v9011_v20 = vpack.c.bf16 %v1640_v18, %v1638_v15 }
 0x241   : > { %v9014_v26 = vpop.f32.mrf.mxu3 }
 0x242   : > { %v1256_v27 = vpop.f32.mrf.mxu0 }
 0x243   : > { %v1257_v29 = vadd.f32 %v1256_v27, %v8759_v37 }
 0x244   : > { %v9037_v41 = vpop.f32.mrf.mxu2 }
 0x245   : > { %v1571_v5 = vmax.f32 %v1257_v29, 0.0 }
 0x247   : > { %v1669_v32 = vpack.c.bf16 %v1571_v5, %v1569_v50 }
 0x249   : > { %v9020_v39 = vpop.f32.mrf.mxu3  ;;  %1915 = vmatmul.bf16.gmra.mxu2 %v1669_v32 }
 0x24a   : > { %v1259_v12 = vpop.f32.mrf.mxu0 }
 0x24b   : > { %v1260_v46 = vadd.f32 %v1259_v12, %v8759_v37 }
 0x24c   : > { %v9045_v5 = vpop.f32.mrf.mxu2 }
 0x24d   : > { %7032 = vmatmul.msk.bf16.gmra.mxu0 %vm7031_vm11, %v8362_v45  ;;  %7096 = vmatmul.msk.bf16.gmra.mxu1 %vm7031_vm11, %v8362_v45  ;;  %v1573_v43 = vmax.f32 %v1260_v46, 0.0 }
 0x24e   : > { %2019 = vmatmul.bf16.gmra.mxu3 %v8806_v40  ;;  %v7245_v40 = vld [vmem:[#allocation8 + $0x48] sm:$0xf0] }
 0x24f   : > { %v7248_v1 = vor.u32 %v7710_v62, %v7245_v40 }
 0x251   : > { %v9029_v48 = vpop.f32.mrf.mxu3  ;;  %3198 = vmatpush.bf16.msrb.mxu2 %v7248_v1 }
 0x252   : > { %v1261_v49 = vpop.f32.mrf.mxu0 }
 0x253   : > { %v1262_v52 = vadd.f32 %v1261_v49, %v8759_v37 }
 0x254   : > { %v9052_v12 = vpop.f32.mrf.mxu2 }
 0x255   : > { %v1575_v35 = vmax.f32 %v1262_v52, 0.0 }
 0x257   : > { %v1671_v58 = vpack.c.bf16 %v1575_v35, %v1573_v43  ;;  %v7694_v35 = vld [vmem:[#allocation7] sm:$0xff] }
 0x258   : > { %2346 = vmatpush.bf16.msrb.mxu0 %v7694_v35 }
 0x259   : > { %v9034_v63 = vpop.f32.mrf.mxu3  ;;  %1920 = vmatmul.bf16.gmra.mxu2 %v1671_v58 }
 0x25a   : > { %v1264_v45 = vpop.f32.mrf.mxu0 }
 0x25b   : > { %v1265_v10 = vadd.f32 %v1264_v45, %v8759_v37 }
 0x25d   : > { %v1577_v18 = vmax.f32 %v1265_v10, 0.0 }
 0x25e   : > { %2024 = vmatmul.bf16.gmra.mxu3 %v8823_v3 }
 0x261   : > { %v9040_v11 = vpop.f32.mrf.mxu3 }
 0x262   : > { %v1266_v16 = vpop.f32.mrf.mxu0 }
 0x263   : > { %v1267_v15 = vadd.f32 %v1266_v16, %v8759_v37  ;;  %v7708_v16 = vld [vmem:[#allocation8 + $0x34] sm:$0xf] }
 0x265   : > { %v1579_v25 = vmax.f32 %v1267_v15, 0.0  ;;  %v7237_v15 = vld [vmem:[#allocation8 + $0x38] sm:$0xf0] }
 0x267   : > { %v1673_v27 = vpack.c.bf16 %v1579_v25, %v1577_v18  ;;  %v7240_v18 = vor.u32 %v7708_v16, %v7237_v15  ;;  %v7235_v25 = vld [vmem:[#allocation8 + $0x30] sm:$0xf] }
 0x269   : > { %v9043_v29 = vpop.f32.mrf.mxu3  ;;  %1925 = vmatmul.bf16.gmra.mxu2 %v1673_v27  ;;  %v7709_v27 = vld [vmem:[#allocation8 + $0x34] sm:$0xf0] }
 0x26a   : > { %v1269_v50 = vpop.f32.mrf.mxu0  ;;  %3199 = vmatpush.bf16.msrb.mxu2 %v7240_v18 }
 0x26b   : > { %v1270_v3 = vadd.f32 %v1269_v50, %v8759_v37  ;;  %v7236_v50 = vor.u32 %v7709_v27, %v7235_v25 }
 0x26d   : > { %v1581_v44 = vmax.f32 %v1270_v3, 0.0  ;;  %3030 = vmatpush.bf16.msrb.mxu1 %v7236_v50 }
 0x26e   : > { %2029 = vmatmul.bf16.gmra.mxu3 %v8840_v31  ;;  %v9057_v31 = vpop.f32.mrf.mxu2 }
 0x271   : > { %v9049_v30 = vpop.f32.mrf.mxu3 }
 0x272   : > { %v1271_v32 = vpop.f32.mrf.mxu0 }
 0x273   : > { %v1272_v33 = vadd.f32 %v1271_v32, %v8759_v37 }
 0x275   : > { %v1583_v46 = vmax.f32 %v1272_v33, 0.0 }
 0x276   : > { %v9063_v6 = vpop.f32.mrf.mxu2 }
 0x277   : > { %v1675_v49 = vpack.c.bf16 %v1583_v46, %v1581_v44 }
 0x279   : > { %v9054_v52 = vpop.f32.mrf.mxu3  ;;  %1930 = vmatmul.bf16.gmra.mxu2 %v1675_v49 }
 0x27a   : > { %v1274_v43 = vpop.f32.mrf.mxu0 }
 0x27b   : > { %v1275_v58 = vadd.f32 %v1274_v43, %v8759_v37 }
 0x27d   : > { %v1585_v1 = vmax.f32 %v1275_v58, 0.0 }
 0x27e   : > { %2034 = vmatmul.bf16.gmra.mxu3 %v8857_v0  ;;  %v9071_v44 = vpop.f32.mrf.mxu2 }
 0x281   : > { %v9060_v45 = vpop.f32.mrf.mxu3 }
 0x282   : > { %v1276_v62 = vpop.f32.mrf.mxu0 }
 0x283   : > { %v1277_v40 = vadd.f32 %v1276_v62, %v8759_v37 }
 0x285   : > { %v1587_v24 = vmax.f32 %v1277_v40, 0.0 }
 0x286   : > { %v9076_v40 = vpop.f32.mrf.mxu2 }
 0x287   : > { %v1677_v17 = vpack.c.bf16 %v1587_v24, %v1585_v1 }
 0x289   : > { %v9065_v10 = vpop.f32.mrf.mxu3  ;;  %1935 = vmatmul.bf16.gmra.mxu2 %v1677_v17 }
 0x28a   : > { %v1279_v0 = vpop.f32.mrf.mxu0 }
 0x28b   : > { %v1280_v3 = vadd.f32 %v1279_v0, %v8759_v37 }
 0x28d   : > { %v1589_v49 = vmax.f32 %v1280_v3, 0.0 }
 0x28e   : > { %2039 = vmatmul.bf16.gmra.mxu3 %v8874_v28  ;;  %v9083_v15 = vpop.f32.mrf.mxu2 }
 0x291   : > { %v9069_v32 = vpop.f32.mrf.mxu3 }
 0x292   : > { %11734 = vst [vmem:[#allocation27_spill] sm:$0xff] %v9069_v32  ;;  %v1281_v33 = vpop.f32.mrf.mxu0 }
 0x293   : > { %v1282_v46 = vadd.f32 %v1281_v33, %v8759_v37 }
 0x295   : > { %v1591_v43 = vmax.f32 %v1282_v46, 0.0 }
 0x296   : > { %v9088_v50 = vpop.f32.mrf.mxu2 }
 0x297   : > { %v1679_v35 = vpack.c.bf16 %v1591_v43, %v1589_v49 }
 0x299   : > { %v9074_v58 = vpop.f32.mrf.mxu3  ;;  %1940 = vmatmul.bf16.gmra.mxu2 %v1679_v35 }
 0x29a   : > { %11735 = vst [vmem:[#allocation28_spill] sm:$0xff] %v9074_v58  ;;  %v1284_v62 = vpop.f32.mrf.mxu0 }
 0x29b   : > { %v1285_v28 = vadd.f32 %v1284_v62, %v8759_v37 }
 0x29d   : > { %v1593_v0 = vmax.f32 %v1285_v28, 0.0  ;;  %v9096_v28 = vpop.f32.mrf.mxu1 }
 0x29e   : > { %2044 = vmatmul.bf16.gmra.mxu3 %v8889_v59 }
 0x2a1   : > { %v9080_v1 = vpop.f32.mrf.mxu3 }
 0x2a2   : > { %11736 = vst [vmem:[#allocation29_spill] sm:$0xff] %v9080_v1  ;;  %v1286_v24 = vpop.f32.mrf.mxu0 }
 0x2a3   : > { %v1287_v17 = vadd.f32 %v1286_v24, %v8759_v37 }
 0x2a5   : > { %v1595_v16 = vmax.f32 %v1287_v17, 0.0  ;;  %v9098_v17 = vpop.f32.mrf.mxu2 }
 0x2a7   : > { %v1681_v18 = vpack.c.bf16 %v1595_v16, %v1593_v0  ;;  %v7229_v0 = vld [vmem:[#allocation8 + $0x28] sm:$0xf0] }
 0x2a9   : > { %v9085_v25 = vpop.f32.mrf.mxu3  ;;  %1945 = vmatmul.bf16.gmra.mxu2 %v1681_v18  ;;  %v7227_v18 = vld [vmem:[#allocation8 + $0x20] sm:$0xf] }
 0x2aa   : > { %11737 = vst [vmem:[#allocation30_spill] sm:$0xff] %v9085_v25  ;;  %v1289_v27 = vpop.f32.mrf.mxu0 }
 0x2ab   : > { %v1290_v59 = vadd.f32 %v1289_v27, %v8759_v37  ;;  %v7707_v27 = vld [vmem:[#allocation8 + $0x24] sm:$0xf0] }
 0x2ad   : > { %v1597_v49 = vmax.f32 %v1290_v59, 0.0 }
 0x2ae   : > { %2049 = vmatmul.bf16.gmra.mxu3 %v8904_v36  ;;  %v7706_v36 = vld [vmem:[#allocation8 + $0x24] sm:$0xf] }
 0x2af   : > { %v7232_v16 = vor.u32 %v7706_v36, %v7229_v0  ;;  %v9108_v36 = vpop.f32.mrf.mxu2 }
 0x2b1   : > { %v9091_v3 = vpop.f32.mrf.mxu3  ;;  %3200 = vmatpush.bf16.msrb.mxu2 %v7232_v16 }
 0x2b2   : > { %11738 = vst [vmem:[#allocation31_spill] sm:$0xff] %v9091_v3  ;;  %v1291_v33 = vpop.f32.mrf.mxu0  ;;  %v7228_v3 = vor.u32 %v7707_v27, %v7227_v18 }
 0x2b3   : > { %v1292_v46 = vadd.f32 %v1291_v33, %v8759_v37 }
 0x2b4   : > { %3031 = vmatpush.bf16.msrb.mxu1 %v7228_v3 }
 0x2b5   : > { %v1599_v43 = vmax.f32 %v1292_v46, 0.0  ;;  %v9105_v46 = vld [vmem:[%s11555_s5] ss:$0 sm:$0xff] }
 0x2b7   : > { %v1683_v35 = vpack.c.bf16 %v1599_v43, %v1597_v49 }
 0x2b9   : > { %v9094_v62 = vpop.f32.mrf.mxu3  ;;  %1950 = vmatmul.bf16.gmra.mxu2 %v1683_v35  ;;  %v1415_v35 = vpop.f32.mrf.mxu1 }
 0x2ba   : > { %11739 = vst [vmem:[#allocation32_spill] sm:$0xff] %v9094_v62  ;;  %v1294_v24 = vpop.f32.mrf.mxu0 }
 0x2bb   : > { %v1295_v59 = vadd.f32 %v1294_v24, %v8759_v37  ;;  %v1849_v24 = vadd.f32 %v9105_v46, %v8942_v57 }
 0x2bd   : > { %v1601_v0 = vmax.f32 %v1295_v59, 0.0  ;;  %v9117_v59 = vpop.f32.mrf.mxu2 }
 0x2be   : > { %2054 = vmatmul.bf16.gmra.mxu3 %v8919_v4  ;;  %v1847_v4 = vadd.f32 %v9105_v46, %v8932_v61 }
 0x2c1   : > { %v2015_v33 = vpop.f32.mrf.mxu3 }
 0x2c2   : > { %v1296_v49 = vpop.f32.mrf.mxu0  ;;  %v2016_v16 = vadd.f32 %v2015_v33, %v1847_v4  ;;  %v1852_v4 = vadd.f32 %v9105_v46, %v8953_v23  ;;  %v1857_v23 = vadd.f32 %v9105_v46, %v8978_v8 }
 0x2c3   : > { %v1297_v43 = vadd.f32 %v1296_v49, %v8759_v37  ;;  %v9114_v49 = vpop.f32.mrf.mxu1 }
 0x2c4   : > { %v2175_v1 = vmax.f32 %v2016_v16, 0.0 }
 0x2c5   : > { %v1603_v62 = vmax.f32 %v1297_v43, 0.0 }
 0x2c7   : > { %v1685_v3 = vpack.c.bf16 %v1603_v62, %v1601_v0 }
 0x2c9   : > { %v2017_v18 = vpop.f32.mrf.mxu3  ;;  %1955 = vmatmul.bf16.gmra.mxu2 %v1685_v3 }
 0x2ca   : > { %v2018_v27 = vadd.f32 %v2017_v18, %v1849_v24  ;;  %v1299_v25 = vpop.f32.mrf.mxu0  ;;  %v9125_v24 = vpop.f32.mrf.mxu2 }
 0x2cb   : > { %v1300_v61 = vadd.f32 %v1299_v25, %v8759_v37 }
 0x2cc   : > { %v2176_v58 = vmax.f32 %v2018_v27, 0.0 }
 0x2cd   : > { %v1605_v33 = vmax.f32 %v1300_v61, 0.0 }
 0x2ce   : > { %v2239_v32 = vpack.c.bf16 %v2176_v58, %v2175_v1  ;;  %2059 = vmatmul.bf16.gmra.mxu3 %v8936_v14  ;;  %v1854_v58 = vadd.f32 %v9105_v46, %v8966_v38  ;;  %v1420_v1 = vpop.f32.mrf.mxu1  ;;  %v1859_v38 = vadd.f32 %v9105_v46, %v8987_v21  ;;  %v1416_v21 = vadd.f32 %v1415_v35, %v8776_v60 }
 0x2d0   : > { %2347 = vmatmul.bf16.vlgmr.msrb.gmra.mxu0 %v2239_v32 }
 0x2d1   : > { %v2020_v62 = vpop.f32.mrf.mxu3 }
 0x2d2   : > { %v1301_v43 = vpop.f32.mrf.mxu0  ;;  %v2021_v14 = vadd.f32 %v2020_v62, %v1852_v4  ;;  %v9142_v35 = vpop.f32.mrf.mxu2 }
 0x2d3   : > { %v1302_v57 = vadd.f32 %v1301_v43, %v8759_v37 }
 0x2d4   : > { %v2177_v16 = vmax.f32 %v2021_v14, 0.0 }
 0x2d5   : > { %v1607_v0 = vmax.f32 %v1302_v57, 0.0 }
 0x2d6   : > { %v1423_v61 = vpop.f32.mrf.mxu1 }
 0x2d7   : > { %v1687_v3 = vpack.c.bf16 %v1607_v0, %v1605_v33 }
 0x2d9   : > { %v2022_v32 = vpop.f32.mrf.mxu3  ;;  %1960 = vmatmul.bf16.gmra.mxu2 %v1687_v3  ;;  %v7704_v3 = vld [vmem:[#allocation8 + $0x14] sm:$0xf] }
 0x2da   : > { %v2023_v25 = vadd.f32 %v2022_v32, %v1854_v58  ;;  %v7221_v58 = vld [vmem:[#allocation8 + $0x18] sm:$0xf0]  ;;  %v7705_v32 = vld [vmem:[#allocation8 + $0x14] sm:$0xf0] }
 0x2db   : > { %v7224_v14 = vor.u32 %v7704_v3, %v7221_v58 }
 0x2dc   : > { %v2178_v18 = vmax.f32 %v2023_v25, 0.0 }
 0x2dd   : > { %3201 = vmatpush.bf16.msrb.mxu2 %v7224_v14  ;;  %v1421_v14 = vadd.f32 %v1420_v1, %v8776_v60 }
 0x2de   : > { %2064 = vmatmul.bf16.gmra.mxu3 %v8955_v7  ;;  %v2240_v37 = vpack.c.bf16 %v2178_v18, %v2177_v16  ;;  %v1425_v33 = vpop.f32.mrf.mxu1  ;;  %v7219_v7 = vld [vmem:[#allocation8 + $0x10] sm:$0xf]  ;;  %v1414_v18 = vadd.f32 %v9096_v28, %v8776_v60 }
 0x2df   : > { %v7220_v16 = vor.u32 %v7705_v32, %v7219_v7  ;;  %v1419_v7 = vadd.f32 %v9114_v49, %v8776_v60  ;;  %v1568_v32 = vmax.f32 %v1421_v14, 0.0 }
 0x2e0   : > { %2352 = vmatmul.bf16.gmra.mxu0 %v2240_v37  ;;  %v1862_v37 = vadd.f32 %v9105_v46, %v8998_v54 }
 0x2e1   : > { %v2025_v27 = vpop.f32.mrf.mxu3  ;;  %3032 = vmatpush.bf16.msrb.mxu1 %v7220_v16  ;;  %v9151_v16 = vpop.f32.mrf.mxu2 }
 0x2e2   : > { %v2026_v62 = vadd.f32 %v2025_v27, %v1857_v23  ;;  %v1564_v23 = vmax.f32 %v1416_v21, 0.0 }
 0x2e4   : > { %v2179_v0 = vmax.f32 %v2026_v62, 0.0 }
 0x2e6   : > { %v9138_v27 = vpop.f32.mrf.mxu1 }
 0x2e9   : > { %v2027_v43 = vpop.f32.mrf.mxu3 }
 0x2ea   : > { %v2028_v57 = vadd.f32 %v2027_v43, %v1859_v38  ;;  %v1562_v43 = vmax.f32 %v1414_v18, 0.0  ;;  %v1566_v18 = vmax.f32 %v1419_v7, 0.0 }
 0x2ec   : > { %v2180_v4 = vmax.f32 %v2028_v57, 0.0  ;;  %v1666_v3 = vpack.c.bf16 %v1564_v23, %v1562_v43  ;;  %v1668_v1 = vpack.c.bf16 %v1568_v32, %v1566_v18  ;;  %v9153_v43 = vpop.f32.mrf.mxu2 }
 0x2ee   : > { %2069 = vmatmul.bf16.gmra.mxu3 %v8972_v56  ;;  %v2241_v25 = vpack.c.bf16 %v2180_v4, %v2179_v0  ;;  %v1864_v56 = vadd.f32 %v9105_v46, %v9005_v9  ;;  %v1430_v58 = vpop.f32.mrf.mxu1  ;;  %v1867_v9 = vadd.f32 %v9105_v46, %v9016_v55  ;;  %v1426_v55 = vadd.f32 %v1425_v33, %v8776_v60  ;;  %v7702_v33 = vld [vmem:[#allocation8 + $0x4] sm:$0xf] }
 0x2f0   : > { %2357 = vmatmul.bf16.gmra.mxu0 %v2241_v25  ;;  %v1869_v25 = vadd.f32 %v9105_v46, %v9023_v42  ;;  %v1424_v42 = vadd.f32 %v1423_v61, %v8776_v60  ;;  %v7211_v61 = vld [vmem:[#allocation8] sm:$0xf] }
 0x2f1   : > { %v2030_v8 = vpop.f32.mrf.mxu3 }
 0x2f2   : > { %v2031_v38 = vadd.f32 %v2030_v8, %v1862_v37  ;;  %v1570_v14 = vmax.f32 %v1424_v42, 0.0 }
 0x2f4   : > { %v2181_v0 = vmax.f32 %v2031_v38, 0.0 }
 0x2f6   : > { %v1433_v37 = vpop.f32.mrf.mxu1 }
 0x2f9   : > { %v2032_v62 = vpop.f32.mrf.mxu3 }
 0x2fa   : > { %v2033_v57 = vadd.f32 %v2032_v62, %v1864_v56 }
 0x2fc   : > { %v2182_v4 = vmax.f32 %v2033_v57, 0.0 }
 0x2fe   : > { %2074 = vmatmul.bf16.gmra.mxu3 %v1666_v3  ;;  %v2242_v28 = vpack.c.bf16 %v2182_v4, %v2181_v0  ;;  %v1435_v57 = vpop.f32.mrf.mxu1  ;;  %v1872_v0 = vadd.f32 %v9105_v46, %v9032_v47  ;;  %v1572_v4 = vmax.f32 %v1426_v55, 0.0  ;;  %v1874_v3 = vadd.f32 %v9105_v46, %v9037_v41 }
 0x300   : > { %2362 = vmatmul.bf16.gmra.mxu0 %v2242_v28 }
 0x301   : > { %v2035_v54 = vpop.f32.mrf.mxu3 }
 0x302   : > { %v2036_v8 = vadd.f32 %v2035_v54, %v1867_v9  ;;  %v9161_v9 = vpop.f32.mrf.mxu2 }
 0x304   : > { %v2183_v56 = vmax.f32 %v2036_v8, 0.0  ;;  %v1670_v8 = vpack.c.bf16 %v1572_v4, %v1570_v14 }
 0x309   : > { %v2037_v21 = vpop.f32.mrf.mxu3 }
 0x30a   : > { %v2038_v23 = vadd.f32 %v2037_v21, %v1869_v25  ;;  %v7213_v21 = vld [vmem:[#allocation8 + $0x8] sm:$0xf0]  ;;  %v9168_v55 = vpop.f32.mrf.mxu2 }
 0x30b   : > { %v7216_v18 = vor.u32 %v7702_v33, %v7213_v21  ;;  %v1436_v33 = vadd.f32 %v1435_v57, %v8776_v60  ;;  %v1434_v21 = vadd.f32 %v1433_v37, %v8776_v60 }
 0x30c   : > { %v2184_v38 = vmax.f32 %v2038_v23, 0.0  ;;  %v7703_v23 = vld [vmem:[#allocation8 + $0x4] sm:$0xf0] }
 0x30d   : > { %3202 = vmatpush.bf16.msrb.mxu2 %v7216_v18  ;;  %v1580_v18 = vmax.f32 %v1436_v33, 0.0 }
 0x30e   : > { %2079 = vmatmul.bf16.gmra.mxu3 %v1668_v1  ;;  %v2243_v62 = vpack.c.bf16 %v2184_v38, %v2183_v56  ;;  %v1438_v56 = vpop.f32.mrf.mxu1  ;;  %v7212_v38 = vor.u32 %v7703_v23, %v7211_v61  ;;  %v1431_v1 = vadd.f32 %v1430_v58, %v8776_v60  ;;  %v1884_v61 = vadd.f32 %v9105_v46, %v9063_v6 }
 0x30f   : > { %v1439_v6 = vadd.f32 %v1438_v56, %v8776_v60 }
 0x310   : > { %2367 = vmatmul.bf16.gmra.mxu0 %v2243_v62  ;;  %3033 = vmatpush.bf16.msrb.mxu1 %v7212_v38  ;;  %v1429_v62 = vadd.f32 %v9138_v27, %v8776_v60  ;;  %v1576_v42 = vmax.f32 %v1431_v1, 0.0  ;;  %v1578_v38 = vmax.f32 %v1434_v21, 0.0 }
 0x311   : > { %v2040_v49 = vpop.f32.mrf.mxu3 }
 0x312   : > { %v2041_v28 = vadd.f32 %v2040_v49, %v1872_v0  ;;  %v1877_v49 = vadd.f32 %v9105_v46, %v9045_v5  ;;  %v1879_v0 = vadd.f32 %v9105_v46, %v9052_v12  ;;  %v9172_v27 = vpop.f32.mrf.mxu2  ;;  %v1882_v12 = vadd.f32 %v9105_v46, %v9057_v31 }
 0x314   : > { %v2185_v32 = vmax.f32 %v2041_v28, 0.0 }
 0x316   : > { %v1440_v4 = vpop.f32.mrf.mxu1 }
 0x317   : > { %v1441_v31 = vadd.f32 %v1440_v4, %v8776_v60  ;;  %v9195_v4 = vld [vmem:[%s11557_s7] ss:$0 sm:$0xff] }
 0x319   : > { %v2042_v54 = vpop.f32.mrf.mxu3 }
 0x31a   : > { %v2043_v7 = vadd.f32 %v2042_v54, %v1874_v3  ;;  %v1574_v54 = vmax.f32 %v1429_v62, 0.0 }
 0x31c   : > { %v2186_v25 = vmax.f32 %v2043_v7, 0.0  ;;  %v1672_v58 = vpack.c.bf16 %v1576_v42, %v1574_v54 }
 0x31e   : > { %2084 = vmatmul.bf16.gmra.mxu3 %v1670_v8  ;;  %v2244_v47 = vpack.c.bf16 %v2186_v25, %v2185_v32  ;;  %v1443_v8 = vpop.f32.mrf.mxu1 }
 0x320   : > { %2372 = vmatmul.bf16.gmra.mxu0 %v2244_v47 }
 0x321   : > { %v2045_v41 = vpop.f32.mrf.mxu3 }
 0x322   : > { %v2046_v3 = vadd.f32 %v2045_v41, %v1877_v49  ;;  %v9180_v41 = vpop.f32.mrf.mxu2 }
 0x324   : > { %v2187_v7 = vmax.f32 %v2046_v3, 0.0 }
 0x326   : > { %v1445_v62 = vpop.f32.mrf.mxu1 }
 0x329   : > { %v2047_v28 = vpop.f32.mrf.mxu3 }
 0x32a   : > { %v2048_v14 = vadd.f32 %v2047_v28, %v1879_v0  ;;  %v1674_v0 = vpack.c.bf16 %v1580_v18, %v1578_v38  ;;  %v9183_v3 = vpop.f32.mrf.mxu2  ;;  %v1887_v28 = vadd.f32 %v9105_v46, %v9071_v44  ;;  %v7387_v44 = vld [vmem:[#allocation10 + $0xe0] sm:$0xf]  ;;  %v7748_v18 = vld [vmem:[#allocation10 + $0xec] sm:$0xf0] }
 0x32c   : > { %v2188_v32 = vmax.f32 %v2048_v14, 0.0  ;;  %v1584_v14 = vmax.f32 %v1441_v31, 0.0  ;;  %v7517_v31 = vld [vmem:[#allocation10 + $0x1f0] sm:$0xf0] }
 0x32e   : > { %2089 = vmatmul.bf16.gmra.mxu3 %v1672_v58  ;;  %v2245_v25 = vpack.c.bf16 %v2188_v32, %v2187_v7  ;;  %v9188_v54 = vpop.f32.mrf.mxu1  ;;  %v1889_v7 = vadd.f32 %v9105_v46, %v9076_v40 }
 0x330   : > { %2377 = vmatmul.bf16.gmra.mxu0 %v2245_v25  ;;  %v1582_v25 = vmax.f32 %v1439_v6, 0.0  ;;  %v7515_v6 = vld [vmem:[#allocation10 + $0x1e0] sm:$0xf] }
 0x331   : > { %v2050_v5 = vpop.f32.mrf.mxu3 }
 0x332   : > { %v2051_v23 = vadd.f32 %v2050_v5, %v1882_v12  ;;  %v1676_v21 = vpack.c.bf16 %v1584_v14, %v1582_v25  ;;  %v1892_v14 = vadd.f32 %v9105_v46, %v9083_v15 }
 0x334   : > { %v2189_v49 = vmax.f32 %v2051_v23, 0.0 }
 0x336   : > { %v1450_v38 = vpop.f32.mrf.mxu1 }
 0x339   : > { %v2052_v47 = vpop.f32.mrf.mxu3 }
 0x33a   : > { %v2053_v1 = vadd.f32 %v2052_v47, %v1884_v61  ;;  %v9197_v61 = vpop.f32.mrf.mxu2  ;;  %v7388_v47 = vor.u32 %v7748_v18, %v7387_v44 }
 0x33c   : > { %v2190_v42 = vmax.f32 %v2053_v1, 0.0  ;;  %3950 = vmatpush.bf16.msra.mxu3 %v7388_v47 }
 0x33e   : > { %2094 = vmatmul.bf16.gmra.mxu3 %v1674_v0  ;;  %v2246_v57 = vpack.c.bf16 %v2190_v42, %v2189_v49  ;;  %v1446_v42 = vadd.f32 %v1445_v62, %v8776_v60  ;;  %v1894_v62 = vadd.f32 %v9105_v46, %v9088_v50  ;;  %v9209_v15 = vpop.f32.mrf.mxu1 }
 0x340   : > { %2382 = vmatmul.bf16.gmra.mxu0 %v2246_v57  ;;  %v1588_v25 = vmax.f32 %v1446_v42, 0.0  ;;  %v7389_v42 = vld [vmem:[#allocation10 + $0xf0] sm:$0xf0] }
 0x341   : > { %v2055_v37 = vpop.f32.mrf.mxu3 }
 0x342   : > { %v2056_v32 = vadd.f32 %v2055_v37, %v1887_v28  ;;  %v7778_v37 = vld [vmem:[#allocation10 + $0x1e4] sm:$0xf]  ;;  %v1444_v28 = vadd.f32 %v1443_v8, %v8776_v60 }
 0x344   : > { %v2191_v33 = vmax.f32 %v2056_v32, 0.0  ;;  %v7520_v32 = vor.u32 %v7778_v37, %v7517_v31 }
 0x346   : > { %4457 = vmatpush.bf16.msra.mxu2 %v7520_v32 }
 0x349   : > { %v2057_v58 = vpop.f32.mrf.mxu3 }
 0x34a   : > { %v2058_v5 = vadd.f32 %v2057_v58, %v1889_v7  ;;  %v7780_v58 = vld [vmem:[#allocation10 + $0x1ec] sm:$0xf0] }
 0x34c   : > { %v2192_v56 = vmax.f32 %v2058_v5, 0.0  ;;  %v7516_v5 = vor.u32 %v7780_v58, %v7515_v6 }
 0x34d   : > { %v2348_v12 = vpop.f32.mrf.mxu0 }
 0x34e   : > { %v2349_v23 = vadd.f32 %v9195_v4, %v2348_v12  ;;  %2099 = vmatmul.bf16.gmra.mxu3 %v1676_v21  ;;  %v2247_v40 = vpack.c.bf16 %v2192_v56, %v2191_v33  ;;  %v9207_v33 = vpop.f32.mrf.mxu2  ;;  %4119 = vmatpush.bf16.msra.mxu0 %v7516_v5  ;;  %v1586_v12 = vmax.f32 %v1444_v28, 0.0  ;;  %v2701_v28 = vld [vmem:[%s9216_s16 + $0x8] sm:$0xff] }
 0x350   : > { %v2508_v1 = vmul.f32 0.5, %v2349_v23  ;;  %2387 = vmatmul.bf16.gmra.mxu0 %v2247_v40  ;;  %v1678_v47 = vpack.c.bf16 %v1588_v25, %v1586_v12  ;;  %v1451_v25 = vadd.f32 %v1450_v38, %v8776_v60 }
 0x351   : > { %v2060_v49 = vpop.f32.mrf.mxu3 }
 0x352   : > { %v2572_v0 = vmul.f32 1.442695, %v2508_v1  ;;  %v2061_v56 = vadd.f32 %v2060_v49, %v1892_v14  ;;  %v7746_v49 = vld [vmem:[#allocation10 + $0xe4] sm:$0xf] }
 0x353   : > { %v7392_v6 = vor.u32 %v7746_v49, %v7389_v42  ;;  %v1899_v42 = vadd.f32 %v9105_v46, %v9108_v36 }
 0x354   : > { %7955 = vpow2.f32 %v2572_v0  ;;  %v2193_v50 = vmax.f32 %v2061_v56, 0.0 }
 0x355   : > { %v2350_v57 = vpop.f32.mrf.mxu0  ;;  %4288 = vmatpush.bf16.msra.mxu1 %v7392_v6 }
 0x356   : > { %v2351_v7 = vadd.f32 %v9195_v4, %v2350_v57  ;;  %v2700_v57 = vld [vmem:[%s9216_s16] sm:$0xff] }
 0x358   : > { %v2509_v21 = vmul.f32 0.5, %v2351_v7 }
 0x359   : > { %v2062_v8 = vpop.f32.mrf.mxu3 }
 0x35a   : > { %v2574_v44 = vmul.f32 1.442695, %v2509_v21  ;;  %v2063_v18 = vadd.f32 %v2062_v8, %v1894_v62  ;;  %v7956_v0 = vpop.eup %7955  ;;  %v9221_v62 = vpop.f32.mrf.mxu2 }
 0x35b   : > { %v2764_v32 = vmul.f32 %v7956_v0, %v2700_v57  ;;  %v1455_v21 = vpop.f32.mrf.mxu1 }
 0x35c   : > { %7957 = vpow2.f32 %v2574_v44  ;;  %v2194_v40 = vmax.f32 %v2063_v18, 0.0 }
 0x35d   : > { %v2353_v1 = vpop.f32.mrf.mxu0  ;;  %v2828_v12 = vadd.f32 %v2764_v32, %v2349_v23 }
 0x35e   : > { %v2354_v37 = vadd.f32 %v9195_v4, %v2353_v1  ;;  %2104 = vmatmul.bf16.gmra.mxu3 %v1678_v47  ;;  %v2248_v31 = vpack.c.bf16 %v2194_v40, %v2193_v50  ;;  %v1449_v50 = vadd.f32 %v9188_v54, %v8776_v60  ;;  %v1897_v40 = vadd.f32 %v9105_v46, %v9098_v17 }
 0x35f   : > { %v1592_v1 = vmax.f32 %v1451_v25, 0.0 }
 0x360   : > { %v2510_v14 = vmul.f32 0.5, %v2354_v37  ;;  %2392 = vmatmul.bf16.gmra.mxu0 %v2248_v31 }
 0x361   : > { %v2065_v58 = vpop.f32.mrf.mxu3 }
 0x362   : > { %v7958_v5 = vpop.eup %7957  ;;  %v2576_v8 = vmul.f32 1.442695, %v2510_v14  ;;  %v2066_v38 = vadd.f32 %v2065_v58, %v1897_v40  ;;  %v9231_v31 = vpop.f32.mrf.mxu2 }
 0x363   : > { %v2765_v56 = vmul.f32 %v7958_v5, %v2701_v28  ;;  %v1458_v36 = vpop.f32.mrf.mxu1  ;;  %v2702_v5 = vld [vmem:[%s9216_s16 + $0x10] sm:$0xff] }
 0x364   : > { %7959 = vpow2.f32 %v2576_v8  ;;  %v2195_v17 = vmax.f32 %v2066_v38, 0.0 }
 0x365   : > { %v2829_v44 = vadd.f32 %v2765_v56, %v2351_v7  ;;  %v2355_v18 = vpop.f32.mrf.mxu0  ;;  %v1590_v7 = vmax.f32 %v1449_v50, 0.0  ;;  %v2703_v56 = vld [vmem:[%s9216_s16 + $0x18] sm:$0xff]  ;;  %v1456_v50 = vadd.f32 %v1455_v21, %v8776_v60  ;;  %v1904_v21 = vadd.f32 %v9105_v46, %v9125_v24 }
 0x366   : > { %v2356_v47 = vadd.f32 %v9195_v4, %v2355_v18 }
 0x367   : > { %v2892_v49 = vpack.c.bf16 %v2829_v44, %v2828_v12  ;;  %v1680_v28 = vpack.c.bf16 %v1592_v1, %v1590_v7 }
 0x368   : > { %v2511_v0 = vmul.f32 0.5, %v2356_v47 }
 0x369   : > { %v2067_v23 = vpop.f32.mrf.mxu3  ;;  %3034 = vmatmul.bf16.vlgmr.msrb.gmra.mxu1 %v2892_v49  ;;  %3203 = vmatmul.bf16.vlgmr.msrb.gmra.mxu2 %v2892_v49 }
 0x36a   : > { %v2578_v54 = vmul.f32 1.442695, %v2511_v0  ;;  %v2068_v57 = vadd.f32 %v2067_v23, %v1899_v42  ;;  %v7960_v32 = vpop.eup %7959  ;;  %v1454_v0 = vadd.f32 %v9209_v15, %v8776_v60  ;;  %v1902_v23 = vadd.f32 %v9105_v46, %v9117_v59  ;;  %v9241_v7 = vpop.f32.mrf.mxu2 }
 0x36b   : > { %v2766_v12 = vmul.f32 %v7960_v32, %v2702_v5 }
 0x36c   : > { %7961 = vpow2.f32 %v2578_v54  ;;  %v2196_v6 = vmax.f32 %v2068_v57, 0.0  ;;  %v1596_v57 = vmax.f32 %v1456_v50, 0.0  ;;  %v1594_v15 = vmax.f32 %v1454_v0, 0.0  ;;  %v2705_v50 = vld [vmem:[%s9216_s16 + $0x28] sm:$0xff] }
 0x36d   : > { %v2358_v14 = vpop.f32.mrf.mxu0  ;;  %v2830_v42 = vadd.f32 %v2766_v12, %v2354_v37  ;;  %v2704_v12 = vld [vmem:[%s9216_s16 + $0x20] sm:$0xff] }
 0x36e   : > { %v2359_v58 = vadd.f32 %v9195_v4, %v2358_v14  ;;  %2109 = vmatmul.bf16.gmra.mxu3 %v1680_v28  ;;  %v2249_v25 = vpack.c.bf16 %v2196_v6, %v2195_v17  ;;  %v1460_v6 = vpop.f32.mrf.mxu1 }
 0x36f   : > { %v1461_v0 = vadd.f32 %v1460_v6, %v8776_v60 }
 0x370   : > { %v2512_v8 = vmul.f32 0.5, %v2359_v58  ;;  %2397 = vmatmul.bf16.gmra.mxu0 %v2249_v25  ;;  %v1682_v25 = vpack.c.bf16 %v1596_v57, %v1594_v15 }
 0x371   : > { %v2070_v44 = vpop.f32.mrf.mxu3 }
 0x372   : > { %v7962_v18 = vpop.eup %7961  ;;  %v2580_v49 = vmul.f32 1.442695, %v2512_v8  ;;  %v2071_v37 = vadd.f32 %v2070_v44, %v1902_v23  ;;  %v9248_v44 = vpop.f32.mrf.mxu2 }
 0x373   : > { %v2767_v40 = vmul.f32 %v7962_v18, %v2703_v56 }
 0x374   : > { %7963 = vpow2.f32 %v2580_v49  ;;  %v2197_v32 = vmax.f32 %v2071_v37, 0.0 }
 0x375   : > { %v2831_v1 = vadd.f32 %v2767_v40, %v2356_v47  ;;  %v2360_v38 = vpop.f32.mrf.mxu0 }
 0x376   : > { %v2361_v54 = vadd.f32 %v9195_v4, %v2360_v38  ;;  %v1463_v38 = vpop.f32.mrf.mxu1 }
 0x377   : > { %v2893_v17 = vpack.c.bf16 %v2831_v1, %v2830_v42 }
 0x378   : > { %v2513_v47 = vmul.f32 0.5, %v2361_v54 }
 0x379   : > { %v2072_v28 = vpop.f32.mrf.mxu3  ;;  %3039 = vmatmul.bf16.gmra.mxu1 %v2893_v17  ;;  %3208 = vmatmul.bf16.gmra.mxu2 %v2893_v17 }
 0x37a   : > { %v2582_v59 = vmul.f32 1.442695, %v2513_v47  ;;  %v2073_v14 = vadd.f32 %v2072_v28, %v1904_v21  ;;  %v7964_v8 = vpop.eup %7963  ;;  %v1459_v47 = vadd.f32 %v1458_v36, %v8776_v60  ;;  %v1907_v28 = vadd.f32 %v9105_v46, %v9142_v35 }
 0x37b   : > { %v2768_v49 = vmul.f32 %v7964_v8, %v2704_v12 }
 0x37c   : > { %7965 = vpow2.f32 %v2582_v59  ;;  %v2198_v5 = vmax.f32 %v2073_v14, 0.0  ;;  %v1600_v59 = vmax.f32 %v1461_v0, 0.0 }
 0x37d   : > { %v2363_v56 = vpop.f32.mrf.mxu0  ;;  %v2832_v17 = vadd.f32 %v2768_v49, %v2359_v58  ;;  %v1598_v58 = vmax.f32 %v1459_v47, 0.0 }
 0x37e   : > { %v2364_v24 = vadd.f32 %v9195_v4, %v2363_v56  ;;  %2114 = vmatmul.bf16.gmra.mxu3 %v1682_v25  ;;  %v2250_v18 = vpack.c.bf16 %v2198_v5, %v2197_v32  ;;  %v1909_v32 = vadd.f32 %v9105_v46, %v9151_v16  ;;  %v1465_v56 = vpop.f32.mrf.mxu1  ;;  %v7371_v16 = vld [vmem:[#allocation10 + $0xc0] sm:$0xf] }
 0x380   : > { %v2514_v40 = vmul.f32 0.5, %v2364_v24  ;;  %2402 = vmatmul.bf16.gmra.mxu0 %v2250_v18  ;;  %v1684_v18 = vpack.c.bf16 %v1600_v59, %v1598_v58  ;;  %v7774_v58 = vld [vmem:[#allocation10 + $0x1c4] sm:$0xf] }
 0x381   : > { %v2075_v42 = vpop.f32.mrf.mxu3 }
 0x382   : > { %v7966_v1 = vpop.eup %7965  ;;  %v2584_v57 = vmul.f32 1.442695, %v2514_v40  ;;  %v2076_v5 = vadd.f32 %v2075_v42, %v1907_v28  ;;  %v7744_v40 = vld [vmem:[#allocation10 + $0xcc] sm:$0xf0]  ;;  %v1466_v28 = vadd.f32 %v1465_v56, %v8776_v60 }
 0x383   : > { %v2769_v23 = vmul.f32 %v7966_v1, %v2705_v50  ;;  %v2706_v42 = vld [vmem:[%s9216_s16 + $0x30] sm:$0xff] }
 0x384   : > { %7967 = vpow2.f32 %v2584_v57  ;;  %v2199_v8 = vmax.f32 %v2076_v5, 0.0  ;;  %v2707_v57 = vld [vmem:[%s9216_s16 + $0x38] sm:$0xff]  ;;  %v7776_v56 = vld [vmem:[#allocation10 + $0x1cc] sm:$0xf0] }
 0x385   : > { %v2833_v21 = vadd.f32 %v2769_v23, %v2361_v54  ;;  %v2365_v37 = vpop.f32.mrf.mxu0  ;;  %v9258_v54 = vpop.f32.mrf.mxu2  ;;  %v7372_v23 = vor.u32 %v7744_v40, %v7371_v16  ;;  %v1604_v40 = vmax.f32 %v1466_v28, 0.0 }
 0x386   : > { %v2366_v15 = vadd.f32 %v9195_v4, %v2365_v37 }
 0x387   : > { %v2894_v14 = vpack.c.bf16 %v2833_v21, %v2832_v17  ;;  %3951 = vmatpush.bf16.msra.mxu3 %v7372_v23 }
 0x388   : > { %v2515_v6 = vmul.f32 0.5, %v2366_v15 }
 0x389   : > { %v2077_v25 = vpop.f32.mrf.mxu3  ;;  %3044 = vmatmul.bf16.gmra.mxu1 %v2894_v14  ;;  %3213 = vmatmul.bf16.gmra.mxu2 %v2894_v14 }
 0x38a   : > { %v2586_v36 = vmul.f32 1.442695, %v2515_v6  ;;  %v2078_v35 = vadd.f32 %v2077_v25, %v1909_v32  ;;  %v7968_v49 = vpop.eup %7967 }
 0x38b   : > { %v2770_v21 = vmul.f32 %v7968_v49, %v2706_v42 }
 0x38c   : > { %7969 = vpow2.f32 %v2586_v36  ;;  %v2200_v12 = vmax.f32 %v2078_v35, 0.0  ;;  %v7501_v36 = vld [vmem:[#allocation10 + $0x1d0] sm:$0xf0]  ;;  %v7499_v35 = vld [vmem:[#allocation10 + $0x1c0] sm:$0xf] }
 0x38d   : > { %v2368_v50 = vpop.f32.mrf.mxu0  ;;  %v9267_v14 = vpop.f32.mrf.mxu2  ;;  %v2834_v5 = vadd.f32 %v2770_v21, %v2364_v24  ;;  %v7504_v16 = vor.u32 %v7774_v58, %v7501_v36  ;;  %v7500_v42 = vor.u32 %v7776_v56, %v7499_v35  ;;  %v1914_v24 = vadd.f32 %v9105_v46, %v9161_v9  ;;  %v7373_v9 = vld [vmem:[#allocation10 + $0xd0] sm:$0xf0]  ;;  %v2709_v35 = vld [vmem:[%s9216_s16 + $0x48] sm:$0xff] }
 0x38e   : > { %v9262_v1 = vadd.f32 %v9195_v4, %v2368_v50  ;;  %2119 = vmatmul.bf16.gmra.mxu3 %v1684_v18  ;;  %v2251_v0 = vpack.c.bf16 %v2200_v12, %v2199_v8  ;;  %v1464_v8 = vadd.f32 %v1463_v38, %v8776_v60  ;;  %v1912_v12 = vadd.f32 %v9105_v46, %v9153_v43  ;;  %v1468_v18 = vpop.f32.mrf.mxu1 }
 0x38f   : > { %4458 = vmatpush.bf16.msra.mxu2 %v7504_v16  ;;  %4120 = vmatpush.bf16.msra.mxu0 %v7500_v42 }
 0x390   : > { %v2516_v17 = vmul.f32 0.5, %v9262_v1  ;;  %2407 = vmatmul.bf16.gmra.mxu0 %v2251_v0  ;;  %v1602_v43 = vmax.f32 %v1464_v8, 0.0 }
 0x391   : > { %v2080_v37 = vpop.f32.mrf.mxu3 }
 0x392   : > { %v7970_v47 = vpop.eup %7969  ;;  %v2588_v32 = vmul.f32 1.442695, %v2516_v17 }
 0x393   : > { %v2771_v59 = vmul.f32 %v7970_v47, %v2707_v57  ;;  %v1686_v47 = vpack.c.bf16 %v1604_v40, %v1602_v43  ;;  %v1917_v43 = vadd.f32 %v9105_v46, %v9168_v55 }
 0x394   : > { %7971 = vpow2.f32 %v2588_v32 }
 0x395   : > { %v2835_v6 = vadd.f32 %v2771_v59, %v2366_v15  ;;  %v2370_v25 = vpop.f32.mrf.mxu0  ;;  %v2081_v15 = vadd.f32 %v2080_v37, %v1912_v12  ;;  %v7742_v59 = vld [vmem:[#allocation10 + $0xc4] sm:$0xf]  ;;  %v9275_v37 = vpop.f32.mrf.mxu2 }
 0x396   : > { %v2371_v50 = vadd.f32 %v9195_v4, %v2370_v25  ;;  %v7376_v58 = vor.u32 %v7742_v59, %v7373_v9  ;;  %v1470_v36 = vpop.f32.mrf.mxu1 }
 0x397   : > { %v2895_v49 = vpack.c.bf16 %v2835_v6, %v2834_v5  ;;  %v2201_v17 = vmax.f32 %v2081_v15, 0.0  ;;  %v2708_v5 = vld [vmem:[%s9216_s16 + $0x40] sm:$0xff]  ;;  %v1471_v40 = vadd.f32 %v1470_v36, %v8776_v60 }
 0x398   : > { %v2517_v0 = vmul.f32 0.5, %v2371_v50  ;;  %4289 = vmatpush.bf16.msra.mxu1 %v7376_v58 }
 0x399   : > { %v2082_v23 = vpop.f32.mrf.mxu3  ;;  %3049 = vmatmul.bf16.gmra.mxu1 %v2895_v49  ;;  %3218 = vmatmul.bf16.gmra.mxu2 %v2895_v49 }
 0x39a   : > { %v2590_v38 = vmul.f32 1.442695, %v2517_v0  ;;  %v2083_v57 = vadd.f32 %v2082_v23, %v1914_v24  ;;  %v7972_v32 = vpop.eup %7971  ;;  %v1469_v23 = vadd.f32 %v1468_v18, %v8776_v60 }
 0x39b   : > { %v2772_v12 = vmul.f32 %v7972_v32, %v2708_v5 }
 0x39c   : > { %7973 = vpow2.f32 %v2590_v38  ;;  %v2202_v21 = vmax.f32 %v2083_v57, 0.0  ;;  %v1608_v57 = vmax.f32 %v1471_v40, 0.0  ;;  %v1606_v60 = vmax.f32 %v1469_v23, 0.0 }
 0x39d   : > { %v2373_v28 = vpop.f32.mrf.mxu0  ;;  %v2836_v24 = vadd.f32 %v2772_v12, %v9262_v1  ;;  %v1922_v23 = vadd.f32 %v9105_v46, %v9180_v41 }
 0x39e   : > { %v2374_v6 = vadd.f32 %v9195_v4, %v2373_v28  ;;  %2124 = vmatmul.bf16.gmra.mxu3 %v1686_v47  ;;  %v2252_v25 = vpack.c.bf16 %v2202_v21, %v2201_v17  ;;  %v1919_v21 = vadd.f32 %v9105_v46, %v9172_v27  ;;  %v9288_v47 = vpop.f32.mrf.mxu2  ;;  %v1688_v32 = vpack.c.bf16 %v1608_v57, %v1606_v60  ;;  %v2710_v27 = vld [vmem:[%s9216_s16 + $0x50] sm:$0xff] }
 0x3a0   : > { %v2518_v8 = vmul.f32 0.5, %v2374_v6  ;;  %2412 = vmatmul.bf16.gmra.mxu0 %v2252_v25 }
 0x3a1   : > { %v2085_v16 = vpop.f32.mrf.mxu3 }
 0x3a2   : > { %v7974_v56 = vpop.eup %7973  ;;  %v2592_v42 = vmul.f32 1.442695, %v2518_v8  ;;  %v2086_v28 = vadd.f32 %v2085_v16, %v1917_v43 }
 0x3a3   : > { %v2773_v49 = vmul.f32 %v7974_v56, %v2709_v35  ;;  %v2711_v35 = vld [vmem:[%s9216_s16 + $0x58] sm:$0xff] }
 0x3a4   : > { %7975 = vpow2.f32 %v2592_v42  ;;  %v2203_v59 = vmax.f32 %v2086_v28, 0.0 }
 0x3a5   : > { %v2837_v15 = vadd.f32 %v2773_v49, %v2371_v50  ;;  %v2375_v0 = vpop.f32.mrf.mxu0 }
 0x3a6   : > { %v2376_v38 = vadd.f32 %v9195_v4, %v2375_v0  ;;  %v9293_v40 = vpop.f32.mrf.mxu2 }
 0x3a7   : > { %v2896_v17 = vpack.c.bf16 %v2837_v15, %v2836_v24 }
 0x3a8   : > { %v2519_v1 = vmul.f32 0.5, %v2376_v38 }
 0x3a9   : > { %v2087_v50 = vpop.f32.mrf.mxu3  ;;  %3054 = vmatmul.bf16.gmra.mxu1 %v2896_v17  ;;  %3223 = vmatmul.bf16.gmra.mxu2 %v2896_v17  ;;  %v1924_v17 = vadd.f32 %v9105_v46, %v9183_v3 }
 0x3aa   : > { %v2594_v18 = vmul.f32 1.442695, %v2519_v1  ;;  %v2088_v55 = vadd.f32 %v2087_v50, %v1919_v21  ;;  %v7976_v25 = vpop.eup %7975 }
 0x3ab   : > { %v2774_v12 = vmul.f32 %v7976_v25, %v2710_v27 }
 0x3ac   : > { %7977 = vpow2.f32 %v2594_v18  ;;  %v2204_v9 = vmax.f32 %v2088_v55, 0.0 }
 0x3ad   : > { %v2378_v5 = vpop.f32.mrf.mxu0  ;;  %v2838_v24 = vadd.f32 %v2774_v12, %v2374_v6 }
 0x3ae   : > { %v2379_v58 = vadd.f32 %v9195_v4, %v2378_v5  ;;  %2129 = vmatmul.bf16.gmra.mxu3 %v1688_v32  ;;  %v2253_v36 = vpack.c.bf16 %v2204_v9, %v2203_v59  ;;  %v9300_v50 = vpop.f32.mrf.mxu2  ;;  %v2712_v59 = vld [vmem:[%s9216_s16 + $0x60] sm:$0xff]  ;;  %v2713_v32 = vld [vmem:[%s9216_s16 + $0x68] sm:$0xff] }
 0x3b0   : > { %v2520_v8 = vmul.f32 0.5, %v2379_v58  ;;  %2417 = vmatmul.bf16.gmra.mxu0 %v2253_v36 }
 0x3b1   : > { %v2090_v16 = vpop.f32.mrf.mxu3 }
 0x3b2   : > { %v7978_v56 = vpop.eup %7977  ;;  %v2596_v42 = vmul.f32 1.442695, %v2520_v8  ;;  %v2091_v21 = vadd.f32 %v2090_v16, %v1922_v23 }
 0x3b3   : > { %v2775_v49 = vmul.f32 %v7978_v56, %v2711_v35 }
 0x3b4   : > { %7979 = vpow2.f32 %v2596_v42  ;;  %v2205_v60 = vmax.f32 %v2091_v21, 0.0 }
 0x3b5   : > { %v2839_v15 = vadd.f32 %v2775_v49, %v2376_v38  ;;  %v2380_v0 = vpop.f32.mrf.mxu0  ;;  %v1927_v49 = vadd.f32 %v9105_v46, %v9197_v61 }
 0x3b6   : > { %v2381_v43 = vadd.f32 %v9195_v4, %v2380_v0  ;;  %v9308_v42 = vpop.f32.mrf.mxu2 }
 0x3b7   : > { %v2897_v57 = vpack.c.bf16 %v2839_v15, %v2838_v24  ;;  %v1929_v15 = vadd.f32 %v9105_v46, %v9207_v33 }
 0x3b8   : > { %v2521_v28 = vmul.f32 0.5, %v2381_v43 }
 0x3b9   : > { %v2092_v1 = vpop.f32.mrf.mxu3  ;;  %3059 = vmatmul.bf16.gmra.mxu1 %v2897_v57  ;;  %3228 = vmatmul.bf16.gmra.mxu2 %v2897_v57 }
 0x3ba   : > { %v2598_v6 = vmul.f32 1.442695, %v2521_v28  ;;  %v2093_v38 = vadd.f32 %v2092_v1, %v1924_v17  ;;  %v7980_v55 = vpop.eup %7979  ;;  %v7355_v28 = vld [vmem:[#allocation10 + $0xa0] sm:$0xf]  ;;  %v7740_v1 = vld [vmem:[#allocation10 + $0xac] sm:$0xf0] }
 0x3bb   : > { %v2776_v25 = vmul.f32 %v7980_v55, %v2712_v59 }
 0x3bc   : > { %7981 = vpow2.f32 %v2598_v6  ;;  %v2206_v41 = vmax.f32 %v2093_v38, 0.0  ;;  %v2714_v38 = vld [vmem:[%s9216_s16 + $0x70] sm:$0xff] }
 0x3bd   : > { %v2383_v18 = vpop.f32.mrf.mxu0  ;;  %v2840_v12 = vadd.f32 %v2776_v25, %v2379_v58 }
 0x3be   : > { %v2384_v9 = vadd.f32 %v9195_v4, %v2383_v18  ;;  %2134 = vmatmul.bf16.gmra.mxu3 %v8898_v19  ;;  %v2254_v3 = vpack.c.bf16 %v2206_v41, %v2205_v60  ;;  %v7356_v60 = vor.u32 %v7740_v1, %v7355_v28  ;;  %v9316_v41 = vpop.f32.mrf.mxu2  ;;  %v2715_v18 = vld [vmem:[%s9216_s16 + $0x78] sm:$0xff]  ;;  %v7738_v1 = vld [vmem:[#allocation10 + $0xa4] sm:$0xf] }
 0x3c0   : > { %v2522_v5 = vmul.f32 0.5, %v2384_v9  ;;  %2422 = vmatmul.bf16.gmra.mxu0 %v2254_v3  ;;  %3952 = vmatpush.bf16.msra.mxu3 %v7356_v60 }
 0x3c1   : > { %v2095_v27 = vpop.f32.mrf.mxu3 }
 0x3c2   : > { %v7982_v36 = vpop.eup %7981  ;;  %v2600_v8 = vmul.f32 1.442695, %v2522_v5  ;;  %v2096_v0 = vadd.f32 %v2095_v27, %v1927_v49 }
 0x3c3   : > { %v2777_v35 = vmul.f32 %v7982_v36, %v2713_v32 }
 0x3c4   : > { %7983 = vpow2.f32 %v2600_v8  ;;  %v2207_v17 = vmax.f32 %v2096_v0, 0.0  ;;  %v7770_v8 = vld [vmem:[#allocation10 + $0x1a4] sm:$0xf] }
 0x3c5   : > { %v2841_v16 = vadd.f32 %v2777_v35, %v2381_v43  ;;  %v2385_v56 = vpop.f32.mrf.mxu0 }
 0x3c6   : > { %v2386_v24 = vadd.f32 %v9195_v4, %v2385_v56 }
 0x3c7   : > { %v2898_v19 = vpack.c.bf16 %v2841_v16, %v2840_v12  ;;  %v7485_v12 = vld [vmem:[#allocation10 + $0x1b0] sm:$0xf0]  ;;  %v7483_v16 = vld [vmem:[#allocation10 + $0x1a0] sm:$0xf] }
 0x3c8   : > { %v2523_v23 = vmul.f32 0.5, %v2386_v24 }
 0x3c9   : > { %v2097_v57 = vpop.f32.mrf.mxu3  ;;  %3064 = vmatmul.bf16.gmra.mxu1 %v2898_v19  ;;  %3233 = vmatmul.bf16.gmra.mxu2 %v2898_v19  ;;  %v7488_v19 = vor.u32 %v7770_v8, %v7485_v12 }
 0x3ca   : > { %v2602_v58 = vmul.f32 1.442695, %v2523_v23  ;;  %v2098_v43 = vadd.f32 %v2097_v57, %v1929_v15  ;;  %v7984_v6 = vpop.eup %7983  ;;  %v7772_v15 = vld [vmem:[#allocation10 + $0x1ac] sm:$0xf0] }
 0x3cb   : > { %v2778_v59 = vmul.f32 %v7984_v6, %v2714_v38  ;;  %v7484_v23 = vor.u32 %v7772_v15, %v7483_v16  ;;  %4459 = vmatpush.bf16.msra.mxu2 %v7488_v19  ;;  %v2716_v38 = vld [vmem:[%s9216_s16 + $0x80] sm:$0xff] }
 0x3cc   : > { %7985 = vpow2.f32 %v2602_v58  ;;  %v2208_v61 = vmax.f32 %v2098_v43, 0.0  ;;  %v9329_v43 = vpop.f32.mrf.mxu2 }
 0x3cd   : > { %v2388_v21 = vpop.f32.mrf.mxu0  ;;  %v2842_v27 = vadd.f32 %v2778_v59, %v2384_v9  ;;  %4121 = vmatpush.bf16.msra.mxu0 %v7484_v23 }
 0x3ce   : > { %v2389_v46 = vadd.f32 %v9195_v4, %v2388_v21  ;;  %2139 = vmatmul.bf16.gmra.mxu3 %v8913_v51  ;;  %v2255_v33 = vpack.c.bf16 %v2208_v61, %v2207_v17  ;;  %v9322_v51 = vld [vmem:[%s11555_s5] ss:$0 sm:$0xff] }
 0x3cf   : > { %v1932_v56 = vadd.f32 %v9322_v51, %v9221_v62  ;;  %v1934_v9 = vadd.f32 %v9322_v51, %v9231_v31  ;;  %v7357_v31 = vld [vmem:[#allocation10 + $0xb0] sm:$0xf0]  ;;  %v1937_v16 = vadd.f32 %v9322_v51, %v9241_v7 }
 0x3d0   : > { %v2524_v55 = vmul.f32 0.5, %v2389_v46  ;;  %2427 = vmatmul.bf16.gmra.mxu0 %v2255_v33 }
 0x3d1   : > { %v2100_v3 = vpop.f32.mrf.mxu3 }
 0x3d2   : > { %v7986_v32 = vpop.eup %7985  ;;  %v2604_v25 = vmul.f32 1.442695, %v2524_v55  ;;  %v2717_v55 = vld [vmem:[%s9216_s16 + $0x88] sm:$0xff] }
 0x3d3   : > { %v2779_v5 = vmul.f32 %v7986_v32, %v2715_v18  ;;  %v7360_v18 = vor.u32 %v7738_v1, %v7357_v31 }
 0x3d4   : > { %7987 = vpow2.f32 %v2604_v25 }
 0x3d5   : > { %v2843_v36 = vadd.f32 %v2779_v5, %v2386_v24  ;;  %v2390_v35 = vpop.f32.mrf.mxu0  ;;  %v2101_v24 = vadd.f32 %v2100_v3, %v1932_v56  ;;  %4290 = vmatpush.bf16.msra.mxu1 %v7360_v18  ;;  %v2940_v56 = vld [vmem:[%s11559_s9] sm:$0x3] }
 0x3d6   : > { %v2391_v49 = vadd.f32 %v9195_v4, %v2390_v35 }
 0x3d7   : > { %v2899_v0 = vpack.c.bf16 %v2843_v36, %v2842_v27  ;;  %v2209_v61 = vmax.f32 %v2101_v24, 0.0  ;;  %v9335_v27 = vpop.f32.mrf.mxu2 }
 0x3d8   : > { %v2525_v57 = vmul.f32 0.5, %v2391_v49 }
 0x3d9   : > { %v2102_v58 = vpop.f32.mrf.mxu3  ;;  %3069 = vmatmul.bf16.gmra.mxu1 %v2899_v0  ;;  %3238 = vmatmul.bf16.gmra.mxu2 %v2899_v0  ;;  %v1939_v0 = vadd.f32 %v9322_v51, %v9248_v44 }
 0x3da   : > { %v2606_v62 = vmul.f32 1.442695, %v2525_v57  ;;  %v2103_v17 = vadd.f32 %v2102_v58, %v1934_v9  ;;  %v7988_v6 = vpop.eup %7987 }
 0x3db   : > { %v2780_v3 = vmul.f32 %v7988_v6, %v2716_v38  ;;  %v9353_v6 = vperm.slane %v2940_v56, 1 }
 0x3dc   : > { %7989 = vpow2.f32 %v2606_v62  ;;  %v2210_v21 = vmax.f32 %v2103_v17, 0.0 }
 0x3dd   : > { %v2393_v28 = vpop.f32.mrf.mxu0  ;;  %v2844_v35 = vadd.f32 %v2780_v3, %v2389_v46 }
 0x3de   : > { %v2394_v33 = vadd.f32 %v9195_v4, %v2393_v28  ;;  %2144 = vmatmul.bf16.gmra.mxu3 %v8928_v22  ;;  %v2256_v60 = vpack.c.bf16 %v2210_v21, %v2209_v61  ;;  %v2718_v21 = vld [vmem:[%s9216_s16 + $0x90] sm:$0xff] }
 0x3e0   : > { %v2526_v59 = vmul.f32 0.5, %v2394_v33  ;;  %2432 = vmatmul.bf16.gmra.mxu0 %v2256_v60  ;;  %v2719_v60 = vld [vmem:[%s9216_s16 + $0x98] sm:$0xff] }
 0x3e1   : > { %v2105_v32 = vpop.f32.mrf.mxu3 }
 0x3e2   : > { %v7990_v5 = vpop.eup %7989  ;;  %v2608_v36 = vmul.f32 1.442695, %v2526_v59  ;;  %v2106_v23 = vadd.f32 %v2105_v32, %v1937_v16 }
 0x3e3   : > { %v2781_v25 = vmul.f32 %v7990_v5, %v2717_v55 }
 0x3e4   : > { %7991 = vpow2.f32 %v2608_v36  ;;  %v2211_v57 = vmax.f32 %v2106_v23, 0.0 }
 0x3e5   : > { %v2845_v8 = vadd.f32 %v2781_v25, %v2391_v49  ;;  %v2395_v12 = vpop.f32.mrf.mxu0  ;;  %v9345_v49 = vperm.slane %v2940_v56, 0 }
 0x3e6   : > { %v2396_v22 = vadd.f32 %v9195_v4, %v2395_v12  ;;  %v3035_v19 = vpop.f32.mrf.mxu1 }
 0x3e7   : > { %v2900_v15 = vpack.c.bf16 %v2845_v8, %v2844_v35  ;;  %v3036_v17 = vadd.f32 %v3035_v19, %v9345_v49 }
 0x3e8   : > { %v2527_v46 = vmul.f32 0.5, %v2396_v22 }
 0x3e9   : > { %v2107_v9 = vpop.f32.mrf.mxu3  ;;  %3074 = vmatmul.bf16.gmra.mxu1 %v2900_v15  ;;  %3243 = vmatmul.bf16.gmra.mxu2 %v2900_v15  ;;  %v3364_v59 = vmax.f32 %v3036_v17, 0.0  ;;  %v1942_v15 = vadd.f32 %v9322_v51, %v9258_v54 }
 0x3ea   : > { %v2610_v7 = vmul.f32 1.442695, %v2527_v46  ;;  %v2108_v24 = vadd.f32 %v2107_v9, %v1939_v0  ;;  %v7992_v44 = vpop.eup %7991 }
 0x3eb   : > { %v2782_v55 = vmul.f32 %v7992_v44, %v2718_v21 }
 0x3ec   : > { %7993 = vpow2.f32 %v2610_v7  ;;  %v2212_v58 = vmax.f32 %v2108_v24, 0.0  ;;  %v3204_v62 = vpop.f32.mrf.mxu2  ;;  %v1944_v24 = vadd.f32 %v9322_v51, %v9267_v14 }
 0x3ed   : > { %v2398_v61 = vpop.f32.mrf.mxu0  ;;  %v3205_v36 = vadd.f32 %v3204_v62, %v9353_v6  ;;  %v2846_v12 = vadd.f32 %v2782_v55, %v2394_v33 }
 0x3ee   : > { %v9350_v28 = vadd.f32 %v9195_v4, %v2398_v61  ;;  %2149 = vmatmul.bf16.gmra.mxu3 %v8947_v2  ;;  %v3037_v1 = vpop.f32.mrf.mxu1  ;;  %v2257_v31 = vpack.c.bf16 %v2212_v58, %v2211_v57 }
 0x3ef   : > { %v3038_v38 = vadd.f32 %v3037_v1, %v9345_v49  ;;  %v3365_v46 = vmax.f32 %v3205_v36, 0.0 }
 0x3f0   : > { %v2528_v18 = vmul.f32 0.5, %v9350_v28  ;;  %2437 = vmatmul.bf16.gmra.mxu0 %v2257_v31  ;;  %v2720_v31 = vld [vmem:[%s9216_s16 + $0xa0] sm:$0xff] }
 0x3f1   : > { %v3366_v3 = vmax.f32 %v3038_v38, 0.0  ;;  %v2110_v32 = vpop.f32.mrf.mxu3 }
 0x3f2   : > { %v7994_v5 = vpop.eup %7993  ;;  %v2612_v2 = vmul.f32 1.442695, %v2528_v18  ;;  %v2111_v57 = vadd.f32 %v2110_v32, %v1942_v15 }
 0x3f3   : > { %v2783_v25 = vmul.f32 %v7994_v5, %v2719_v60  ;;  %v9359_v35 = vpack.c.bf16 %v3366_v3, %v3364_v59  ;;  %v2721_v59 = vld [vmem:[%s9216_s16 + $0xa8] sm:$0xff] }
 0x3f4   : > { %v3206_v8 = vpop.f32.mrf.mxu2  ;;  %7995 = vpow2.f32 %v2612_v2  ;;  %v2213_v17 = vmax.f32 %v2111_v57, 0.0 }
 0x3f5   : > { %v2847_v16 = vadd.f32 %v2783_v25, %v2396_v22  ;;  %v3207_v56 = vadd.f32 %v3206_v8, %v9353_v6  ;;  %v2400_v19 = vpop.f32.mrf.mxu0 }
 0x3f6   : > { %v2401_v0 = vadd.f32 %v9195_v4, %v2400_v19  ;;  %v3040_v23 = vpop.f32.mrf.mxu1 }
 0x3f7   : > { %v3367_v9 = vmax.f32 %v3207_v56, 0.0  ;;  %v2901_v7 = vpack.c.bf16 %v2847_v16, %v2846_v12  ;;  %v3041_v21 = vadd.f32 %v3040_v23, %v9345_v49 }
 0x3f8   : > { %v2529_v33 = vmul.f32 0.5, %v2401_v0 }
 0x3f9   : > { %v9367_v22 = vpack.c.bf16 %v3367_v9, %v3365_v46  ;;  %v2112_v58 = vpop.f32.mrf.mxu3  ;;  %3079 = vmatmul.bf16.gmra.mxu1 %v2901_v7  ;;  %3248 = vmatmul.bf16.gmra.mxu2 %v2901_v7  ;;  %v3368_v5 = vmax.f32 %v3041_v21, 0.0  ;;  %v1947_v9 = vadd.f32 %v9322_v51, %v9275_v37 }
 0x3fa   : > { %v2614_v54 = vmul.f32 1.442695, %v2529_v33  ;;  %v2113_v62 = vadd.f32 %v2112_v58, %v1944_v24  ;;  %v7996_v14 = vpop.eup %7995 }
 0x3fb   : > { %11740 = vst [vmem:[#allocation33_spill] sm:$0xff] %v9367_v22  ;;  %v2784_v32 = vmul.f32 %v7996_v14, %v2720_v31  ;;  %v7323_v31 = vld [vmem:[#allocation10 + $0x60] sm:$0xf] }
 0x3fc   : > { %7997 = vpow2.f32 %v2614_v54  ;;  %v2214_v61 = vmax.f32 %v2113_v62, 0.0  ;;  %v3209_v44 = vpop.f32.mrf.mxu2  ;;  %v1949_v54 = vadd.f32 %v9322_v51, %v9288_v47 }
 0x3fd   : > { %v2403_v1 = vpop.f32.mrf.mxu0  ;;  %v3210_v12 = vadd.f32 %v3209_v44, %v9353_v6  ;;  %v2848_v19 = vadd.f32 %v2784_v32, %v9350_v28  ;;  %v7339_v28 = vld [vmem:[#allocation10 + $0x80] sm:$0xf]  ;;  %v2722_v32 = vld [vmem:[%s9216_s16 + $0xb0] sm:$0xff] }
 0x3fe   : > { %v9372_v38 = vadd.f32 %v9195_v4, %v2403_v1  ;;  %2154 = vmatmul.bf16.gmra.mxu3 %v8964_v34  ;;  %v3042_v60 = vpop.f32.mrf.mxu1  ;;  %v2258_v18 = vpack.c.bf16 %v2214_v61, %v2213_v17 }
 0x3ff   : > { %v3043_v55 = vadd.f32 %v3042_v60, %v9345_v49  ;;  %v3369_v57 = vmax.f32 %v3210_v12, 0.0  ;;  %v7732_v60 = vld [vmem:[#allocation10 + $0x6c] sm:$0xf0]  ;;  %v2723_v12 = vld [vmem:[%s9216_s16 + $0xb8] sm:$0xff] }
 0x400   : > { %v2530_v3 = vmul.f32 0.5, %v9372_v38  ;;  %2442 = vmatmul.bf16.gmra.mxu0 %v2258_v18 }
 0x401   : > { %v3370_v25 = vmax.f32 %v3043_v55, 0.0  ;;  %v2115_v36 = vpop.f32.mrf.mxu3 }
 0x402   : > { %v7998_v2 = vpop.eup %7997  ;;  %v2616_v56 = vmul.f32 1.442695, %v2530_v3  ;;  %v2116_v62 = vadd.f32 %v2115_v36, %v1947_v9 }
 0x403   : > { %v2785_v8 = vmul.f32 %v7998_v2, %v2721_v59  ;;  %v9379_v16 = vpack.c.bf16 %v3370_v25, %v3368_v5  ;;  %v7324_v59 = vor.u32 %v7732_v60, %v7323_v31  ;;  %v9395_v5 = vld [vmem:[%s11557_s7] ss:$0 sm:$0xff] }
 0x404   : > { %v3211_v34 = vpop.f32.mrf.mxu2  ;;  %7999 = vpow2.f32 %v2616_v56  ;;  %v2215_v1 = vmax.f32 %v2116_v62, 0.0 }
 0x405   : > { %v2849_v15 = vadd.f32 %v2785_v8, %v2401_v0  ;;  %v3212_v23 = vadd.f32 %v3211_v34, %v9353_v6  ;;  %v2405_v46 = vpop.f32.mrf.mxu0  ;;  %v7736_v0 = vld [vmem:[#allocation10 + $0x8c] sm:$0xf0]  ;;  %v7307_v34 = vld [vmem:[#allocation10 + $0x40] sm:$0xf] }
 0x406   : > { %v2406_v7 = vadd.f32 %v9195_v4, %v2405_v46  ;;  %v3045_v24 = vpop.f32.mrf.mxu1  ;;  %v7340_v37 = vor.u32 %v7736_v0, %v7339_v28  ;;  %v7724_v28 = vld [vmem:[#allocation10 + $0x2c] sm:$0xf0] }
 0x407   : > { %v3371_v33 = vmax.f32 %v3212_v23, 0.0  ;;  %v2902_v58 = vpack.c.bf16 %v2849_v15, %v2848_v19  ;;  %v3046_v18 = vadd.f32 %v3045_v24, %v9345_v49  ;;  %v7728_v19 = vld [vmem:[#allocation10 + $0x4c] sm:$0xf0] }
 0x408   : > { %v2531_v17 = vmul.f32 0.5, %v2406_v7  ;;  %3953 = vmatpush.bf16.msra.mxu3 %v7340_v37  ;;  %v7308_v24 = vor.u32 %v7728_v19, %v7307_v34 }
 0x409   : > { %v9388_v61 = vpack.c.bf16 %v3371_v33, %v3369_v57  ;;  %v2117_v44 = vpop.f32.mrf.mxu3  ;;  %3084 = vmatmul.bf16.gmra.mxu1 %v2902_v58  ;;  %3253 = vmatmul.bf16.gmra.mxu2 %v2902_v58  ;;  %v3372_v23 = vmax.f32 %v3046_v18, 0.0 }
 0x40a   : > { %v2618_v4 = vmul.f32 1.442695, %v2531_v17  ;;  %v2118_v21 = vadd.f32 %v2117_v44, %v1949_v54  ;;  %v8000_v3 = vpop.eup %7999  ;;  %v7291_v17 = vld [vmem:[#allocation10 + $0x20] sm:$0xf] }
 0x40b   : > { %11741 = vst [vmem:[#allocation34_spill] sm:$0xff] %v9388_v61  ;;  %v2786_v15 = vmul.f32 %v8000_v3, %v2722_v32  ;;  %v7292_v31 = vor.u32 %v7724_v28, %v7291_v17 }
 0x40c   : > { %8001 = vpow2.f32 %v2618_v4  ;;  %v2216_v14 = vmax.f32 %v2118_v21, 0.0  ;;  %v3214_v47 = vpop.f32.mrf.mxu2  ;;  %3954 = vmatpush.bf16.msra.mxu3 %v7324_v59  ;;  %v7766_v21 = vld [vmem:[#allocation10 + $0x184] sm:$0xf]  ;;  %v7768_v59 = vld [vmem:[#allocation10 + $0x18c] sm:$0xf0] }
 0x40d   : > { %v2408_v55 = vpop.f32.mrf.mxu0  ;;  %v2850_v0 = vadd.f32 %v2786_v15, %v9372_v38 }
 0x40e   : > { %v9398_v25 = vadd.f32 %v9395_v5, %v2408_v55  ;;  %2159 = vmatmul.bf16.gmra.mxu3 %v8983_v13  ;;  %v3047_v36 = vpop.f32.mrf.mxu1  ;;  %v2259_v2 = vpack.c.bf16 %v2216_v14, %v2215_v1  ;;  %v3215_v13 = vadd.f32 %v3214_v47, %v9353_v6  ;;  %v7469_v1 = vld [vmem:[#allocation10 + $0x190] sm:$0xf0]  ;;  %v7467_v14 = vld [vmem:[#allocation10 + $0x180] sm:$0xf]  ;;  %v1952_v47 = vadd.f32 %v9322_v51, %v9293_v40 }
 0x40f   : > { %v3048_v8 = vadd.f32 %v3047_v36, %v9345_v49  ;;  %v7472_v55 = vor.u32 %v7766_v21, %v7469_v1  ;;  %v7468_v38 = vor.u32 %v7768_v59, %v7467_v14 }
 0x410   : > { %v2532_v56 = vmul.f32 0.5, %v9398_v25  ;;  %2447 = vmatmul.bf16.gmra.mxu0 %v2259_v2  ;;  %3955 = vmatpush.bf16.msra.mxu3 %v7308_v24  ;;  %v3373_v3 = vmax.f32 %v3215_v13, 0.0  ;;  %v7341_v13 = vld [vmem:[#allocation10 + $0x90] sm:$0xf0] }
 0x411   : > { %v3374_v46 = vmax.f32 %v3048_v8, 0.0  ;;  %v2120_v9 = vpop.f32.mrf.mxu3  ;;  %4460 = vmatpush.bf16.msra.mxu2 %v7472_v55  ;;  %4122 = vmatpush.bf16.msra.mxu0 %v7468_v38 }
 0x412   : > { %v8002_v57 = vpop.eup %8001  ;;  %v2620_v54 = vmul.f32 1.442695, %v2532_v56  ;;  %v2121_v2 = vadd.f32 %v2120_v9, %v1952_v47  ;;  %v7720_v56 = vld [vmem:[#allocation10 + $0xc] sm:$0xf0] }
 0x413   : > { %v2787_v33 = vmul.f32 %v8002_v57, %v2723_v12  ;;  %v9405_v58 = vpack.c.bf16 %v3374_v46, %v3372_v23  ;;  %v7275_v12 = vld [vmem:[#allocation10] sm:$0xf] }
 0x414   : > { %v3216_v62 = vpop.f32.mrf.mxu2  ;;  %3956 = vmatpush.bf16.msra.mxu3 %v7292_v31  ;;  %8003 = vpow2.f32 %v2620_v54  ;;  %v7276_v19 = vor.u32 %v7720_v56, %v7275_v12  ;;  %v2217_v46 = vmax.f32 %v2121_v2, 0.0 }
 0x415   : > { %11742 = vst [vmem:[#allocation35_spill] sm:$0xff] %v9405_v58  ;;  %v2851_v44 = vadd.f32 %v2787_v33, %v2406_v7  ;;  %v3217_v37 = vadd.f32 %v3216_v62, %v9353_v6  ;;  %v2410_v4 = vpop.f32.mrf.mxu0  ;;  %v1954_v7 = vadd.f32 %v9322_v51, %v9300_v50  ;;  %v7734_v33 = vld [vmem:[#allocation10 + $0x84] sm:$0xf] }
 0x416   : > { %v2411_v60 = vadd.f32 %v9395_v5, %v2410_v4  ;;  %v3050_v18 = vpop.f32.mrf.mxu1  ;;  %v2724_v62 = vld [vmem:[%s9216_s16 + $0xc0] sm:$0xff]  ;;  %v2725_v4 = vld [vmem:[%s9216_s16 + $0xc8] sm:$0xff] }
 0x417   : > { %v3375_v32 = vmax.f32 %v3217_v37, 0.0  ;;  %v2903_v36 = vpack.c.bf16 %v2851_v44, %v2850_v0  ;;  %v3051_v24 = vadd.f32 %v3050_v18, %v9345_v49  ;;  %v7344_v44 = vor.u32 %v7734_v33, %v7341_v13 }
 0x418   : > { %v2533_v8 = vmul.f32 0.5, %v2411_v60  ;;  %3957 = vmatpush.bf16.msra.mxu3 %v7276_v19 }
 0x419   : > { %v9414_v40 = vpack.c.bf16 %v3375_v32, %v3373_v3  ;;  %v2122_v34 = vpop.f32.mrf.mxu3  ;;  %3089 = vmatmul.bf16.gmra.mxu1 %v2903_v36  ;;  %3258 = vmatmul.bf16.gmra.mxu2 %v2903_v36  ;;  %v3376_v14 = vmax.f32 %v3051_v24, 0.0 }
 0x41a   : > { %v2622_v15 = vmul.f32 1.442695, %v2533_v8  ;;  %v2123_v23 = vadd.f32 %v2122_v34, %v1954_v7  ;;  %v8004_v54 = vpop.eup %8003  ;;  %4291 = vmatpush.bf16.msra.mxu1 %v7344_v44  ;;  %v1957_v8 = vadd.f32 %v9322_v51, %v9308_v42 }
 0x41b   : > { %11743 = vst [vmem:[#allocation36_spill] sm:$0xff] %v9414_v40  ;;  %v2788_v1 = vmul.f32 %v8004_v54, %v2724_v62  ;;  %v2726_v62 = vld [vmem:[%s9216_s16 + $0xd0] sm:$0xff] }
 0x41c   : > { %8005 = vpow2.f32 %v2622_v15  ;;  %v2218_v50 = vmax.f32 %v2123_v23, 0.0  ;;  %v3219_v9 = vpop.f32.mrf.mxu2  ;;  %v1959_v23 = vadd.f32 %v9322_v51, %v9316_v41 }
 0x41d   : > { %v2413_v57 = vpop.f32.mrf.mxu0  ;;  %v3220_v59 = vadd.f32 %v3219_v9, %v9353_v6  ;;  %v2852_v36 = vadd.f32 %v2788_v1, %v9398_v25 }
 0x41e   : > { %v9419_v17 = vadd.f32 %v9395_v5, %v2413_v57  ;;  %2164 = vmatmul.bf16.gmra.mxu3 %v8996_v53  ;;  %v3052_v28 = vpop.f32.mrf.mxu1  ;;  %v2260_v0 = vpack.c.bf16 %v2218_v50, %v2217_v46 }
 0x41f   : > { %v3053_v37 = vadd.f32 %v3052_v28, %v9345_v49  ;;  %v3377_v34 = vmax.f32 %v3220_v59, 0.0 }
 0x420   : > { %v2534_v21 = vmul.f32 0.5, %v9419_v17  ;;  %2452 = vmatmul.bf16.gmra.mxu0 %v2260_v0 }
 0x421   : > { %v3378_v31 = vmax.f32 %v3053_v37, 0.0  ;;  %v2125_v47 = vpop.f32.mrf.mxu3 }
 0x422   : > { %v8006_v18 = vpop.eup %8005  ;;  %v2624_v53 = vmul.f32 1.442695, %v2534_v21  ;;  %v2126_v46 = vadd.f32 %v2125_v47, %v1957_v8  ;;  %v1962_v8 = vadd.f32 %v9322_v51, %v9329_v43 }
 0x423   : > { %v2789_v55 = vmul.f32 %v8006_v18, %v2725_v4  ;;  %v9426_v3 = vpack.c.bf16 %v3378_v31, %v3376_v14  ;;  %v2727_v4 = vld [vmem:[%s9216_s16 + $0xd8] sm:$0xff] }
 0x424   : > { %v3221_v32 = vpop.f32.mrf.mxu2  ;;  %8007 = vpow2.f32 %v2624_v53  ;;  %v2219_v24 = vmax.f32 %v2126_v46, 0.0  ;;  %v1964_v46 = vadd.f32 %v9322_v51, %v9335_v27 }
 0x425   : > { %11744 = vst [vmem:[#allocation37_spill] sm:$0xff] %v9426_v3  ;;  %v2853_v38 = vadd.f32 %v2789_v55, %v2411_v60  ;;  %v3222_v7 = vadd.f32 %v3221_v32, %v9353_v6  ;;  %v2415_v2 = vpop.f32.mrf.mxu0 }
 0x426   : > { %v2416_v12 = vadd.f32 %v9395_v5, %v2415_v2  ;;  %v3055_v56 = vpop.f32.mrf.mxu1 }
 0x427   : > { %v3379_v19 = vmax.f32 %v3222_v7, 0.0  ;;  %v2904_v15 = vpack.c.bf16 %v2853_v38, %v2852_v36  ;;  %v3056_v13 = vadd.f32 %v3055_v56, %v9345_v49 }
 0x428   : > { %v2535_v25 = vmul.f32 0.5, %v2416_v12 }
 0x429   : > { %v9435_v60 = vpack.c.bf16 %v3379_v19, %v3377_v34  ;;  %v2127_v50 = vpop.f32.mrf.mxu3  ;;  %3094 = vmatmul.bf16.gmra.mxu1 %v2904_v15  ;;  %3263 = vmatmul.bf16.gmra.mxu2 %v2904_v15  ;;  %v3380_v14 = vmax.f32 %v3056_v13, 0.0 }
 0x42a   : > { %v2626_v42 = vmul.f32 1.442695, %v2535_v25  ;;  %v2128_v9 = vadd.f32 %v2127_v50, %v1959_v23  ;;  %v8008_v41 = vpop.eup %8007 }
 0x42b   : > { %11745 = vst [vmem:[#allocation38_spill] sm:$0xff] %v9435_v60  ;;  %v2790_v1 = vmul.f32 %v8008_v41, %v2726_v62 }
 0x42c   : > { %8009 = vpow2.f32 %v2626_v42  ;;  %v2220_v57 = vmax.f32 %v2128_v9, 0.0  ;;  %v3224_v33 = vpop.f32.mrf.mxu2 }
 0x42d   : > { %v2418_v54 = vpop.f32.mrf.mxu0  ;;  %v3225_v59 = vadd.f32 %v3224_v33, %v9353_v6  ;;  %v2854_v36 = vadd.f32 %v2790_v1, %v9419_v17 }
 0x42e   : > { %v9440_v28 = vadd.f32 %v9395_v5, %v2418_v54  ;;  %2169 = vmatmul.bf16.gmra.mxu3 %v9011_v20  ;;  %v3057_v0 = vpop.f32.mrf.mxu1  ;;  %v2261_v44 = vpack.c.bf16 %v2220_v57, %v2219_v24  ;;  %v2728_v54 = vld [vmem:[%s9216_s16 + $0xe0] sm:$0xff] }
 0x42f   : > { %v3058_v37 = vadd.f32 %v3057_v0, %v9345_v49  ;;  %v3381_v19 = vmax.f32 %v3225_v59, 0.0 }
 0x430   : > { %v2536_v21 = vmul.f32 0.5, %v9440_v28  ;;  %2457 = vmatmul.bf16.gmra.mxu0 %v2261_v44 }
 0x431   : > { %v3382_v31 = vmax.f32 %v3058_v37, 0.0  ;;  %v2130_v47 = vpop.f32.mrf.mxu3  ;;  %v2729_v37 = vld [vmem:[%s9216_s16 + $0xe8] sm:$0xff] }
 0x432   : > { %v8010_v18 = vpop.eup %8009  ;;  %v2628_v32 = vmul.f32 1.442695, %v2536_v21  ;;  %v2131_v25 = vadd.f32 %v2130_v47, %v1962_v8  ;;  %v1967_v8 = vadd.f32 %v9322_v51, %v9014_v26 }
 0x433   : > { %v2791_v55 = vmul.f32 %v8010_v18, %v2727_v4  ;;  %v9447_v53 = vpack.c.bf16 %v3382_v31, %v3380_v14 }
 0x434   : > { %v3226_v20 = vpop.f32.mrf.mxu2  ;;  %8011 = vpow2.f32 %v2628_v32  ;;  %v2221_v9 = vmax.f32 %v2131_v25, 0.0  ;;  %v1969_v25 = vadd.f32 %v9322_v51, %v9020_v39 }
 0x435   : > { %11746 = vst [vmem:[#allocation39_spill] sm:$0xff] %v9447_v53  ;;  %v2855_v38 = vadd.f32 %v2791_v55, %v2416_v12  ;;  %v3227_v7 = vadd.f32 %v3226_v20, %v9353_v6  ;;  %v2420_v2 = vpop.f32.mrf.mxu0 }
 0x436   : > { %v2421_v56 = vadd.f32 %v9395_v5, %v2420_v2  ;;  %v3060_v34 = vpop.f32.mrf.mxu1 }
 0x437   : > { %v3383_v15 = vmax.f32 %v3227_v7, 0.0  ;;  %v2905_v23 = vpack.c.bf16 %v2855_v38, %v2854_v36  ;;  %v3061_v33 = vadd.f32 %v3060_v34, %v9345_v49 }
 0x438   : > { %v2537_v17 = vmul.f32 0.5, %v2421_v56 }
 0x439   : > { %v9456_v12 = vpack.c.bf16 %v3383_v15, %v3381_v19  ;;  %v2132_v50 = vpop.f32.mrf.mxu3  ;;  %3099 = vmatmul.bf16.gmra.mxu1 %v2905_v23  ;;  %3268 = vmatmul.bf16.gmra.mxu2 %v2905_v23  ;;  %v3384_v1 = vmax.f32 %v3061_v33, 0.0 }
 0x43a   : > { %v2630_v43 = vmul.f32 1.442695, %v2537_v17  ;;  %v2133_v42 = vadd.f32 %v2132_v50, %v1964_v46  ;;  %v8012_v27 = vpop.eup %8011 }
 0x43b   : > { %11747 = vst [vmem:[#allocation40_spill] sm:$0xff] %v9456_v12  ;;  %v2792_v21 = vmul.f32 %v8012_v27, %v2728_v54 }
 0x43c   : > { %8013 = vpow2.f32 %v2630_v43  ;;  %v2222_v24 = vmax.f32 %v2133_v42, 0.0  ;;  %v3229_v57 = vpop.f32.mrf.mxu2 }
 0x43d   : > { %v2423_v13 = vpop.f32.mrf.mxu0  ;;  %v3230_v55 = vadd.f32 %v3229_v57, %v9353_v6  ;;  %v2856_v36 = vadd.f32 %v2792_v21, %v9440_v28 }
 0x43e   : > { %v9461_v41 = vadd.f32 %v9395_v5, %v2423_v13  ;;  %v3062_v62 = vpop.f32.mrf.mxu1  ;;  %3958 = vmatmul.bf16.vlgmr.msra.gmra.mxu3 %v9359_v35  ;;  %v2262_v0 = vpack.c.bf16 %v2222_v24, %v2221_v9  ;;  %v2730_v13 = vld [vmem:[%s9216_s16 + $0xf0] sm:$0xff] }
 0x43f   : > { %v3063_v44 = vadd.f32 %v3062_v62, %v9345_v49  ;;  %v3385_v15 = vmax.f32 %v3230_v55, 0.0 }
 0x440   : > { %v2538_v4 = vmul.f32 0.5, %v9461_v41  ;;  %2462 = vmatmul.bf16.gmra.mxu0 %v2262_v0 }
 0x441   : > { %v3386_v14 = vmax.f32 %v3063_v44, 0.0  ;;  %v2135_v31 = vpop.f32.mrf.mxu3  ;;  %v2731_v44 = vld [vmem:[%s9216_s16 + $0xf8] sm:$0xff] }
 0x442   : > { %v8014_v47 = vpop.eup %8013  ;;  %v2632_v32 = vmul.f32 1.442695, %v2538_v4  ;;  %v2136_v17 = vadd.f32 %v2135_v31, %v1967_v8  ;;  %v7762_v8 = vld [vmem:[#allocation10 + $0x164] sm:$0xf] }
 0x443   : > { %v2793_v18 = vmul.f32 %v8014_v47, %v2729_v37  ;;  %v9468_v59 = vpack.c.bf16 %v3386_v14, %v3384_v1 }
 0x444   : > { %v3231_v20 = vpop.f32.mrf.mxu2  ;;  %8015 = vpow2.f32 %v2632_v32  ;;  %v2223_v42 = vmax.f32 %v2136_v17, 0.0 }
 0x445   : > { %11748 = vst [vmem:[#allocation41_spill] sm:$0xff] %v9468_v59  ;;  %v2857_v38 = vadd.f32 %v2793_v18, %v2421_v56  ;;  %v3232_v7 = vadd.f32 %v3231_v20, %v9353_v6  ;;  %v2425_v2 = vpop.f32.mrf.mxu0 }
 0x446   : > { %v2426_v34 = vadd.f32 %v9395_v5, %v2425_v2  ;;  %v3065_v19 = vpop.f32.mrf.mxu1 }
 0x447   : > { %v3387_v23 = vmax.f32 %v3232_v7, 0.0  ;;  %v2906_v46 = vpack.c.bf16 %v2857_v38, %v2856_v36  ;;  %v3066_v57 = vadd.f32 %v3065_v19, %v9345_v49  ;;  %v7453_v19 = vld [vmem:[#allocation10 + $0x170] sm:$0xf0] }
 0x448   : > { %v2539_v28 = vmul.f32 0.5, %v2426_v34  ;;  %v7456_v17 = vor.u32 %v7762_v8, %v7453_v19 }
 0x449   : > { %v9477_v56 = vpack.c.bf16 %v3387_v23, %v3385_v15  ;;  %v2137_v50 = vpop.f32.mrf.mxu3  ;;  %3104 = vmatmul.bf16.gmra.mxu1 %v2906_v46  ;;  %3273 = vmatmul.bf16.gmra.mxu2 %v2906_v46  ;;  %v3388_v21 = vmax.f32 %v3066_v57, 0.0  ;;  %v7451_v15 = vld [vmem:[#allocation10 + $0x160] sm:$0xf]  ;;  %v1972_v23 = vadd.f32 %v9322_v51, %v9029_v48 }
 0x44a   : > { %v2634_v26 = vmul.f32 1.442695, %v2539_v28  ;;  %v2138_v43 = vadd.f32 %v2137_v50, %v1969_v25  ;;  %v8016_v39 = vpop.eup %8015  ;;  %v7764_v28 = vld [vmem:[#allocation10 + $0x16c] sm:$0xf0]  ;;  %4461 = vmatpush.bf16.msra.mxu2 %v7456_v17 }
 0x44b   : > { %11749 = vst [vmem:[#allocation42_spill] sm:$0xff] %v9477_v56  ;;  %v2794_v4 = vmul.f32 %v8016_v39, %v2730_v13 }
 0x44c   : > { %8017 = vpow2.f32 %v2634_v26  ;;  %v2224_v9 = vmax.f32 %v2138_v43, 0.0  ;;  %v3234_v24 = vpop.f32.mrf.mxu2 }
 0x44d   : > { %v2428_v33 = vpop.f32.mrf.mxu0  ;;  %v3235_v18 = vadd.f32 %v3234_v24, %v9353_v6  ;;  %v2858_v36 = vadd.f32 %v2794_v4, %v9461_v41  ;;  %v1974_v41 = vadd.f32 %v9322_v51, %v9034_v63  ;;  %v2732_v4 = vld [vmem:[%s9216_s16 + $0x100] sm:$0xff] }
 0x44e   : > { %v9482_v27 = vadd.f32 %v9395_v5, %v2428_v33  ;;  %v3067_v54 = vpop.f32.mrf.mxu1  ;;  %3963 = vmatmul.bf16.gmra.mxu3 %v9379_v16  ;;  %v2263_v62 = vpack.c.bf16 %v2224_v9, %v2223_v42  ;;  %v7452_v42 = vor.u32 %v7764_v28, %v7451_v15 }
 0x44f   : > { %v3068_v0 = vadd.f32 %v3067_v54, %v9345_v49  ;;  %v3389_v50 = vmax.f32 %v3235_v18, 0.0  ;;  %v2733_v18 = vld [vmem:[%s9216_s16 + $0x108] sm:$0xff] }
 0x450   : > { %v2540_v37 = vmul.f32 0.5, %v9482_v27  ;;  %2467 = vmatmul.bf16.gmra.mxu0 %v2263_v62 }
 0x451   : > { %v3390_v1 = vmax.f32 %v3068_v0, 0.0  ;;  %v2140_v14 = vpop.f32.mrf.mxu3  ;;  %4123 = vmatpush.bf16.msra.mxu0 %v7452_v42  ;;  %v7730_v0 = vld [vmem:[#allocation10 + $0x64] sm:$0xf] }
 0x452   : > { %v8018_v31 = vpop.eup %8017  ;;  %v2636_v32 = vmul.f32 1.442695, %v2540_v37 }
 0x453   : > { %v2795_v47 = vmul.f32 %v8018_v31, %v2731_v44  ;;  %v9489_v55 = vpack.c.bf16 %v3390_v1, %v3388_v21  ;;  %v7325_v44 = vld [vmem:[#allocation10 + $0x70] sm:$0xf0] }
 0x454   : > { %v3236_v20 = vpop.f32.mrf.mxu2  ;;  %8019 = vpow2.f32 %v2636_v32  ;;  %v7328_v31 = vor.u32 %v7730_v0, %v7325_v44 }
 0x455   : > { %11750 = vst [vmem:[#allocation43_spill] sm:$0xff] %v9489_v55  ;;  %v2859_v38 = vadd.f32 %v2795_v47, %v2426_v34  ;;  %v3237_v7 = vadd.f32 %v3236_v20, %v9353_v6  ;;  %v2430_v2 = vpop.f32.mrf.mxu0  ;;  %v2141_v34 = vadd.f32 %v2140_v14, %v1972_v23 }
 0x456   : > { %v2431_v46 = vadd.f32 %v9395_v5, %v2430_v2  ;;  %v3070_v25 = vpop.f32.mrf.mxu1  ;;  %4292 = vmatpush.bf16.msra.mxu1 %v7328_v31 }
 0x457   : > { %v3391_v26 = vmax.f32 %v3237_v7, 0.0  ;;  %v2907_v43 = vpack.c.bf16 %v2859_v38, %v2858_v36  ;;  %v2225_v39 = vmax.f32 %v2141_v34, 0.0  ;;  %v3071_v63 = vadd.f32 %v3070_v25, %v9345_v49 }
 0x458   : > { %v2541_v9 = vmul.f32 0.5, %v2431_v46 }
 0x459   : > { %v9498_v24 = vpack.c.bf16 %v3391_v26, %v3389_v50  ;;  %v2142_v48 = vpop.f32.mrf.mxu3  ;;  %3109 = vmatmul.bf16.gmra.mxu1 %v2907_v43  ;;  %3278 = vmatmul.bf16.gmra.mxu2 %v2907_v43  ;;  %v3392_v36 = vmax.f32 %v3071_v63, 0.0  ;;  %v1977_v43 = vadd.f32 %v9322_v51, %v9040_v11 }
 0x45a   : > { %v2638_v57 = vmul.f32 1.442695, %v2541_v9  ;;  %v2143_v33 = vadd.f32 %v2142_v48, %v1974_v41  ;;  %v8020_v37 = vpop.eup %8019 }
 0x45b   : > { %11751 = vst [vmem:[#allocation44_spill] sm:$0xff] %v9498_v24  ;;  %v2796_v20 = vmul.f32 %v8020_v37, %v2732_v4  ;;  %v2734_v37 = vld [vmem:[%s9216_s16 + $0x110] sm:$0xff] }
 0x45c   : > { %8021 = vpow2.f32 %v2638_v57  ;;  %v2226_v13 = vmax.f32 %v2143_v33, 0.0  ;;  %v3239_v54 = vpop.f32.mrf.mxu2  ;;  %v1979_v57 = vadd.f32 %v9322_v51, %v9043_v29 }
 0x45d   : > { %v2433_v62 = vpop.f32.mrf.mxu0  ;;  %v3240_v19 = vadd.f32 %v3239_v54, %v9353_v6  ;;  %v2860_v17 = vadd.f32 %v2796_v20, %v9482_v27 }
 0x45e   : > { %v9503_v21 = vadd.f32 %v9395_v5, %v2433_v62  ;;  %v3072_v1 = vpop.f32.mrf.mxu1  ;;  %3968 = vmatmul.bf16.gmra.mxu3 %v9405_v58  ;;  %v2264_v14 = vpack.c.bf16 %v2226_v13, %v2225_v39 }
 0x45f   : > { %v3073_v47 = vadd.f32 %v3072_v1, %v9345_v49  ;;  %v3393_v34 = vmax.f32 %v3240_v19, 0.0 }
 0x460   : > { %v2542_v32 = vmul.f32 0.5, %v9503_v21  ;;  %2472 = vmatmul.bf16.gmra.mxu0 %v2264_v14 }
 0x461   : > { %v3394_v38 = vmax.f32 %v3073_v47, 0.0  ;;  %v2145_v7 = vpop.f32.mrf.mxu3  ;;  %v2735_v47 = vld [vmem:[%s9216_s16 + $0x118] sm:$0xff] }
 0x462   : > { %v8022_v2 = vpop.eup %8021  ;;  %v2640_v23 = vmul.f32 1.442695, %v2542_v32  ;;  %v2146_v33 = vadd.f32 %v2145_v7, %v1977_v43  ;;  %v1982_v43 = vadd.f32 %v9322_v51, %v9049_v30 }
 0x463   : > { %v2797_v8 = vmul.f32 %v8022_v2, %v2733_v18  ;;  %v9510_v15 = vpack.c.bf16 %v3394_v38, %v3392_v36 }
 0x464   : > { %v3241_v25 = vpop.f32.mrf.mxu2  ;;  %8023 = vpow2.f32 %v2640_v23  ;;  %v2227_v54 = vmax.f32 %v2146_v33, 0.0  ;;  %v1984_v33 = vadd.f32 %v9322_v51, %v9054_v52  ;;  %v2736_v51 = vld [vmem:[%s9216_s16 + $0x120] sm:$0xff] }
 0x465   : > { %11752 = vst [vmem:[#allocation45_spill] sm:$0xff] %v9510_v15  ;;  %v2861_v28 = vadd.f32 %v2797_v8, %v2431_v46  ;;  %v3242_v50 = vadd.f32 %v3241_v25, %v9353_v6  ;;  %v2435_v26 = vpop.f32.mrf.mxu0 }
 0x466   : > { %v2436_v42 = vadd.f32 %v9395_v5, %v2435_v26  ;;  %v3075_v41 = vpop.f32.mrf.mxu1 }
 0x467   : > { %v3395_v9 = vmax.f32 %v3242_v50, 0.0  ;;  %v2908_v48 = vpack.c.bf16 %v2861_v28, %v2860_v17  ;;  %v3076_v0 = vadd.f32 %v3075_v41, %v9345_v49 }
 0x468   : > { %v2543_v27 = vmul.f32 0.5, %v2436_v42 }
 0x469   : > { %v9519_v46 = vpack.c.bf16 %v3395_v9, %v3393_v34  ;;  %v2147_v39 = vpop.f32.mrf.mxu3  ;;  %3114 = vmatmul.bf16.gmra.mxu1 %v2908_v48  ;;  %3283 = vmatmul.bf16.gmra.mxu2 %v2908_v48  ;;  %v3396_v20 = vmax.f32 %v3076_v0, 0.0 }
 0x46a   : > { %v2642_v11 = vmul.f32 1.442695, %v2543_v27  ;;  %v2148_v13 = vadd.f32 %v2147_v39, %v1979_v57  ;;  %v8024_v29 = vpop.eup %8023 }
 0x46b   : > { %11753 = vst [vmem:[#allocation46_spill] sm:$0xff] %v9519_v46  ;;  %v2798_v32 = vmul.f32 %v8024_v29, %v2734_v37 }
 0x46c   : > { %8025 = vpow2.f32 %v2642_v11  ;;  %v2228_v63 = vmax.f32 %v2148_v13, 0.0  ;;  %v3244_v62 = vpop.f32.mrf.mxu2 }
 0x46d   : > { %v2438_v44 = vpop.f32.mrf.mxu0  ;;  %v3245_v8 = vadd.f32 %v3244_v62, %v9353_v6  ;;  %v2862_v17 = vadd.f32 %v2798_v32, %v9503_v21 }
 0x46e   : > { %v9524_v4 = vadd.f32 %v9395_v5, %v2438_v44  ;;  %v3077_v1 = vpop.f32.mrf.mxu1  ;;  %3973 = vmatmul.bf16.gmra.mxu3 %v9426_v3  ;;  %v2265_v14 = vpack.c.bf16 %v2228_v63, %v2227_v54 }
 0x46f   : > { %v3078_v31 = vadd.f32 %v3077_v1, %v9345_v49  ;;  %v3397_v9 = vmax.f32 %v3245_v8, 0.0 }
 0x470   : > { %v2544_v18 = vmul.f32 0.5, %v9524_v4  ;;  %2477 = vmatmul.bf16.gmra.mxu0 %v2265_v14  ;;  %v2737_v14 = vld [vmem:[%s9216_s16 + $0x128] sm:$0xff] }
 0x471   : > { %v3398_v36 = vmax.f32 %v3078_v31, 0.0  ;;  %v2150_v38 = vpop.f32.mrf.mxu3 }
 0x472   : > { %v8026_v7 = vpop.eup %8025  ;;  %v2644_v23 = vmul.f32 1.442695, %v2544_v18  ;;  %v2151_v27 = vadd.f32 %v2150_v38, %v1982_v43 }
 0x473   : > { %v2799_v2 = vmul.f32 %v8026_v7, %v2735_v47  ;;  %v9531_v19 = vpack.c.bf16 %v3398_v36, %v3396_v20 }
 0x474   : > { %v3246_v25 = vpop.f32.mrf.mxu2  ;;  %8027 = vpow2.f32 %v2644_v23  ;;  %v2229_v13 = vmax.f32 %v2151_v27, 0.0 }
 0x475   : > { %11754 = vst [vmem:[#allocation47_spill] sm:$0xff] %v9531_v19  ;;  %v2863_v28 = vadd.f32 %v2799_v2, %v2436_v42  ;;  %v3247_v50 = vadd.f32 %v3246_v25, %v9353_v6  ;;  %v2440_v26 = vpop.f32.mrf.mxu0 }
 0x476   : > { %v2441_v41 = vadd.f32 %v9395_v5, %v2440_v26  ;;  %v3080_v34 = vpop.f32.mrf.mxu1  ;;  %v9559_v26 = vld [vmem:[%s11555_s5] ss:$0 sm:$0xff] }
 0x477   : > { %v3399_v48 = vmax.f32 %v3247_v50, 0.0  ;;  %v2909_v57 = vpack.c.bf16 %v2863_v28, %v2862_v17  ;;  %v3081_v62 = vadd.f32 %v3080_v34, %v9345_v49  ;;  %v1987_v43 = vadd.f32 %v9559_v26, %v9060_v45 }
 0x478   : > { %v2545_v21 = vmul.f32 0.5, %v2441_v41 }
 0x479   : > { %v9540_v42 = vpack.c.bf16 %v3399_v48, %v3397_v9  ;;  %v2152_v39 = vpop.f32.mrf.mxu3  ;;  %3119 = vmatmul.bf16.gmra.mxu1 %v2909_v57  ;;  %3288 = vmatmul.bf16.gmra.mxu2 %v2909_v57  ;;  %v3400_v18 = vmax.f32 %v3081_v62, 0.0 }
 0x47a   : > { %v2646_v30 = vmul.f32 1.442695, %v2545_v21  ;;  %v2153_v11 = vadd.f32 %v2152_v39, %v1984_v33  ;;  %v8028_v52 = vpop.eup %8027 }
 0x47b   : > { %11755 = vst [vmem:[#allocation48_spill] sm:$0xff] %v9540_v42  ;;  %v2800_v47 = vmul.f32 %v8028_v52, %v2736_v51 }
 0x47c   : > { %8029 = vpow2.f32 %v2646_v30  ;;  %v2230_v54 = vmax.f32 %v2153_v11, 0.0  ;;  %v3249_v63 = vpop.f32.mrf.mxu2 }
 0x47d   : > { %v2443_v0 = vpop.f32.mrf.mxu0  ;;  %v3250_v7 = vadd.f32 %v3249_v63, %v9353_v6  ;;  %v2864_v25 = vadd.f32 %v2800_v47, %v9524_v4  ;;  %v1989_v4 = vadd.f32 %v9559_v26, %v9065_v10 }
 0x47e   : > { %v9545_v44 = vadd.f32 %v9395_v5, %v2443_v0  ;;  %v3082_v29 = vpop.f32.mrf.mxu1  ;;  %3978 = vmatmul.bf16.gmra.mxu3 %v9447_v53  ;;  %v2266_v37 = vpack.c.bf16 %v2230_v54, %v2229_v13  ;;  %v2738_v0 = vld [vmem:[%s9216_s16 + $0x130] sm:$0xff] }
 0x47f   : > { %v3083_v1 = vadd.f32 %v3082_v29, %v9345_v49  ;;  %v3401_v48 = vmax.f32 %v3250_v7, 0.0 }
 0x480   : > { %v2546_v31 = vmul.f32 0.5, %v9545_v44  ;;  %2482 = vmatmul.bf16.gmra.mxu0 %v2266_v37 }
 0x481   : > { %v3402_v32 = vmax.f32 %v3083_v1, 0.0  ;;  %v2155_v20 = vpop.f32.mrf.mxu3  ;;  %v2739_v1 = vld [vmem:[%s9216_s16 + $0x138] sm:$0xff] }
 0x482   : > { %v8030_v36 = vpop.eup %8029  ;;  %v2648_v8 = vmul.f32 1.442695, %v2546_v31 }
 0x483   : > { %v2801_v38 = vmul.f32 %v8030_v36, %v2737_v14  ;;  %v9552_v2 = vpack.c.bf16 %v3402_v32, %v3400_v18 }
 0x484   : > { %v3251_v23 = vpop.f32.mrf.mxu2  ;;  %8031 = vpow2.f32 %v2648_v8 }
 0x485   : > { %11756 = vst [vmem:[#allocation49_spill] sm:$0xff] %v9552_v2  ;;  %v2865_v17 = vadd.f32 %v2801_v38, %v2441_v41  ;;  %v3252_v28 = vadd.f32 %v3251_v23, %v9353_v6  ;;  %v2445_v50 = vpop.f32.mrf.mxu0  ;;  %v2156_v41 = vadd.f32 %v2155_v20, %v1987_v43  ;;  %v7758_v43 = vld [vmem:[#allocation10 + $0x144] sm:$0xf] }
 0x486   : > { %v2446_v34 = vadd.f32 %v9395_v5, %v2445_v50  ;;  %v3085_v9 = vpop.f32.mrf.mxu1 }
 0x487   : > { %v3403_v57 = vmax.f32 %v3252_v28, 0.0  ;;  %v2910_v33 = vpack.c.bf16 %v2865_v17, %v2864_v25  ;;  %v2231_v11 = vmax.f32 %v2156_v41, 0.0  ;;  %v3086_v63 = vadd.f32 %v3085_v9, %v9345_v49  ;;  %v7437_v9 = vld [vmem:[#allocation10 + $0x150] sm:$0xf0] }
 0x488   : > { %v2547_v27 = vmul.f32 0.5, %v2446_v34 }
 0x489   : > { %v9566_v21 = vpack.c.bf16 %v3403_v57, %v3401_v48  ;;  %v2157_v39 = vpop.f32.mrf.mxu3  ;;  %3124 = vmatmul.bf16.gmra.mxu1 %v2910_v33  ;;  %3293 = vmatmul.bf16.gmra.mxu2 %v2910_v33  ;;  %v3404_v47 = vmax.f32 %v3086_v63, 0.0  ;;  %v7435_v48 = vld [vmem:[#allocation10 + $0x140] sm:$0xf] }
 0x48a   : > { %v2650_v45 = vmul.f32 1.442695, %v2547_v27  ;;  %v2158_v30 = vadd.f32 %v2157_v39, %v1989_v4  ;;  %v8032_v10 = vpop.eup %8031  ;;  %v11759_v57 = vld [vmem:[#allocation27_spill] sm:$0xff]  ;;  %v7440_v27 = vor.u32 %v7758_v43, %v7437_v9  ;;  %v7760_v39 = vld [vmem:[#allocation10 + $0x14c] sm:$0xf0] }
 0x48b   : > { %11757 = vst [vmem:[#allocation50_spill] sm:$0xff] %v9566_v21  ;;  %v2802_v31 = vmul.f32 %v8032_v10, %v2738_v0  ;;  %v1992_v33 = vadd.f32 %v9559_v26, %v11759_v57 }
 0x48c   : > { %8033 = vpow2.f32 %v2650_v45  ;;  %v2232_v13 = vmax.f32 %v2158_v30, 0.0  ;;  %v3254_v54 = vpop.f32.mrf.mxu2  ;;  %4462 = vmatpush.bf16.msra.mxu2 %v7440_v27 }
 0x48d   : > { %v2448_v62 = vpop.f32.mrf.mxu0  ;;  %v3255_v38 = vadd.f32 %v3254_v54, %v9353_v6  ;;  %v2866_v25 = vadd.f32 %v2802_v31, %v9545_v44  ;;  %v11760_v44 = vld [vmem:[#allocation28_spill] sm:$0xff] }
 0x48e   : > { %v9571_v52 = vadd.f32 %v9395_v5, %v2448_v62  ;;  %v3087_v51 = vpop.f32.mrf.mxu1  ;;  %3983 = vmatmul.bf16.gmra.mxu3 %v9468_v59  ;;  %v2267_v29 = vpack.c.bf16 %v2232_v13, %v2231_v11  ;;  %v7436_v13 = vor.u32 %v7760_v39, %v7435_v48 }
 0x48f   : > { %v3088_v37 = vadd.f32 %v3087_v51, %v9345_v49  ;;  %v3405_v45 = vmax.f32 %v3255_v38, 0.0 }
 0x490   : > { %v2548_v14 = vmul.f32 0.5, %v9571_v52  ;;  %2487 = vmatmul.bf16.gmra.mxu0 %v2267_v29 }
 0x491   : > { %v3406_v18 = vmax.f32 %v3088_v37, 0.0  ;;  %v2160_v32 = vpop.f32.mrf.mxu3  ;;  %4124 = vmatpush.bf16.msra.mxu0 %v7436_v13 }
 0x492   : > { %v8034_v20 = vpop.eup %8033  ;;  %v2652_v8 = vmul.f32 1.442695, %v2548_v14  ;;  %v2161_v54 = vadd.f32 %v2160_v32, %v1992_v33 }
 0x493   : > { %v2803_v36 = vmul.f32 %v8034_v20, %v2739_v1  ;;  %v9578_v7 = vpack.c.bf16 %v3406_v18, %v3404_v47  ;;  %v7726_v47 = vld [vmem:[#allocation10 + $0x44] sm:$0xf]  ;;  %v7309_v18 = vld [vmem:[#allocation10 + $0x50] sm:$0xf0] }
 0x494   : > { %v3256_v23 = vpop.f32.mrf.mxu2  ;;  %8035 = vpow2.f32 %v2652_v8  ;;  %v2233_v29 = vmax.f32 %v2161_v54, 0.0  ;;  %v2740_v20 = vld [vmem:[%s9216_s16 + $0x140] sm:$0xff] }
 0x495   : > { %11758 = vst [vmem:[#allocation51_spill] sm:$0xff] %v9578_v7  ;;  %v2867_v17 = vadd.f32 %v2803_v36, %v2446_v34  ;;  %v3257_v28 = vadd.f32 %v3256_v23, %v9353_v6  ;;  %v2450_v50 = vpop.f32.mrf.mxu0  ;;  %v1994_v34 = vadd.f32 %v9559_v26, %v11760_v44  ;;  %v7312_v23 = vor.u32 %v7726_v47, %v7309_v18 }
 0x496   : > { %v2451_v4 = vadd.f32 %v9395_v5, %v2450_v50  ;;  %v3090_v41 = vpop.f32.mrf.mxu1 }
 0x497   : > { %v3407_v30 = vmax.f32 %v3257_v28, 0.0  ;;  %v2911_v11 = vpack.c.bf16 %v2867_v17, %v2866_v25  ;;  %v3091_v14 = vadd.f32 %v3090_v41, %v9345_v49  ;;  %v2741_v17 = vld [vmem:[%s9216_s16 + $0x148] sm:$0xff]  ;;  %4293 = vmatpush.bf16.msra.mxu1 %v7312_v23 }
 0x498   : > { %v2549_v63 = vmul.f32 0.5, %v2451_v4 }
 0x499   : > { %v9587_v62 = vpack.c.bf16 %v3407_v30, %v3405_v45  ;;  %v2162_v10 = vpop.f32.mrf.mxu3  ;;  %3129 = vmatmul.bf16.gmra.mxu1 %v2911_v11  ;;  %3298 = vmatmul.bf16.gmra.mxu2 %v2911_v11  ;;  %v3408_v43 = vmax.f32 %v3091_v14, 0.0 }
 0x49a   : > { %v2654_v0 = vmul.f32 1.442695, %v2549_v63  ;;  %v2163_v51 = vadd.f32 %v2162_v10, %v1994_v34  ;;  %v8036_v32 = vpop.eup %8035  ;;  %v11763_v34 = vld [vmem:[#allocation29_spill] sm:$0xff] }
 0x49b   : > { %11761 = vst [vmem:[#allocation27_spill] sm:$0xff] %v9587_v62  ;;  %v2804_v50 = vmul.f32 %v8036_v32, %v2740_v20  ;;  %v1997_v54 = vadd.f32 %v9559_v26, %v11763_v34 }
 0x49c   : > { %8037 = vpow2.f32 %v2654_v0  ;;  %v2234_v37 = vmax.f32 %v2163_v51, 0.0  ;;  %v3259_v1 = vpop.f32.mrf.mxu2  ;;  %v7419_v0 = vld [vmem:[#allocation10 + $0x120] sm:$0xf]  ;;  %v7756_v51 = vld [vmem:[#allocation10 + $0x12c] sm:$0xf0] }
 0x49d   : > { %v2453_v31 = vpop.f32.mrf.mxu0  ;;  %v3260_v41 = vadd.f32 %v3259_v1, %v9353_v6  ;;  %v2868_v30 = vadd.f32 %v2804_v50, %v9571_v52  ;;  %v7420_v14 = vor.u32 %v7756_v51, %v7419_v0 }
 0x49e   : > { %v9592_v36 = vadd.f32 %v9395_v5, %v2453_v31  ;;  %v3092_v38 = vpop.f32.mrf.mxu1  ;;  %3988 = vmatmul.bf16.gmra.mxu3 %v9489_v55  ;;  %v2268_v8 = vpack.c.bf16 %v2234_v37, %v2233_v29  ;;  %v11764_v31 = vld [vmem:[#allocation30_spill] sm:$0xff]  ;;  %v7750_v55 = vld [vmem:[#allocation10 + $0x104] sm:$0xf] }
 0x49f   : > { %v3093_v25 = vadd.f32 %v3092_v38, %v9345_v49  ;;  %v3409_v29 = vmax.f32 %v3260_v41, 0.0  ;;  %v1999_v47 = vadd.f32 %v9559_v26, %v11764_v31  ;;  %4125 = vmatpush.bf16.msra.mxu0 %v7420_v14  ;;  %v7403_v38 = vld [vmem:[#allocation10 + $0x100] sm:$0xf] }
 0x4a0   : > { %v2550_v28 = vmul.f32 0.5, %v9592_v36  ;;  %2492 = vmatmul.bf16.gmra.mxu0 %v2268_v8  ;;  %v7752_v8 = vld [vmem:[#allocation10 + $0x10c] sm:$0xf0] }
 0x4a1   : > { %v3410_v9 = vmax.f32 %v3093_v25, 0.0  ;;  %v2165_v48 = vpop.f32.mrf.mxu3  ;;  %v7404_v23 = vor.u32 %v7752_v8, %v7403_v38 }
 0x4a2   : > { %v8038_v57 = vpop.eup %8037  ;;  %v2656_v39 = vmul.f32 1.442695, %v2550_v28  ;;  %v2166_v52 = vadd.f32 %v2165_v48, %v1997_v54  ;;  %v2742_v48 = vld [vmem:[%s9216_s16 + $0x150] sm:$0xff] }
 0x4a3   : > { %v2805_v33 = vmul.f32 %v8038_v57, %v2741_v17  ;;  %v9599_v27 = vpack.c.bf16 %v3410_v9, %v3408_v43  ;;  %v9615_v57 = vld [vmem:[%s11557_s7] ss:$0 sm:$0xff]  ;;  %4126 = vmatpush.bf16.msra.mxu0 %v7404_v23 }
 0x4a4   : > { %v3261_v45 = vpop.f32.mrf.mxu2  ;;  %8039 = vpow2.f32 %v2656_v39  ;;  %v2235_v25 = vmax.f32 %v2166_v52, 0.0 }
 0x4a5   : > { %11762 = vst [vmem:[#allocation28_spill] sm:$0xff] %v9599_v27  ;;  %v2869_v11 = vadd.f32 %v2805_v33, %v2451_v4  ;;  %v3262_v13 = vadd.f32 %v3261_v45, %v9353_v6  ;;  %v2455_v44 = vpop.f32.mrf.mxu0 }
 0x4a6   : > { %v2456_v63 = vadd.f32 %v9395_v5, %v2455_v44  ;;  %v3095_v10 = vpop.f32.mrf.mxu1 }
 0x4a7   : > { %v3411_v37 = vmax.f32 %v3262_v13, 0.0  ;;  %v2912_v1 = vpack.c.bf16 %v2869_v11, %v2868_v30  ;;  %v3096_v50 = vadd.f32 %v3095_v10, %v9345_v49  ;;  %v2743_v30 = vld [vmem:[%s9216_s16 + $0x158] sm:$0xff] }
 0x4a8   : > { %v2551_v4 = vmul.f32 0.5, %v2456_v63 }
 0x4a9   : > { %v9608_v18 = vpack.c.bf16 %v3411_v37, %v3409_v29  ;;  %v2167_v32 = vpop.f32.mrf.mxu3  ;;  %3134 = vmatmul.bf16.gmra.mxu1 %v2912_v1  ;;  %3303 = vmatmul.bf16.gmra.mxu2 %v2912_v1  ;;  %v3412_v44 = vmax.f32 %v3096_v50, 0.0 }
 0x4aa   : > { %v2658_v5 = vmul.f32 1.442695, %v2551_v4  ;;  %v2168_v20 = vadd.f32 %v2167_v32, %v1999_v47  ;;  %v8040_v9 = vpop.eup %8039  ;;  %v11766_v4 = vld [vmem:[#allocation31_spill] sm:$0xff] }
 0x4ab   : > { %v2806_v13 = vmul.f32 %v8040_v9, %v2742_v48  ;;  %v2002_v32 = vadd.f32 %v9559_v26, %v11766_v4 }
 0x4ac   : > { %8041 = vpow2.f32 %v2658_v5  ;;  %v2236_v17 = vmax.f32 %v2168_v20, 0.0  ;;  %v3264_v28 = vpop.f32.mrf.mxu2 }
 0x4ad   : > { %v2458_v43 = vpop.f32.mrf.mxu0  ;;  %v3265_v51 = vadd.f32 %v3264_v28, %v9353_v6  ;;  %v2870_v14 = vadd.f32 %v2806_v13, %v9592_v36 }
 0x4ae   : > { %v9618_v33 = vadd.f32 %v9615_v57, %v2458_v43  ;;  %v3097_v41 = vpop.f32.mrf.mxu1  ;;  %3993 = vmatmul.bf16.gmra.mxu3 %v9510_v15  ;;  %v2269_v39 = vpack.c.bf16 %v2236_v17, %v2235_v25  ;;  %v11767_v25 = vld [vmem:[#allocation32_spill] sm:$0xff] }
 0x4af   : > { %v3098_v45 = vadd.f32 %v3097_v41, %v9345_v49  ;;  %v3413_v38 = vmax.f32 %v3265_v51, 0.0  ;;  %v2004_v17 = vadd.f32 %v9559_v26, %v11767_v25 }
 0x4b0   : > { %v2552_v11 = vmul.f32 0.5, %v9618_v33  ;;  %2497 = vmatmul.bf16.gmra.mxu0 %v2269_v39 }
 0x4b1   : > { %v3414_v34 = vmax.f32 %v3098_v45, 0.0  ;;  %v2170_v54 = vpop.f32.mrf.mxu3 }
 0x4b2   : > { %v8042_v10 = vpop.eup %8041  ;;  %v2660_v37 = vmul.f32 1.442695, %v2552_v11  ;;  %v2171_v28 = vadd.f32 %v2170_v54, %v2002_v32  ;;  %v2744_v11 = vld [vmem:[%s9216_s16 + $0x160] sm:$0xff] }
 0x4b3   : > { %v2807_v0 = vmul.f32 %v8042_v10, %v2743_v30  ;;  %v9625_v29 = vpack.c.bf16 %v3414_v34, %v3412_v44  ;;  %v2745_v10 = vld [vmem:[%s9216_s16 + $0x168] sm:$0xff] }
 0x4b4   : > { %v3266_v1 = vpop.f32.mrf.mxu2  ;;  %8043 = vpow2.f32 %v2660_v37  ;;  %v2237_v48 = vmax.f32 %v2171_v28, 0.0 }
 0x4b5   : > { %11765 = vst [vmem:[#allocation29_spill] sm:$0xff] %v9625_v29  ;;  %v2871_v31 = vadd.f32 %v2807_v0, %v2456_v63  ;;  %v3267_v47 = vadd.f32 %v3266_v1, %v9353_v6  ;;  %v2460_v52 = vpop.f32.mrf.mxu0 }
 0x4b6   : > { %v2461_v5 = vadd.f32 %v9615_v57, %v2460_v52  ;;  %v3100_v20 = vpop.f32.mrf.mxu1 }
 0x4b7   : > { %v3415_v8 = vmax.f32 %v3267_v47, 0.0  ;;  %v2913_v23 = vpack.c.bf16 %v2871_v31, %v2870_v14  ;;  %v3101_v45 = vadd.f32 %v3100_v20, %v9345_v49 }
 0x4b8   : > { %v2553_v36 = vmul.f32 0.5, %v2461_v5 }
 0x4b9   : > { %v9634_v63 = vpack.c.bf16 %v3415_v8, %v3413_v38  ;;  %v2172_v50 = vpop.f32.mrf.mxu3  ;;  %3139 = vmatmul.bf16.gmra.mxu1 %v2913_v23  ;;  %3308 = vmatmul.bf16.gmra.mxu2 %v2913_v23  ;;  %v3416_v37 = vmax.f32 %v3101_v45, 0.0 }
 0x4ba   : > { %v2662_v43 = vmul.f32 1.442695, %v2553_v36  ;;  %v2173_v9 = vadd.f32 %v2172_v50, %v2004_v17  ;;  %v8044_v26 = vpop.eup %8043 }
 0x4bb   : > { %11768 = vst [vmem:[#allocation30_spill] sm:$0xff] %v9634_v63  ;;  %v2808_v51 = vmul.f32 %v8044_v26, %v2744_v11  ;;  %v2746_v26 = vld [vmem:[%s9216_s16 + $0x170] sm:$0xff] }
 0x4bc   : > { %8045 = vpow2.f32 %v2662_v43  ;;  %v2238_v41 = vmax.f32 %v2173_v9, 0.0  ;;  %v3269_v39 = vpop.f32.mrf.mxu2 }
 0x4bd   : > { %v2463_v30 = vpop.f32.mrf.mxu0  ;;  %v3270_v52 = vadd.f32 %v3269_v39, %v9353_v6  ;;  %v2872_v38 = vadd.f32 %v2808_v51, %v9618_v33 }
 0x4be   : > { %v2464_v13 = vadd.f32 %v9615_v57, %v2463_v30  ;;  %v3102_v44 = vpop.f32.mrf.mxu1  ;;  %3998 = vmatmul.bf16.gmra.mxu3 %v9531_v19  ;;  %v2270_v34 = vpack.c.bf16 %v2238_v41, %v2237_v48 }
 0x4bf   : > { %v3103_v54 = vadd.f32 %v3102_v44, %v9345_v49  ;;  %v3417_v36 = vmax.f32 %v3270_v52, 0.0 }
 0x4c0   : > { %v2554_v0 = vmul.f32 0.5, %v2464_v13  ;;  %2502 = vmatmul.bf16.gmra.mxu0 %v2270_v34 }
 0x4c1   : > { %v3418_v1 = vmax.f32 %v3103_v54, 0.0  ;;  %v9642_v14 = vpop.f32.mrf.mxu3  ;;  %v2747_v54 = vld [vmem:[%s9216_s16 + $0x178] sm:$0xff] }
 0x4c2   : > { %v8046_v31 = vpop.eup %8045  ;;  %v2664_v32 = vmul.f32 1.442695, %v2554_v0 }
 0x4c3   : > { %v2809_v47 = vmul.f32 %v8046_v31, %v2745_v10  ;;  %v9645_v4 = vpack.c.bf16 %v3418_v1, %v3416_v37 }
 0x4c4   : > { %v3271_v20 = vpop.f32.mrf.mxu2  ;;  %8047 = vpow2.f32 %v2664_v32 }
 0x4c5   : > { %11769 = vst [vmem:[#allocation31_spill] sm:$0xff] %v9645_v4  ;;  %v2873_v8 = vadd.f32 %v2809_v47, %v2461_v5  ;;  %v3272_v23 = vadd.f32 %v3271_v20, %v9353_v6  ;;  %v2465_v25 = vpop.f32.mrf.mxu0 }
 0x4c6   : > { %v2466_v17 = vadd.f32 %v9615_v57, %v2465_v25  ;;  %v3105_v28 = vpop.f32.mrf.mxu1 }
 0x4c7   : > { %v3419_v50 = vmax.f32 %v3272_v23, 0.0  ;;  %v2914_v43 = vpack.c.bf16 %v2873_v8, %v2872_v38  ;;  %v3106_v39 = vadd.f32 %v3105_v28, %v9345_v49 }
 0x4c8   : > { %v2555_v9 = vmul.f32 0.5, %v2466_v17 }
 0x4c9   : > { %v9650_v48 = vpack.c.bf16 %v3419_v50, %v3417_v36  ;;  %3144 = vmatmul.bf16.gmra.mxu1 %v2914_v43  ;;  %3313 = vmatmul.bf16.gmra.mxu2 %v2914_v43  ;;  %v9652_v41 = vpop.f32.mrf.mxu3  ;;  %v3420_v51 = vmax.f32 %v3106_v39, 0.0  ;;  %v7754_v36 = vld [vmem:[#allocation10 + $0x124] sm:$0xf]  ;;  %v7421_v50 = vld [vmem:[#allocation10 + $0x130] sm:$0xf0] }
 0x4ca   : > { %v2666_v33 = vmul.f32 1.442695, %v2555_v9  ;;  %v8048_v30 = vpop.eup %8047 }
 0x4cb   : > { %11770 = vst [vmem:[#allocation32_spill] sm:$0xff] %v9650_v48  ;;  %v2810_v0 = vmul.f32 %v8048_v30, %v2746_v26 }
 0x4cc   : > { %8049 = vpow2.f32 %v2666_v33  ;;  %v3274_v5 = vpop.f32.mrf.mxu2  ;;  %v7424_v33 = vor.u32 %v7754_v36, %v7421_v50 }
 0x4cd   : > { %v2468_v45 = vpop.f32.mrf.mxu0  ;;  %v3275_v52 = vadd.f32 %v3274_v5, %v9353_v6  ;;  %v2874_v8 = vadd.f32 %v2810_v0, %v2464_v13  ;;  %v7293_v0 = vld [vmem:[#allocation10 + $0x30] sm:$0xf0] }
 0x4ce   : > { %v9657_v11 = vadd.f32 %v9615_v57, %v2468_v45  ;;  %v3107_v44 = vpop.f32.mrf.mxu1  ;;  %4003 = vmatmul.bf16.gmra.mxu3 %v9552_v2  ;;  %4463 = vmatpush.bf16.msra.mxu2 %v7424_v33 }
 0x4cf   : > { %v3108_v34 = vadd.f32 %v3107_v44, %v9345_v49  ;;  %v3421_v39 = vmax.f32 %v3275_v52, 0.0 }
 0x4d0   : > { %v2556_v10 = vmul.f32 0.5, %v9657_v11  ;;  %4127 = vmatmul.bf16.vlgmr.msra.gmra.mxu0 %v9367_v22 }
 0x4d1   : > { %v3422_v37 = vmax.f32 %v3108_v34, 0.0  ;;  %v9664_v1 = vpop.f32.mrf.mxu3 }
 0x4d2   : > { %v8050_v31 = vpop.eup %8049  ;;  %v2668_v20 = vmul.f32 1.442695, %v2556_v10  ;;  %v7722_v10 = vld [vmem:[#allocation10 + $0x24] sm:$0xf] }
 0x4d3   : > { %v2811_v47 = vmul.f32 %v8050_v31, %v2747_v54  ;;  %v9667_v32 = vpack.c.bf16 %v3422_v37, %v3420_v51  ;;  %v2748_v37 = vld [vmem:[%s9216_s16 + $0x180] sm:$0xff]  ;;  %v7296_v52 = vor.u32 %v7722_v10, %v7293_v0 }
 0x4d4   : > { %v3276_v38 = vpop.f32.mrf.mxu2  ;;  %8051 = vpow2.f32 %v2668_v20 }
 0x4d5   : > { %11771 = vst [vmem:[#allocation52_spill] sm:$0xff] %v9667_v32  ;;  %v2875_v23 = vadd.f32 %v2811_v47, %v2466_v17  ;;  %v3277_v25 = vadd.f32 %v3276_v38, %v9353_v6  ;;  %v2470_v28 = vpop.f32.mrf.mxu0  ;;  %v2749_v38 = vld [vmem:[%s9216_s16 + $0x188] sm:$0xff]  ;;  %4294 = vmatpush.bf16.msra.mxu1 %v7296_v52 }
 0x4d6   : > { %v2471_v43 = vadd.f32 %v9615_v57, %v2470_v28  ;;  %v3110_v9 = vpop.f32.mrf.mxu1 }
 0x4d7   : > { %v3423_v45 = vmax.f32 %v3277_v25, 0.0  ;;  %v2915_v30 = vpack.c.bf16 %v2875_v23, %v2874_v8  ;;  %v3111_v34 = vadd.f32 %v3110_v9, %v9345_v49 }
 0x4d8   : > { %v2557_v5 = vmul.f32 0.5, %v2471_v43 }
 0x4d9   : > { %v9671_v26 = vpack.c.bf16 %v3423_v45, %v3421_v39  ;;  %3149 = vmatmul.bf16.gmra.mxu1 %v2915_v30  ;;  %3318 = vmatmul.bf16.gmra.mxu2 %v2915_v30  ;;  %v9673_v13 = vpop.f32.mrf.mxu3  ;;  %v3424_v25 = vmax.f32 %v3111_v34, 0.0 }
 0x4da   : > { %v2670_v17 = vmul.f32 1.442695, %v2557_v5  ;;  %v8052_v51 = vpop.eup %8051 }
 0x4db   : > { %11772 = vst [vmem:[#allocation53_spill] sm:$0xff] %v9671_v26  ;;  %v2812_v23 = vmul.f32 %v8052_v51, %v2748_v37 }
 0x4dc   : > { %8053 = vpow2.f32 %v2670_v17  ;;  %v3279_v44 = vpop.f32.mrf.mxu2 }
 0x4dd   : > { %v2473_v54 = vpop.f32.mrf.mxu0  ;;  %v3280_v33 = vadd.f32 %v3279_v44, %v9353_v6  ;;  %v2876_v5 = vadd.f32 %v2812_v23, %v9657_v11 }
 0x4de   : > { %v2474_v31 = vadd.f32 %v9615_v57, %v2473_v54  ;;  %v3112_v47 = vpop.f32.mrf.mxu1  ;;  %4008 = vmatmul.bf16.gmra.mxu3 %v9578_v7 }
 0x4df   : > { %v3113_v20 = vadd.f32 %v3112_v47, %v9345_v49  ;;  %v3425_v51 = vmax.f32 %v3280_v33, 0.0  ;;  %v2751_v33 = vld [vmem:[%s9216_s16 + $0x198] sm:$0xff] }
 0x4e0   : > { %v2558_v8 = vmul.f32 0.5, %v2474_v31  ;;  %4132 = vmatmul.bf16.gmra.mxu0 %v9388_v61 }
 0x4e1   : > { %v3426_v28 = vmax.f32 %v3113_v20, 0.0  ;;  %v9682_v36 = vpop.f32.mrf.mxu3 }
 0x4e2   : > { %v8054_v50 = vpop.eup %8053  ;;  %v2672_v45 = vmul.f32 1.442695, %v2558_v8 }
 0x4e3   : > { %v2813_v9 = vmul.f32 %v8054_v50, %v2749_v38  ;;  %v9685_v39 = vpack.c.bf16 %v3426_v28, %v3424_v25  ;;  %v2750_v25 = vld [vmem:[%s9216_s16 + $0x190] sm:$0xff] }
 0x4e4   : > { %v3281_v30 = vpop.f32.mrf.mxu2  ;;  %8055 = vpow2.f32 %v2672_v45 }
 0x4e5   : > { %11773 = vst [vmem:[#allocation54_spill] sm:$0xff] %v9685_v39  ;;  %v2877_v17 = vadd.f32 %v2813_v9, %v2471_v43  ;;  %v3282_v54 = vadd.f32 %v3281_v30, %v9353_v6  ;;  %v2475_v10 = vpop.f32.mrf.mxu0 }
 0x4e6   : > { %v2476_v0 = vadd.f32 %v9615_v57, %v2475_v10  ;;  %v3115_v34 = vpop.f32.mrf.mxu1 }
 0x4e7   : > { %v3427_v37 = vmax.f32 %v3282_v54, 0.0  ;;  %v2916_v47 = vpack.c.bf16 %v2877_v17, %v2876_v5  ;;  %v3116_v38 = vadd.f32 %v3115_v34, %v9345_v49 }
 0x4e8   : > { %v2559_v52 = vmul.f32 0.5, %v2476_v0 }
 0x4e9   : > { %v9690_v44 = vpack.c.bf16 %v3427_v37, %v3425_v51  ;;  %3154 = vmatmul.bf16.gmra.mxu1 %v2916_v47  ;;  %3323 = vmatmul.bf16.gmra.mxu2 %v2916_v47  ;;  %v9692_v20 = vpop.f32.mrf.mxu3  ;;  %v3428_v5 = vmax.f32 %v3116_v38, 0.0 }
 0x4ea   : > { %v2674_v11 = vmul.f32 1.442695, %v2559_v52  ;;  %v8056_v23 = vpop.eup %8055 }
 0x4eb   : > { %11774 = vst [vmem:[#allocation55_spill] sm:$0xff] %v9690_v44  ;;  %v2814_v30 = vmul.f32 %v8056_v23, %v2750_v25  ;;  %v7405_v44 = vld [vmem:[#allocation10 + $0x110] sm:$0xf0] }
 0x4ec   : > { %8057 = vpow2.f32 %v2674_v11  ;;  %v3284_v43 = vpop.f32.mrf.mxu2 }
 0x4ed   : > { %v2478_v8 = vpop.f32.mrf.mxu0  ;;  %v3285_v51 = vadd.f32 %v3284_v43, %v9353_v6  ;;  %v2878_v11 = vadd.f32 %v2814_v30, %v2474_v31 }
 0x4ee   : > { %v2479_v28 = vadd.f32 %v9615_v57, %v2478_v8  ;;  %v3117_v50 = vpop.f32.mrf.mxu1  ;;  %4013 = vmatmul.bf16.gmra.mxu3 %v9599_v27 }
 0x4ef   : > { %v3118_v9 = vadd.f32 %v3117_v50, %v9345_v49  ;;  %v3429_v38 = vmax.f32 %v3285_v51, 0.0 }
 0x4f0   : > { %v2560_v45 = vmul.f32 0.5, %v2479_v28  ;;  %4137 = vmatmul.bf16.gmra.mxu0 %v9414_v40 }
 0x4f1   : > { %v3430_v17 = vmax.f32 %v3118_v9, 0.0  ;;  %v9701_v54 = vpop.f32.mrf.mxu3 }
 0x4f2   : > { %v8058_v10 = vpop.eup %8057  ;;  %v2676_v47 = vmul.f32 1.442695, %v2560_v45 }
 0x4f3   : > { %v2815_v34 = vmul.f32 %v8058_v10, %v2751_v33  ;;  %v9704_v37 = vpack.c.bf16 %v3430_v17, %v3428_v5  ;;  %v2752_v17 = vld [vmem:[%s9216_s16 + $0x1a0] sm:$0xff] }
 0x4f4   : > { %v3286_v52 = vpop.f32.mrf.mxu2  ;;  %8059 = vpow2.f32 %v2676_v47  ;;  %v2753_v47 = vld [vmem:[%s9216_s16 + $0x1a8] sm:$0xff] }
 0x4f5   : > { %11775 = vst [vmem:[#allocation56_spill] sm:$0xff] %v9704_v37  ;;  %v2879_v8 = vadd.f32 %v2815_v34, %v2476_v0  ;;  %v3287_v50 = vadd.f32 %v3286_v52, %v9353_v6  ;;  %v2480_v27 = vpop.f32.mrf.mxu0 }
 0x4f6   : > { %v2481_v7 = vadd.f32 %v9615_v57, %v2480_v27  ;;  %v3120_v23 = vpop.f32.mrf.mxu1 }
 0x4f7   : > { %v3431_v25 = vmax.f32 %v3287_v50, 0.0  ;;  %v2917_v9 = vpack.c.bf16 %v2879_v8, %v2878_v11  ;;  %v3121_v30 = vadd.f32 %v3120_v23, %v9345_v49 }
 0x4f8   : > { %v2561_v33 = vmul.f32 0.5, %v2481_v7 }
 0x4f9   : > { %v9708_v43 = vpack.c.bf16 %v3431_v25, %v3429_v38  ;;  %3159 = vmatmul.bf16.gmra.mxu1 %v2917_v9  ;;  %3328 = vmatmul.bf16.gmra.mxu2 %v2917_v9  ;;  %v9710_v45 = vpop.f32.mrf.mxu3  ;;  %v3432_v8 = vmax.f32 %v3121_v30, 0.0 }
 0x4fa   : > { %v2678_v31 = vmul.f32 1.442695, %v2561_v33  ;;  %v8060_v5 = vpop.eup %8059 }
 0x4fb   : > { %11776 = vst [vmem:[#allocation57_spill] sm:$0xff] %v9708_v43  ;;  %v2816_v11 = vmul.f32 %v8060_v5, %v2752_v17 }
 0x4fc   : > { %8061 = vpow2.f32 %v2678_v31  ;;  %v3289_v0 = vpop.f32.mrf.mxu2 }
 0x4fd   : > { %v2483_v27 = vpop.f32.mrf.mxu0  ;;  %v3290_v9 = vadd.f32 %v3289_v0, %v9353_v6 }
 0x4fe   : > { %v2484_v10 = vadd.f32 %v9615_v57, %v2483_v27  ;;  %v3122_v34 = vpop.f32.mrf.mxu1  ;;  %4018 = vmatmul.bf16.gmra.mxu3 %v9625_v29  ;;  %v2880_v29 = vadd.f32 %v2816_v11, %v2479_v28 }
 0x4ff   : > { %v3123_v51 = vadd.f32 %v3122_v34, %v9345_v49  ;;  %v3433_v30 = vmax.f32 %v3290_v9, 0.0 }
 0x500   : > { %v2562_v52 = vmul.f32 0.5, %v2484_v10  ;;  %4142 = vmatmul.bf16.gmra.mxu0 %v9435_v60 }
 0x501   : > { %v3434_v50 = vmax.f32 %v3123_v51, 0.0  ;;  %v9719_v38 = vpop.f32.mrf.mxu3 }
 0x502   : > { %v8062_v23 = vpop.eup %8061  ;;  %v2680_v31 = vmul.f32 1.442695, %v2562_v52 }
 0x503   : > { %v2817_v25 = vmul.f32 %v8062_v23, %v2753_v47  ;;  %v9722_v33 = vpack.c.bf16 %v3434_v50, %v3432_v8  ;;  %v2754_v50 = vld [vmem:[%s9216_s16 + $0x1b0] sm:$0xff] }
 0x504   : > { %v3291_v27 = vpop.f32.mrf.mxu2  ;;  %8063 = vpow2.f32 %v2680_v31 }
 0x505   : > { %11777 = vst [vmem:[#allocation58_spill] sm:$0xff] %v9722_v33  ;;  %v2881_v2 = vadd.f32 %v2817_v25, %v2481_v7  ;;  %v3292_v34 = vadd.f32 %v3291_v27, %v9353_v6  ;;  %v2485_v19 = vpop.f32.mrf.mxu0  ;;  %v2755_v25 = vld [vmem:[%s9216_s16 + $0x1b8] sm:$0xff] }
 0x506   : > { %v2486_v15 = vadd.f32 %v9615_v57, %v2485_v19  ;;  %v3125_v5 = vpop.f32.mrf.mxu1 }
 0x507   : > { %v3435_v17 = vmax.f32 %v3292_v34, 0.0  ;;  %v2918_v51 = vpack.c.bf16 %v2881_v2, %v2880_v29  ;;  %v3126_v11 = vadd.f32 %v3125_v5, %v9345_v49 }
 0x508   : > { %v2563_v47 = vmul.f32 0.5, %v2486_v15 }
 0x509   : > { %v9726_v0 = vpack.c.bf16 %v3435_v17, %v3433_v30  ;;  %3164 = vmatmul.bf16.gmra.mxu1 %v2918_v51  ;;  %3333 = vmatmul.bf16.gmra.mxu2 %v2918_v51  ;;  %v9728_v52 = vpop.f32.mrf.mxu3  ;;  %v3436_v27 = vmax.f32 %v3126_v11, 0.0 }
 0x50a   : > { %v2682_v7 = vmul.f32 1.442695, %v2563_v47  ;;  %v8064_v8 = vpop.eup %8063 }
 0x50b   : > { %11778 = vst [vmem:[#allocation59_spill] sm:$0xff] %v9726_v0  ;;  %v2818_v31 = vmul.f32 %v8064_v8, %v2754_v50  ;;  %v7408_v50 = vor.u32 %v7750_v55, %v7405_v44  ;;  %v7718_v44 = vld [vmem:[#allocation10 + $0x4] sm:$0xf] }
 0x50c   : > { %8065 = vpow2.f32 %v2682_v7  ;;  %v3294_v28 = vpop.f32.mrf.mxu2 }
 0x50d   : > { %v2488_v19 = vpop.f32.mrf.mxu0  ;;  %v3295_v51 = vadd.f32 %v3294_v28, %v9353_v6  ;;  %4464 = vmatpush.bf16.msra.mxu2 %v7408_v50 }
 0x50e   : > { %v9733_v23 = vadd.f32 %v9615_v57, %v2488_v19  ;;  %v3127_v2 = vpop.f32.mrf.mxu1  ;;  %4023 = vmatmul.bf16.gmra.mxu3 %v9645_v4  ;;  %v2882_v4 = vadd.f32 %v2818_v31, %v2484_v10 }
 0x50f   : > { %v3128_v29 = vadd.f32 %v3127_v2, %v9345_v49 }
 0x510   : > { %v2564_v9 = vmul.f32 0.5, %v9733_v23  ;;  %4147 = vmatmul.bf16.gmra.mxu0 %v9456_v12 }
 0x511   : > { %v3438_v34 = vmax.f32 %v3128_v29, 0.0  ;;  %v9740_v5 = vpop.f32.mrf.mxu3  ;;  %v3437_v29 = vmax.f32 %v3295_v51, 0.0  ;;  %v2757_v51 = vld [vmem:[%s9216_s16 + $0x1c8] sm:$0xff] }
 0x512   : > { %v8066_v30 = vpop.eup %8065  ;;  %v2684_v7 = vmul.f32 1.442695, %v2564_v9 }
 0x513   : > { %v2819_v17 = vmul.f32 %v8066_v30, %v2755_v25  ;;  %v9743_v47 = vpack.c.bf16 %v3438_v34, %v3436_v27  ;;  %v2756_v27 = vld [vmem:[%s9216_s16 + $0x1c0] sm:$0xff] }
 0x514   : > { %v3296_v19 = vpop.f32.mrf.mxu2  ;;  %8067 = vpow2.f32 %v2684_v7 }
 0x515   : > { %11779 = vst [vmem:[#allocation60_spill] sm:$0xff] %v9743_v47  ;;  %v2883_v2 = vadd.f32 %v2819_v17, %v2486_v15  ;;  %v3297_v0 = vadd.f32 %v3296_v19, %v9353_v6  ;;  %v2490_v43 = vpop.f32.mrf.mxu0 }
 0x516   : > { %v2491_v11 = vadd.f32 %v9615_v57, %v2490_v43  ;;  %v3130_v8 = vpop.f32.mrf.mxu1 }
 0x517   : > { %v3439_v59 = vmax.f32 %v3297_v0, 0.0  ;;  %v2919_v25 = vpack.c.bf16 %v2883_v2, %v2882_v4  ;;  %v3131_v43 = vadd.f32 %v3130_v8, %v9345_v49  ;;  %v7277_v0 = vld [vmem:[#allocation10 + $0x10] sm:$0xf0] }
 0x518   : > { %v2565_v28 = vmul.f32 0.5, %v2491_v11 }
 0x519   : > { %v9747_v9 = vpack.c.bf16 %v3439_v59, %v3437_v29  ;;  %3169 = vmatmul.bf16.gmra.mxu1 %v2919_v25  ;;  %3338 = vmatmul.bf16.gmra.mxu2 %v2919_v25  ;;  %v9749_v15 = vpop.f32.mrf.mxu3  ;;  %v7280_v59 = vor.u32 %v7718_v44, %v7277_v0  ;;  %v3440_v2 = vmax.f32 %v3131_v43, 0.0 }
 0x51a   : > { %v2686_v10 = vmul.f32 1.442695, %v2565_v28  ;;  %v8068_v4 = vpop.eup %8067 }
 0x51b   : > { %11780 = vst [vmem:[#allocation61_spill] sm:$0xff] %v9747_v9  ;;  %4295 = vmatpush.bf16.msra.mxu1 %v7280_v59  ;;  %v2820_v19 = vmul.f32 %v8068_v4, %v2756_v27 }
 0x51c   : > { %8069 = vpow2.f32 %v2686_v10  ;;  %v3299_v31 = vpop.f32.mrf.mxu2 }
 0x51d   : > { %v2493_v55 = vpop.f32.mrf.mxu0  ;;  %v3300_v28 = vadd.f32 %v3299_v31, %v9353_v6  ;;  %v2884_v0 = vadd.f32 %v2820_v19, %v9733_v23 }
 0x51e   : > { %v2494_v34 = vadd.f32 %v9615_v57, %v2493_v55  ;;  %v3132_v30 = vpop.f32.mrf.mxu1  ;;  %4028 = vmatmul.bf16.gmra.mxu3 %v9667_v32 }
 0x51f   : > { %v3133_v17 = vadd.f32 %v3132_v30, %v9345_v49  ;;  %v3441_v27 = vmax.f32 %v3300_v28, 0.0  ;;  %v2759_v28 = vld [vmem:[%s9216_s16 + $0x1d8] sm:$0xff] }
 0x520   : > { %v2566_v7 = vmul.f32 0.5, %v2494_v34  ;;  %4152 = vmatmul.bf16.gmra.mxu0 %v9477_v56 }
 0x521   : > { %v3442_v8 = vmax.f32 %v3133_v17, 0.0  ;;  %v9758_v50 = vpop.f32.mrf.mxu3 }
 0x522   : > { %v8070_v29 = vpop.eup %8069  ;;  %v2688_v55 = vmul.f32 1.442695, %v2566_v7 }
 0x523   : > { %v2821_v25 = vmul.f32 %v8070_v29, %v2757_v51  ;;  %v9761_v10 = vpack.c.bf16 %v3442_v8, %v3440_v2  ;;  %v2758_v8 = vld [vmem:[%s9216_s16 + $0x1d0] sm:$0xff] }
 0x524   : > { %v3301_v44 = vpop.f32.mrf.mxu2  ;;  %8071 = vpow2.f32 %v2688_v55 }
 0x525   : > { %11781 = vst [vmem:[#allocation62_spill] sm:$0xff] %v9761_v10  ;;  %v2885_v30 = vadd.f32 %v2821_v25, %v2491_v11  ;;  %v3302_v32 = vadd.f32 %v3301_v44, %v9353_v6  ;;  %v2495_v9 = vpop.f32.mrf.mxu0 }
 0x526   : > { %v2496_v4 = vadd.f32 %v9615_v57, %v2495_v9  ;;  %v3135_v43 = vpop.f32.mrf.mxu1 }
 0x527   : > { %v3443_v59 = vmax.f32 %v3302_v32, 0.0  ;;  %v2920_v17 = vpack.c.bf16 %v2885_v30, %v2884_v0  ;;  %v3136_v19 = vadd.f32 %v3135_v43, %v9345_v49 }
 0x528   : > { %v2567_v51 = vmul.f32 0.5, %v2496_v4 }
 0x529   : > { %v9766_v31 = vpack.c.bf16 %v3443_v59, %v3441_v27  ;;  %3174 = vmatmul.bf16.gmra.mxu1 %v2920_v17  ;;  %3343 = vmatmul.bf16.gmra.mxu2 %v2920_v17  ;;  %v9768_v7 = vpop.f32.mrf.mxu3  ;;  %v3444_v0 = vmax.f32 %v3136_v19, 0.0 }
 0x52a   : > { %v2690_v23 = vmul.f32 1.442695, %v2567_v51  ;;  %v8072_v2 = vpop.eup %8071 }
 0x52b   : > { %11782 = vst [vmem:[#allocation63_spill] sm:$0xff] %v9766_v31  ;;  %v2822_v44 = vmul.f32 %v8072_v2, %v2758_v8 }
 0x52c   : > { %8073 = vpow2.f32 %v2690_v23  ;;  %v3304_v11 = vpop.f32.mrf.mxu2 }
 0x52d   : > { %v2498_v9 = vpop.f32.mrf.mxu0  ;;  %v3305_v17 = vadd.f32 %v3304_v11, %v9353_v6 }
 0x52e   : > { %v2499_v32 = vadd.f32 %v9615_v57, %v2498_v9  ;;  %v3137_v29 = vpop.f32.mrf.mxu1  ;;  %4033 = vmatmul.bf16.gmra.mxu3 %v9685_v39  ;;  %v2886_v39 = vadd.f32 %v2822_v44, %v2494_v34 }
 0x52f   : > { %v3138_v25 = vadd.f32 %v3137_v29, %v9345_v49  ;;  %v3445_v19 = vmax.f32 %v3305_v17, 0.0 }
 0x530   : > { %v2568_v55 = vmul.f32 0.5, %v2499_v32  ;;  %4157 = vmatmul.bf16.gmra.mxu0 %v9498_v24 }
 0x531   : > { %v3446_v30 = vmax.f32 %v3138_v25, 0.0  ;;  %v9777_v27 = vpop.f32.mrf.mxu3 }
 0x532   : > { %v8074_v43 = vpop.eup %8073  ;;  %v2692_v23 = vmul.f32 1.442695, %v2568_v55 }
 0x533   : > { %v2823_v59 = vmul.f32 %v8074_v43, %v2759_v28  ;;  %v9780_v51 = vpack.c.bf16 %v3446_v30, %v3444_v0  ;;  %v2760_v30 = vld [vmem:[%s9216_s16 + $0x1e0] sm:$0xff] }
 0x534   : > { %v3306_v9 = vpop.f32.mrf.mxu2  ;;  %8075 = vpow2.f32 %v2692_v23 }
 0x535   : > { %11783 = vst [vmem:[#allocation64_spill] sm:$0xff] %v9780_v51  ;;  %v2887_v31 = vadd.f32 %v2823_v59, %v2496_v4  ;;  %v3307_v29 = vadd.f32 %v3306_v9, %v9353_v6  ;;  %v2500_v56 = vpop.f32.mrf.mxu0  ;;  %v2761_v59 = vld [vmem:[%s9216_s16 + $0x1e8] sm:$0xff] }
 0x536   : > { %v2501_v24 = vadd.f32 %v9615_v57, %v2500_v56  ;;  %v3140_v2 = vpop.f32.mrf.mxu1 }
 0x537   : > { %v3447_v8 = vmax.f32 %v3307_v29, 0.0  ;;  %v2921_v25 = vpack.c.bf16 %v2887_v31, %v2886_v39  ;;  %v3141_v44 = vadd.f32 %v3140_v2, %v9345_v49 }
 0x538   : > { %v2569_v28 = vmul.f32 0.5, %v2501_v24 }
 0x539   : > { %v9784_v11 = vpack.c.bf16 %v3447_v8, %v3445_v19  ;;  %3179 = vmatmul.bf16.gmra.mxu1 %v2921_v25  ;;  %3348 = vmatmul.bf16.gmra.mxu2 %v2921_v25  ;;  %v9786_v55 = vpop.f32.mrf.mxu3  ;;  %v3448_v9 = vmax.f32 %v3141_v44, 0.0 }
 0x53a   : > { %v2694_v34 = vmul.f32 1.442695, %v2569_v28  ;;  %v8076_v0 = vpop.eup %8075 }
 0x53b   : > { %11784 = vst [vmem:[#allocation65_spill] sm:$0xff] %v9784_v11  ;;  %v2824_v23 = vmul.f32 %v8076_v0, %v2760_v30 }
 0x53c   : > { %8077 = vpow2.f32 %v2694_v34  ;;  %v3309_v4 = vpop.f32.mrf.mxu2  ;;  %v7395_v34 = vld [vmem:[#allocation10 + $0xe8] sm:$0xf] }
 0x53d   : > { %v2503_v56 = vpop.f32.mrf.mxu0  ;;  %v3310_v25 = vadd.f32 %v3309_v4, %v9353_v6  ;;  %v2888_v44 = vadd.f32 %v2824_v23, %v2499_v32  ;;  %v7779_v23 = vld [vmem:[#allocation10 + $0x1ec] sm:$0xf] }
 0x53e   : > { %v9791_v43 = vadd.f32 %v9615_v57, %v2503_v56  ;;  %v3142_v39 = vpop.f32.mrf.mxu1  ;;  %4038 = vmatmul.bf16.gmra.mxu3 %v9704_v37  ;;  %v7749_v56 = vld [vmem:[#allocation10 + $0xf4] sm:$0xf0] }
 0x53f   : > { %v3143_v31 = vadd.f32 %v3142_v39, %v9345_v49  ;;  %v7396_v11 = vor.u32 %v7749_v56, %v7395_v34 }
 0x540   : > { %v2570_v17 = vmul.f32 0.5, %v9791_v43  ;;  %4162 = vmatmul.bf16.gmra.mxu0 %v9519_v46  ;;  %v9806_v46 = vld [vmem:[%s11561_s11] sm:$0xf] }
 0x541   : > { %v3450_v29 = vmax.f32 %v3143_v31, 0.0  ;;  %v9798_v2 = vpop.f32.mrf.mxu3  ;;  %11786 = vst [vmem:[#allocation67_spill] sm:$0xff] %v9806_v46  ;;  %4626 = vmatpush.bf16.msrb.mxu3 %v7396_v11  ;;  %v7523_v11 = vld [vmem:[#allocation10 + $0x1e8] sm:$0xf] }
 0x542   : > { %v8078_v19 = vpop.eup %8077  ;;  %v2696_v37 = vmul.f32 1.442695, %v2570_v17  ;;  %v9811_v17 = vperm.slane %v9806_v46, 0 }
 0x543   : > { %v2825_v8 = vmul.f32 %v8078_v19, %v2761_v59  ;;  %v9801_v28 = vpack.c.bf16 %v3450_v29, %v3448_v9  ;;  %v3449_v9 = vmax.f32 %v3310_v25, 0.0  ;;  %v7781_v25 = vld [vmem:[#allocation10 + $0x1f4] sm:$0xf0] }
 0x544   : > { %v3311_v39 = vpop.f32.mrf.mxu2  ;;  %8079 = vpow2.f32 %v2696_v37 }
 0x545   : > { %11785 = vst [vmem:[#allocation66_spill] sm:$0xff] %v9801_v28  ;;  %v2889_v0 = vadd.f32 %v2825_v8, %v2501_v24  ;;  %v3312_v30 = vadd.f32 %v3311_v39, %v9353_v6  ;;  %v2505_v31 = vpop.f32.mrf.mxu0  ;;  %v3960_v39 = vadd.f32 %v9642_v14, %v9811_v17  ;;  %v7747_v14 = vld [vmem:[#allocation10 + $0xec] sm:$0xf] }
 0x546   : > { %v2506_v59 = vadd.f32 %v9615_v57, %v2505_v31  ;;  %v3145_v4 = vpop.f32.mrf.mxu1  ;;  %v7525_v57 = vld [vmem:[#allocation10 + $0x1f8] sm:$0xf0] }
 0x547   : > { %v3451_v29 = vmax.f32 %v3312_v30, 0.0  ;;  %v2922_v19 = vpack.c.bf16 %v2889_v0, %v2888_v44  ;;  %v7528_v8 = vor.u32 %v7779_v23, %v7525_v57  ;;  %v7524_v44 = vor.u32 %v7781_v25, %v7523_v11  ;;  %v2763_v23 = vld [vmem:[%s9216_s16 + $0x1f8] sm:$0xff] }
 0x548   : > { %v2571_v34 = vmul.f32 0.5, %v2506_v59  ;;  %v3146_v0 = vadd.f32 %v3145_v4, %v9345_v49 }
 0x549   : > { %v9813_v56 = vpack.c.bf16 %v3451_v29, %v3449_v9  ;;  %3184 = vmatmul.bf16.gmra.mxu1 %v2922_v19  ;;  %3353 = vmatmul.bf16.gmra.mxu2 %v2922_v19  ;;  %v9815_v24 = vpop.f32.mrf.mxu3  ;;  %v2762_v9 = vld [vmem:[%s9216_s16 + $0x1f0] sm:$0xff]  ;;  %s575_s16 = sand.u32 1, %s12064_s23  }
 0x54a   : > { %v2698_v32 = vmul.f32 1.442695, %v2571_v34  ;;  %5133 = vmatpush.bf16.msrb.mxu2 %v7528_v8  ;;  %v8080_v31 = vpop.eup %8079  ;;  %4795 = vmatpush.bf16.msrb.mxu0 %v7524_v44  ;;  %v3452_v11 = vmax.f32 %v3146_v0, 0.0  ;;  %v3962_v44 = vadd.f32 %v9652_v41, %v9811_v17  ;;  %s6852_s15 = sshll.u32 %s575_s16, 9  ;;  %s6687_s17 = scalar_lea.sflag [#allocation4], %s575_s16 }
 0x54b   : > { %11787 = vst [vmem:[#allocation68_spill] sm:$0xff] %v9813_v56  ;;  %v2826_v57 = vmul.f32 %v8080_v31, %v2762_v9  ;;  %s11228_s22 = scalar_lea.vmem [#allocation13], %s6852_s15  ;;  %s8289_s15 = scalar_lea.hbm %s12118_s26, 2048 }
 0x54c   : > { %8081 = vpow2.f32 %v2698_v32  ;;  %v3314_v37 = vpop.f32.mrf.mxu2  ;;  %v7397_v32 = vld [vmem:[#allocation10 + $0xf8] sm:$0xf0]  ;;  %s6699_s20 = sshll.u32 %s11228_s22, 4  ;;  %p8291_p4 = scmp.lt.s32.totalorder %s8289_s15, %s8285_s8  ;;  %s6700_s20 = int_to_ptr.vmem [resolvable:$true] %s6699_s20 }
 0x54d   : > { %v4128_v30 = vpop.f32.mrf.mxu0  ;;  %v7400_v8 = vor.u32 %v7747_v14, %v7397_v32 }
 0x54e   : > { %v4129_v29 = vadd.f32 %v4128_v30, %v3960_v39  ;;  %v3147_v19 = vpop.f32.mrf.mxu1  ;;  %4043 = vmatmul.bf16.gmra.mxu3 %v9722_v33  ;;  %v3315_v39 = vadd.f32 %v3314_v37, %v9353_v6  ;;  %v2890_v33 = vadd.f32 %v2826_v57, %v9791_v43  ;;  %p8292_p7 = por %p8291_p4, %p8290_p3 }
 0x54f   : > { %v3148_v34 = vadd.f32 %v3147_v19, %v9345_v49  ;;  %4964 = vmatpush.bf16.msrb.mxu1 %v7400_v8 }
 0x550   : > { %4167 = vmatmul.bf16.gmra.mxu0 %v9540_v42  ;;  %v3453_v14 = vmax.f32 %v3315_v39, 0.0  ;;  %p8293_p8 = pnand %p8292_p7, %p8288_p2 }
 0x551   : > { %v3454_v25 = vmax.f32 %v3148_v34, 0.0  ;;  %v9825_v4 = vpop.f32.mrf.mxu3 }
 0x552   : > { %v8082_v56 = vpop.eup %8081 }
 0x553   : > { %v2827_v46 = vmul.f32 %v8082_v56, %v2763_v23  ;;  %v9828_v30 = vpack.c.bf16 %v3454_v25, %v3452_v11  ;;  %v5302_v23 = vmax.f32 %v4129_v29, 0.0 }
 0x554   : > { %v3316_v19 = vpop.f32.mrf.mxu2 }
 0x555   : > { %11788 = vst [vmem:[#allocation69_spill] sm:$0xff] %v9828_v30  ;;  %v2891_v42 = vadd.f32 %v2827_v46, %v2506_v59  ;;  %v3317_v0 = vadd.f32 %v3316_v19, %v9353_v6  ;;  %v4130_v31 = vpop.f32.mrf.mxu0  ;;  %v3965_v46 = vadd.f32 %v9664_v1, %v9811_v17  ;;  %v3967_v1 = vadd.f32 %v9673_v13, %v9811_v17 }
 0x556   : > { %v4131_v9 = vadd.f32 %v4130_v31, %v3962_v44  ;;  %v3150_v34 = vpop.f32.mrf.mxu1  ;;  %v3970_v13 = vadd.f32 %v9682_v36, %v9811_v17  ;;  %v3972_v36 = vadd.f32 %v9692_v20, %v9811_v17  ;;  %v3975_v20 = vadd.f32 %v9701_v54, %v9811_v17  ;;  %v7379_v54 = vld [vmem:[#allocation10 + $0xc8] sm:$0xf] }
 0x557   : > { %v3455_v32 = vmax.f32 %v3317_v0, 0.0  ;;  %v2923_v56 = vpack.c.bf16 %v2891_v42, %v2890_v33  ;;  %v3151_v59 = vadd.f32 %v3150_v34, %v9345_v49 }
 0x558   : > { %v5306_v37 = vmax.f32 %v4131_v9, 0.0 }
 0x559   : > { %v9834_v11 = vpack.c.bf16 %v3455_v32, %v3453_v14  ;;  %3189 = vmatmul.bf16.gmra.mxu1 %v2923_v56  ;;  %3358 = vmatmul.bf16.gmra.mxu2 %v2923_v56  ;;  %v9836_v25 = vpop.f32.mrf.mxu3  ;;  %v3456_v33 = vmax.f32 %v3151_v59, 0.0 }
 0x55a   : > { %v9838_v41 = vpack.c.bf16 %v5306_v37, %v5302_v23 }
 0x55b   : > { %11789 = vst [vmem:[#allocation70_spill] sm:$0xff] %v9834_v11 }
 0x55c   : > { %11790 = vst [vmem:[#allocation71_spill] sm:$0xff] %v9838_v41  ;;  %v3319_v43 = vpop.f32.mrf.mxu2 }
 0x55d   : > { %v4133_v57 = vpop.f32.mrf.mxu0  ;;  %v3320_v19 = vadd.f32 %v3319_v43, %v9353_v6 }
 0x55e   : > { %v4134_v8 = vadd.f32 %v4133_v57, %v3965_v46  ;;  %v3152_v39 = vpop.f32.mrf.mxu1  ;;  %4048 = vmatmul.bf16.gmra.mxu3 %v9743_v47 }
 0x55f   : > { %v3153_v42 = vadd.f32 %v3152_v39, %v9345_v49  ;;  %v3457_v56 = vmax.f32 %v3320_v19, 0.0 }
 0x560   : > { %4172 = vmatmul.bf16.gmra.mxu0 %v9566_v21  ;;  %v5310_v37 = vmax.f32 %v4134_v8, 0.0 }
 0x561   : > { %v3458_v29 = vmax.f32 %v3153_v42, 0.0  ;;  %v9846_v44 = vpop.f32.mrf.mxu3 }
 0x563   : > { %v9849_v0 = vpack.c.bf16 %v3458_v29, %v3456_v33 }
 0x564   : > { %v3321_v31 = vpop.f32.mrf.mxu2 }
 0x565   : > { %11791 = vst [vmem:[#allocation72_spill] sm:$0xff] %v9849_v0  ;;  %v3322_v9 = vadd.f32 %v3321_v31, %v9353_v6  ;;  %v4135_v34 = vpop.f32.mrf.mxu0 }
 0x566   : > { %v4136_v14 = vadd.f32 %v4135_v34, %v3967_v1  ;;  %v3155_v32 = vpop.f32.mrf.mxu1 }
 0x567   : > { %v3459_v23 = vmax.f32 %v3322_v9, 0.0  ;;  %v3156_v42 = vadd.f32 %v3155_v32, %v9345_v49 }
 0x568   : > { %v5314_v46 = vmax.f32 %v4136_v14, 0.0 }
 0x569   : > { %v9854_v59 = vpack.c.bf16 %v3459_v23, %v3457_v56  ;;  %v9856_v57 = vpop.f32.mrf.mxu3  ;;  %4296 = vmatmul.bf16.vlgmr.msra.gmra.mxu1 %v9359_v35  ;;  %4465 = vmatmul.bf16.vlgmr.msra.gmra.mxu2 %v9367_v22  ;;  %v3460_v1 = vmax.f32 %v3156_v42, 0.0 }
 0x56a   : > { %v9860_v43 = vpack.c.bf16 %v5314_v46, %v5310_v37 }
 0x56b   : > { %11792 = vst [vmem:[#allocation73_spill] sm:$0xff] %v9854_v59 }
 0x56c   : > { %11793 = vst [vmem:[#allocation74_spill] sm:$0xff] %v9860_v43  ;;  %v3324_v39 = vpop.f32.mrf.mxu2 }
 0x56d   : > { %v4138_v33 = vpop.f32.mrf.mxu0  ;;  %v3325_v34 = vadd.f32 %v3324_v39, %v9353_v6 }
 0x56e   : > { %v4139_v29 = vadd.f32 %v4138_v33, %v3970_v13  ;;  %v3157_v8 = vpop.f32.mrf.mxu1  ;;  %4053 = vmatmul.bf16.gmra.mxu3 %v9761_v10 }
 0x56f   : > { %v3158_v19 = vadd.f32 %v3157_v8, %v9345_v49  ;;  %v3461_v13 = vmax.f32 %v3325_v34, 0.0 }
 0x570   : > { %4177 = vmatmul.bf16.gmra.mxu0 %v9587_v62  ;;  %v5318_v8 = vmax.f32 %v4139_v29, 0.0 }
 0x571   : > { %v3462_v31 = vmax.f32 %v3158_v19, 0.0  ;;  %v9868_v9 = vpop.f32.mrf.mxu3 }
 0x573   : > { %v9871_v14 = vpack.c.bf16 %v3462_v31, %v3460_v1 }
 0x574   : > { %v3326_v32 = vpop.f32.mrf.mxu2 }
 0x575   : > { %11794 = vst [vmem:[#allocation75_spill] sm:$0xff] %v9871_v14  ;;  %v3327_v56 = vadd.f32 %v3326_v32, %v9353_v6  ;;  %v4140_v23 = vpop.f32.mrf.mxu0 }
 0x576   : > { %v4141_v37 = vadd.f32 %v4140_v23, %v3972_v36  ;;  %v3160_v46 = vpop.f32.mrf.mxu1 }
 0x577   : > { %v3463_v33 = vmax.f32 %v3327_v56, 0.0  ;;  %v3161_v31 = vadd.f32 %v3160_v46, %v9345_v49  ;;  %v3977_v46 = vadd.f32 %v9710_v45, %v9811_v17  ;;  %v7775_v45 = vld [vmem:[#allocation10 + $0x1cc] sm:$0xf] }
 0x578   : > { %v5322_v42 = vmax.f32 %v4141_v37, 0.0 }
 0x579   : > { %v9876_v19 = vpack.c.bf16 %v3463_v33, %v3461_v13  ;;  %v9878_v43 = vpop.f32.mrf.mxu3  ;;  %4301 = vmatmul.bf16.gmra.mxu1 %v9379_v16  ;;  %4470 = vmatmul.bf16.gmra.mxu2 %v9388_v61  ;;  %v3464_v56 = vmax.f32 %v3161_v31, 0.0 }
 0x57a   : > { %v9882_v39 = vpack.c.bf16 %v5322_v42, %v5318_v8  ;;  %v7745_v8 = vld [vmem:[#allocation10 + $0xd4] sm:$0xf0] }
 0x57b   : > { %11795 = vst [vmem:[#allocation76_spill] sm:$0xff] %v9876_v19 }
 0x57c   : > { %11796 = vst [vmem:[#allocation77_spill] sm:$0xff] %v9882_v39  ;;  %v3329_v1 = vpop.f32.mrf.mxu2 }
 0x57d   : > { %v4143_v34 = vpop.f32.mrf.mxu0  ;;  %v3330_v13 = vadd.f32 %v3329_v1, %v9353_v6 }
 0x57e   : > { %v4144_v36 = vadd.f32 %v4143_v34, %v3975_v20  ;;  %v3162_v29 = vpop.f32.mrf.mxu1  ;;  %4058 = vmatmul.bf16.gmra.mxu3 %v9780_v51  ;;  %v7380_v20 = vor.u32 %v7745_v8, %v7379_v54  ;;  %v7507_v54 = vld [vmem:[#allocation10 + $0x1c8] sm:$0xf] }
 0x57f   : > { %v3163_v32 = vadd.f32 %v3162_v29, %v9345_v49  ;;  %v3465_v31 = vmax.f32 %v3330_v13, 0.0  ;;  %v3980_v13 = vadd.f32 %v9719_v38, %v9811_v17 }
 0x580   : > { %4182 = vmatmul.bf16.gmra.mxu0 %v9608_v18  ;;  %4627 = vmatpush.bf16.msrb.mxu3 %v7380_v20  ;;  %v5326_v61 = vmax.f32 %v4144_v36, 0.0 }
 0x581   : > { %v3466_v23 = vmax.f32 %v3163_v32, 0.0  ;;  %v9890_v37 = vpop.f32.mrf.mxu3 }
 0x583   : > { %v9893_v33 = vpack.c.bf16 %v3466_v23, %v3464_v56  ;;  %v7509_v23 = vld [vmem:[#allocation10 + $0x1d8] sm:$0xf0] }
 0x584   : > { %v3331_v42 = vpop.f32.mrf.mxu2 }
 0x585   : > { %11797 = vst [vmem:[#allocation78_spill] sm:$0xff] %v9893_v33  ;;  %v3332_v34 = vadd.f32 %v3331_v42, %v9353_v6  ;;  %v4145_v29 = vpop.f32.mrf.mxu0  ;;  %v7777_v42 = vld [vmem:[#allocation10 + $0x1d4] sm:$0xf0] }
 0x586   : > { %v4146_v39 = vadd.f32 %v4145_v29, %v3977_v46  ;;  %v3165_v41 = vpop.f32.mrf.mxu1  ;;  %v7512_v46 = vor.u32 %v7775_v45, %v7509_v23 }
 0x587   : > { %v3467_v32 = vmax.f32 %v3332_v34, 0.0  ;;  %v3166_v20 = vadd.f32 %v3165_v41, %v9345_v49 }
 0x588   : > { %v5330_v22 = vmax.f32 %v4146_v39, 0.0  ;;  %v7508_v39 = vor.u32 %v7777_v42, %v7507_v54  ;;  %5134 = vmatpush.bf16.msrb.mxu2 %v7512_v46  ;;  %v3982_v46 = vadd.f32 %v9728_v52, %v9811_v17  ;;  %v3985_v52 = vadd.f32 %v9740_v5, %v9811_v17 }
 0x589   : > { %v9898_v1 = vpack.c.bf16 %v3467_v32, %v3465_v31  ;;  %v9900_v56 = vpop.f32.mrf.mxu3  ;;  %4306 = vmatmul.bf16.gmra.mxu1 %v9405_v58  ;;  %4475 = vmatmul.bf16.gmra.mxu2 %v9414_v40  ;;  %v3468_v45 = vmax.f32 %v3166_v20, 0.0  ;;  %v3987_v5 = vadd.f32 %v9749_v15, %v9811_v17  ;;  %v3990_v15 = vadd.f32 %v9758_v50, %v9811_v17 }
 0x58a   : > { %v9904_v8 = vpack.c.bf16 %v5330_v22, %v5326_v61  ;;  %4796 = vmatpush.bf16.msrb.mxu0 %v7508_v39  ;;  %v7743_v22 = vld [vmem:[#allocation10 + $0xcc] sm:$0xf]  ;;  %v7381_v61 = vld [vmem:[#allocation10 + $0xd8] sm:$0xf0]  ;;  %v3992_v50 = vadd.f32 %v9768_v7, %v9811_v17  ;;  %v3995_v7 = vadd.f32 %v9777_v27, %v9811_v17  ;;  %v7363_v27 = vld [vmem:[#allocation10 + $0xa8] sm:$0xf] }
 0x58b   : > { %11798 = vst [vmem:[#allocation79_spill] sm:$0xff] %v9898_v1  ;;  %v7384_v54 = vor.u32 %v7743_v22, %v7381_v61 }
 0x58c   : > { %11799 = vst [vmem:[#allocation80_spill] sm:$0xff] %v9904_v8  ;;  %v3334_v36 = vpop.f32.mrf.mxu2 }
 0x58d   : > { %v4148_v34 = vpop.f32.mrf.mxu0  ;;  %v3335_v41 = vadd.f32 %v3334_v36, %v9353_v6  ;;  %4965 = vmatpush.bf16.msrb.mxu1 %v7384_v54 }
 0x58e   : > { %v4149_v29 = vadd.f32 %v4148_v34, %v3980_v13  ;;  %v3167_v31 = vpop.f32.mrf.mxu1  ;;  %4063 = vmatmul.bf16.gmra.mxu3 %v9801_v28 }
 0x58f   : > { %v3168_v32 = vadd.f32 %v3167_v31, %v9345_v49  ;;  %v3469_v40 = vmax.f32 %v3335_v41, 0.0 }
 0x590   : > { %4187 = vmatmul.bf16.gmra.mxu0 %v9634_v63 }
 0x591   : > { %v3470_v23 = vmax.f32 %v3168_v32, 0.0  ;;  %v9912_v38 = vpop.f32.mrf.mxu3  ;;  %v5334_v32 = vmax.f32 %v4149_v29, 0.0 }
 0x593   : > { %v9915_v42 = vpack.c.bf16 %v3470_v23, %v3468_v45 }
 0x594   : > { %v3336_v13 = vpop.f32.mrf.mxu2 }
 0x595   : > { %11800 = vst [vmem:[#allocation81_spill] sm:$0xff] %v9915_v42  ;;  %v3337_v39 = vadd.f32 %v3336_v13, %v9353_v6  ;;  %v4150_v34 = vpop.f32.mrf.mxu0 }
 0x596   : > { %v4151_v31 = vadd.f32 %v4150_v34, %v3982_v46  ;;  %v3170_v8 = vpop.f32.mrf.mxu1 }
 0x597   : > { %v3471_v20 = vmax.f32 %v3337_v39, 0.0  ;;  %v3171_v45 = vadd.f32 %v3170_v8, %v9345_v49 }
 0x598   : > { %v5338_v28 = vmax.f32 %v4151_v31, 0.0 }
 0x599   : > { %v9920_v51 = vpack.c.bf16 %v3471_v20, %v3469_v40  ;;  %v9922_v22 = vpop.f32.mrf.mxu3  ;;  %4311 = vmatmul.bf16.gmra.mxu1 %v9426_v3  ;;  %4480 = vmatmul.bf16.gmra.mxu2 %v9435_v60  ;;  %v3472_v41 = vmax.f32 %v3171_v45, 0.0 }
 0x59a   : > { %v9926_v36 = vpack.c.bf16 %v5338_v28, %v5334_v32 }
 0x59b   : > { %11801 = vst [vmem:[#allocation82_spill] sm:$0xff] %v9920_v51 }
 0x59c   : > { %11802 = vst [vmem:[#allocation83_spill] sm:$0xff] %v9926_v36  ;;  %v3339_v61 = vpop.f32.mrf.mxu2 }
 0x59d   : > { %v4153_v23 = vpop.f32.mrf.mxu0  ;;  %v3340_v28 = vadd.f32 %v3339_v61, %v9353_v6 }
 0x59e   : > { %v4154_v54 = vadd.f32 %v4153_v23, %v3985_v52  ;;  %v3172_v29 = vpop.f32.mrf.mxu1  ;;  %4068 = vmatmul.bf16.gmra.mxu3 %v9828_v30 }
 0x59f   : > { %v3173_v40 = vadd.f32 %v3172_v29, %v9345_v49  ;;  %v3473_v52 = vmax.f32 %v3340_v28, 0.0 }
 0x5a0   : > { %4192 = vmatmul.bf16.gmra.mxu0 %v9650_v48  ;;  %v5342_v29 = vmax.f32 %v4154_v54, 0.0 }
 0x5a1   : > { %v3474_v46 = vmax.f32 %v3173_v40, 0.0  ;;  %v9934_v13 = vpop.f32.mrf.mxu3 }
 0x5a3   : > { %v9937_v39 = vpack.c.bf16 %v3474_v46, %v3472_v41 }
 0x5a4   : > { %v3341_v8 = vpop.f32.mrf.mxu2 }
 0x5a5   : > { %11803 = vst [vmem:[#allocation84_spill] sm:$0xff] %v9937_v39  ;;  %v3342_v34 = vadd.f32 %v3341_v8, %v9353_v6  ;;  %v4155_v31 = vpop.f32.mrf.mxu0 }
 0x5a6   : > { %v4156_v20 = vadd.f32 %v4155_v31, %v3987_v5  ;;  %v3175_v32 = vpop.f32.mrf.mxu1 }
 0x5a7   : > { %v3475_v23 = vmax.f32 %v3342_v34, 0.0  ;;  %v3176_v46 = vadd.f32 %v3175_v32, %v9345_v49 }
 0x5a8   : > { %v5346_v45 = vmax.f32 %v4156_v20, 0.0 }
 0x5a9   : > { %v9942_v40 = vpack.c.bf16 %v3475_v23, %v3473_v52  ;;  %v9944_v36 = vpop.f32.mrf.mxu3  ;;  %4316 = vmatmul.bf16.gmra.mxu1 %v9447_v53  ;;  %4485 = vmatmul.bf16.gmra.mxu2 %v9456_v12  ;;  %v3476_v34 = vmax.f32 %v3176_v46, 0.0 }
 0x5aa   : > { %v9948_v61 = vpack.c.bf16 %v5346_v45, %v5342_v29 }
 0x5ab   : > { %11804 = vst [vmem:[#allocation85_spill] sm:$0xff] %v9942_v40 }
 0x5ac   : > { %11805 = vst [vmem:[#allocation86_spill] sm:$0xff] %v9948_v61  ;;  %v3344_v41 = vpop.f32.mrf.mxu2 }
 0x5ad   : > { %v4158_v28 = vpop.f32.mrf.mxu0  ;;  %v3345_v52 = vadd.f32 %v3344_v41, %v9353_v6  ;;  %v11808_v41 = vld [vmem:[#allocation41_spill] sm:$0xff] }
 0x5ae   : > { %v4159_v5 = vadd.f32 %v4158_v28, %v3990_v15  ;;  %v3177_v54 = vpop.f32.mrf.mxu1  ;;  %4073 = vmatmul.bf16.gmra.mxu3 %v9849_v0 }
 0x5af   : > { %v3178_v8 = vadd.f32 %v3177_v54, %v9345_v49  ;;  %v3477_v54 = vmax.f32 %v3345_v52, 0.0 }
 0x5b0   : > { %4197 = vmatmul.bf16.gmra.mxu0 %v9671_v26  ;;  %v5350_v12 = vmax.f32 %v4159_v5, 0.0 }
 0x5b1   : > { %v3478_v31 = vmax.f32 %v3178_v8, 0.0  ;;  %v9956_v20 = vpop.f32.mrf.mxu3 }
 0x5b3   : > { %v9959_v23 = vpack.c.bf16 %v3478_v31, %v3476_v34  ;;  %v11809_v34 = vld [vmem:[#allocation42_spill] sm:$0xff] }
 0x5b4   : > { %v3346_v32 = vpop.f32.mrf.mxu2 }
 0x5b5   : > { %11806 = vst [vmem:[#allocation87_spill] sm:$0xff] %v9959_v23  ;;  %v3347_v29 = vadd.f32 %v3346_v32, %v9353_v6  ;;  %v4160_v45 = vpop.f32.mrf.mxu0 }
 0x5b6   : > { %v4161_v15 = vadd.f32 %v4160_v45, %v3992_v50  ;;  %v3180_v28 = vpop.f32.mrf.mxu1  ;;  %v11811_v45 = vld [vmem:[#allocation55_spill] sm:$0xff] }
 0x5b7   : > { %v3479_v61 = vmax.f32 %v3347_v29, 0.0  ;;  %v3181_v50 = vadd.f32 %v3180_v28, %v9345_v49  ;;  %v3997_v28 = vadd.f32 %v9786_v55, %v9811_v17  ;;  %v7771_v55 = vld [vmem:[#allocation10 + $0x1ac] sm:$0xf] }
 0x5b8   : > { %v5354_v46 = vmax.f32 %v4161_v15, 0.0 }
 0x5b9   : > { %v9964_v8 = vpack.c.bf16 %v3479_v61, %v3477_v54  ;;  %v9966_v60 = vpop.f32.mrf.mxu3  ;;  %4321 = vmatmul.bf16.gmra.mxu1 %v11808_v41  ;;  %4490 = vmatmul.bf16.gmra.mxu2 %v11809_v34  ;;  %v3480_v15 = vmax.f32 %v3181_v50, 0.0  ;;  %v11815_v41 = vld [vmem:[#allocation44_spill] sm:$0xff] }
 0x5ba   : > { %v9970_v31 = vpack.c.bf16 %v5354_v46, %v5350_v12 }
 0x5bb   : > { %11807 = vst [vmem:[#allocation88_spill] sm:$0xff] %v9964_v8 }
 0x5bc   : > { %11810 = vst [vmem:[#allocation89_spill] sm:$0xff] %v9970_v31  ;;  %v3349_v32 = vpop.f32.mrf.mxu2  ;;  %v7741_v31 = vld [vmem:[#allocation10 + $0xb4] sm:$0xf0] }
 0x5bd   : > { %v4163_v52 = vpop.f32.mrf.mxu0  ;;  %v3350_v12 = vadd.f32 %v3349_v32, %v9353_v6 }
 0x5be   : > { %v4164_v29 = vadd.f32 %v4163_v52, %v3995_v7  ;;  %v3182_v5 = vpop.f32.mrf.mxu1  ;;  %4078 = vmatmul.bf16.gmra.mxu3 %v9871_v14  ;;  %v7364_v52 = vor.u32 %v7741_v31, %v7363_v27  ;;  %v7493_v31 = vld [vmem:[#allocation10 + $0x1b8] sm:$0xf0]  ;;  %v7491_v27 = vld [vmem:[#allocation10 + $0x1a8] sm:$0xf] }
 0x5bf   : > { %v3183_v61 = vadd.f32 %v3182_v5, %v9345_v49  ;;  %v3481_v50 = vmax.f32 %v3350_v12, 0.0 }
 0x5c0   : > { %4202 = vmatmul.bf16.gmra.mxu0 %v11811_v45  ;;  %4628 = vmatpush.bf16.msrb.mxu3 %v7364_v52  ;;  %v5358_v10 = vmax.f32 %v4164_v29, 0.0 }
 0x5c1   : > { %v3482_v54 = vmax.f32 %v3183_v61, 0.0  ;;  %v9978_v34 = vpop.f32.mrf.mxu3 }
 0x5c3   : > { %v9981_v46 = vpack.c.bf16 %v3482_v54, %v3480_v15  ;;  %v11814_v54 = vld [vmem:[#allocation43_spill] sm:$0xff] }
 0x5c4   : > { %v3351_v7 = vpop.f32.mrf.mxu2 }
 0x5c5   : > { %11812 = vst [vmem:[#allocation90_spill] sm:$0xff] %v9981_v46  ;;  %v3352_v14 = vadd.f32 %v3351_v7, %v9353_v6  ;;  %v4165_v5 = vpop.f32.mrf.mxu0 }
 0x5c6   : > { %v4166_v0 = vadd.f32 %v4165_v5, %v3997_v28  ;;  %v3185_v30 = vpop.f32.mrf.mxu1  ;;  %v7496_v28 = vor.u32 %v7771_v55, %v7493_v31  ;;  %v7773_v5 = vld [vmem:[#allocation10 + $0x1b4] sm:$0xf0]  ;;  %v7365_v55 = vld [vmem:[#allocation10 + $0xb8] sm:$0xf0] }
 0x5c7   : > { %v3483_v61 = vmax.f32 %v3352_v14, 0.0  ;;  %v4000_v14 = vadd.f32 %v9798_v2, %v9811_v17  ;;  %v3186_v12 = vadd.f32 %v3185_v30, %v9345_v49 }
 0x5c8   : > { %v5362_v8 = vmax.f32 %v4166_v0, 0.0  ;;  %v7492_v0 = vor.u32 %v7773_v5, %v7491_v27  ;;  %5135 = vmatpush.bf16.msrb.mxu2 %v7496_v28  ;;  %v4002_v28 = vadd.f32 %v9815_v24, %v9811_v17  ;;  %v4005_v24 = vadd.f32 %v9825_v4, %v9811_v17 }
 0x5c9   : > { %v9986_v32 = vpack.c.bf16 %v3483_v61, %v3481_v50  ;;  %v9988_v15 = vpop.f32.mrf.mxu3  ;;  %4326 = vmatmul.bf16.gmra.mxu1 %v11814_v54  ;;  %4495 = vmatmul.bf16.gmra.mxu2 %v11815_v41  ;;  %v3484_v31 = vmax.f32 %v3186_v12, 0.0  ;;  %v4007_v4 = vadd.f32 %v9836_v25, %v9811_v17  ;;  %v11826_v25 = vld [vmem:[#allocation48_spill] sm:$0xff] }
 0x5ca   : > { %v9992_v7 = vpack.c.bf16 %v5362_v8, %v5358_v10  ;;  %4797 = vmatpush.bf16.msrb.mxu0 %v7492_v0  ;;  %v11817_v10 = vld [vmem:[#allocation57_spill] sm:$0xff]  ;;  %v7739_v8 = vld [vmem:[#allocation10 + $0xac] sm:$0xf] }
 0x5cb   : > { %11813 = vst [vmem:[#allocation91_spill] sm:$0xff] %v9986_v32  ;;  %v7368_v27 = vor.u32 %v7739_v8, %v7365_v55 }
 0x5cc   : > { %11816 = vst [vmem:[#allocation92_spill] sm:$0xff] %v9992_v7  ;;  %v3354_v29 = vpop.f32.mrf.mxu2 }
 0x5cd   : > { %v4168_v52 = vpop.f32.mrf.mxu0  ;;  %v3355_v30 = vadd.f32 %v3354_v29, %v9353_v6  ;;  %4966 = vmatpush.bf16.msrb.mxu1 %v7368_v27  ;;  %v11820_v29 = vld [vmem:[#allocation46_spill] sm:$0xff] }
 0x5ce   : > { %v4169_v50 = vadd.f32 %v4168_v52, %v4000_v14  ;;  %v3187_v61 = vpop.f32.mrf.mxu1  ;;  %4083 = vmatmul.bf16.gmra.mxu3 %v9893_v33 }
 0x5cf   : > { %v3188_v41 = vadd.f32 %v3187_v61, %v9345_v49  ;;  %v3485_v32 = vmax.f32 %v3355_v30, 0.0 }
 0x5d0   : > { %4207 = vmatmul.bf16.gmra.mxu0 %v11817_v10 }
 0x5d1   : > { %v3486_v7 = vmax.f32 %v3188_v41, 0.0  ;;  %v10000_v2 = vpop.f32.mrf.mxu3  ;;  %v5366_v41 = vmax.f32 %v4169_v50, 0.0 }
 0x5d3   : > { %v10003_v5 = vpack.c.bf16 %v3486_v7, %v3484_v31  ;;  %v11819_v7 = vld [vmem:[#allocation45_spill] sm:$0xff] }
 0x5d4   : > { %v3356_v14 = vpop.f32.mrf.mxu2 }
 0x5d5   : > { %v3357_v0 = vadd.f32 %v3356_v14, %v9353_v6  ;;  %v4170_v52 = vpop.f32.mrf.mxu0  ;;  %v11822_v14 = vld [vmem:[#allocation59_spill] sm:$0xff] }
 0x5d6   : > { %v4171_v61 = vadd.f32 %v4170_v52, %v4002_v28  ;;  %v3190_v33 = vpop.f32.mrf.mxu1 }
 0x5d7   : > { %v3487_v12 = vmax.f32 %v3357_v0, 0.0  ;;  %v3191_v27 = vadd.f32 %v3190_v33, %v9345_v49 }
 0x5d8   : > { %v5370_v54 = vmax.f32 %v4171_v61, 0.0 }
 0x5d9   : > { %v10008_v47 = vpack.c.bf16 %v3487_v12, %v3485_v32  ;;  %v10010_v8 = vpop.f32.mrf.mxu3  ;;  %4331 = vmatmul.bf16.gmra.mxu1 %v11819_v7  ;;  %4500 = vmatmul.bf16.gmra.mxu2 %v11820_v29  ;;  %v3488_v0 = vmax.f32 %v3191_v27, 0.0  ;;  %v11823_v29 = vld [vmem:[#allocation67_spill] sm:$0xff] }
 0x5da   : > { %v10014_v55 = vpack.c.bf16 %v5370_v54, %v5366_v41  ;;  %v10031_v27 = vperm.slane %v11823_v29, 1 }
 0x5db   : > { %11818 = vst [vmem:[#allocation93_spill] sm:$0xff] %v10008_v47 }
 0x5dc   : > { %11821 = vst [vmem:[#allocation94_spill] sm:$0xff] %v10014_v55  ;;  %v3359_v31 = vpop.f32.mrf.mxu2 }
 0x5dd   : > { %v4173_v30 = vpop.f32.mrf.mxu0  ;;  %v3360_v54 = vadd.f32 %v3359_v31, %v9353_v6 }
 0x5de   : > { %v4174_v28 = vadd.f32 %v4173_v30, %v4005_v24  ;;  %v3192_v50 = vpop.f32.mrf.mxu1  ;;  %4088 = vmatmul.bf16.gmra.mxu3 %v9915_v42 }
 0x5df   : > { %v3193_v32 = vadd.f32 %v3192_v50, %v9345_v49  ;;  %v3489_v49 = vmax.f32 %v3360_v54, 0.0  ;;  %v4010_v54 = vadd.f32 %v9846_v44, %v9811_v17 }
 0x5e0   : > { %4212 = vmatmul.bf16.gmra.mxu0 %v11822_v14 }
 0x5e1   : > { %v3490_v52 = vmax.f32 %v3193_v32, 0.0  ;;  %v10022_v61 = vpop.f32.mrf.mxu3  ;;  %v5374_v32 = vmax.f32 %v4174_v28, 0.0 }
 0x5e3   : > { %v10025_v12 = vpack.c.bf16 %v3490_v52, %v3488_v0  ;;  %v11825_v0 = vld [vmem:[#allocation47_spill] sm:$0xff] }
 0x5e4   : > { %v3361_v33 = vpop.f32.mrf.mxu2 }
 0x5e5   : > { %v3362_v41 = vadd.f32 %v3361_v33, %v9353_v6  ;;  %v4175_v24 = vpop.f32.mrf.mxu0 }
 0x5e6   : > { %v4176_v30 = vadd.f32 %v4175_v24, %v4007_v4  ;;  %v4297_v55 = vpop.f32.mrf.mxu1  ;;  %v11828_v24 = vld [vmem:[#allocation61_spill] sm:$0xff] }
 0x5e7   : > { %v3491_v50 = vmax.f32 %v3362_v41, 0.0  ;;  %v4298_v6 = vadd.f32 %v4297_v55, %v10031_v27 }
 0x5e8   : > { %v5378_v42 = vmax.f32 %v4176_v30, 0.0 }
 0x5e9   : > { %v10033_v47 = vpack.c.bf16 %v3491_v50, %v3489_v49  ;;  %v10035_v31 = vpop.f32.mrf.mxu3  ;;  %4336 = vmatmul.bf16.gmra.mxu1 %v11825_v0  ;;  %4505 = vmatmul.bf16.gmra.mxu2 %v11826_v25  ;;  %v11833_v0 = vld [vmem:[#allocation51_spill] sm:$0xff] }
 0x5ea   : > { %v10039_v52 = vpack.c.bf16 %v5378_v42, %v5374_v32  ;;  %v4012_v42 = vadd.f32 %v9856_v57, %v9811_v17 }
 0x5eb   : > { %11824 = vst [vmem:[#allocation67_spill] sm:$0xff] %v10033_v47  ;;  %v11830_v47 = vld [vmem:[#allocation49_spill] sm:$0xff] }
 0x5ec   : > { %11827 = vst [vmem:[#allocation95_spill] sm:$0xff] %v10039_v52  ;;  %v4466_v4 = vpop.f32.mrf.mxu2 }
 0x5ed   : > { %v4467_v29 = vadd.f32 %v4466_v4, %v4298_v6  ;;  %v4178_v33 = vpop.f32.mrf.mxu0 }
 0x5ee   : > { %v4179_v28 = vadd.f32 %v4178_v33, %v4010_v54  ;;  %4093 = vmatmul.bf16.gmra.mxu3 %v9937_v39  ;;  %v4299_v41 = vpop.f32.mrf.mxu1 }
 0x5ef   : > { %v4300_v49 = vadd.f32 %v4299_v41, %v10031_v27  ;;  %v5303_v6 = vmax.f32 %v4467_v29, 0.0 }
 0x5f0   : > { %4217 = vmatmul.bf16.gmra.mxu0 %v11828_v24  ;;  %v5382_v54 = vmax.f32 %v4179_v28, 0.0 }
 0x5f1   : > { %v10046_v30 = vpop.f32.mrf.mxu3 }
 0x5f4   : > { %v4468_v55 = vpop.f32.mrf.mxu2 }
 0x5f5   : > { %v4469_v50 = vadd.f32 %v4468_v55, %v4300_v49  ;;  %v4180_v32 = vpop.f32.mrf.mxu0  ;;  %v4015_v49 = vadd.f32 %v9868_v9, %v9811_v17 }
 0x5f6   : > { %v4181_v44 = vadd.f32 %v4180_v32, %v4012_v42  ;;  %v4302_v52 = vpop.f32.mrf.mxu1  ;;  %v11832_v32 = vld [vmem:[#allocation63_spill] sm:$0xff] }
 0x5f7   : > { %v5307_v4 = vmax.f32 %v4469_v50, 0.0  ;;  %v4303_v57 = vadd.f32 %v4302_v52, %v10031_v27  ;;  %v4017_v52 = vadd.f32 %v9878_v43, %v9811_v17  ;;  %v7477_v43 = vld [vmem:[#allocation10 + $0x198] sm:$0xf0] }
 0x5f8   : > { %v5386_v33 = vmax.f32 %v4181_v44, 0.0 }
 0x5f9   : > { %v10051_v25 = vpack.c.bf16 %v5307_v4, %v5303_v6  ;;  %v10053_v39 = vpop.f32.mrf.mxu3  ;;  %4341 = vmatmul.bf16.gmra.mxu1 %v11830_v47  ;;  %4510 = vmatmul.bf16.gmra.mxu2 %v9566_v21  ;;  %v7347_v6 = vld [vmem:[#allocation10 + $0x88] sm:$0xf]  ;;  %v7737_v4 = vld [vmem:[#allocation10 + $0x94] sm:$0xf0] }
 0x5fa   : > { %v10057_v41 = vpack.c.bf16 %v5386_v33, %v5382_v54  ;;  %v7348_v33 = vor.u32 %v7737_v4, %v7347_v6  ;;  %v7767_v6 = vld [vmem:[#allocation10 + $0x18c] sm:$0xf]  ;;  %v7475_v4 = vld [vmem:[#allocation10 + $0x188] sm:$0xf] }
 0x5fb   : > { %11829 = vst [vmem:[#allocation96_spill] sm:$0xff] %v10051_v25 }
 0x5fc   : > { %11831 = vst [vmem:[#allocation97_spill] sm:$0xff] %v10057_v41  ;;  %v4471_v42 = vpop.f32.mrf.mxu2  ;;  %4629 = vmatpush.bf16.msrb.mxu3 %v7348_v33 }
 0x5fd   : > { %v4472_v29 = vadd.f32 %v4471_v42, %v4303_v57  ;;  %v4183_v55 = vpop.f32.mrf.mxu0 }
 0x5fe   : > { %v4184_v28 = vadd.f32 %v4183_v55, %v4015_v49  ;;  %4098 = vmatmul.bf16.gmra.mxu3 %v9959_v23  ;;  %v4304_v50 = vpop.f32.mrf.mxu1 }
 0x5ff   : > { %v4305_v54 = vadd.f32 %v4304_v50, %v10031_v27  ;;  %v5311_v55 = vmax.f32 %v4472_v29, 0.0  ;;  %v7769_v29 = vld [vmem:[#allocation10 + $0x194] sm:$0xf0] }
 0x600   : > { %4222 = vmatmul.bf16.gmra.mxu0 %v11832_v32  ;;  %v5390_v21 = vmax.f32 %v4184_v28, 0.0 }
 0x601   : > { %v10064_v44 = vpop.f32.mrf.mxu3 }
 0x604   : > { %v4473_v9 = vpop.f32.mrf.mxu2 }
 0x605   : > { %v4474_v41 = vadd.f32 %v4473_v9, %v4305_v54  ;;  %v4185_v57 = vpop.f32.mrf.mxu0  ;;  %v7476_v9 = vor.u32 %v7769_v29, %v7475_v4  ;;  %v7315_v4 = vld [vmem:[#allocation10 + $0x48] sm:$0xf]  ;;  %v7729_v29 = vld [vmem:[#allocation10 + $0x54] sm:$0xf0] }
 0x606   : > { %v4186_v49 = vadd.f32 %v4185_v57, %v4017_v52  ;;  %v4307_v42 = vpop.f32.mrf.mxu1  ;;  %v7480_v52 = vor.u32 %v7767_v6, %v7477_v43  ;;  %v7331_v57 = vld [vmem:[#allocation10 + $0x68] sm:$0xf]  ;;  %v7349_v6 = vld [vmem:[#allocation10 + $0x98] sm:$0xf0] }
 0x607   : > { %v5315_v25 = vmax.f32 %v4474_v41, 0.0  ;;  %v4308_v33 = vadd.f32 %v4307_v42, %v10031_v27  ;;  %v4020_v41 = vadd.f32 %v9890_v37, %v9811_v17  ;;  %4798 = vmatpush.bf16.msrb.mxu0 %v7476_v9  ;;  %v7735_v42 = vld [vmem:[#allocation10 + $0x8c] sm:$0xf] }
 0x608   : > { %v5394_v23 = vmax.f32 %v4186_v49, 0.0  ;;  %v7733_v49 = vld [vmem:[#allocation10 + $0x74] sm:$0xf0]  ;;  %5136 = vmatpush.bf16.msrb.mxu2 %v7480_v52  ;;  %v7352_v37 = vor.u32 %v7735_v42, %v7349_v6 }
 0x609   : > { %v10069_v47 = vpop.f32.mrf.mxu3  ;;  %4346 = vmatmul.bf16.gmra.mxu1 %v11833_v0  ;;  %4515 = vmatmul.bf16.gmra.mxu2 %v9587_v62  ;;  %v10073_v50 = vpack.c.bf16 %v5315_v25, %v5311_v55  ;;  %v7332_v25 = vor.u32 %v7733_v49, %v7331_v57 }
 0x60a   : > { %v10075_v54 = vpack.c.bf16 %v5394_v23, %v5390_v21  ;;  %v11836_v23 = vld [vmem:[#allocation65_spill] sm:$0xff]  ;;  %4967 = vmatpush.bf16.msrb.mxu1 %v7352_v37 }
 0x60b   : > { %11834 = vst [vmem:[#allocation98_spill] sm:$0xff] %v10073_v50  ;;  %4630 = vmatpush.bf16.msrb.mxu3 %v7332_v25 }
 0x60c   : > { %11835 = vst [vmem:[#allocation99_spill] sm:$0xff] %v10075_v54  ;;  %v4476_v28 = vpop.f32.mrf.mxu2  ;;  %v7316_v54 = vor.u32 %v7729_v29, %v7315_v4  ;;  %v7283_v4 = vld [vmem:[#allocation10 + $0x8] sm:$0xf] }
 0x60d   : > { %v4477_v0 = vadd.f32 %v4476_v28, %v4308_v33  ;;  %v4188_v62 = vpop.f32.mrf.mxu0  ;;  %v7725_v28 = vld [vmem:[#allocation10 + $0x34] sm:$0xf0]  ;;  %v11837_v29 = vld [vmem:[#allocation28_spill] sm:$0xff] }
 0x60e   : > { %v4189_v55 = vadd.f32 %v4188_v62, %v4020_v41  ;;  %4103 = vmatmul.bf16.gmra.mxu3 %v9981_v46  ;;  %v4309_v21 = vpop.f32.mrf.mxu1  ;;  %v4022_v62 = vadd.f32 %v9900_v56, %v9811_v17  ;;  %v7299_v41 = vld [vmem:[#allocation10 + $0x28] sm:$0xf] }
 0x60f   : > { %v4310_v33 = vadd.f32 %v4309_v21, %v10031_v27  ;;  %4631 = vmatpush.bf16.msrb.mxu3 %v7316_v54  ;;  %v7300_v49 = vor.u32 %v7725_v28, %v7299_v41  ;;  %v5319_v46 = vmax.f32 %v4477_v0, 0.0  ;;  %v7721_v21 = vld [vmem:[#allocation10 + $0x14] sm:$0xf0]  ;;  %v4025_v0 = vadd.f32 %v9912_v38, %v9811_v17 }
 0x610   : > { %4227 = vmatmul.bf16.gmra.mxu0 %v11836_v23  ;;  %v5398_v6 = vmax.f32 %v4189_v55, 0.0  ;;  %v7284_v56 = vor.u32 %v7721_v21, %v7283_v4 }
 0x611   : > { %v10082_v43 = vpop.f32.mrf.mxu3 }
 0x613   : > { %4632 = vmatpush.bf16.msrb.mxu3 %v7300_v49 }
 0x614   : > { %v4478_v52 = vpop.f32.mrf.mxu2 }
 0x615   : > { %v4479_v9 = vadd.f32 %v4478_v52, %v4310_v33  ;;  %v4190_v57 = vpop.f32.mrf.mxu0 }
 0x616   : > { %v4191_v25 = vadd.f32 %v4190_v57, %v4022_v62  ;;  %v4312_v50 = vpop.f32.mrf.mxu1  ;;  %v11840_v57 = vld [vmem:[#allocation68_spill] sm:$0xff] }
 0x617   : > { %v5323_v42 = vmax.f32 %v4479_v9, 0.0  ;;  %v4313_v62 = vadd.f32 %v4312_v50, %v10031_v27  ;;  %4633 = vmatpush.bf16.msrb.mxu3 %v7284_v56 }
 0x618   : > { %v5402_v7 = vmax.f32 %v4191_v25, 0.0 }
 0x619   : > { %v10087_v37 = vpop.f32.mrf.mxu3  ;;  %4351 = vmatmul.bf16.gmra.mxu1 %v11837_v29  ;;  %4520 = vmatmul.bf16.gmra.mxu2 %v9608_v18  ;;  %v10091_v54 = vpack.c.bf16 %v5323_v42, %v5319_v46 }
 0x61a   : > { %v10093_v33 = vpack.c.bf16 %v5402_v7, %v5398_v6  ;;  %v4027_v7 = vadd.f32 %v9922_v22, %v9811_v17 }
 0x61b   : > { %11838 = vst [vmem:[#allocation100_spill] sm:$0xff] %v10091_v54 }
 0x61c   : > { %11839 = vst [vmem:[#allocation101_spill] sm:$0xff] %v10093_v33  ;;  %v4481_v55 = vpop.f32.mrf.mxu2 }
 0x61d   : > { %v4482_v52 = vadd.f32 %v4481_v55, %v4313_v62  ;;  %v4193_v41 = vpop.f32.mrf.mxu0  ;;  %v11841_v55 = vld [vmem:[#allocation29_spill] sm:$0xff] }
 0x61e   : > { %v4194_v28 = vadd.f32 %v4193_v41, %v4025_v0  ;;  %4108 = vmatmul.bf16.gmra.mxu3 %v10003_v5  ;;  %v4314_v9 = vpop.f32.mrf.mxu1 }
 0x61f   : > { %v4315_v46 = vadd.f32 %v4314_v9, %v10031_v27  ;;  %v5327_v4 = vmax.f32 %v4482_v52, 0.0 }
 0x620   : > { %4232 = vmatmul.bf16.gmra.mxu0 %v11840_v57  ;;  %v5406_v56 = vmax.f32 %v4194_v28, 0.0 }
 0x621   : > { %v10100_v49 = vpop.f32.mrf.mxu3 }
 0x624   : > { %v4483_v50 = vpop.f32.mrf.mxu2 }
 0x625   : > { %v4484_v25 = vadd.f32 %v4483_v50, %v4315_v46  ;;  %v4195_v38 = vpop.f32.mrf.mxu0  ;;  %v4030_v46 = vadd.f32 %v9934_v13, %v9811_v17 }
 0x626   : > { %v4196_v42 = vadd.f32 %v4195_v38, %v4027_v7  ;;  %v4317_v6 = vpop.f32.mrf.mxu1 }
 0x627   : > { %v5331_v21 = vmax.f32 %v4484_v25, 0.0  ;;  %v4318_v22 = vadd.f32 %v4317_v6, %v10031_v27 }
 0x628   : > { %v5410_v62 = vmax.f32 %v4196_v42, 0.0 }
 0x629   : > { %v10105_v0 = vpop.f32.mrf.mxu3  ;;  %4356 = vmatmul.bf16.gmra.mxu1 %v11841_v55  ;;  %4525 = vmatmul.bf16.gmra.mxu2 %v9634_v63  ;;  %v10109_v41 = vpack.c.bf16 %v5331_v21, %v5327_v4  ;;  %v4032_v4 = vadd.f32 %v9944_v36, %v9811_v17 }
 0x62a   : > { %v10111_v9 = vpack.c.bf16 %v5410_v62, %v5406_v56 }
 0x62b   : > { %11842 = vst [vmem:[#allocation102_spill] sm:$0xff] %v10109_v41  ;;  %v11844_v41 = vld [vmem:[#allocation31_spill] sm:$0xff] }
 0x62c   : > { %11843 = vst [vmem:[#allocation103_spill] sm:$0xff] %v10111_v9  ;;  %v4486_v7 = vpop.f32.mrf.mxu2 }
 0x62d   : > { %v4487_v52 = vadd.f32 %v4486_v7, %v4318_v22  ;;  %v4198_v50 = vpop.f32.mrf.mxu0 }
 0x62e   : > { %v4199_v28 = vadd.f32 %v4198_v50, %v4030_v46  ;;  %4113 = vmatmul.bf16.gmra.mxu3 %v10025_v12  ;;  %v4319_v25 = vpop.f32.mrf.mxu1 }
 0x62f   : > { %v4320_v42 = vadd.f32 %v4319_v25, %v10031_v27  ;;  %v5335_v22 = vmax.f32 %v4487_v52, 0.0 }
 0x630   : > { %4237 = vmatmul.bf16.gmra.mxu0 %v9834_v11  ;;  %v5414_v46 = vmax.f32 %v4199_v28, 0.0 }
 0x631   : > { %v10118_v38 = vpop.f32.mrf.mxu3 }
 0x634   : > { %v4488_v6 = vpop.f32.mrf.mxu2 }
 0x635   : > { %v4489_v21 = vadd.f32 %v4488_v6, %v4320_v42  ;;  %v4200_v56 = vpop.f32.mrf.mxu0  ;;  %v4035_v42 = vadd.f32 %v9956_v20, %v9811_v17 }
 0x636   : > { %v4201_v13 = vadd.f32 %v4200_v56, %v4032_v4  ;;  %v4322_v62 = vpop.f32.mrf.mxu1 }
 0x637   : > { %v5339_v7 = vmax.f32 %v4489_v21, 0.0  ;;  %v4323_v36 = vadd.f32 %v4322_v62, %v10031_v27 }
 0x638   : > { %v5418_v50 = vmax.f32 %v4201_v13, 0.0 }
 0x639   : > { %v10123_v9 = vpop.f32.mrf.mxu3  ;;  %4361 = vmatmul.bf16.gmra.mxu1 %v11844_v41  ;;  %4530 = vmatmul.bf16.gmra.mxu2 %v9650_v48  ;;  %v10127_v33 = vpack.c.bf16 %v5339_v7, %v5335_v22  ;;  %v4037_v22 = vadd.f32 %v9966_v60, %v9811_v17  ;;  %v7461_v48 = vld [vmem:[#allocation10 + $0x178] sm:$0xf0]  ;;  %v7459_v60 = vld [vmem:[#allocation10 + $0x168] sm:$0xf] }
 0x63a   : > { %v10129_v25 = vpack.c.bf16 %v5418_v50, %v5414_v46 }
 0x63b   : > { %11845 = vst [vmem:[#allocation104_spill] sm:$0xff] %v10127_v33  ;;  %v11847_v33 = vld [vmem:[#allocation52_spill] sm:$0xff] }
 0x63c   : > { %11846 = vst [vmem:[#allocation105_spill] sm:$0xff] %v10129_v25  ;;  %v4491_v4 = vpop.f32.mrf.mxu2 }
 0x63d   : > { %v4492_v52 = vadd.f32 %v4491_v4, %v4323_v36  ;;  %v4203_v6 = vpop.f32.mrf.mxu0 }
 0x63e   : > { %v4204_v28 = vadd.f32 %v4203_v6, %v4035_v42  ;;  %v4324_v21 = vpop.f32.mrf.mxu1  ;;  %4634 = vmatmul.bf16.vlgmr.msrb.gmra.mxu3 %v9359_v35 }
 0x63f   : > { %v4325_v13 = vadd.f32 %v4324_v21, %v10031_v27  ;;  %v5343_v36 = vmax.f32 %v4492_v52, 0.0  ;;  %v7763_v21 = vld [vmem:[#allocation10 + $0x16c] sm:$0xf]  ;;  %v7765_v52 = vld [vmem:[#allocation10 + $0x174] sm:$0xf0] }
 0x640   : > { %4242 = vmatmul.bf16.gmra.mxu0 %v9854_v59  ;;  %v5422_v42 = vmax.f32 %v4204_v28, 0.0  ;;  %v4040_v28 = vadd.f32 %v9978_v34, %v9811_v17  ;;  %v4042_v34 = vadd.f32 %v9988_v15, %v9811_v17 }
 0x641   : > { %v10136_v56 = vpop.f32.mrf.mxu3 }
 0x644   : > { %v4493_v62 = vpop.f32.mrf.mxu2 }
 0x645   : > { %v4494_v7 = vadd.f32 %v4493_v62, %v4325_v13  ;;  %v4205_v46 = vpop.f32.mrf.mxu0 }
 0x646   : > { %v4206_v20 = vadd.f32 %v4205_v46, %v4037_v22  ;;  %v4327_v50 = vpop.f32.mrf.mxu1  ;;  %v7464_v22 = vor.u32 %v7763_v21, %v7461_v48 }
 0x647   : > { %v5347_v4 = vmax.f32 %v4494_v7, 0.0  ;;  %v4328_v13 = vadd.f32 %v4327_v50, %v10031_v27  ;;  %v7460_v7 = vor.u32 %v7765_v52, %v7459_v60 }
 0x648   : > { %v5426_v6 = vmax.f32 %v4206_v20, 0.0  ;;  %5137 = vmatpush.bf16.msrb.mxu2 %v7464_v22 }
 0x649   : > { %v10141_v25 = vpop.f32.mrf.mxu3  ;;  %4366 = vmatmul.bf16.gmra.mxu1 %v11847_v33  ;;  %4535 = vmatmul.bf16.gmra.mxu2 %v9671_v26  ;;  %v10145_v54 = vpack.c.bf16 %v5347_v4, %v5343_v36  ;;  %v7731_v4 = vld [vmem:[#allocation10 + $0x6c] sm:$0xf] }
 0x64a   : > { %v10147_v63 = vpack.c.bf16 %v5426_v6, %v5422_v42  ;;  %4799 = vmatpush.bf16.msrb.mxu0 %v7460_v7  ;;  %v7333_v42 = vld [vmem:[#allocation10 + $0x78] sm:$0xf0] }
 0x64b   : > { %11848 = vst [vmem:[#allocation52_spill] sm:$0xff] %v10145_v54  ;;  %v7336_v48 = vor.u32 %v7731_v4, %v7333_v42  ;;  %v11850_v54 = vld [vmem:[#allocation54_spill] sm:$0xff]  ;;  %v4045_v42 = vadd.f32 %v10000_v2, %v9811_v17 }
 0x64c   : > { %11849 = vst [vmem:[#allocation106_spill] sm:$0xff] %v10147_v63  ;;  %v4496_v62 = vpop.f32.mrf.mxu2 }
 0x64d   : > { %v4497_v46 = vadd.f32 %v4496_v62, %v4328_v13  ;;  %v4208_v20 = vpop.f32.mrf.mxu0  ;;  %4968 = vmatpush.bf16.msrb.mxu1 %v7336_v48 }
 0x64e   : > { %v4209_v26 = vadd.f32 %v4208_v20, %v4040_v28  ;;  %v4329_v36 = vpop.f32.mrf.mxu1  ;;  %4639 = vmatmul.bf16.gmra.mxu3 %v9379_v16 }
 0x64f   : > { %v4330_v6 = vadd.f32 %v4329_v36, %v10031_v27  ;;  %v5351_v28 = vmax.f32 %v4497_v46, 0.0 }
 0x650   : > { %4247 = vmatmul.bf16.gmra.mxu0 %v9876_v19  ;;  %v5430_v7 = vmax.f32 %v4209_v26, 0.0 }
 0x651   : > { %v10154_v50 = vpop.f32.mrf.mxu3 }
 0x654   : > { %v4498_v21 = vpop.f32.mrf.mxu2 }
 0x655   : > { %v4499_v60 = vadd.f32 %v4498_v21, %v4330_v6  ;;  %v4210_v13 = vpop.f32.mrf.mxu0 }
 0x656   : > { %v4211_v22 = vadd.f32 %v4210_v13, %v4042_v34  ;;  %v4332_v52 = vpop.f32.mrf.mxu1  ;;  %v4047_v13 = vadd.f32 %v10010_v8, %v9811_v17 }
 0x657   : > { %v5355_v62 = vmax.f32 %v4499_v60, 0.0  ;;  %v4333_v15 = vadd.f32 %v4332_v52, %v10031_v27 }
 0x658   : > { %v5434_v20 = vmax.f32 %v4211_v22, 0.0 }
 0x659   : > { %v10159_v63 = vpop.f32.mrf.mxu3  ;;  %4371 = vmatmul.bf16.gmra.mxu1 %v11850_v54  ;;  %4540 = vmatmul.bf16.gmra.mxu2 %v11811_v45  ;;  %v10163_v36 = vpack.c.bf16 %v5355_v62, %v5351_v28 }
 0x65a   : > { %v10165_v4 = vpack.c.bf16 %v5434_v20, %v5430_v7 }
 0x65b   : > { %11851 = vst [vmem:[#allocation107_spill] sm:$0xff] %v10163_v36 }
 0x65c   : > { %11852 = vst [vmem:[#allocation108_spill] sm:$0xff] %v10165_v4  ;;  %v4501_v48 = vpop.f32.mrf.mxu2 }
 0x65d   : > { %v4502_v46 = vadd.f32 %v4501_v48, %v4333_v15  ;;  %v4213_v6 = vpop.f32.mrf.mxu0 }
 0x65e   : > { %v4214_v26 = vadd.f32 %v4213_v6, %v4045_v42  ;;  %v4334_v34 = vpop.f32.mrf.mxu1  ;;  %4644 = vmatmul.bf16.gmra.mxu3 %v9405_v58  ;;  %v11853_v6 = vld [vmem:[#allocation56_spill] sm:$0xff]  ;;  %v11872_v58 = vld [vmem:[#allocation45_spill] sm:$0xff] }
 0x65f   : > { %v4335_v60 = vadd.f32 %v4334_v34, %v10031_v27  ;;  %v5359_v7 = vmax.f32 %v4502_v46, 0.0 }
 0x660   : > { %4252 = vmatmul.bf16.gmra.mxu0 %v9898_v1  ;;  %v5438_v15 = vmax.f32 %v4214_v26, 0.0 }
 0x661   : > { %v10172_v21 = vpop.f32.mrf.mxu3 }
 0x664   : > { %v4503_v22 = vpop.f32.mrf.mxu2 }
 0x665   : > { %v4504_v52 = vadd.f32 %v4503_v22, %v4335_v60  ;;  %v4215_v28 = vpop.f32.mrf.mxu0  ;;  %v4050_v60 = vadd.f32 %v10022_v61, %v9811_v17 }
 0x666   : > { %v4216_v2 = vadd.f32 %v4215_v28, %v4047_v13  ;;  %v4337_v62 = vpop.f32.mrf.mxu1 }
 0x667   : > { %v5363_v20 = vmax.f32 %v4504_v52, 0.0  ;;  %v4338_v8 = vadd.f32 %v4337_v62, %v10031_v27 }
 0x668   : > { %v5442_v42 = vmax.f32 %v4216_v2, 0.0 }
 0x669   : > { %v10177_v48 = vpop.f32.mrf.mxu3  ;;  %4376 = vmatmul.bf16.gmra.mxu1 %v11853_v6  ;;  %4545 = vmatmul.bf16.gmra.mxu2 %v11817_v10  ;;  %v10181_v4 = vpack.c.bf16 %v5363_v20, %v5359_v7  ;;  %v4052_v7 = vadd.f32 %v10035_v31, %v9811_v17  ;;  %v7445_v10 = vld [vmem:[#allocation10 + $0x158] sm:$0xf0] }
 0x66a   : > { %v10183_v34 = vpack.c.bf16 %v5442_v42, %v5438_v15 }
 0x66b   : > { %11854 = vst [vmem:[#allocation56_spill] sm:$0xff] %v10181_v4  ;;  %v11856_v4 = vld [vmem:[#allocation58_spill] sm:$0xff] }
 0x66c   : > { %11855 = vst [vmem:[#allocation109_spill] sm:$0xff] %v10183_v34  ;;  %v4506_v13 = vpop.f32.mrf.mxu2 }
 0x66d   : > { %v4507_v46 = vadd.f32 %v4506_v13, %v4338_v8  ;;  %v4218_v22 = vpop.f32.mrf.mxu0 }
 0x66e   : > { %v4219_v26 = vadd.f32 %v4218_v22, %v4050_v60  ;;  %v4339_v52 = vpop.f32.mrf.mxu1  ;;  %4649 = vmatmul.bf16.gmra.mxu3 %v9426_v3  ;;  %v11869_v3 = vld [vmem:[#allocation64_spill] sm:$0xff] }
 0x66f   : > { %v4340_v2 = vadd.f32 %v4339_v52, %v10031_v27  ;;  %v5367_v8 = vmax.f32 %v4507_v46, 0.0 }
 0x670   : > { %4257 = vmatmul.bf16.gmra.mxu0 %v9920_v51  ;;  %v5446_v60 = vmax.f32 %v4219_v26, 0.0 }
 0x671   : > { %v10190_v28 = vpop.f32.mrf.mxu3 }
 0x674   : > { %v4508_v62 = vpop.f32.mrf.mxu2 }
 0x675   : > { %v4509_v20 = vadd.f32 %v4508_v62, %v4340_v2  ;;  %v4220_v15 = vpop.f32.mrf.mxu0  ;;  %v4055_v2 = vadd.f32 %v10046_v30, %v9811_v17 }
 0x676   : > { %v4221_v61 = vadd.f32 %v4220_v15, %v4052_v7  ;;  %v4342_v42 = vpop.f32.mrf.mxu1 }
 0x677   : > { %v5371_v13 = vmax.f32 %v4509_v20, 0.0  ;;  %v4343_v31 = vadd.f32 %v4342_v42, %v10031_v27 }
 0x678   : > { %v5450_v22 = vmax.f32 %v4221_v61, 0.0 }
 0x679   : > { %v10195_v34 = vpop.f32.mrf.mxu3  ;;  %4381 = vmatmul.bf16.gmra.mxu1 %v11856_v4  ;;  %4550 = vmatmul.bf16.gmra.mxu2 %v11822_v14  ;;  %v10199_v36 = vpack.c.bf16 %v5371_v13, %v5367_v8  ;;  %v4057_v8 = vadd.f32 %v10053_v39, %v9811_v17  ;;  %v7443_v39 = vld [vmem:[#allocation10 + $0x148] sm:$0xf] }
 0x67a   : > { %v10201_v52 = vpack.c.bf16 %v5450_v22, %v5446_v60 }
 0x67b   : > { %11857 = vst [vmem:[#allocation110_spill] sm:$0xff] %v10199_v36  ;;  %v11859_v36 = vld [vmem:[#allocation60_spill] sm:$0xff] }
 0x67c   : > { %11858 = vst [vmem:[#allocation111_spill] sm:$0xff] %v10201_v52  ;;  %v4511_v7 = vpop.f32.mrf.mxu2 }
 0x67d   : > { %v4512_v46 = vadd.f32 %v4511_v7, %v4343_v31  ;;  %v4223_v62 = vpop.f32.mrf.mxu0 }
 0x67e   : > { %v4224_v26 = vadd.f32 %v4223_v62, %v4055_v2  ;;  %v4344_v20 = vpop.f32.mrf.mxu1  ;;  %4654 = vmatmul.bf16.gmra.mxu3 %v9447_v53  ;;  %v11864_v53 = vld [vmem:[#allocation62_spill] sm:$0xff] }
 0x67f   : > { %v4345_v61 = vadd.f32 %v4344_v20, %v10031_v27  ;;  %v5375_v31 = vmax.f32 %v4512_v46, 0.0  ;;  %v7759_v20 = vld [vmem:[#allocation10 + $0x14c] sm:$0xf]  ;;  %v7761_v46 = vld [vmem:[#allocation10 + $0x154] sm:$0xf0] }
 0x680   : > { %4262 = vmatmul.bf16.gmra.mxu0 %v9942_v40  ;;  %v5454_v2 = vmax.f32 %v4224_v26, 0.0  ;;  %v4060_v26 = vadd.f32 %v10064_v44, %v9811_v17  ;;  %v4062_v44 = vadd.f32 %v10069_v47, %v9811_v17 }
 0x681   : > { %v10208_v15 = vpop.f32.mrf.mxu3 }
 0x684   : > { %v4513_v42 = vpop.f32.mrf.mxu2 }
 0x685   : > { %v4514_v13 = vadd.f32 %v4513_v42, %v4345_v61  ;;  %v4225_v60 = vpop.f32.mrf.mxu0 }
 0x686   : > { %v4226_v30 = vadd.f32 %v4225_v60, %v4057_v8  ;;  %v4347_v22 = vpop.f32.mrf.mxu1  ;;  %v7448_v8 = vor.u32 %v7759_v20, %v7445_v10 }
 0x687   : > { %v5379_v7 = vmax.f32 %v4514_v13, 0.0  ;;  %v4348_v61 = vadd.f32 %v4347_v22, %v10031_v27  ;;  %v7444_v13 = vor.u32 %v7761_v46, %v7443_v39 }
 0x688   : > { %v5458_v62 = vmax.f32 %v4226_v30, 0.0  ;;  %5138 = vmatpush.bf16.msrb.mxu2 %v7448_v8 }
 0x689   : > { %v10213_v52 = vpop.f32.mrf.mxu3  ;;  %4386 = vmatmul.bf16.gmra.mxu1 %v11859_v36  ;;  %4555 = vmatmul.bf16.gmra.mxu2 %v11828_v24  ;;  %v10217_v14 = vpack.c.bf16 %v5379_v7, %v5375_v31  ;;  %v11862_v7 = vld [vmem:[#allocation41_spill] sm:$0xff] }
 0x68a   : > { %v10219_v45 = vpack.c.bf16 %v5458_v62, %v5454_v2  ;;  %4800 = vmatpush.bf16.msrb.mxu0 %v7444_v13  ;;  %v7727_v2 = vld [vmem:[#allocation10 + $0x4c] sm:$0xf]  ;;  %v7317_v62 = vld [vmem:[#allocation10 + $0x58] sm:$0xf0] }
 0x68b   : > { %11860 = vst [vmem:[#allocation60_spill] sm:$0xff] %v10217_v14  ;;  %v11863_v14 = vld [vmem:[#allocation88_spill] sm:$0xff]  ;;  %v7320_v10 = vor.u32 %v7727_v2, %v7317_v62  ;;  %v4065_v62 = vadd.f32 %v10082_v43, %v9811_v17 }
 0x68c   : > { %11861 = vst [vmem:[#allocation112_spill] sm:$0xff] %v10219_v45  ;;  %v4516_v42 = vpop.f32.mrf.mxu2 }
 0x68d   : > { %v4517_v60 = vadd.f32 %v4516_v42, %v4348_v61  ;;  %v4228_v30 = vpop.f32.mrf.mxu0  ;;  %4969 = vmatpush.bf16.msrb.mxu1 %v7320_v10 }
 0x68e   : > { %v4229_v24 = vadd.f32 %v4228_v30, %v4060_v26  ;;  %v4349_v31 = vpop.f32.mrf.mxu1  ;;  %4659 = vmatmul.bf16.gmra.mxu3 %v11862_v7 }
 0x68f   : > { %v4350_v20 = vadd.f32 %v4349_v31, %v10031_v27  ;;  %v5383_v42 = vmax.f32 %v4517_v60, 0.0 }
 0x690   : > { %4267 = vmatmul.bf16.gmra.mxu0 %v11863_v14  ;;  %v5462_v30 = vmax.f32 %v4229_v24, 0.0 }
 0x691   : > { %v10226_v22 = vpop.f32.mrf.mxu3 }
 0x694   : > { %v4518_v39 = vpop.f32.mrf.mxu2 }
 0x695   : > { %v4519_v61 = vadd.f32 %v4518_v39, %v4350_v20  ;;  %v4230_v8 = vpop.f32.mrf.mxu0  ;;  %v11867_v39 = vld [vmem:[#allocation43_spill] sm:$0xff] }
 0x696   : > { %v4231_v46 = vadd.f32 %v4230_v8, %v4062_v44  ;;  %v4352_v26 = vpop.f32.mrf.mxu1 }
 0x697   : > { %v5387_v13 = vmax.f32 %v4519_v61, 0.0  ;;  %v4353_v47 = vadd.f32 %v4352_v26, %v10031_v27  ;;  %v11868_v61 = vld [vmem:[#allocation91_spill] sm:$0xff] }
 0x698   : > { %v5466_v45 = vmax.f32 %v4231_v46, 0.0 }
 0x699   : > { %v10231_v7 = vpop.f32.mrf.mxu3  ;;  %4391 = vmatmul.bf16.gmra.mxu1 %v11864_v53  ;;  %4560 = vmatmul.bf16.gmra.mxu2 %v11832_v32  ;;  %v10235_v31 = vpack.c.bf16 %v5387_v13, %v5383_v42 }
 0x69a   : > { %v10237_v2 = vpack.c.bf16 %v5466_v45, %v5462_v30  ;;  %v4067_v45 = vadd.f32 %v10087_v37, %v9811_v17  ;;  %v7411_v37 = vld [vmem:[#allocation10 + $0x108] sm:$0xf] }
 0x69b   : > { %11865 = vst [vmem:[#allocation62_spill] sm:$0xff] %v10235_v31 }
 0x69c   : > { %11866 = vst [vmem:[#allocation113_spill] sm:$0xff] %v10237_v2  ;;  %v4521_v10 = vpop.f32.mrf.mxu2 }
 0x69d   : > { %v4522_v60 = vadd.f32 %v4521_v10, %v4353_v47  ;;  %v4233_v20 = vpop.f32.mrf.mxu0  ;;  %v7427_v47 = vld [vmem:[#allocation10 + $0x128] sm:$0xf]  ;;  %v7757_v10 = vld [vmem:[#allocation10 + $0x134] sm:$0xf0] }
 0x69e   : > { %v4234_v24 = vadd.f32 %v4233_v20, %v4065_v62  ;;  %v4354_v44 = vpop.f32.mrf.mxu1  ;;  %4664 = vmatmul.bf16.gmra.mxu3 %v11867_v39  ;;  %v7428_v2 = vor.u32 %v7757_v10, %v7427_v47 }
 0x69f   : > { %v4355_v46 = vadd.f32 %v4354_v44, %v10031_v27  ;;  %v5391_v62 = vmax.f32 %v4522_v60, 0.0 }
 0x6a0   : > { %4272 = vmatmul.bf16.gmra.mxu0 %v11868_v61  ;;  %v5470_v31 = vmax.f32 %v4234_v24, 0.0  ;;  %v4070_v24 = vadd.f32 %v10100_v49, %v9811_v17 }
 0x6a1   : > { %v10244_v8 = vpop.f32.mrf.mxu3  ;;  %4801 = vmatpush.bf16.msrb.mxu0 %v7428_v2 }
 0x6a4   : > { %v4523_v26 = vpop.f32.mrf.mxu2 }
 0x6a5   : > { %v4524_v42 = vadd.f32 %v4523_v26, %v4355_v46  ;;  %v4235_v13 = vpop.f32.mrf.mxu0  ;;  %v7753_v46 = vld [vmem:[#allocation10 + $0x114] sm:$0xf0] }
 0x6a6   : > { %v4236_v43 = vadd.f32 %v4235_v13, %v4067_v45  ;;  %v4357_v30 = vpop.f32.mrf.mxu1  ;;  %v7412_v60 = vor.u32 %v7753_v46, %v7411_v37 }
 0x6a7   : > { %v5395_v20 = vmax.f32 %v4524_v42, 0.0  ;;  %v4358_v26 = vadd.f32 %v4357_v30, %v10031_v27 }
 0x6a8   : > { %v5474_v32 = vmax.f32 %v4236_v43, 0.0  ;;  %4802 = vmatpush.bf16.msrb.mxu0 %v7412_v60  ;;  %v11874_v60 = vld [vmem:[#allocation66_spill] sm:$0xff] }
 0x6a9   : > { %v10249_v39 = vpop.f32.mrf.mxu3  ;;  %4396 = vmatmul.bf16.gmra.mxu1 %v11869_v3  ;;  %4565 = vmatmul.bf16.gmra.mxu2 %v11836_v23  ;;  %v10253_v44 = vpack.c.bf16 %v5395_v20, %v5391_v62  ;;  %v11873_v62 = vld [vmem:[#allocation93_spill] sm:$0xff] }
 0x6aa   : > { %v10255_v45 = vpack.c.bf16 %v5474_v32, %v5470_v31  ;;  %v4072_v31 = vadd.f32 %v10105_v0, %v9811_v17 }
 0x6ab   : > { %11870 = vst [vmem:[#allocation64_spill] sm:$0xff] %v10253_v44 }
 0x6ac   : > { %11871 = vst [vmem:[#allocation114_spill] sm:$0xff] %v10255_v45  ;;  %v4526_v42 = vpop.f32.mrf.mxu2 }
 0x6ad   : > { %v4527_v13 = vadd.f32 %v4526_v42, %v4358_v26  ;;  %v4238_v43 = vpop.f32.mrf.mxu0 }
 0x6ae   : > { %v4239_v47 = vadd.f32 %v4238_v43, %v4070_v24  ;;  %v4359_v10 = vpop.f32.mrf.mxu1  ;;  %4669 = vmatmul.bf16.gmra.mxu3 %v11872_v58  ;;  %v7429_v58 = vld [vmem:[#allocation10 + $0x138] sm:$0xf0] }
 0x6af   : > { %v4360_v32 = vadd.f32 %v4359_v10, %v10031_v27  ;;  %v5399_v26 = vmax.f32 %v4527_v13, 0.0 }
 0x6b0   : > { %4277 = vmatmul.bf16.gmra.mxu0 %v11873_v62  ;;  %v5478_v42 = vmax.f32 %v4239_v47, 0.0 }
 0x6b1   : > { %v10262_v2 = vpop.f32.mrf.mxu3 }
 0x6b4   : > { %v4528_v30 = vpop.f32.mrf.mxu2 }
 0x6b5   : > { %v4529_v20 = vadd.f32 %v4528_v30, %v4360_v32  ;;  %v4240_v49 = vpop.f32.mrf.mxu0  ;;  %v4075_v32 = vadd.f32 %v10118_v38, %v9811_v17 }
 0x6b6   : > { %v4241_v37 = vadd.f32 %v4240_v49, %v4072_v31  ;;  %v4362_v46 = vpop.f32.mrf.mxu1  ;;  %v11877_v49 = vld [vmem:[#allocation47_spill] sm:$0xff] }
 0x6b7   : > { %v5403_v24 = vmax.f32 %v4529_v20, 0.0  ;;  %v4363_v0 = vadd.f32 %v4362_v46, %v10031_v27 }
 0x6b8   : > { %v5482_v43 = vmax.f32 %v4241_v37, 0.0  ;;  %v11878_v37 = vld [vmem:[#allocation67_spill] sm:$0xff] }
 0x6b9   : > { %v10267_v45 = vpop.f32.mrf.mxu3  ;;  %4401 = vmatmul.bf16.gmra.mxu1 %v11874_v60  ;;  %4570 = vmatmul.bf16.gmra.mxu2 %v11840_v57  ;;  %v10271_v44 = vpack.c.bf16 %v5403_v24, %v5399_v26  ;;  %v4077_v24 = vadd.f32 %v10123_v9, %v9811_v17 }
 0x6ba   : > { %v10273_v10 = vpack.c.bf16 %v5482_v43, %v5478_v42 }
 0x6bb   : > { %11875 = vst [vmem:[#allocation66_spill] sm:$0xff] %v10271_v44  ;;  %v11879_v44 = vld [vmem:[#allocation69_spill] sm:$0xff] }
 0x6bc   : > { %11876 = vst [vmem:[#allocation115_spill] sm:$0xff] %v10273_v10  ;;  %v4531_v31 = vpop.f32.mrf.mxu2 }
 0x6bd   : > { %v4532_v13 = vadd.f32 %v4531_v31, %v4363_v0  ;;  %v4243_v30 = vpop.f32.mrf.mxu0 }
 0x6be   : > { %v4244_v47 = vadd.f32 %v4243_v30, %v4075_v32  ;;  %v4364_v20 = vpop.f32.mrf.mxu1  ;;  %4674 = vmatmul.bf16.gmra.mxu3 %v11877_v49 }
 0x6bf   : > { %v4365_v26 = vadd.f32 %v4364_v20, %v10031_v27  ;;  %v5407_v0 = vmax.f32 %v4532_v13, 0.0  ;;  %v7755_v20 = vld [vmem:[#allocation10 + $0x12c] sm:$0xf]  ;;  %v4080_v13 = vadd.f32 %v10136_v56, %v9811_v17  ;;  %v4082_v56 = vadd.f32 %v10141_v25, %v9811_v17 }
 0x6c0   : > { %4282 = vmatmul.bf16.gmra.mxu0 %v11878_v37  ;;  %v5486_v32 = vmax.f32 %v4244_v47, 0.0 }
 0x6c1   : > { %v10280_v23 = vpop.f32.mrf.mxu3 }
 0x6c4   : > { %v4533_v46 = vpop.f32.mrf.mxu2 }
 0x6c5   : > { %v4534_v42 = vadd.f32 %v4533_v46, %v4365_v26  ;;  %v4245_v43 = vpop.f32.mrf.mxu0 }
 0x6c6   : > { %v4246_v38 = vadd.f32 %v4245_v43, %v4077_v24  ;;  %v4367_v10 = vpop.f32.mrf.mxu1  ;;  %v7432_v24 = vor.u32 %v7755_v20, %v7429_v58 }
 0x6c7   : > { %v5411_v31 = vmax.f32 %v4534_v42, 0.0  ;;  %v4368_v26 = vadd.f32 %v4367_v10, %v10031_v27 }
 0x6c8   : > { %v5490_v30 = vmax.f32 %v4246_v38, 0.0  ;;  %5139 = vmatpush.bf16.msrb.mxu2 %v7432_v24 }
 0x6c9   : > { %4406 = vmatmul.bf16.gmra.mxu1 %v11879_v44  ;;  %4575 = vmatmul.bf16.gmra.mxu2 %v9834_v11  ;;  %v10287_v57 = vpop.f32.mrf.mxu3  ;;  %v10289_v49 = vpack.c.bf16 %v5411_v31, %v5407_v0  ;;  %v11882_v11 = vld [vmem:[#allocation49_spill] sm:$0xff]  ;;  %v7723_v31 = vld [vmem:[#allocation10 + $0x2c] sm:$0xf] }
 0x6ca   : > { %v10291_v9 = vpack.c.bf16 %v5490_v30, %v5486_v32  ;;  %v11883_v0 = vld [vmem:[#allocation33_spill] sm:$0xff]  ;;  %v11884_v44 = vld [vmem:[#allocation72_spill] sm:$0xff] }
 0x6cb   : > { %11880 = vst [vmem:[#allocation116_spill] sm:$0xff] %v10289_v49  ;;  %v7301_v49 = vld [vmem:[#allocation10 + $0x38] sm:$0xf0] }
 0x6cc   : > { %11881 = vst [vmem:[#allocation117_spill] sm:$0xff] %v10291_v9  ;;  %v4536_v47 = vpop.f32.mrf.mxu2  ;;  %v7304_v30 = vor.u32 %v7723_v31, %v7301_v49 }
 0x6cd   : > { %v4537_v46 = vadd.f32 %v4536_v47, %v4368_v26  ;;  %v4248_v42 = vpop.f32.mrf.mxu0 }
 0x6ce   : > { %v4249_v43 = vadd.f32 %v4248_v42, %v4080_v13  ;;  %v4369_v38 = vpop.f32.mrf.mxu1  ;;  %4679 = vmatmul.bf16.gmra.mxu3 %v11882_v11  ;;  %4970 = vmatpush.bf16.msrb.mxu1 %v7304_v30  ;;  %v4085_v30 = vadd.f32 %v10154_v50, %v9811_v17 }
 0x6cf   : > { %v4370_v58 = vadd.f32 %v4369_v38, %v10031_v27  ;;  %v5415_v47 = vmax.f32 %v4537_v46, 0.0 }
 0x6d0   : > { %4803 = vmatmul.bf16.vlgmr.msrb.gmra.mxu0 %v11883_v0  ;;  %v5494_v9 = vmax.f32 %v4249_v43, 0.0 }
 0x6d1   : > { %v10298_v32 = vpop.f32.mrf.mxu3 }
 0x6d4   : > { %v4538_v10 = vpop.f32.mrf.mxu2 }
 0x6d5   : > { %v4539_v20 = vadd.f32 %v4538_v10, %v4370_v58  ;;  %v4250_v26 = vpop.f32.mrf.mxu0 }
 0x6d6   : > { %v4251_v24 = vadd.f32 %v4250_v26, %v4082_v56  ;;  %v4372_v13 = vpop.f32.mrf.mxu1  ;;  %v11888_v26 = vld [vmem:[#allocation34_spill] sm:$0xff] }
 0x6d7   : > { %v5419_v42 = vmax.f32 %v4539_v20, 0.0  ;;  %v4373_v25 = vadd.f32 %v4372_v13, %v10031_v27  ;;  %v11887_v20 = vld [vmem:[#allocation51_spill] sm:$0xff] }
 0x6d8   : > { %v5498_v11 = vmax.f32 %v4251_v24, 0.0 }
 0x6d9   : > { %4411 = vmatmul.bf16.gmra.mxu1 %v11884_v44  ;;  %4580 = vmatmul.bf16.gmra.mxu2 %v9854_v59  ;;  %v10305_v49 = vpop.f32.mrf.mxu3  ;;  %v10307_v38 = vpack.c.bf16 %v5419_v42, %v5415_v47 }
 0x6da   : > { %v10309_v31 = vpack.c.bf16 %v5498_v11, %v5494_v9  ;;  %v4087_v11 = vadd.f32 %v10159_v63, %v9811_v17 }
 0x6db   : > { %11885 = vst [vmem:[#allocation33_spill] sm:$0xff] %v10307_v38  ;;  %v11889_v38 = vld [vmem:[#allocation75_spill] sm:$0xff] }
 0x6dc   : > { %11886 = vst [vmem:[#allocation72_spill] sm:$0xff] %v10309_v31  ;;  %v4541_v58 = vpop.f32.mrf.mxu2 }
 0x6dd   : > { %v4542_v46 = vadd.f32 %v4541_v58, %v4373_v25  ;;  %v4253_v56 = vpop.f32.mrf.mxu0 }
 0x6de   : > { %v4254_v43 = vadd.f32 %v4253_v56, %v4085_v30  ;;  %v4374_v10 = vpop.f32.mrf.mxu1  ;;  %4684 = vmatmul.bf16.gmra.mxu3 %v11887_v20 }
 0x6df   : > { %v4375_v47 = vadd.f32 %v4374_v10, %v10031_v27  ;;  %v5423_v25 = vmax.f32 %v4542_v46, 0.0 }
 0x6e0   : > { %4808 = vmatmul.bf16.gmra.mxu0 %v11888_v26  ;;  %v5502_v30 = vmax.f32 %v4254_v43, 0.0 }
 0x6e1   : > { %v10316_v24 = vpop.f32.mrf.mxu3 }
 0x6e4   : > { %v4543_v9 = vpop.f32.mrf.mxu2 }
 0x6e5   : > { %v4544_v13 = vadd.f32 %v4543_v9, %v4375_v47  ;;  %v4255_v42 = vpop.f32.mrf.mxu0  ;;  %v4090_v47 = vadd.f32 %v10172_v21, %v9811_v17 }
 0x6e6   : > { %v4256_v50 = vadd.f32 %v4255_v42, %v4087_v11  ;;  %v4377_v31 = vpop.f32.mrf.mxu1  ;;  %v11892_v42 = vld [vmem:[#allocation36_spill] sm:$0xff] }
 0x6e7   : > { %v5427_v58 = vmax.f32 %v4544_v13, 0.0  ;;  %v4378_v63 = vadd.f32 %v4377_v31, %v10031_v27 }
 0x6e8   : > { %v5506_v56 = vmax.f32 %v4256_v50, 0.0 }
 0x6e9   : > { %4416 = vmatmul.bf16.gmra.mxu1 %v11889_v38  ;;  %4585 = vmatmul.bf16.gmra.mxu2 %v9876_v19  ;;  %v10323_v59 = vpop.f32.mrf.mxu3  ;;  %v10325_v20 = vpack.c.bf16 %v5427_v58, %v5423_v25  ;;  %v4092_v58 = vadd.f32 %v10177_v48, %v9811_v17 }
 0x6ea   : > { %v10327_v10 = vpack.c.bf16 %v5506_v56, %v5502_v30 }
 0x6eb   : > { %11890 = vst [vmem:[#allocation34_spill] sm:$0xff] %v10325_v20  ;;  %v11893_v20 = vld [vmem:[#allocation78_spill] sm:$0xff] }
 0x6ec   : > { %11891 = vst [vmem:[#allocation118_spill] sm:$0xff] %v10327_v10  ;;  %v4546_v11 = vpop.f32.mrf.mxu2 }
 0x6ed   : > { %v4547_v46 = vadd.f32 %v4546_v11, %v4378_v63  ;;  %v4258_v9 = vpop.f32.mrf.mxu0 }
 0x6ee   : > { %v4259_v43 = vadd.f32 %v4258_v9, %v4090_v47  ;;  %v4379_v13 = vpop.f32.mrf.mxu1  ;;  %4689 = vmatmul.bf16.gmra.mxu3 %v11837_v29 }
 0x6ef   : > { %v4380_v25 = vadd.f32 %v4379_v13, %v10031_v27  ;;  %v5431_v63 = vmax.f32 %v4547_v46, 0.0 }
 0x6f0   : > { %4813 = vmatmul.bf16.gmra.mxu0 %v11892_v42  ;;  %v5510_v47 = vmax.f32 %v4259_v43, 0.0 }
 0x6f1   : > { %v10334_v50 = vpop.f32.mrf.mxu3 }
 0x6f4   : > { %v4548_v31 = vpop.f32.mrf.mxu2 }
 0x6f5   : > { %v4549_v30 = vadd.f32 %v4548_v31, %v4380_v25  ;;  %v4260_v56 = vpop.f32.mrf.mxu0  ;;  %v4095_v25 = vadd.f32 %v10190_v28, %v9811_v17 }
 0x6f6   : > { %v4261_v21 = vadd.f32 %v4260_v56, %v4092_v58  ;;  %v4382_v10 = vpop.f32.mrf.mxu1  ;;  %v11896_v56 = vld [vmem:[#allocation38_spill] sm:$0xff] }
 0x6f7   : > { %v5435_v11 = vmax.f32 %v4549_v30, 0.0  ;;  %v4383_v48 = vadd.f32 %v4382_v10, %v10031_v27 }
 0x6f8   : > { %v5514_v9 = vmax.f32 %v4261_v21, 0.0 }
 0x6f9   : > { %4421 = vmatmul.bf16.gmra.mxu1 %v11893_v20  ;;  %4590 = vmatmul.bf16.gmra.mxu2 %v9898_v1  ;;  %v10341_v19 = vpop.f32.mrf.mxu3  ;;  %v10343_v29 = vpack.c.bf16 %v5435_v11, %v5431_v63  ;;  %v4097_v11 = vadd.f32 %v10195_v34, %v9811_v17  ;;  %v7413_v20 = vld [vmem:[#allocation10 + $0x118] sm:$0xf0] }
 0x6fa   : > { %v10345_v13 = vpack.c.bf16 %v5514_v9, %v5510_v47 }
 0x6fb   : > { %11894 = vst [vmem:[#allocation36_spill] sm:$0xff] %v10343_v29  ;;  %v11897_v29 = vld [vmem:[#allocation81_spill] sm:$0xff] }
 0x6fc   : > { %11895 = vst [vmem:[#allocation119_spill] sm:$0xff] %v10345_v13  ;;  %v4551_v58 = vpop.f32.mrf.mxu2 }
 0x6fd   : > { %v4552_v46 = vadd.f32 %v4551_v58, %v4383_v48  ;;  %v4263_v31 = vpop.f32.mrf.mxu0 }
 0x6fe   : > { %v4264_v43 = vadd.f32 %v4263_v31, %v4095_v25  ;;  %v4384_v30 = vpop.f32.mrf.mxu1  ;;  %4694 = vmatmul.bf16.gmra.mxu3 %v11841_v55 }
 0x6ff   : > { %v4385_v63 = vadd.f32 %v4384_v30, %v10031_v27  ;;  %v5439_v48 = vmax.f32 %v4552_v46, 0.0  ;;  %v7751_v30 = vld [vmem:[#allocation10 + $0x10c] sm:$0xf]  ;;  %v4100_v46 = vadd.f32 %v10208_v15, %v9811_v17  ;;  %v4102_v15 = vadd.f32 %v10213_v52, %v9811_v17 }
 0x700   : > { %4818 = vmatmul.bf16.gmra.mxu0 %v11896_v56  ;;  %v5518_v25 = vmax.f32 %v4264_v43, 0.0 }
 0x701   : > { %v10352_v21 = vpop.f32.mrf.mxu3 }
 0x704   : > { %v4553_v10 = vpop.f32.mrf.mxu2 }
 0x705   : > { %v4554_v47 = vadd.f32 %v4553_v10, %v4385_v63  ;;  %v4265_v9 = vpop.f32.mrf.mxu0 }
 0x706   : > { %v4266_v28 = vadd.f32 %v4265_v9, %v4097_v11  ;;  %v4387_v13 = vpop.f32.mrf.mxu1  ;;  %v7416_v11 = vor.u32 %v7751_v30, %v7413_v20 }
 0x707   : > { %v5443_v58 = vmax.f32 %v4554_v47, 0.0  ;;  %v4388_v63 = vadd.f32 %v4387_v13, %v10031_v27 }
 0x708   : > { %v5522_v31 = vmax.f32 %v4266_v28, 0.0  ;;  %5140 = vmatpush.bf16.msrb.mxu2 %v7416_v11 }
 0x709   : > { %4426 = vmatmul.bf16.gmra.mxu1 %v11897_v29  ;;  %4595 = vmatmul.bf16.gmra.mxu2 %v9920_v51  ;;  %v10359_v1 = vpop.f32.mrf.mxu3  ;;  %v10361_v55 = vpack.c.bf16 %v5443_v58, %v5439_v48  ;;  %v11900_v48 = vld [vmem:[#allocation40_spill] sm:$0xff] }
 0x70a   : > { %v10363_v34 = vpack.c.bf16 %v5522_v31, %v5518_v25  ;;  %v7719_v58 = vld [vmem:[#allocation10 + $0xc] sm:$0xf] }
 0x70b   : > { %11898 = vst [vmem:[#allocation38_spill] sm:$0xff] %v10361_v55  ;;  %v7285_v55 = vld [vmem:[#allocation10 + $0x18] sm:$0xf0] }
 0x70c   : > { %11899 = vst [vmem:[#allocation81_spill] sm:$0xff] %v10363_v34  ;;  %v4556_v43 = vpop.f32.mrf.mxu2  ;;  %v7288_v31 = vor.u32 %v7719_v58, %v7285_v55 }
 0x70d   : > { %v4557_v10 = vadd.f32 %v4556_v43, %v4388_v63  ;;  %v4268_v47 = vpop.f32.mrf.mxu0 }
 0x70e   : > { %v4269_v9 = vadd.f32 %v4268_v47, %v4100_v46  ;;  %v4389_v28 = vpop.f32.mrf.mxu1  ;;  %4699 = vmatmul.bf16.gmra.mxu3 %v11844_v41  ;;  %4971 = vmatpush.bf16.msrb.mxu1 %v7288_v31  ;;  %v11901_v41 = vld [vmem:[#allocation84_spill] sm:$0xff]  ;;  %v4105_v31 = vadd.f32 %v10226_v22, %v9811_v17 }
 0x70f   : > { %v4390_v20 = vadd.f32 %v4389_v28, %v10031_v27  ;;  %v5447_v43 = vmax.f32 %v4557_v10, 0.0 }
 0x710   : > { %4823 = vmatmul.bf16.gmra.mxu0 %v11900_v48  ;;  %v5526_v34 = vmax.f32 %v4269_v9, 0.0 }
 0x711   : > { %v10370_v25 = vpop.f32.mrf.mxu3 }
 0x714   : > { %v4558_v13 = vpop.f32.mrf.mxu2 }
 0x715   : > { %v4559_v30 = vadd.f32 %v4558_v13, %v4390_v20  ;;  %v4270_v63 = vpop.f32.mrf.mxu0 }
 0x716   : > { %v4271_v11 = vadd.f32 %v4270_v63, %v4102_v15  ;;  %v4392_v46 = vpop.f32.mrf.mxu1 }
 0x717   : > { %v5451_v47 = vmax.f32 %v4559_v30, 0.0  ;;  %v4393_v52 = vadd.f32 %v4392_v46, %v10031_v27  ;;  %v11904_v30 = vld [vmem:[#allocation42_spill] sm:$0xff] }
 0x718   : > { %v5530_v51 = vmax.f32 %v4271_v11, 0.0 }
 0x719   : > { %4431 = vmatmul.bf16.gmra.mxu1 %v11901_v41  ;;  %4600 = vmatmul.bf16.gmra.mxu2 %v9942_v40  ;;  %v10377_v55 = vpop.f32.mrf.mxu3  ;;  %v10379_v28 = vpack.c.bf16 %v5451_v47, %v5447_v43 }
 0x71a   : > { %v10381_v58 = vpack.c.bf16 %v5530_v51, %v5526_v34  ;;  %v4107_v51 = vadd.f32 %v10231_v7, %v9811_v17 }
 0x71b   : > { %11902 = vst [vmem:[#allocation40_spill] sm:$0xff] %v10379_v28 }
 0x71c   : > { %11903 = vst [vmem:[#allocation84_spill] sm:$0xff] %v10381_v58  ;;  %v4561_v20 = vpop.f32.mrf.mxu2  ;;  %v11905_v58 = vld [vmem:[#allocation87_spill] sm:$0xff] }
 0x71d   : > { %v4562_v10 = vadd.f32 %v4561_v20, %v4393_v52  ;;  %v4273_v15 = vpop.f32.mrf.mxu0 }
 0x71e   : > { %v4274_v9 = vadd.f32 %v4273_v15, %v4105_v31  ;;  %v4394_v13 = vpop.f32.mrf.mxu1  ;;  %4704 = vmatmul.bf16.gmra.mxu3 %v11847_v33 }
 0x71f   : > { %v4395_v11 = vadd.f32 %v4394_v13, %v10031_v27  ;;  %v5455_v52 = vmax.f32 %v4562_v10, 0.0 }
 0x720   : > { %4828 = vmatmul.bf16.gmra.mxu0 %v11904_v30  ;;  %v5534_v31 = vmax.f32 %v4274_v9, 0.0 }
 0x721   : > { %v10388_v63 = vpop.f32.mrf.mxu3 }
 0x724   : > { %v4563_v34 = vpop.f32.mrf.mxu2 }
 0x725   : > { %v4564_v46 = vadd.f32 %v4563_v34, %v4395_v11  ;;  %v4275_v43 = vpop.f32.mrf.mxu0  ;;  %v4110_v11 = vadd.f32 %v10244_v8, %v9811_v17 }
 0x726   : > { %v4276_v22 = vadd.f32 %v4275_v43, %v4107_v51  ;;  %v4397_v47 = vpop.f32.mrf.mxu1  ;;  %v11908_v43 = vld [vmem:[#allocation44_spill] sm:$0xff] }
 0x727   : > { %v5459_v20 = vmax.f32 %v4564_v46, 0.0  ;;  %v4398_v7 = vadd.f32 %v4397_v47, %v10031_v27 }
 0x728   : > { %v5538_v15 = vmax.f32 %v4276_v22, 0.0 }
 0x729   : > { %4436 = vmatmul.bf16.gmra.mxu1 %v11905_v58  ;;  %4605 = vmatmul.bf16.gmra.mxu2 %v11863_v14  ;;  %v10395_v28 = vpop.f32.mrf.mxu3  ;;  %v10397_v40 = vpack.c.bf16 %v5459_v20, %v5455_v52  ;;  %v4112_v20 = vadd.f32 %v10249_v39, %v9811_v17 }
 0x72a   : > { %v10399_v13 = vpack.c.bf16 %v5538_v15, %v5534_v31 }
 0x72b   : > { %11906 = vst [vmem:[#allocation42_spill] sm:$0xff] %v10397_v40  ;;  %v11909_v40 = vld [vmem:[#allocation90_spill] sm:$0xff] }
 0x72c   : > { %11907 = vst [vmem:[#allocation87_spill] sm:$0xff] %v10399_v13  ;;  %v4566_v51 = vpop.f32.mrf.mxu2 }
 0x72d   : > { %v4567_v10 = vadd.f32 %v4566_v51, %v4398_v7  ;;  %v4278_v34 = vpop.f32.mrf.mxu0 }
 0x72e   : > { %v4279_v9 = vadd.f32 %v4278_v34, %v4110_v11  ;;  %v4399_v46 = vpop.f32.mrf.mxu1  ;;  %4709 = vmatmul.bf16.gmra.mxu3 %v11850_v54 }
 0x72f   : > { %v4400_v52 = vadd.f32 %v4399_v46, %v10031_v27  ;;  %v5463_v7 = vmax.f32 %v4567_v10, 0.0 }
 0x730   : > { %4833 = vmatmul.bf16.gmra.mxu0 %v11908_v43  ;;  %v5542_v11 = vmax.f32 %v4279_v9, 0.0 }
 0x731   : > { %v10406_v22 = vpop.f32.mrf.mxu3 }
 0x734   : > { %v4568_v47 = vpop.f32.mrf.mxu2 }
 0x735   : > { %v4569_v31 = vadd.f32 %v4568_v47, %v4400_v52  ;;  %v4280_v15 = vpop.f32.mrf.mxu0  ;;  %v4115_v52 = vadd.f32 %v10262_v2, %v9811_v17 }
 0x736   : > { %v4281_v8 = vadd.f32 %v4280_v15, %v4112_v20  ;;  %v4402_v13 = vpop.f32.mrf.mxu1  ;;  %v11912_v15 = vld [vmem:[#allocation46_spill] sm:$0xff] }
 0x737   : > { %v5467_v51 = vmax.f32 %v4569_v31, 0.0  ;;  %v4403_v39 = vadd.f32 %v4402_v13, %v10031_v27  ;;  %v4117_v13 = vadd.f32 %v10267_v45, %v9811_v17 }
 0x738   : > { %v5546_v34 = vmax.f32 %v4281_v8, 0.0 }
 0x739   : > { %4441 = vmatmul.bf16.gmra.mxu1 %v11909_v40  ;;  %4610 = vmatmul.bf16.gmra.mxu2 %v11868_v61  ;;  %v10413_v14 = vpop.f32.mrf.mxu3  ;;  %v10415_v54 = vpack.c.bf16 %v5467_v51, %v5463_v7  ;;  %v7789_v7 = vld [vmem:[#allocation11 + $0x38] sm:$0xff] }
 0x73a   : > { %v10417_v46 = vpack.c.bf16 %v5546_v34, %v5542_v11  ;;  %5946 = vmatpush.bf16.msra.mxu3 %v7789_v7  ;;  %v7797_v7 = vld [vmem:[#allocation11 + $0x78] sm:$0xff] }
 0x73b   : > { %11910 = vst [vmem:[#allocation44_spill] sm:$0xff] %v10415_v54  ;;  %6115 = vmatpush.bf16.msra.mxu0 %v7797_v7 }
 0x73c   : > { %11911 = vst [vmem:[#allocation90_spill] sm:$0xff] %v10417_v46  ;;  %v4571_v20 = vpop.f32.mrf.mxu2  ;;  %v10432_v46 = vld [vmem:[%s11561_s11] sm:$0xf] }
 0x73d   : > { %v4572_v10 = vadd.f32 %v4571_v20, %v4403_v39  ;;  %v4283_v47 = vpop.f32.mrf.mxu0  ;;  %v10435_v54 = vperm.slane %v10432_v46, 2 }
 0x73e   : > { %v4284_v9 = vadd.f32 %v4283_v47, %v4115_v52  ;;  %v4404_v31 = vpop.f32.mrf.mxu1  ;;  %4714 = vmatmul.bf16.gmra.mxu3 %v11853_v6 }
 0x73f   : > { %v4405_v51 = vadd.f32 %v4404_v31, %v10031_v27  ;;  %v5471_v52 = vmax.f32 %v4572_v10, 0.0  ;;  %v7813_v10 = vld [vmem:[#allocation11 + $0xf8] sm:$0xff] }
 0x740   : > { %4838 = vmatmul.bf16.gmra.mxu0 %v11912_v15  ;;  %v5550_v31 = vmax.f32 %v4284_v9, 0.0  ;;  %6453 = vmatpush.bf16.msra.mxu2 %v7813_v10 }
 0x741   : > { %v10424_v8 = vpop.f32.mrf.mxu3 }
 0x744   : > { %v4573_v11 = vpop.f32.mrf.mxu2 }
 0x745   : > { %v4574_v2 = vadd.f32 %v4573_v11, %v4405_v51  ;;  %v4285_v34 = vpop.f32.mrf.mxu0  ;;  %v4636_v11 = vadd.f32 %v10280_v23, %v10435_v54  ;;  %v4638_v23 = vadd.f32 %v10287_v57, %v10435_v54 }
 0x746   : > { %v4286_v39 = vadd.f32 %v4285_v34, %v4117_v13  ;;  %v4407_v20 = vpop.f32.mrf.mxu1 }
 0x747   : > { %v5475_v47 = vmax.f32 %v4574_v2, 0.0  ;;  %v4408_v13 = vadd.f32 %v4407_v20, %v10031_v27 }
 0x748   : > { %v5554_v61 = vmax.f32 %v4286_v39, 0.0 }
 0x749   : > { %4446 = vmatmul.bf16.gmra.mxu1 %v10003_v5  ;;  %4615 = vmatmul.bf16.gmra.mxu2 %v11873_v62  ;;  %v10439_v17 = vpop.f32.mrf.mxu3  ;;  %v10441_v45 = vpack.c.bf16 %v5475_v47, %v5471_v52  ;;  %v11915_v52 = vld [vmem:[#allocation48_spill] sm:$0xff]  ;;  %v7805_v47 = vld [vmem:[#allocation11 + $0xb8] sm:$0xff] }
 0x74a   : > { %v10443_v51 = vpack.c.bf16 %v5554_v61, %v5550_v31  ;;  %6284 = vmatpush.bf16.msra.mxu1 %v7805_v47 }
 0x74b   : > { %11913 = vst [vmem:[#allocation46_spill] sm:$0xff] %v10441_v45 }
 0x74c   : > { %11914 = vst [vmem:[#allocation120_spill] sm:$0xff] %v10443_v51  ;;  %v4576_v2 = vpop.f32.mrf.mxu2 }
 0x74d   : > { %v4577_v9 = vadd.f32 %v4576_v2, %v4408_v13  ;;  %v4804_v34 = vpop.f32.mrf.mxu0 }
 0x74e   : > { %v4805_v39 = vadd.f32 %v4804_v34, %v4636_v11  ;;  %v4409_v62 = vpop.f32.mrf.mxu1  ;;  %4719 = vmatmul.bf16.gmra.mxu3 %v11856_v4 }
 0x74f   : > { %v4410_v61 = vadd.f32 %v4409_v62, %v10031_v27  ;;  %v5479_v11 = vmax.f32 %v4577_v9, 0.0 }
 0x750   : > { %4843 = vmatmul.bf16.gmra.mxu0 %v11915_v52  ;;  %v5304_v34 = vmax.f32 %v4805_v39, 0.0 }
 0x751   : > { %v10450_v45 = vpop.f32.mrf.mxu3 }
 0x754   : > { %v4578_v20 = vpop.f32.mrf.mxu2 }
 0x755   : > { %v4579_v31 = vadd.f32 %v4578_v20, %v4410_v61  ;;  %v4806_v10 = vpop.f32.mrf.mxu0  ;;  %v4641_v61 = vadd.f32 %v10298_v32, %v10435_v54 }
 0x756   : > { %v4807_v7 = vadd.f32 %v4806_v10, %v4638_v23  ;;  %v4412_v13 = vpop.f32.mrf.mxu1  ;;  %v11918_v10 = vld [vmem:[#allocation50_spill] sm:$0xff] }
 0x757   : > { %v5483_v2 = vmax.f32 %v4579_v31, 0.0  ;;  %v4413_v57 = vadd.f32 %v4412_v13, %v10031_v27 }
 0x758   : > { %v5308_v51 = vmax.f32 %v4807_v7, 0.0 }
 0x759   : > { %4451 = vmatmul.bf16.gmra.mxu1 %v10025_v12  ;;  %4620 = vmatmul.bf16.gmra.mxu2 %v11878_v37  ;;  %v10457_v4 = vpop.f32.mrf.mxu3  ;;  %v10459_v47 = vpack.c.bf16 %v5483_v2, %v5479_v11 }
 0x75a   : > { %v10461_v62 = vpack.c.bf16 %v5308_v51, %v5304_v34  ;;  %v4643_v51 = vadd.f32 %v10305_v49, %v10435_v54 }
 0x75b   : > { %11916 = vst [vmem:[#allocation48_spill] sm:$0xff] %v10459_v47 }
 0x75c   : > { %11917 = vst [vmem:[#allocation121_spill] sm:$0xff] %v10461_v62  ;;  %v4581_v23 = vpop.f32.mrf.mxu2 }
 0x75d   : > { %v4582_v9 = vadd.f32 %v4581_v23, %v4413_v57  ;;  %v4809_v20 = vpop.f32.mrf.mxu0 }
 0x75e   : > { %v4810_v39 = vadd.f32 %v4809_v20, %v4641_v61  ;;  %v4414_v31 = vpop.f32.mrf.mxu1  ;;  %4724 = vmatmul.bf16.gmra.mxu3 %v11859_v36 }
 0x75f   : > { %v4415_v11 = vadd.f32 %v4414_v31, %v10031_v27  ;;  %v5487_v57 = vmax.f32 %v4582_v9, 0.0 }
 0x760   : > { %4848 = vmatmul.bf16.gmra.mxu0 %v11918_v10  ;;  %v5312_v61 = vmax.f32 %v4810_v39, 0.0 }
 0x761   : > { %v10468_v7 = vpop.f32.mrf.mxu3 }
 0x764   : > { %v4583_v13 = vpop.f32.mrf.mxu2 }
 0x765   : > { %v4584_v2 = vadd.f32 %v4583_v13, %v4415_v11  ;;  %v4811_v34 = vpop.f32.mrf.mxu0  ;;  %v4646_v11 = vadd.f32 %v10316_v24, %v10435_v54 }
 0x766   : > { %v4812_v32 = vadd.f32 %v4811_v34, %v4643_v51  ;;  %v4417_v47 = vpop.f32.mrf.mxu1  ;;  %v11921_v34 = vld [vmem:[#allocation27_spill] sm:$0xff] }
 0x767   : > { %v5491_v23 = vmax.f32 %v4584_v2, 0.0  ;;  %v4418_v49 = vadd.f32 %v4417_v47, %v10031_v27 }
 0x768   : > { %v5316_v20 = vmax.f32 %v4812_v32, 0.0  ;;  %v4648_v32 = vadd.f32 %v10323_v59, %v10435_v54 }
 0x769   : > { %v10473_v62 = vpop.f32.mrf.mxu3  ;;  %4972 = vmatmul.bf16.vlgmr.msrb.gmra.mxu1 %v9359_v35  ;;  %5141 = vmatmul.bf16.vlgmr.msrb.gmra.mxu2 %v11883_v0  ;;  %v10477_v37 = vpack.c.bf16 %v5491_v23, %v5487_v57 }
 0x76a   : > { %v10479_v31 = vpack.c.bf16 %v5316_v20, %v5312_v61 }
 0x76b   : > { %11919 = vst [vmem:[#allocation50_spill] sm:$0xff] %v10477_v37 }
 0x76c   : > { %11920 = vst [vmem:[#allocation122_spill] sm:$0xff] %v10479_v31  ;;  %v4586_v51 = vpop.f32.mrf.mxu2 }
 0x76d   : > { %v4587_v9 = vadd.f32 %v4586_v51, %v4418_v49  ;;  %v4814_v13 = vpop.f32.mrf.mxu0 }
 0x76e   : > { %v4815_v39 = vadd.f32 %v4814_v13, %v4646_v11  ;;  %v4419_v2 = vpop.f32.mrf.mxu1  ;;  %4729 = vmatmul.bf16.gmra.mxu3 %v11864_v53 }
 0x76f   : > { %v4420_v0 = vadd.f32 %v4419_v2, %v10031_v27  ;;  %v5495_v20 = vmax.f32 %v4587_v9, 0.0 }
 0x770   : > { %4853 = vmatmul.bf16.gmra.mxu0 %v11921_v34  ;;  %v5320_v11 = vmax.f32 %v4815_v39, 0.0 }
 0x771   : > { %v10486_v35 = vpop.f32.mrf.mxu3 }
 0x774   : > { %v4588_v47 = vpop.f32.mrf.mxu2 }
 0x775   : > { %v4589_v57 = vadd.f32 %v4588_v47, %v4420_v0  ;;  %v4816_v23 = vpop.f32.mrf.mxu0  ;;  %v4651_v0 = vadd.f32 %v10334_v50, %v10435_v54 }
 0x776   : > { %v4817_v24 = vadd.f32 %v4816_v23, %v4648_v32  ;;  %v4422_v61 = vpop.f32.mrf.mxu1 }
 0x777   : > { %v5499_v49 = vmax.f32 %v4589_v57, 0.0  ;;  %v4423_v59 = vadd.f32 %v4422_v61, %v10031_v27 }
 0x778   : > { %v5324_v51 = vmax.f32 %v4817_v24, 0.0  ;;  %v4653_v24 = vadd.f32 %v10341_v19, %v10435_v54  ;;  %v7796_v19 = vld [vmem:[#allocation11 + $0x70] sm:$0xff] }
 0x779   : > { %v10491_v13 = vpop.f32.mrf.mxu3  ;;  %4977 = vmatmul.bf16.gmra.mxu1 %v9379_v16  ;;  %5146 = vmatmul.bf16.gmra.mxu2 %v11888_v26  ;;  %v10495_v37 = vpack.c.bf16 %v5499_v49, %v5495_v20  ;;  %v7788_v26 = vld [vmem:[#allocation11 + $0x30] sm:$0xff] }
 0x77a   : > { %v10497_v2 = vpack.c.bf16 %v5324_v51, %v5320_v11  ;;  %5947 = vmatpush.bf16.msra.mxu3 %v7788_v26  ;;  %6116 = vmatpush.bf16.msra.mxu0 %v7796_v19 }
 0x77b   : > { %11922 = vst [vmem:[#allocation27_spill] sm:$0xff] %v10495_v37  ;;  %v11924_v37 = vld [vmem:[#allocation35_spill] sm:$0xff] }
 0x77c   : > { %11923 = vst [vmem:[#allocation123_spill] sm:$0xff] %v10497_v2  ;;  %v4591_v32 = vpop.f32.mrf.mxu2  ;;  %v7812_v2 = vld [vmem:[#allocation11 + $0xf0] sm:$0xff] }
 0x77d   : > { %v4592_v9 = vadd.f32 %v4591_v32, %v4423_v59  ;;  %v4819_v47 = vpop.f32.mrf.mxu0  ;;  %6454 = vmatpush.bf16.msra.mxu2 %v7812_v2 }
 0x77e   : > { %v4820_v39 = vadd.f32 %v4819_v47, %v4651_v0  ;;  %v4424_v57 = vpop.f32.mrf.mxu1  ;;  %4734 = vmatmul.bf16.gmra.mxu3 %v11869_v3 }
 0x77f   : > { %v4425_v23 = vadd.f32 %v4424_v57, %v10031_v27  ;;  %v5503_v51 = vmax.f32 %v4592_v9, 0.0  ;;  %v4656_v9 = vadd.f32 %v10352_v21, %v10435_v54  ;;  %v4658_v21 = vadd.f32 %v10359_v1, %v10435_v54 }
 0x780   : > { %4858 = vmatmul.bf16.gmra.mxu0 %v9608_v18  ;;  %v5328_v0 = vmax.f32 %v4820_v39, 0.0 }
 0x781   : > { %v10504_v16 = vpop.f32.mrf.mxu3 }
 0x784   : > { %v4593_v61 = vpop.f32.mrf.mxu2 }
 0x785   : > { %v4594_v50 = vadd.f32 %v4593_v61, %v4425_v23  ;;  %v4821_v20 = vpop.f32.mrf.mxu0 }
 0x786   : > { %v4822_v49 = vadd.f32 %v4821_v20, %v4653_v24  ;;  %v4427_v11 = vpop.f32.mrf.mxu1 }
 0x787   : > { %v5507_v59 = vmax.f32 %v4594_v50, 0.0  ;;  %v4428_v26 = vadd.f32 %v4427_v11, %v10031_v27  ;;  %v7804_v50 = vld [vmem:[#allocation11 + $0xb0] sm:$0xff] }
 0x788   : > { %v5332_v32 = vmax.f32 %v4822_v49, 0.0  ;;  %6285 = vmatpush.bf16.msra.mxu1 %v7804_v50 }
 0x789   : > { %v10509_v47 = vpop.f32.mrf.mxu3  ;;  %4982 = vmatmul.bf16.gmra.mxu1 %v11924_v37  ;;  %5151 = vmatmul.bf16.gmra.mxu2 %v11892_v42  ;;  %v10513_v57 = vpack.c.bf16 %v5507_v59, %v5503_v51  ;;  %v11927_v42 = vld [vmem:[#allocation30_spill] sm:$0xff] }
 0x78a   : > { %v10515_v31 = vpack.c.bf16 %v5332_v32, %v5328_v0 }
 0x78b   : > { %11925 = vst [vmem:[#allocation35_spill] sm:$0xff] %v10513_v57  ;;  %v11933_v57 = vld [vmem:[#allocation39_spill] sm:$0xff] }
 0x78c   : > { %11926 = vst [vmem:[#allocation124_spill] sm:$0xff] %v10515_v31  ;;  %v4596_v23 = vpop.f32.mrf.mxu2  ;;  %v7811_v31 = vld [vmem:[#allocation11 + $0xe8] sm:$0xff] }
 0x78d   : > { %v4597_v39 = vadd.f32 %v4596_v23, %v4428_v26  ;;  %v4824_v24 = vpop.f32.mrf.mxu0  ;;  %6455 = vmatpush.bf16.msra.mxu2 %v7811_v31 }
 0x78e   : > { %v4825_v61 = vadd.f32 %v4824_v24, %v4656_v9  ;;  %v4429_v37 = vpop.f32.mrf.mxu1  ;;  %4739 = vmatmul.bf16.gmra.mxu3 %v11874_v60  ;;  %v11928_v24 = vld [vmem:[#allocation37_spill] sm:$0xff] }
 0x78f   : > { %v4430_v49 = vadd.f32 %v4429_v37, %v10031_v27  ;;  %v5511_v32 = vmax.f32 %v4597_v39, 0.0 }
 0x790   : > { %4863 = vmatmul.bf16.gmra.mxu0 %v11927_v42  ;;  %v5336_v26 = vmax.f32 %v4825_v61, 0.0 }
 0x791   : > { %v10522_v20 = vpop.f32.mrf.mxu3 }
 0x794   : > { %v4598_v11 = vpop.f32.mrf.mxu2 }
 0x795   : > { %v4599_v2 = vadd.f32 %v4598_v11, %v4430_v49  ;;  %v4826_v51 = vpop.f32.mrf.mxu0  ;;  %v4661_v49 = vadd.f32 %v10370_v25, %v10435_v54 }
 0x796   : > { %v4827_v59 = vadd.f32 %v4826_v51, %v4658_v21  ;;  %v4432_v0 = vpop.f32.mrf.mxu1  ;;  %v11931_v51 = vld [vmem:[#allocation69_spill] sm:$0xff] }
 0x797   : > { %v5515_v19 = vmax.f32 %v4599_v2, 0.0  ;;  %v4433_v1 = vadd.f32 %v4432_v0, %v10031_v27 }
 0x798   : > { %v5340_v9 = vmax.f32 %v4827_v59, 0.0  ;;  %v11932_v59 = vld [vmem:[#allocation32_spill] sm:$0xff] }
 0x799   : > { %v10527_v23 = vpop.f32.mrf.mxu3  ;;  %4987 = vmatmul.bf16.gmra.mxu1 %v11928_v24  ;;  %5156 = vmatmul.bf16.gmra.mxu2 %v11896_v56  ;;  %v10531_v50 = vpack.c.bf16 %v5515_v19, %v5511_v32  ;;  %v4663_v32 = vadd.f32 %v10377_v55, %v10435_v54 }
 0x79a   : > { %v10533_v37 = vpack.c.bf16 %v5340_v9, %v5336_v26 }
 0x79b   : > { %11929 = vst [vmem:[#allocation30_spill] sm:$0xff] %v10531_v50 }
 0x79c   : > { %11930 = vst [vmem:[#allocation37_spill] sm:$0xff] %v10533_v37  ;;  %v4601_v21 = vpop.f32.mrf.mxu2 }
 0x79d   : > { %v4602_v39 = vadd.f32 %v4601_v21, %v4433_v1  ;;  %v4829_v11 = vpop.f32.mrf.mxu0 }
 0x79e   : > { %v4830_v61 = vadd.f32 %v4829_v11, %v4661_v49  ;;  %v4434_v2 = vpop.f32.mrf.mxu1  ;;  %4744 = vmatmul.bf16.gmra.mxu3 %v11931_v51 }
 0x79f   : > { %v4435_v56 = vadd.f32 %v4434_v2, %v10031_v27  ;;  %v5519_v1 = vmax.f32 %v4602_v39, 0.0 }
 0x7a0   : > { %4868 = vmatmul.bf16.gmra.mxu0 %v11932_v59  ;;  %v5344_v49 = vmax.f32 %v4830_v61, 0.0 }
 0x7a1   : > { %v10540_v24 = vpop.f32.mrf.mxu3 }
 0x7a4   : > { %v4603_v0 = vpop.f32.mrf.mxu2 }
 0x7a5   : > { %v4604_v19 = vadd.f32 %v4603_v0, %v4435_v56  ;;  %v4831_v26 = vpop.f32.mrf.mxu0  ;;  %v4666_v56 = vadd.f32 %v10388_v63, %v10435_v54 }
 0x7a6   : > { %v4832_v25 = vadd.f32 %v4831_v26, %v4663_v32  ;;  %v4437_v9 = vpop.f32.mrf.mxu1  ;;  %v11936_v26 = vld [vmem:[#allocation53_spill] sm:$0xff] }
 0x7a7   : > { %v5523_v21 = vmax.f32 %v4604_v19, 0.0  ;;  %v4438_v55 = vadd.f32 %v4437_v9, %v10031_v27 }
 0x7a8   : > { %v5348_v11 = vmax.f32 %v4832_v25, 0.0  ;;  %v4668_v25 = vadd.f32 %v10395_v28, %v10435_v54 }
 0x7a9   : > { %v10545_v50 = vpop.f32.mrf.mxu3  ;;  %4992 = vmatmul.bf16.gmra.mxu1 %v11933_v57  ;;  %5161 = vmatmul.bf16.gmra.mxu2 %v11900_v48  ;;  %v10549_v37 = vpack.c.bf16 %v5523_v21, %v5519_v1 }
 0x7aa   : > { %v10551_v2 = vpack.c.bf16 %v5348_v11, %v5344_v49 }
 0x7ab   : > { %11934 = vst [vmem:[#allocation69_spill] sm:$0xff] %v10549_v37  ;;  %v11937_v37 = vld [vmem:[#allocation41_spill] sm:$0xff] }
 0x7ac   : > { %11935 = vst [vmem:[#allocation32_spill] sm:$0xff] %v10551_v2  ;;  %v4606_v32 = vpop.f32.mrf.mxu2 }
 0x7ad   : > { %v4607_v39 = vadd.f32 %v4606_v32, %v4438_v55  ;;  %v4834_v0 = vpop.f32.mrf.mxu0 }
 0x7ae   : > { %v4835_v61 = vadd.f32 %v4834_v0, %v4666_v56  ;;  %v4439_v19 = vpop.f32.mrf.mxu1  ;;  %4749 = vmatmul.bf16.gmra.mxu3 %v11884_v44 }
 0x7af   : > { %v4440_v48 = vadd.f32 %v4439_v19, %v10031_v27  ;;  %v5527_v11 = vmax.f32 %v4607_v39, 0.0 }
 0x7b0   : > { %4873 = vmatmul.bf16.gmra.mxu0 %v11936_v26  ;;  %v5352_v56 = vmax.f32 %v4835_v61, 0.0 }
 0x7b1   : > { %v10558_v57 = vpop.f32.mrf.mxu3 }
 0x7b4   : > { %v4608_v9 = vpop.f32.mrf.mxu2 }
 0x7b5   : > { %v4609_v1 = vadd.f32 %v4608_v9, %v4440_v48  ;;  %v4836_v21 = vpop.f32.mrf.mxu0  ;;  %v4671_v48 = vadd.f32 %v10406_v22, %v10435_v54 }
 0x7b6   : > { %v4837_v63 = vadd.f32 %v4836_v21, %v4668_v25  ;;  %v4442_v49 = vpop.f32.mrf.mxu1  ;;  %v11940_v21 = vld [vmem:[#allocation55_spill] sm:$0xff] }
 0x7b7   : > { %v5531_v55 = vmax.f32 %v4609_v1, 0.0  ;;  %v4443_v28 = vadd.f32 %v4442_v49, %v10031_v27  ;;  %v4673_v49 = vadd.f32 %v10413_v14, %v10435_v54  ;;  %v7795_v14 = vld [vmem:[#allocation11 + $0x68] sm:$0xff] }
 0x7b8   : > { %v5356_v32 = vmax.f32 %v4837_v63, 0.0  ;;  %6117 = vmatpush.bf16.msra.mxu0 %v7795_v14 }
 0x7b9   : > { %v10563_v0 = vpop.f32.mrf.mxu3  ;;  %4997 = vmatmul.bf16.gmra.mxu1 %v11937_v37  ;;  %5166 = vmatmul.bf16.gmra.mxu2 %v11904_v30  ;;  %v10567_v2 = vpack.c.bf16 %v5531_v55, %v5527_v11  ;;  %v7787_v30 = vld [vmem:[#allocation11 + $0x28] sm:$0xff] }
 0x7ba   : > { %v10569_v19 = vpack.c.bf16 %v5356_v32, %v5352_v56  ;;  %5948 = vmatpush.bf16.msra.mxu3 %v7787_v30 }
 0x7bb   : > { %11938 = vst [vmem:[#allocation39_spill] sm:$0xff] %v10567_v2 }
 0x7bc   : > { %11939 = vst [vmem:[#allocation53_spill] sm:$0xff] %v10569_v19  ;;  %v4611_v25 = vpop.f32.mrf.mxu2  ;;  %v11941_v19 = vld [vmem:[#allocation43_spill] sm:$0xff] }
 0x7bd   : > { %v4612_v39 = vadd.f32 %v4611_v25, %v4443_v28  ;;  %v4839_v9 = vpop.f32.mrf.mxu0 }
 0x7be   : > { %v4840_v61 = vadd.f32 %v4839_v9, %v4671_v48  ;;  %v4444_v1 = vpop.f32.mrf.mxu1  ;;  %4754 = vmatmul.bf16.gmra.mxu3 %v11889_v38 }
 0x7bf   : > { %v4445_v63 = vadd.f32 %v4444_v1, %v10031_v27  ;;  %v5535_v28 = vmax.f32 %v4612_v39, 0.0  ;;  %v4676_v39 = vadd.f32 %v10424_v8, %v10435_v54  ;;  %v4678_v8 = vadd.f32 %v10439_v17, %v10435_v54 }
 0x7c0   : > { %4878 = vmatmul.bf16.gmra.mxu0 %v11940_v21  ;;  %v5360_v25 = vmax.f32 %v4840_v61, 0.0 }
 0x7c1   : > { %v10576_v37 = vpop.f32.mrf.mxu3 }
 0x7c4   : > { %v4613_v11 = vpop.f32.mrf.mxu2 }
 0x7c5   : > { %v4614_v22 = vadd.f32 %v4613_v11, %v4445_v63  ;;  %v4841_v55 = vpop.f32.mrf.mxu0 }
 0x7c6   : > { %v4842_v56 = vadd.f32 %v4841_v55, %v4673_v49  ;;  %v4447_v32 = vpop.f32.mrf.mxu1  ;;  %v7803_v55 = vld [vmem:[#allocation11 + $0xa8] sm:$0xff] }
 0x7c7   : > { %v5539_v48 = vmax.f32 %v4614_v22, 0.0  ;;  %v4448_v30 = vadd.f32 %v4447_v32, %v10031_v27  ;;  %v11944_v22 = vld [vmem:[#allocation78_spill] sm:$0xff]  ;;  %6286 = vmatpush.bf16.msra.mxu1 %v7803_v55 }
 0x7c8   : > { %v5364_v9 = vmax.f32 %v4842_v56, 0.0 }
 0x7c9   : > { %v10581_v2 = vpop.f32.mrf.mxu3  ;;  %5002 = vmatmul.bf16.gmra.mxu1 %v11941_v19  ;;  %5171 = vmatmul.bf16.gmra.mxu2 %v11908_v43  ;;  %v10585_v1 = vpack.c.bf16 %v5539_v48, %v5535_v28  ;;  %v11945_v43 = vld [vmem:[#allocation57_spill] sm:$0xff] }
 0x7ca   : > { %v10587_v38 = vpack.c.bf16 %v5364_v9, %v5360_v25 }
 0x7cb   : > { %11942 = vst [vmem:[#allocation41_spill] sm:$0xff] %v10585_v1  ;;  %v11946_v1 = vld [vmem:[#allocation45_spill] sm:$0xff] }
 0x7cc   : > { %11943 = vst [vmem:[#allocation55_spill] sm:$0xff] %v10587_v38  ;;  %v4616_v63 = vpop.f32.mrf.mxu2  ;;  %v7810_v38 = vld [vmem:[#allocation11 + $0xe0] sm:$0xff] }
 0x7cd   : > { %v4617_v61 = vadd.f32 %v4616_v63, %v4448_v30  ;;  %v4844_v49 = vpop.f32.mrf.mxu0  ;;  %6456 = vmatpush.bf16.msra.mxu2 %v7810_v38  ;;  %v4698_v38 = vadd.f32 %v10509_v47, %v10435_v54 }
 0x7ce   : > { %v4845_v11 = vadd.f32 %v4844_v49, %v4676_v39  ;;  %v4449_v19 = vpop.f32.mrf.mxu1  ;;  %4759 = vmatmul.bf16.gmra.mxu3 %v11944_v22 }
 0x7cf   : > { %v4450_v32 = vadd.f32 %v4449_v19, %v10031_v27  ;;  %v5543_v14 = vmax.f32 %v4617_v61, 0.0 }
 0x7d0   : > { %4883 = vmatmul.bf16.gmra.mxu0 %v11945_v43  ;;  %v5368_v39 = vmax.f32 %v4845_v11, 0.0 }
 0x7d1   : > { %v10594_v56 = vpop.f32.mrf.mxu3 }
 0x7d4   : > { %v4618_v28 = vpop.f32.mrf.mxu2 }
 0x7d5   : > { %v4619_v31 = vadd.f32 %v4618_v28, %v4450_v32  ;;  %v4846_v48 = vpop.f32.mrf.mxu0  ;;  %v4681_v32 = vadd.f32 %v10450_v45, %v10435_v54 }
 0x7d6   : > { %v4847_v25 = vadd.f32 %v4846_v48, %v4678_v8  ;;  %v4452_v9 = vpop.f32.mrf.mxu1  ;;  %v11949_v48 = vld [vmem:[#allocation59_spill] sm:$0xff] }
 0x7d7   : > { %v5547_v30 = vmax.f32 %v4619_v31, 0.0  ;;  %v4453_v17 = vadd.f32 %v4452_v9, %v10031_v27 }
 0x7d8   : > { %v5372_v63 = vmax.f32 %v4847_v25, 0.0  ;;  %v4683_v25 = vadd.f32 %v10457_v4, %v10435_v54 }
 0x7d9   : > { %v10599_v49 = vpop.f32.mrf.mxu3  ;;  %5007 = vmatmul.bf16.gmra.mxu1 %v11946_v1  ;;  %5176 = vmatmul.bf16.gmra.mxu2 %v11912_v15  ;;  %v10603_v55 = vpack.c.bf16 %v5547_v30, %v5543_v14 }
 0x7da   : > { %v10605_v19 = vpack.c.bf16 %v5372_v63, %v5368_v39 }
 0x7db   : > { %11947 = vst [vmem:[#allocation43_spill] sm:$0xff] %v10603_v55 }
 0x7dc   : > { %11948 = vst [vmem:[#allocation78_spill] sm:$0xff] %v10605_v19  ;;  %v4621_v8 = vpop.f32.mrf.mxu2  ;;  %v11950_v19 = vld [vmem:[#allocation47_spill] sm:$0xff] }
 0x7dd   : > { %v4622_v61 = vadd.f32 %v4621_v8, %v4453_v17  ;;  %v4849_v28 = vpop.f32.mrf.mxu0 }
 0x7de   : > { %v4850_v11 = vadd.f32 %v4849_v28, %v4681_v32  ;;  %v4454_v31 = vpop.f32.mrf.mxu1  ;;  %4764 = vmatmul.bf16.gmra.mxu3 %v11897_v29  ;;  %v10618_v32 = vperm.slane %v10432_v46, 3 }
 0x7df   : > { %v4455_v15 = vadd.f32 %v4454_v31, %v10031_v27  ;;  %v5551_v63 = vmax.f32 %v4622_v61, 0.0  ;;  %v4686_v61 = vadd.f32 %v10468_v7, %v10435_v54 }
 0x7e0   : > { %4888 = vmatmul.bf16.gmra.mxu0 %v11949_v48  ;;  %v5376_v8 = vmax.f32 %v4850_v11, 0.0 }
 0x7e1   : > { %v10612_v1 = vpop.f32.mrf.mxu3 }
 0x7e4   : > { %v4623_v9 = vpop.f32.mrf.mxu2 }
 0x7e5   : > { %v4624_v14 = vadd.f32 %v4623_v9, %v4455_v15  ;;  %v4851_v30 = vpop.f32.mrf.mxu0 }
 0x7e6   : > { %v4852_v45 = vadd.f32 %v4851_v30, %v4683_v25  ;;  %v4973_v39 = vpop.f32.mrf.mxu1  ;;  %v4688_v30 = vadd.f32 %v10473_v62, %v10435_v54 }
 0x7e7   : > { %v5555_v17 = vmax.f32 %v4624_v14, 0.0  ;;  %v4974_v31 = vadd.f32 %v4973_v39, %v10618_v32  ;;  %v11953_v14 = vld [vmem:[#allocation61_spill] sm:$0xff] }
 0x7e8   : > { %v5380_v28 = vmax.f32 %v4852_v45, 0.0 }
 0x7e9   : > { %v10620_v55 = vpop.f32.mrf.mxu3  ;;  %5012 = vmatmul.bf16.gmra.mxu1 %v11950_v19  ;;  %5181 = vmatmul.bf16.gmra.mxu2 %v11915_v52  ;;  %v10624_v27 = vpack.c.bf16 %v5555_v17, %v5551_v63 }
 0x7ea   : > { %v10626_v4 = vpack.c.bf16 %v5380_v28, %v5376_v8 }
 0x7eb   : > { %11951 = vst [vmem:[#allocation57_spill] sm:$0xff] %v10624_v27  ;;  %v11955_v27 = vld [vmem:[#allocation49_spill] sm:$0xff] }
 0x7ec   : > { %11952 = vst [vmem:[#allocation45_spill] sm:$0xff] %v10626_v4  ;;  %v5142_v15 = vpop.f32.mrf.mxu2  ;;  %v11958_v4 = vld [vmem:[#allocation51_spill] sm:$0xff] }
 0x7ed   : > { %v5143_v46 = vadd.f32 %v5142_v15, %v4974_v31  ;;  %v4854_v25 = vpop.f32.mrf.mxu0 }
 0x7ee   : > { %v4855_v11 = vadd.f32 %v4854_v25, %v4686_v61  ;;  %4769 = vmatmul.bf16.gmra.mxu3 %v11901_v41  ;;  %v4975_v9 = vpop.f32.mrf.mxu1 }
 0x7ef   : > { %v4976_v52 = vadd.f32 %v4975_v9, %v10618_v32  ;;  %v5305_v8 = vmax.f32 %v5143_v46, 0.0 }
 0x7f0   : > { %4893 = vmatmul.bf16.gmra.mxu0 %v11953_v14  ;;  %v5384_v31 = vmax.f32 %v4855_v11, 0.0 }
 0x7f1   : > { %v10633_v19 = vpop.f32.mrf.mxu3 }
 0x7f4   : > { %v5144_v45 = vpop.f32.mrf.mxu2 }
 0x7f5   : > { %v5145_v39 = vadd.f32 %v5144_v45, %v4976_v52  ;;  %v4856_v63 = vpop.f32.mrf.mxu0  ;;  %v4691_v52 = vadd.f32 %v10486_v35, %v10435_v54 }
 0x7f6   : > { %v4857_v7 = vadd.f32 %v4856_v63, %v4688_v30  ;;  %v4978_v17 = vpop.f32.mrf.mxu1  ;;  %v11957_v63 = vld [vmem:[#allocation63_spill] sm:$0xff] }
 0x7f7   : > { %v5309_v28 = vmax.f32 %v5145_v39, 0.0  ;;  %v4979_v62 = vadd.f32 %v4978_v17, %v10618_v32  ;;  %v4693_v17 = vadd.f32 %v10491_v13, %v10435_v54  ;;  %v7794_v13 = vld [vmem:[#allocation11 + $0x60] sm:$0xff] }
 0x7f8   : > { %v5388_v61 = vmax.f32 %v4857_v7, 0.0  ;;  %6118 = vmatpush.bf16.msra.mxu0 %v7794_v13 }
 0x7f9   : > { %v10638_v15 = vpack.c.bf16 %v5309_v28, %v5305_v8  ;;  %v10640_v25 = vpop.f32.mrf.mxu3  ;;  %5017 = vmatmul.bf16.gmra.mxu1 %v11955_v27  ;;  %5186 = vmatmul.bf16.gmra.mxu2 %v11918_v10  ;;  %v7786_v27 = vld [vmem:[#allocation11 + $0x20] sm:$0xff] }
 0x7fa   : > { %v10644_v9 = vpack.c.bf16 %v5388_v61, %v5384_v31  ;;  %5949 = vmatpush.bf16.msra.mxu3 %v7786_v27 }
 0x7fb   : > { %11954 = vst [vmem:[#allocation59_spill] sm:$0xff] %v10638_v15 }
 0x7fc   : > { %11956 = vst [vmem:[#allocation47_spill] sm:$0xff] %v10644_v9  ;;  %v5147_v30 = vpop.f32.mrf.mxu2 }
 0x7fd   : > { %v5148_v46 = vadd.f32 %v5147_v30, %v4979_v62  ;;  %v4859_v45 = vpop.f32.mrf.mxu0 }
 0x7fe   : > { %v4860_v11 = vadd.f32 %v4859_v45, %v4691_v52  ;;  %4774 = vmatmul.bf16.gmra.mxu3 %v11905_v58  ;;  %v4980_v39 = vpop.f32.mrf.mxu1 }
 0x7ff   : > { %v4981_v10 = vadd.f32 %v4980_v39, %v10618_v32  ;;  %v5313_v62 = vmax.f32 %v5148_v46, 0.0  ;;  %v4696_v46 = vadd.f32 %v10504_v16, %v10435_v54 }
 0x800   : > { %4898 = vmatmul.bf16.gmra.mxu0 %v11957_v63  ;;  %v5392_v30 = vmax.f32 %v4860_v11, 0.0 }
 0x801   : > { %v10651_v7 = vpop.f32.mrf.mxu3 }
 0x804   : > { %v5149_v8 = vpop.f32.mrf.mxu2 }
 0x805   : > { %v5150_v35 = vadd.f32 %v5149_v8, %v4981_v10  ;;  %v4861_v28 = vpop.f32.mrf.mxu0  ;;  %v7785_v8 = vld [vmem:[#allocation11 + $0x18] sm:$0xff] }
 0x806   : > { %v4862_v31 = vadd.f32 %v4861_v28, %v4693_v17  ;;  %v4983_v61 = vpop.f32.mrf.mxu1  ;;  %5950 = vmatpush.bf16.msra.mxu3 %v7785_v8  ;;  %v7802_v28 = vld [vmem:[#allocation11 + $0xa0] sm:$0xff] }
 0x807   : > { %v5317_v52 = vmax.f32 %v5150_v35, 0.0  ;;  %v4984_v27 = vadd.f32 %v4983_v61, %v10618_v32  ;;  %v11960_v35 = vld [vmem:[#allocation65_spill] sm:$0xff]  ;;  %6287 = vmatpush.bf16.msra.mxu1 %v7802_v28  ;;  %v11961_v28 = vld [vmem:[#allocation28_spill] sm:$0xff] }
 0x808   : > { %v5396_v45 = vmax.f32 %v4862_v31, 0.0  ;;  %v7784_v61 = vld [vmem:[#allocation11 + $0x10] sm:$0xff] }
 0x809   : > { %v10656_v9 = vpop.f32.mrf.mxu3  ;;  %5022 = vmatmul.bf16.gmra.mxu1 %v11958_v4  ;;  %5191 = vmatmul.bf16.gmra.mxu2 %v11921_v34  ;;  %v10660_v39 = vpack.c.bf16 %v5317_v52, %v5313_v62 }
 0x80a   : > { %v10662_v15 = vpack.c.bf16 %v5396_v45, %v5392_v30  ;;  %5951 = vmatpush.bf16.msra.mxu3 %v7784_v61  ;;  %v7783_v45 = vld [vmem:[#allocation11 + $0x8] sm:$0xff] }
 0x80c   : > { %11959 = vst [vmem:[#allocation61_spill] sm:$0xff] %v10662_v15  ;;  %v5152_v10 = vpop.f32.mrf.mxu2 }
 0x80d   : > { %v5153_v11 = vadd.f32 %v5152_v10, %v4984_v27  ;;  %v4864_v17 = vpop.f32.mrf.mxu0 }
 0x80e   : > { %v4865_v4 = vadd.f32 %v4864_v17, %v4696_v46  ;;  %4779 = vmatmul.bf16.gmra.mxu3 %v11909_v40  ;;  %v4985_v34 = vpop.f32.mrf.mxu1 }
 0x80f   : > { %v4986_v16 = vadd.f32 %v4985_v34, %v10618_v32  ;;  %v5321_v46 = vmax.f32 %v5153_v11, 0.0  ;;  %5952 = vmatpush.bf16.msra.mxu3 %v7783_v45  ;;  %v7782_v34 = vld [vmem:[#allocation11] sm:$0xff]  ;;  %v4701_v11 = vadd.f32 %v10522_v20, %v10435_v54  ;;  %v11963_v45 = vld [vmem:[#allocation68_spill] sm:$0xff] }
 0x810   : > { %4903 = vmatmul.bf16.gmra.mxu0 %v11960_v35  ;;  %v5400_v17 = vmax.f32 %v4865_v4, 0.0 }
 0x811   : > { %v10669_v31 = vpop.f32.mrf.mxu3 }
 0x813   : > { %5953 = vmatpush.bf16.msra.mxu3 %v7782_v34 }
 0x814   : > { %v5154_v62 = vpop.f32.mrf.mxu2 }
 0x815   : > { %v5155_v52 = vadd.f32 %v5154_v62, %v4986_v16  ;;  %v4866_v30 = vpop.f32.mrf.mxu0 }
 0x816   : > { %v4867_v13 = vadd.f32 %v4866_v30, %v4698_v38  ;;  %v4988_v27 = vpop.f32.mrf.mxu1 }
 0x817   : > { %v5325_v10 = vmax.f32 %v5155_v52, 0.0  ;;  %v4989_v16 = vadd.f32 %v4988_v27, %v10618_v32  ;;  %v4703_v27 = vadd.f32 %v10527_v23, %v10435_v54 }
 0x818   : > { %v5404_v8 = vmax.f32 %v4867_v13, 0.0 }
 0x819   : > { %v10674_v15 = vpop.f32.mrf.mxu3  ;;  %5027 = vmatmul.bf16.gmra.mxu1 %v11961_v28  ;;  %5196 = vmatmul.bf16.gmra.mxu2 %v9608_v18  ;;  %v10678_v61 = vpack.c.bf16 %v5325_v10, %v5321_v46 }
 0x81a   : > { %v10680_v47 = vpack.c.bf16 %v5404_v8, %v5400_v17 }
 0x81c   : > { %11962 = vst [vmem:[#allocation49_spill] sm:$0xff] %v10680_v47  ;;  %v5157_v38 = vpop.f32.mrf.mxu2 }
 0x81d   : > { %v5158_v4 = vadd.f32 %v5157_v38, %v4989_v16  ;;  %v4869_v62 = vpop.f32.mrf.mxu0 }
 0x81e   : > { %v4870_v52 = vadd.f32 %v4869_v62, %v4701_v11  ;;  %4784 = vmatmul.bf16.gmra.mxu3 %v10003_v5  ;;  %v4990_v30 = vpop.f32.mrf.mxu1  ;;  %v11964_v62 = vld [vmem:[#allocation29_spill] sm:$0xff] }
 0x81f   : > { %v4991_v13 = vadd.f32 %v4990_v30, %v10618_v32  ;;  %v5329_v28 = vmax.f32 %v5158_v4, 0.0 }
 0x820   : > { %4908 = vmatmul.bf16.gmra.mxu0 %v11963_v45  ;;  %v5408_v16 = vmax.f32 %v4870_v52, 0.0 }
 0x821   : > { %v10687_v18 = vpop.f32.mrf.mxu3 }
 0x824   : > { %v5159_v46 = vpop.f32.mrf.mxu2 }
 0x825   : > { %v5160_v10 = vadd.f32 %v5159_v46, %v4991_v13  ;;  %v4871_v17 = vpop.f32.mrf.mxu0  ;;  %v4706_v13 = vadd.f32 %v10540_v24, %v10435_v54 }
 0x826   : > { %v4872_v20 = vadd.f32 %v4871_v17, %v4703_v27  ;;  %v4993_v8 = vpop.f32.mrf.mxu1  ;;  %v11967_v17 = vld [vmem:[#allocation70_spill] sm:$0xff] }
 0x827   : > { %v5333_v34 = vmax.f32 %v5160_v10, 0.0  ;;  %v4994_v23 = vadd.f32 %v4993_v8, %v10618_v32 }
 0x828   : > { %v5412_v11 = vmax.f32 %v4872_v20, 0.0 }
 0x829   : > { %v10692_v38 = vpop.f32.mrf.mxu3  ;;  %5032 = vmatmul.bf16.gmra.mxu1 %v11964_v62  ;;  %5201 = vmatmul.bf16.gmra.mxu2 %v11927_v42  ;;  %v10696_v47 = vpack.c.bf16 %v5333_v34, %v5329_v28  ;;  %v4708_v28 = vadd.f32 %v10545_v50, %v10435_v54 }
 0x82a   : > { %v10698_v30 = vpack.c.bf16 %v5412_v11, %v5408_v16 }
 0x82b   : > { %11965 = vst [vmem:[#allocation63_spill] sm:$0xff] %v10696_v47 }
 0x82c   : > { %11966 = vst [vmem:[#allocation51_spill] sm:$0xff] %v10698_v30  ;;  %v5162_v27 = vpop.f32.mrf.mxu2  ;;  %v11968_v30 = vld [vmem:[#allocation31_spill] sm:$0xff] }
 0x82d   : > { %v5163_v4 = vadd.f32 %v5162_v27, %v4994_v23  ;;  %v4874_v46 = vpop.f32.mrf.mxu0 }
 0x82e   : > { %v4875_v52 = vadd.f32 %v4874_v46, %v4706_v13  ;;  %4789 = vmatmul.bf16.gmra.mxu3 %v10025_v12  ;;  %v4995_v10 = vpop.f32.mrf.mxu1 }
 0x82f   : > { %v4996_v42 = vadd.f32 %v4995_v10, %v10618_v32  ;;  %v5337_v62 = vmax.f32 %v5163_v4, 0.0 }
 0x830   : > { %4913 = vmatmul.bf16.gmra.mxu0 %v11967_v17  ;;  %v5416_v13 = vmax.f32 %v4875_v52, 0.0 }
 0x831   : > { %v10705_v20 = vpop.f32.mrf.mxu3 }
 0x834   : > { %v5164_v8 = vpop.f32.mrf.mxu2 }
 0x835   : > { %v5165_v34 = vadd.f32 %v5164_v8, %v4996_v42  ;;  %v4876_v16 = vpop.f32.mrf.mxu0  ;;  %v4711_v42 = vadd.f32 %v10558_v57, %v10435_v54 }
 0x836   : > { %v4877_v24 = vadd.f32 %v4876_v16, %v4708_v28  ;;  %v4998_v11 = vpop.f32.mrf.mxu1  ;;  %v11971_v16 = vld [vmem:[#allocation71_spill] sm:$0xff] }
 0x837   : > { %v5341_v23 = vmax.f32 %v5165_v34, 0.0  ;;  %v4999_v50 = vadd.f32 %v4998_v11, %v10618_v32 }
 0x838   : > { %v5420_v27 = vmax.f32 %v4877_v24, 0.0  ;;  %v11972_v24 = vld [vmem:[#allocation73_spill] sm:$0xff] }
 0x839   : > { %v10710_v46 = vpop.f32.mrf.mxu3  ;;  %5037 = vmatmul.bf16.gmra.mxu1 %v11968_v30  ;;  %5206 = vmatmul.bf16.gmra.mxu2 %v11932_v59  ;;  %v10714_v47 = vpack.c.bf16 %v5341_v23, %v5337_v62  ;;  %v4713_v62 = vadd.f32 %v10563_v0, %v10435_v54 }
 0x83a   : > { %v10716_v10 = vpack.c.bf16 %v5420_v27, %v5416_v13 }
 0x83b   : > { %11969 = vst [vmem:[#allocation65_spill] sm:$0xff] %v10714_v47  ;;  %v7793_v47 = vld [vmem:[#allocation11 + $0x58] sm:$0xff] }
 0x83c   : > { %11970 = vst [vmem:[#allocation28_spill] sm:$0xff] %v10716_v10  ;;  %v5167_v28 = vpop.f32.mrf.mxu2  ;;  %6119 = vmatpush.bf16.msra.mxu0 %v7793_v47 }
 0x83d   : > { %v5168_v4 = vadd.f32 %v5167_v28, %v4999_v50  ;;  %v4879_v8 = vpop.f32.mrf.mxu0 }
 0x83e   : > { %v4880_v52 = vadd.f32 %v4879_v8, %v4711_v42  ;;  %v5000_v34 = vpop.f32.mrf.mxu1  ;;  %5954 = vmatmul.bf16.vlgmr.msra.gmra.mxu3 %v11971_v16 }
 0x83f   : > { %v5001_v59 = vadd.f32 %v5000_v34, %v10618_v32  ;;  %v5345_v50 = vmax.f32 %v5168_v4, 0.0  ;;  %v7809_v34 = vld [vmem:[#allocation11 + $0xd8] sm:$0xff]  ;;  %v4716_v4 = vadd.f32 %v10576_v37, %v10435_v54  ;;  %v4718_v37 = vadd.f32 %v10581_v2, %v10435_v54 }
 0x840   : > { %4918 = vmatmul.bf16.gmra.mxu0 %v11972_v24  ;;  %v5424_v42 = vmax.f32 %v4880_v52, 0.0  ;;  %6457 = vmatpush.bf16.msra.mxu2 %v7809_v34 }
 0x841   : > { %v10723_v30 = vpop.f32.mrf.mxu3 }
 0x844   : > { %v5169_v11 = vpop.f32.mrf.mxu2 }
 0x845   : > { %v5170_v23 = vadd.f32 %v5169_v11, %v5001_v59  ;;  %v4881_v13 = vpop.f32.mrf.mxu0 }
 0x846   : > { %v4882_v57 = vadd.f32 %v4881_v13, %v4713_v62  ;;  %v5003_v27 = vpop.f32.mrf.mxu1  ;;  %v11974_v13 = vld [vmem:[#allocation74_spill] sm:$0xff] }
 0x847   : > { %v5349_v28 = vmax.f32 %v5170_v23, 0.0  ;;  %v5004_v59 = vadd.f32 %v5003_v27, %v10618_v32 }
 0x848   : > { %v5428_v8 = vmax.f32 %v4882_v57, 0.0  ;;  %v7801_v57 = vld [vmem:[#allocation11 + $0x98] sm:$0xff] }
 0x849   : > { %v10728_v10 = vpop.f32.mrf.mxu3  ;;  %5042 = vmatmul.bf16.gmra.mxu1 %v11847_v33  ;;  %5211 = vmatmul.bf16.gmra.mxu2 %v11936_v26  ;;  %v10732_v16 = vpack.c.bf16 %v5349_v28, %v5345_v50  ;;  %v11975_v26 = vld [vmem:[#allocation76_spill] sm:$0xff] }
 0x84a   : > { %v10734_v0 = vpack.c.bf16 %v5428_v8, %v5424_v42  ;;  %6288 = vmatpush.bf16.msra.mxu1 %v7801_v57 }
 0x84c   : > { %11973 = vst [vmem:[#allocation68_spill] sm:$0xff] %v10734_v0  ;;  %v5172_v62 = vpop.f32.mrf.mxu2  ;;  %v11976_v0 = vld [vmem:[#allocation54_spill] sm:$0xff] }
 0x84d   : > { %v5173_v52 = vadd.f32 %v5172_v62, %v5004_v59  ;;  %v4884_v11 = vpop.f32.mrf.mxu0 }
 0x84e   : > { %v4885_v23 = vadd.f32 %v4884_v11, %v4716_v4  ;;  %v5005_v33 = vpop.f32.mrf.mxu1  ;;  %5959 = vmatmul.bf16.gmra.mxu3 %v11974_v13 }
 0x84f   : > { %v5006_v27 = vadd.f32 %v5005_v33, %v10618_v32  ;;  %v5353_v59 = vmax.f32 %v5173_v52, 0.0 }
 0x850   : > { %4923 = vmatmul.bf16.gmra.mxu0 %v11975_v26  ;;  %v5432_v62 = vmax.f32 %v4885_v23, 0.0 }
 0x851   : > { %v10741_v50 = vpop.f32.mrf.mxu3 }
 0x854   : > { %v5174_v28 = vpop.f32.mrf.mxu2 }
 0x855   : > { %v5175_v42 = vadd.f32 %v5174_v28, %v5006_v27  ;;  %v4886_v47 = vpop.f32.mrf.mxu0  ;;  %v4721_v27 = vadd.f32 %v10594_v56, %v10435_v54 }
 0x856   : > { %v4887_v8 = vadd.f32 %v4886_v47, %v4718_v37  ;;  %v5008_v34 = vpop.f32.mrf.mxu1  ;;  %v11978_v47 = vld [vmem:[#allocation77_spill] sm:$0xff] }
 0x857   : > { %v5357_v4 = vmax.f32 %v5175_v42, 0.0  ;;  %v5009_v2 = vadd.f32 %v5008_v34, %v10618_v32 }
 0x858   : > { %v5436_v11 = vmax.f32 %v4887_v8, 0.0  ;;  %v11979_v8 = vld [vmem:[#allocation79_spill] sm:$0xff] }
 0x859   : > { %v10746_v13 = vpop.f32.mrf.mxu3  ;;  %5047 = vmatmul.bf16.gmra.mxu1 %v11976_v0  ;;  %5216 = vmatmul.bf16.gmra.mxu2 %v11940_v21  ;;  %v10750_v57 = vpack.c.bf16 %v5357_v4, %v5353_v59  ;;  %v4723_v59 = vadd.f32 %v10599_v49, %v10435_v54 }
 0x85a   : > { %v10752_v33 = vpack.c.bf16 %v5436_v11, %v5432_v62 }
 0x85c   : > { %11977 = vst [vmem:[#allocation29_spill] sm:$0xff] %v10752_v33  ;;  %v5177_v37 = vpop.f32.mrf.mxu2 }
 0x85d   : > { %v5178_v52 = vadd.f32 %v5177_v37, %v5009_v2  ;;  %v4889_v28 = vpop.f32.mrf.mxu0 }
 0x85e   : > { %v4890_v23 = vadd.f32 %v4889_v28, %v4721_v27  ;;  %v5010_v42 = vpop.f32.mrf.mxu1  ;;  %5964 = vmatmul.bf16.gmra.mxu3 %v11978_v47 }
 0x85f   : > { %v5011_v21 = vadd.f32 %v5010_v42, %v10618_v32  ;;  %v5361_v2 = vmax.f32 %v5178_v52, 0.0 }
 0x860   : > { %4928 = vmatmul.bf16.gmra.mxu0 %v11979_v8  ;;  %v5440_v27 = vmax.f32 %v4890_v23, 0.0 }
 0x861   : > { %v10759_v0 = vpop.f32.mrf.mxu3 }
 0x864   : > { %v5179_v34 = vpop.f32.mrf.mxu2 }
 0x865   : > { %v5180_v4 = vadd.f32 %v5179_v34, %v5011_v21  ;;  %v4891_v62 = vpop.f32.mrf.mxu0  ;;  %v4726_v21 = vadd.f32 %v10612_v1, %v10435_v54 }
 0x866   : > { %v4892_v56 = vadd.f32 %v4891_v62, %v4723_v59  ;;  %v5013_v11 = vpop.f32.mrf.mxu1  ;;  %v11982_v62 = vld [vmem:[#allocation80_spill] sm:$0xff] }
 0x867   : > { %v5365_v37 = vmax.f32 %v5180_v4, 0.0  ;;  %v5014_v49 = vadd.f32 %v5013_v11, %v10618_v32 }
 0x868   : > { %v5444_v28 = vmax.f32 %v4892_v56, 0.0  ;;  %v11983_v56 = vld [vmem:[#allocation82_spill] sm:$0xff] }
 0x869   : > { %v10764_v33 = vpop.f32.mrf.mxu3  ;;  %5052 = vmatmul.bf16.gmra.mxu1 %v11853_v6  ;;  %5221 = vmatmul.bf16.gmra.mxu2 %v11945_v43  ;;  %v10768_v47 = vpack.c.bf16 %v5365_v37, %v5361_v2  ;;  %v4728_v2 = vadd.f32 %v10620_v55, %v10435_v54 }
 0x86a   : > { %v10770_v42 = vpack.c.bf16 %v5444_v28, %v5440_v27 }
 0x86b   : > { %11980 = vst [vmem:[#allocation70_spill] sm:$0xff] %v10768_v47 }
 0x86c   : > { %11981 = vst [vmem:[#allocation31_spill] sm:$0xff] %v10770_v42  ;;  %v5182_v59 = vpop.f32.mrf.mxu2 }
 0x86d   : > { %v5183_v52 = vadd.f32 %v5182_v59, %v5014_v49  ;;  %v4894_v34 = vpop.f32.mrf.mxu0 }
 0x86e   : > { %v4895_v23 = vadd.f32 %v4894_v34, %v4726_v21  ;;  %v5015_v4 = vpop.f32.mrf.mxu1  ;;  %5969 = vmatmul.bf16.gmra.mxu3 %v11982_v62  ;;  %v11984_v62 = vld [vmem:[#allocation58_spill] sm:$0xff] }
 0x86f   : > { %v5016_v43 = vadd.f32 %v5015_v4, %v10618_v32  ;;  %v5369_v49 = vmax.f32 %v5183_v52, 0.0 }
 0x870   : > { %4933 = vmatmul.bf16.gmra.mxu0 %v11983_v56  ;;  %v5448_v21 = vmax.f32 %v4895_v23, 0.0 }
 0x871   : > { %v10777_v6 = vpop.f32.mrf.mxu3 }
 0x874   : > { %v5184_v11 = vpop.f32.mrf.mxu2 }
 0x875   : > { %v5185_v37 = vadd.f32 %v5184_v11, %v5016_v43  ;;  %v4896_v27 = vpop.f32.mrf.mxu0  ;;  %v4731_v43 = vadd.f32 %v10633_v19, %v10435_v54 }
 0x876   : > { %v4897_v1 = vadd.f32 %v4896_v27, %v4728_v2  ;;  %v5018_v28 = vpop.f32.mrf.mxu1  ;;  %v11987_v27 = vld [vmem:[#allocation83_spill] sm:$0xff] }
 0x877   : > { %v5373_v59 = vmax.f32 %v5185_v37, 0.0  ;;  %v5019_v55 = vadd.f32 %v5018_v28, %v10618_v32 }
 0x878   : > { %v5452_v34 = vmax.f32 %v4897_v1, 0.0  ;;  %v11988_v1 = vld [vmem:[#allocation85_spill] sm:$0xff] }
 0x879   : > { %v10782_v42 = vpop.f32.mrf.mxu3  ;;  %5057 = vmatmul.bf16.gmra.mxu1 %v11984_v62  ;;  %5226 = vmatmul.bf16.gmra.mxu2 %v11949_v48  ;;  %v10786_v47 = vpack.c.bf16 %v5373_v59, %v5369_v49  ;;  %v4733_v49 = vadd.f32 %v10640_v25, %v10435_v54 }
 0x87a   : > { %v10788_v4 = vpack.c.bf16 %v5452_v34, %v5448_v21 }
 0x87b   : > { %11985 = vst [vmem:[#allocation71_spill] sm:$0xff] %v10786_v47  ;;  %v7792_v47 = vld [vmem:[#allocation11 + $0x50] sm:$0xff] }
 0x87c   : > { %11986 = vst [vmem:[#allocation73_spill] sm:$0xff] %v10788_v4  ;;  %v5187_v2 = vpop.f32.mrf.mxu2  ;;  %6120 = vmatpush.bf16.msra.mxu0 %v7792_v47 }
 0x87d   : > { %v5188_v52 = vadd.f32 %v5187_v2, %v5019_v55  ;;  %v4899_v11 = vpop.f32.mrf.mxu0 }
 0x87e   : > { %v4900_v23 = vadd.f32 %v4899_v11, %v4731_v43  ;;  %v5020_v37 = vpop.f32.mrf.mxu1  ;;  %5974 = vmatmul.bf16.gmra.mxu3 %v11987_v27 }
 0x87f   : > { %v5021_v48 = vadd.f32 %v5020_v37, %v10618_v32  ;;  %v5377_v55 = vmax.f32 %v5188_v52, 0.0  ;;  %v7808_v37 = vld [vmem:[#allocation11 + $0xd0] sm:$0xff]  ;;  %v4736_v52 = vadd.f32 %v10651_v7, %v10435_v54  ;;  %v4738_v7 = vadd.f32 %v10656_v9, %v10435_v54 }
 0x880   : > { %4938 = vmatmul.bf16.gmra.mxu0 %v11988_v1  ;;  %v5456_v43 = vmax.f32 %v4900_v23, 0.0  ;;  %6458 = vmatpush.bf16.msra.mxu2 %v7808_v37 }
 0x881   : > { %v10795_v62 = vpop.f32.mrf.mxu3 }
 0x884   : > { %v5189_v28 = vpop.f32.mrf.mxu2 }
 0x885   : > { %v5190_v59 = vadd.f32 %v5189_v28, %v5021_v48  ;;  %v4901_v21 = vpop.f32.mrf.mxu0 }
 0x886   : > { %v4902_v19 = vadd.f32 %v4901_v21, %v4733_v49  ;;  %v5023_v34 = vpop.f32.mrf.mxu1  ;;  %v11990_v21 = vld [vmem:[#allocation86_spill] sm:$0xff] }
 0x887   : > { %v5381_v2 = vmax.f32 %v5190_v59, 0.0  ;;  %v5024_v48 = vadd.f32 %v5023_v34, %v10618_v32 }
 0x888   : > { %v5460_v11 = vmax.f32 %v4902_v19, 0.0  ;;  %v7800_v19 = vld [vmem:[#allocation11 + $0x90] sm:$0xff] }
 0x889   : > { %v10800_v4 = vpop.f32.mrf.mxu3  ;;  %5062 = vmatmul.bf16.gmra.mxu1 %v11859_v36  ;;  %5231 = vmatmul.bf16.gmra.mxu2 %v11953_v14  ;;  %v10804_v27 = vpack.c.bf16 %v5381_v2, %v5377_v55  ;;  %v11991_v14 = vld [vmem:[#allocation88_spill] sm:$0xff] }
 0x88a   : > { %v10806_v25 = vpack.c.bf16 %v5460_v11, %v5456_v43  ;;  %6289 = vmatpush.bf16.msra.mxu1 %v7800_v19 }
 0x88c   : > { %11989 = vst [vmem:[#allocation74_spill] sm:$0xff] %v10806_v25  ;;  %v5192_v49 = vpop.f32.mrf.mxu2  ;;  %v11996_v25 = vld [vmem:[#allocation92_spill] sm:$0xff] }
 0x88d   : > { %v5193_v23 = vadd.f32 %v5192_v49, %v5024_v48  ;;  %v4904_v28 = vpop.f32.mrf.mxu0 }
 0x88e   : > { %v4905_v59 = vadd.f32 %v4904_v28, %v4736_v52  ;;  %v5025_v36 = vpop.f32.mrf.mxu1  ;;  %5979 = vmatmul.bf16.gmra.mxu3 %v11990_v21 }
 0x88f   : > { %v5026_v34 = vadd.f32 %v5025_v36, %v10618_v32  ;;  %v5385_v48 = vmax.f32 %v5193_v23, 0.0 }
 0x890   : > { %4943 = vmatmul.bf16.gmra.mxu0 %v11991_v14  ;;  %v5464_v49 = vmax.f32 %v4905_v59, 0.0 }
 0x891   : > { %v10813_v55 = vpop.f32.mrf.mxu3 }
 0x894   : > { %v5194_v2 = vpop.f32.mrf.mxu2 }
 0x895   : > { %v5195_v43 = vadd.f32 %v5194_v2, %v5026_v34  ;;  %v4906_v47 = vpop.f32.mrf.mxu0  ;;  %v4741_v34 = vadd.f32 %v10669_v31, %v10435_v54 }
 0x896   : > { %v4907_v11 = vadd.f32 %v4906_v47, %v4738_v7  ;;  %v5028_v37 = vpop.f32.mrf.mxu1  ;;  %v11993_v47 = vld [vmem:[#allocation89_spill] sm:$0xff] }
 0x897   : > { %v5389_v52 = vmax.f32 %v5195_v43, 0.0  ;;  %v5029_v9 = vadd.f32 %v5028_v37, %v10618_v32 }
 0x898   : > { %v5468_v28 = vmax.f32 %v4907_v11, 0.0  ;;  %v11994_v11 = vld [vmem:[#allocation91_spill] sm:$0xff] }
 0x899   : > { %v10818_v21 = vpop.f32.mrf.mxu3  ;;  %5067 = vmatmul.bf16.gmra.mxu1 %v11864_v53  ;;  %5236 = vmatmul.bf16.gmra.mxu2 %v11957_v63  ;;  %v10822_v19 = vpack.c.bf16 %v5389_v52, %v5385_v48  ;;  %v4743_v48 = vadd.f32 %v10674_v15, %v10435_v54 }
 0x89a   : > { %v10824_v36 = vpack.c.bf16 %v5468_v28, %v5464_v49 }
 0x89c   : > { %11992 = vst [vmem:[#allocation76_spill] sm:$0xff] %v10824_v36  ;;  %v5197_v7 = vpop.f32.mrf.mxu2 }
 0x89d   : > { %v5198_v23 = vadd.f32 %v5197_v7, %v5029_v9  ;;  %v4909_v2 = vpop.f32.mrf.mxu0 }
 0x89e   : > { %v4910_v59 = vadd.f32 %v4909_v2, %v4741_v34  ;;  %v5030_v43 = vpop.f32.mrf.mxu1  ;;  %5984 = vmatmul.bf16.gmra.mxu3 %v11993_v47  ;;  %v7791_v34 = vld [vmem:[#allocation11 + $0x48] sm:$0xff] }
 0x89f   : > { %v5031_v63 = vadd.f32 %v5030_v43, %v10618_v32  ;;  %v5393_v9 = vmax.f32 %v5198_v23, 0.0  ;;  %6121 = vmatpush.bf16.msra.mxu0 %v7791_v34  ;;  %v4746_v23 = vadd.f32 %v10687_v18, %v10435_v54 }
 0x8a0   : > { %4948 = vmatmul.bf16.gmra.mxu0 %v11994_v11  ;;  %v5472_v2 = vmax.f32 %v4910_v59, 0.0 }
 0x8a1   : > { %v10831_v53 = vpop.f32.mrf.mxu3 }
 0x8a4   : > { %v5199_v37 = vpop.f32.mrf.mxu2 }
 0x8a5   : > { %v5200_v52 = vadd.f32 %v5199_v37, %v5031_v63  ;;  %v4911_v49 = vpop.f32.mrf.mxu0 }
 0x8a6   : > { %v4912_v31 = vadd.f32 %v4911_v49, %v4743_v48  ;;  %v5033_v28 = vpop.f32.mrf.mxu1  ;;  %v7790_v48 = vld [vmem:[#allocation11 + $0x40] sm:$0xff] }
 0x8a7   : > { %v5397_v7 = vmax.f32 %v5200_v52, 0.0  ;;  %v5034_v63 = vadd.f32 %v5033_v28, %v10618_v32  ;;  %6122 = vmatpush.bf16.msra.mxu0 %v7790_v48  ;;  %v4748_v28 = vadd.f32 %v10692_v38, %v10435_v54 }
 0x8a8   : > { %v5476_v36 = vmax.f32 %v4912_v31, 0.0 }
 0x8a9   : > { %v10836_v47 = vpop.f32.mrf.mxu3  ;;  %5072 = vmatmul.bf16.gmra.mxu1 %v11869_v3  ;;  %5241 = vmatmul.bf16.gmra.mxu2 %v11960_v35  ;;  %v10840_v43 = vpack.c.bf16 %v5397_v7, %v5393_v9  ;;  %v11997_v3 = vld [vmem:[#allocation93_spill] sm:$0xff] }
 0x8aa   : > { %v10842_v15 = vpack.c.bf16 %v5476_v36, %v5472_v2 }
 0x8ac   : > { %11995 = vst [vmem:[#allocation54_spill] sm:$0xff] %v10842_v15  ;;  %v5202_v37 = vpop.f32.mrf.mxu2 }
 0x8ad   : > { %v5203_v59 = vadd.f32 %v5202_v37, %v5034_v63  ;;  %v4914_v52 = vpop.f32.mrf.mxu0 }
 0x8ae   : > { %v4915_v49 = vadd.f32 %v4914_v52, %v4746_v23  ;;  %v5035_v31 = vpop.f32.mrf.mxu1  ;;  %5989 = vmatmul.bf16.gmra.mxu3 %v11996_v25 }
 0x8af   : > { %v5036_v36 = vadd.f32 %v5035_v31, %v10618_v32  ;;  %v5401_v63 = vmax.f32 %v5203_v59, 0.0 }
 0x8b0   : > { %4953 = vmatmul.bf16.gmra.mxu0 %v11997_v3  ;;  %v5480_v37 = vmax.f32 %v4915_v49, 0.0 }
 0x8b1   : > { %v10849_v35 = vpop.f32.mrf.mxu3 }
 0x8b4   : > { %v5204_v9 = vpop.f32.mrf.mxu2 }
 0x8b5   : > { %v5205_v7 = vadd.f32 %v5204_v9, %v5036_v36  ;;  %v4916_v18 = vpop.f32.mrf.mxu0  ;;  %v4751_v36 = vadd.f32 %v10705_v20, %v10435_v54 }
 0x8b6   : > { %v4917_v34 = vadd.f32 %v4916_v18, %v4748_v28  ;;  %v5038_v2 = vpop.f32.mrf.mxu1  ;;  %v11999_v18 = vld [vmem:[#allocation94_spill] sm:$0xff] }
 0x8b7   : > { %v5405_v23 = vmax.f32 %v5205_v7, 0.0  ;;  %v5039_v38 = vadd.f32 %v5038_v2, %v10618_v32 }
 0x8b8   : > { %v5484_v52 = vmax.f32 %v4917_v34, 0.0  ;;  %v12000_v34 = vld [vmem:[#allocation67_spill] sm:$0xff] }
 0x8b9   : > { %v10854_v25 = vpop.f32.mrf.mxu3  ;;  %5077 = vmatmul.bf16.gmra.mxu1 %v11874_v60  ;;  %5246 = vmatmul.bf16.gmra.mxu2 %v11963_v45  ;;  %v10858_v48 = vpack.c.bf16 %v5405_v23, %v5401_v63  ;;  %v4753_v63 = vadd.f32 %v10710_v46, %v10435_v54 }
 0x8ba   : > { %v10860_v31 = vpack.c.bf16 %v5484_v52, %v5480_v37 }
 0x8bc   : > { %11998 = vst [vmem:[#allocation77_spill] sm:$0xff] %v10860_v31  ;;  %v5207_v28 = vpop.f32.mrf.mxu2 }
 0x8bd   : > { %v5208_v59 = vadd.f32 %v5207_v28, %v5039_v38  ;;  %v4919_v9 = vpop.f32.mrf.mxu0 }
 0x8be   : > { %v4920_v49 = vadd.f32 %v4919_v9, %v4751_v36  ;;  %v5040_v7 = vpop.f32.mrf.mxu1  ;;  %5994 = vmatmul.bf16.gmra.mxu3 %v11999_v18 }
 0x8bf   : > { %v5041_v45 = vadd.f32 %v5040_v7, %v10618_v32  ;;  %v5409_v38 = vmax.f32 %v5208_v59, 0.0  ;;  %v7807_v7 = vld [vmem:[#allocation11 + $0xc8] sm:$0xff] }
 0x8c0   : > { %4958 = vmatmul.bf16.gmra.mxu0 %v12000_v34  ;;  %v5488_v36 = vmax.f32 %v4920_v49, 0.0  ;;  %6459 = vmatpush.bf16.msra.mxu2 %v7807_v7 }
 0x8c1   : > { %v10867_v60 = vpop.f32.mrf.mxu3 }
 0x8c4   : > { %v5209_v2 = vpop.f32.mrf.mxu2 }
 0x8c5   : > { %v5210_v23 = vadd.f32 %v5209_v2, %v5041_v45  ;;  %v4921_v37 = vpop.f32.mrf.mxu0  ;;  %v4756_v45 = vadd.f32 %v10723_v30, %v10435_v54 }
 0x8c6   : > { %v4922_v20 = vadd.f32 %v4921_v37, %v4753_v63  ;;  %v5043_v52 = vpop.f32.mrf.mxu1  ;;  %v7799_v37 = vld [vmem:[#allocation11 + $0x88] sm:$0xff] }
 0x8c7   : > { %v5413_v28 = vmax.f32 %v5210_v23, 0.0  ;;  %v5044_v46 = vadd.f32 %v5043_v52, %v10618_v32  ;;  %v12001_v23 = vld [vmem:[#allocation95_spill] sm:$0xff]  ;;  %6290 = vmatpush.bf16.msra.mxu1 %v7799_v37  ;;  %v4758_v52 = vadd.f32 %v10728_v10, %v10435_v54  ;;  %v4761_v37 = vadd.f32 %v10741_v50, %v10435_v54 }
 0x8c8   : > { %v5492_v9 = vmax.f32 %v4922_v20, 0.0 }
 0x8c9   : > { %5082 = vmatmul.bf16.gmra.mxu1 %v11931_v51  ;;  %5251 = vmatmul.bf16.gmra.mxu2 %v11967_v17  ;;  %v10874_v18 = vpop.f32.mrf.mxu3  ;;  %v10876_v31 = vpack.c.bf16 %v5413_v28, %v5409_v38  ;;  %v12002_v17 = vld [vmem:[#allocation96_spill] sm:$0xff] }
 0x8ca   : > { %v10878_v15 = vpack.c.bf16 %v5492_v9, %v5488_v36 }
 0x8cc   : > { %v5212_v59 = vpop.f32.mrf.mxu2 }
 0x8cd   : > { %v5213_v49 = vadd.f32 %v5212_v59, %v5044_v46  ;;  %v4924_v63 = vpop.f32.mrf.mxu0 }
 0x8ce   : > { %v4925_v2 = vadd.f32 %v4924_v63, %v4756_v45  ;;  %v5045_v51 = vpop.f32.mrf.mxu1  ;;  %5999 = vmatmul.bf16.gmra.mxu3 %v12001_v23 }
 0x8cf   : > { %v5046_v38 = vadd.f32 %v5045_v51, %v10618_v32  ;;  %v5417_v46 = vmax.f32 %v5213_v49, 0.0 }
 0x8d0   : > { %6123 = vmatmul.bf16.vlgmr.msra.gmra.mxu0 %v12002_v17  ;;  %v5496_v59 = vmax.f32 %v4925_v2, 0.0 }
 0x8d1   : > { %v10885_v20 = vpop.f32.mrf.mxu3 }
 0x8d4   : > { %v5214_v30 = vpop.f32.mrf.mxu2 }
 0x8d5   : > { %v5215_v28 = vadd.f32 %v5214_v30, %v5046_v38  ;;  %v4926_v36 = vpop.f32.mrf.mxu0 }
 0x8d6   : > { %v4927_v9 = vadd.f32 %v4926_v36, %v4758_v52  ;;  %v5048_v7 = vpop.f32.mrf.mxu1 }
 0x8d7   : > { %v5421_v45 = vmax.f32 %v5215_v28, 0.0  ;;  %v5049_v10 = vadd.f32 %v5048_v7, %v10618_v32  ;;  %v12004_v28 = vld [vmem:[#allocation97_spill] sm:$0xff] }
 0x8d8   : > { %v5500_v63 = vmax.f32 %v4927_v9, 0.0  ;;  %v4763_v9 = vadd.f32 %v10746_v13, %v10435_v54 }
 0x8d9   : > { %5087 = vmatmul.bf16.gmra.mxu1 %v11884_v44  ;;  %5256 = vmatmul.bf16.gmra.mxu2 %v11972_v24  ;;  %v10892_v23 = vpop.f32.mrf.mxu3  ;;  %v10894_v17 = vpack.c.bf16 %v5421_v45, %v5417_v46  ;;  %v12005_v44 = vld [vmem:[#allocation98_spill] sm:$0xff] }
 0x8da   : > { %v10896_v51 = vpack.c.bf16 %v5500_v63, %v5496_v59 }
 0x8dc   : > { %12003 = vst [vmem:[#allocation79_spill] sm:$0xff] %v10896_v51  ;;  %v5217_v38 = vpop.f32.mrf.mxu2 }
 0x8dd   : > { %v5218_v49 = vadd.f32 %v5217_v38, %v5049_v10  ;;  %v4929_v52 = vpop.f32.mrf.mxu0 }
 0x8de   : > { %v4930_v2 = vadd.f32 %v4929_v52, %v4761_v37  ;;  %v5050_v30 = vpop.f32.mrf.mxu1  ;;  %6004 = vmatmul.bf16.gmra.mxu3 %v12004_v28  ;;  %v12006_v52 = vld [vmem:[#allocation75_spill] sm:$0xff] }
 0x8df   : > { %v5051_v36 = vadd.f32 %v5050_v30, %v10618_v32  ;;  %v5425_v63 = vmax.f32 %v5218_v49, 0.0 }
 0x8e0   : > { %6128 = vmatmul.bf16.gmra.mxu0 %v12005_v44  ;;  %v5504_v37 = vmax.f32 %v4930_v2, 0.0 }
 0x8e1   : > { %v10903_v24 = vpop.f32.mrf.mxu3 }
 0x8e4   : > { %v5219_v7 = vpop.f32.mrf.mxu2 }
 0x8e5   : > { %v5220_v46 = vadd.f32 %v5219_v7, %v5051_v36  ;;  %v4931_v45 = vpop.f32.mrf.mxu0  ;;  %v4766_v36 = vadd.f32 %v10759_v0, %v10435_v54 }
 0x8e6   : > { %v4932_v50 = vadd.f32 %v4931_v45, %v4763_v9  ;;  %v5053_v59 = vpop.f32.mrf.mxu1  ;;  %v12008_v45 = vld [vmem:[#allocation99_spill] sm:$0xff] }
 0x8e7   : > { %v5429_v10 = vmax.f32 %v5220_v46, 0.0  ;;  %v5054_v13 = vadd.f32 %v5053_v59, %v10618_v32 }
 0x8e8   : > { %v5508_v38 = vmax.f32 %v4932_v50, 0.0  ;;  %v12009_v50 = vld [vmem:[#allocation100_spill] sm:$0xff] }
 0x8e9   : > { %5092 = vmatmul.bf16.gmra.mxu1 %v12006_v52  ;;  %5261 = vmatmul.bf16.gmra.mxu2 %v11975_v26  ;;  %v10910_v28 = vpop.f32.mrf.mxu3  ;;  %v10912_v44 = vpack.c.bf16 %v5429_v10, %v5425_v63  ;;  %v4768_v10 = vadd.f32 %v10764_v33, %v10435_v54 }
 0x8ea   : > { %v10914_v30 = vpack.c.bf16 %v5508_v38, %v5504_v37 }
 0x8ec   : > { %12007 = vst [vmem:[#allocation80_spill] sm:$0xff] %v10914_v30  ;;  %v5222_v9 = vpop.f32.mrf.mxu2 }
 0x8ed   : > { %v5223_v49 = vadd.f32 %v5222_v9, %v5054_v13  ;;  %v4934_v7 = vpop.f32.mrf.mxu0 }
 0x8ee   : > { %v4935_v2 = vadd.f32 %v4934_v7, %v4766_v36  ;;  %v5055_v46 = vpop.f32.mrf.mxu1  ;;  %6009 = vmatmul.bf16.gmra.mxu3 %v12008_v45 }
 0x8ef   : > { %v5056_v63 = vadd.f32 %v5055_v46, %v10618_v32  ;;  %v5433_v13 = vmax.f32 %v5223_v49, 0.0 }
 0x8f0   : > { %6133 = vmatmul.bf16.gmra.mxu0 %v12009_v50  ;;  %v5512_v36 = vmax.f32 %v4935_v2, 0.0 }
 0x8f1   : > { %v10921_v26 = vpop.f32.mrf.mxu3 }
 0x8f4   : > { %v5224_v59 = vpop.f32.mrf.mxu2 }
 0x8f5   : > { %v5225_v37 = vadd.f32 %v5224_v59, %v5056_v63  ;;  %v4936_v38 = vpop.f32.mrf.mxu0  ;;  %v4771_v63 = vadd.f32 %v10777_v6, %v10435_v54 }
 0x8f6   : > { %v4937_v0 = vadd.f32 %v4936_v38, %v4768_v10  ;;  %v5058_v52 = vpop.f32.mrf.mxu1  ;;  %v12011_v38 = vld [vmem:[#allocation101_spill] sm:$0xff] }
 0x8f7   : > { %v5437_v9 = vmax.f32 %v5225_v37, 0.0  ;;  %v5059_v33 = vadd.f32 %v5058_v52, %v10618_v32 }
 0x8f8   : > { %v5516_v7 = vmax.f32 %v4937_v0, 0.0 }
 0x8f9   : > { %5097 = vmatmul.bf16.gmra.mxu1 %v11944_v22  ;;  %5266 = vmatmul.bf16.gmra.mxu2 %v11979_v8  ;;  %v10928_v45 = vpop.f32.mrf.mxu3  ;;  %v10930_v50 = vpack.c.bf16 %v5437_v9, %v5433_v13  ;;  %v12012_v22 = vld [vmem:[#allocation102_spill] sm:$0xff]  ;;  %v4773_v13 = vadd.f32 %v10782_v42, %v10435_v54 }
 0x8fa   : > { %v10932_v46 = vpack.c.bf16 %v5516_v7, %v5512_v36 }
 0x8fc   : > { %12010 = vst [vmem:[#allocation82_spill] sm:$0xff] %v10932_v46  ;;  %v5227_v10 = vpop.f32.mrf.mxu2 }
 0x8fd   : > { %v5228_v49 = vadd.f32 %v5227_v10, %v5059_v33  ;;  %v4939_v59 = vpop.f32.mrf.mxu0 }
 0x8fe   : > { %v4940_v2 = vadd.f32 %v4939_v59, %v4771_v63  ;;  %v5060_v37 = vpop.f32.mrf.mxu1  ;;  %6014 = vmatmul.bf16.gmra.mxu3 %v12011_v38 }
 0x8ff   : > { %v5061_v0 = vadd.f32 %v5060_v37, %v10618_v32  ;;  %v5441_v33 = vmax.f32 %v5228_v49, 0.0  ;;  %v7806_v37 = vld [vmem:[#allocation11 + $0xc0] sm:$0xff] }
 0x900   : > { %6138 = vmatmul.bf16.gmra.mxu0 %v12012_v22  ;;  %v5520_v63 = vmax.f32 %v4940_v2, 0.0  ;;  %6460 = vmatpush.bf16.msra.mxu2 %v7806_v37 }
 0x901   : > { %v10939_v8 = vpop.f32.mrf.mxu3 }
 0x904   : > { %v5229_v52 = vpop.f32.mrf.mxu2 }
 0x905   : > { %v5230_v9 = vadd.f32 %v5229_v52, %v5061_v0  ;;  %v4941_v36 = vpop.f32.mrf.mxu0  ;;  %v4776_v0 = vadd.f32 %v10795_v62, %v10435_v54 }
 0x906   : > { %v4942_v6 = vadd.f32 %v4941_v36, %v4773_v13  ;;  %v5063_v7 = vpop.f32.mrf.mxu1  ;;  %v7798_v36 = vld [vmem:[#allocation11 + $0x80] sm:$0xff] }
 0x907   : > { %v5445_v10 = vmax.f32 %v5230_v9, 0.0  ;;  %v5064_v42 = vadd.f32 %v5063_v7, %v10618_v32  ;;  %v12014_v9 = vld [vmem:[#allocation103_spill] sm:$0xff]  ;;  %6291 = vmatpush.bf16.msra.mxu1 %v7798_v36  ;;  %v4778_v7 = vadd.f32 %v10800_v4, %v10435_v54  ;;  %v4781_v36 = vadd.f32 %v10813_v55, %v10435_v54 }
 0x908   : > { %v5524_v59 = vmax.f32 %v4942_v6, 0.0 }
 0x909   : > { %5102 = vmatmul.bf16.gmra.mxu1 %v11897_v29  ;;  %5271 = vmatmul.bf16.gmra.mxu2 %v11983_v56  ;;  %v10946_v38 = vpop.f32.mrf.mxu3  ;;  %v10948_v22 = vpack.c.bf16 %v5445_v10, %v5441_v33  ;;  %v12015_v56 = vld [vmem:[#allocation104_spill] sm:$0xff] }
 0x90a   : > { %v10950_v46 = vpack.c.bf16 %v5524_v59, %v5520_v63 }
 0x90c   : > { %12013 = vst [vmem:[#allocation58_spill] sm:$0xff] %v10950_v46  ;;  %v5232_v49 = vpop.f32.mrf.mxu2  ;;  %v12047_v46 = vld [vmem:[#allocation116_spill] sm:$0xff] }
 0x90d   : > { %v5233_v2 = vadd.f32 %v5232_v49, %v5064_v42  ;;  %v4944_v13 = vpop.f32.mrf.mxu0 }
 0x90e   : > { %v4945_v52 = vadd.f32 %v4944_v13, %v4776_v0  ;;  %v5065_v29 = vpop.f32.mrf.mxu1  ;;  %6019 = vmatmul.bf16.gmra.mxu3 %v12014_v9 }
 0x90f   : > { %v5066_v33 = vadd.f32 %v5065_v29, %v10618_v32  ;;  %v5449_v42 = vmax.f32 %v5233_v2, 0.0 }
 0x910   : > { %6143 = vmatmul.bf16.gmra.mxu0 %v12015_v56  ;;  %v5528_v49 = vmax.f32 %v4945_v52, 0.0 }
 0x911   : > { %v10957_v6 = vpop.f32.mrf.mxu3 }
 0x914   : > { %v5234_v62 = vpop.f32.mrf.mxu2 }
 0x915   : > { %v5235_v10 = vadd.f32 %v5234_v62, %v5066_v33  ;;  %v4946_v63 = vpop.f32.mrf.mxu0 }
 0x916   : > { %v4947_v59 = vadd.f32 %v4946_v63, %v4778_v7  ;;  %v5068_v37 = vpop.f32.mrf.mxu1 }
 0x917   : > { %v5453_v0 = vmax.f32 %v5235_v10, 0.0  ;;  %v5069_v4 = vadd.f32 %v5068_v37, %v10618_v32  ;;  %v12017_v10 = vld [vmem:[#allocation105_spill] sm:$0xff] }
 0x918   : > { %v5532_v13 = vmax.f32 %v4947_v59, 0.0  ;;  %v4783_v59 = vadd.f32 %v10818_v21, %v10435_v54 }
 0x919   : > { %5107 = vmatmul.bf16.gmra.mxu1 %v11901_v41  ;;  %5276 = vmatmul.bf16.gmra.mxu2 %v11988_v1  ;;  %v10964_v9 = vpop.f32.mrf.mxu3  ;;  %v10966_v56 = vpack.c.bf16 %v5453_v0, %v5449_v42  ;;  %v12018_v41 = vld [vmem:[#allocation52_spill] sm:$0xff] }
 0x91a   : > { %v10968_v29 = vpack.c.bf16 %v5532_v13, %v5528_v49 }
 0x91c   : > { %12016 = vst [vmem:[#allocation83_spill] sm:$0xff] %v10968_v29  ;;  %v5237_v33 = vpop.f32.mrf.mxu2 }
 0x91d   : > { %v5238_v2 = vadd.f32 %v5237_v33, %v5069_v4  ;;  %v4949_v7 = vpop.f32.mrf.mxu0 }
 0x91e   : > { %v4950_v52 = vadd.f32 %v4949_v7, %v4781_v36  ;;  %v5070_v62 = vpop.f32.mrf.mxu1  ;;  %6024 = vmatmul.bf16.gmra.mxu3 %v12017_v10 }
 0x91f   : > { %v5071_v63 = vadd.f32 %v5070_v62, %v10618_v32  ;;  %v5457_v13 = vmax.f32 %v5238_v2, 0.0 }
 0x920   : > { %6148 = vmatmul.bf16.gmra.mxu0 %v12018_v41  ;;  %v5536_v36 = vmax.f32 %v4950_v52, 0.0  ;;  %v4786_v41 = vadd.f32 %v10831_v53, %v10435_v54 }
 0x921   : > { %v10975_v1 = vpop.f32.mrf.mxu3 }
 0x924   : > { %v5239_v37 = vpop.f32.mrf.mxu2 }
 0x925   : > { %v5240_v42 = vadd.f32 %v5239_v37, %v5071_v63  ;;  %v4951_v0 = vpop.f32.mrf.mxu0 }
 0x926   : > { %v4952_v55 = vadd.f32 %v4951_v0, %v4783_v59  ;;  %v5073_v49 = vpop.f32.mrf.mxu1  ;;  %v4788_v0 = vadd.f32 %v10836_v47, %v10435_v54 }
 0x927   : > { %v5461_v4 = vmax.f32 %v5240_v42, 0.0  ;;  %v5074_v21 = vadd.f32 %v5073_v49, %v10618_v32  ;;  %v12020_v42 = vld [vmem:[#allocation106_spill] sm:$0xff] }
 0x928   : > { %v5540_v33 = vmax.f32 %v4952_v55, 0.0 }
 0x929   : > { %5112 = vmatmul.bf16.gmra.mxu1 %v11905_v58  ;;  %5281 = vmatmul.bf16.gmra.mxu2 %v11991_v14  ;;  %v10982_v7 = vpack.c.bf16 %v5461_v4, %v5457_v13  ;;  %v10984_v10 = vpop.f32.mrf.mxu3  ;;  %v12021_v58 = vld [vmem:[#allocation107_spill] sm:$0xff] }
 0x92a   : > { %v10986_v62 = vpack.c.bf16 %v5540_v33, %v5536_v36 }
 0x92c   : > { %12019 = vst [vmem:[#allocation85_spill] sm:$0xff] %v10986_v62  ;;  %v5242_v63 = vpop.f32.mrf.mxu2 }
 0x92d   : > { %v5243_v2 = vadd.f32 %v5242_v63, %v5074_v21  ;;  %v4954_v59 = vpop.f32.mrf.mxu0 }
 0x92e   : > { %v4955_v52 = vadd.f32 %v4954_v59, %v4786_v41  ;;  %v5075_v37 = vpop.f32.mrf.mxu1  ;;  %6029 = vmatmul.bf16.gmra.mxu3 %v12020_v42  ;;  %v4791_v42 = vadd.f32 %v10849_v35, %v10435_v54 }
 0x92f   : > { %v5076_v14 = vadd.f32 %v5075_v37, %v10618_v32  ;;  %v5465_v33 = vmax.f32 %v5243_v2, 0.0 }
 0x930   : > { %6153 = vmatmul.bf16.gmra.mxu0 %v12021_v58  ;;  %v5544_v41 = vmax.f32 %v4955_v52, 0.0 }
 0x931   : > { %v10996_v55 = vpop.f32.mrf.mxu3 }
 0x934   : > { %v5244_v49 = vpop.f32.mrf.mxu2 }
 0x935   : > { %v5245_v13 = vadd.f32 %v5244_v49, %v5076_v14  ;;  %v4956_v4 = vpop.f32.mrf.mxu0 }
 0x936   : > { %v4957_v53 = vadd.f32 %v4956_v4, %v4788_v0  ;;  %v5078_v36 = vpop.f32.mrf.mxu1  ;;  %v4793_v4 = vadd.f32 %v10854_v25, %v10435_v54 }
 0x937   : > { %v5469_v21 = vmax.f32 %v5245_v13, 0.0  ;;  %v5079_v47 = vadd.f32 %v5078_v36, %v10618_v32  ;;  %v12023_v13 = vld [vmem:[#allocation108_spill] sm:$0xff] }
 0x938   : > { %v5548_v63 = vmax.f32 %v4957_v53, 0.0 }
 0x939   : > { %5117 = vmatmul.bf16.gmra.mxu1 %v11909_v40  ;;  %5286 = vmatmul.bf16.gmra.mxu2 %v11994_v11  ;;  %v11000_v59 = vpack.c.bf16 %v5469_v21, %v5465_v33  ;;  %v11007_v2 = vpop.f32.mrf.mxu3  ;;  %v12024_v40 = vld [vmem:[#allocation56_spill] sm:$0xff] }
 0x93a   : > { %v11002_v37 = vpack.c.bf16 %v5548_v63, %v5544_v41 }
 0x93c   : > { %12022 = vst [vmem:[#allocation86_spill] sm:$0xff] %v11002_v37  ;;  %v5247_v58 = vpop.f32.mrf.mxu2 }
 0x93d   : > { %v5248_v14 = vadd.f32 %v5247_v58, %v5079_v47  ;;  %v4959_v0 = vpop.f32.mrf.mxu0  ;;  %v11017_v47 = vld [vmem:[%s11563_s13] ss:$0 sm:$0xff] }
 0x93e   : > { %v4960_v52 = vadd.f32 %v4959_v0, %v4791_v42  ;;  %v5080_v49 = vpop.f32.mrf.mxu1  ;;  %6034 = vmatmul.bf16.gmra.mxu3 %v12023_v13 }
 0x93f   : > { %v5081_v11 = vadd.f32 %v5080_v49, %v10618_v32  ;;  %v5473_v41 = vmax.f32 %v5248_v14, 0.0  ;;  %v5956_v49 = vadd.f32 %v11017_v47, %v10867_v60 }
 0x940   : > { %6158 = vmatmul.bf16.gmra.mxu0 %v12024_v40  ;;  %v5552_v42 = vmax.f32 %v4960_v52, 0.0 }
 0x941   : > { %v11019_v58 = vpop.f32.mrf.mxu3 }
 0x944   : > { %v5249_v53 = vpop.f32.mrf.mxu2 }
 0x945   : > { %v5250_v36 = vadd.f32 %v5249_v53, %v5081_v11  ;;  %v4961_v33 = vpop.f32.mrf.mxu0  ;;  %v12026_v53 = vld [vmem:[#allocation109_spill] sm:$0xff] }
 0x946   : > { %v4962_v35 = vadd.f32 %v4961_v33, %v4793_v4  ;;  %v5083_v21 = vpop.f32.mrf.mxu1  ;;  %v5958_v33 = vadd.f32 %v11017_v47, %v10874_v18 }
 0x947   : > { %v5477_v63 = vmax.f32 %v5250_v36, 0.0  ;;  %v5084_v14 = vadd.f32 %v5083_v21, %v10618_v32 }
 0x948   : > { %v5556_v0 = vmax.f32 %v4962_v35, 0.0 }
 0x949   : > { %5122 = vmatmul.bf16.gmra.mxu1 %v10003_v5  ;;  %5291 = vmatmul.bf16.gmra.mxu2 %v11997_v3  ;;  %v11023_v54 = vpack.c.bf16 %v5477_v63, %v5473_v41  ;;  %v12027_v5 = vld [vmem:[#allocation110_spill] sm:$0xff]  ;;  %v11034_v3 = vpop.f32.mrf.mxu3 }
 0x94a   : > { %v11025_v25 = vpack.c.bf16 %v5556_v0, %v5552_v42 }
 0x94c   : > { %12025 = vst [vmem:[#allocation88_spill] sm:$0xff] %v11025_v25  ;;  %v5252_v13 = vpop.f32.mrf.mxu2 }
 0x94d   : > { %v5253_v40 = vadd.f32 %v5252_v13, %v5084_v14  ;;  %v6124_v11 = vpop.f32.mrf.mxu0  ;;  %v5961_v13 = vadd.f32 %v11017_v47, %v10885_v20 }
 0x94e   : > { %v11030_v52 = vadd.f32 %v6124_v11, %v5956_v49  ;;  %v5085_v4 = vpop.f32.mrf.mxu1  ;;  %6039 = vmatmul.bf16.gmra.mxu3 %v12026_v53 }
 0x94f   : > { %v5086_v36 = vadd.f32 %v5085_v4, %v10618_v32  ;;  %v5481_v42 = vmax.f32 %v5253_v40, 0.0 }
 0x950   : > { %6163 = vmatmul.bf16.gmra.mxu0 %v12027_v5 }
 0x951   : > { %v11048_v18 = vpop.f32.mrf.mxu3 }
 0x954   : > { %v5254_v35 = vpop.f32.mrf.mxu2 }
 0x955   : > { %v5255_v21 = vadd.f32 %v5254_v35, %v5086_v36  ;;  %v6126_v60 = vpop.f32.mrf.mxu0  ;;  %v12028_v36 = vld [vmem:[#allocation111_spill] sm:$0xff] }
 0x956   : > { %v11039_v41 = vadd.f32 %v6126_v60, %v5958_v33  ;;  %v5088_v63 = vpop.f32.mrf.mxu1  ;;  %v5963_v33 = vadd.f32 %v11017_v47, %v10892_v23  ;;  %v5966_v23 = vadd.f32 %v11017_v47, %v10903_v24 }
 0x957   : > { %v5485_v0 = vmax.f32 %v5255_v21, 0.0  ;;  %v5089_v49 = vadd.f32 %v5088_v63, %v10618_v32 }
 0x959   : > { %5127 = vmatmul.bf16.gmra.mxu1 %v10025_v12  ;;  %5296 = vmatmul.bf16.gmra.mxu2 %v12000_v34  ;;  %v11043_v14 = vpack.c.bf16 %v5485_v0, %v5481_v42  ;;  %v12029_v12 = vld [vmem:[#allocation60_spill] sm:$0xff]  ;;  %v11057_v60 = vpop.f32.mrf.mxu3 }
 0x95c   : > { %v5257_v11 = vpop.f32.mrf.mxu2 }
 0x95d   : > { %v5258_v4 = vadd.f32 %v5257_v11, %v5089_v49  ;;  %v6129_v53 = vpop.f32.mrf.mxu0  ;;  %v12031_v11 = vld [vmem:[#allocation59_spill] sm:$0xff] }
 0x95e   : > { %v11050_v5 = vadd.f32 %v6129_v53, %v5961_v13  ;;  %v5090_v40 = vpop.f32.mrf.mxu1  ;;  %6044 = vmatmul.bf16.gmra.mxu3 %v12028_v36  ;;  %v12030_v13 = vld [vmem:[#allocation121_spill] sm:$0xff] }
 0x95f   : > { %v5091_v34 = vadd.f32 %v5090_v40, %v10618_v32  ;;  %v5489_v0 = vmax.f32 %v5258_v4, 0.0 }
 0x960   : > { %6168 = vmatmul.bf16.gmra.mxu0 %v12029_v12 }
 0x961   : > { %v11071_v4 = vpop.f32.mrf.mxu3 }
 0x964   : > { %v5259_v35 = vpop.f32.mrf.mxu2 }
 0x965   : > { %v5260_v21 = vadd.f32 %v5259_v35, %v5091_v34  ;;  %v6131_v20 = vpop.f32.mrf.mxu0 }
 0x966   : > { %v11059_v63 = vadd.f32 %v6131_v20, %v5963_v33  ;;  %v5093_v42 = vpop.f32.mrf.mxu1  ;;  %v12033_v20 = vld [vmem:[#allocation112_spill] sm:$0xff] }
 0x967   : > { %v5493_v49 = vmax.f32 %v5260_v21, 0.0  ;;  %v5094_v40 = vadd.f32 %v5093_v42, %v10618_v32  ;;  %v12034_v21 = vld [vmem:[#allocation62_spill] sm:$0xff]  ;;  %v5968_v42 = vadd.f32 %v11017_v47, %v10910_v28  ;;  %v5971_v28 = vadd.f32 %v11017_v47, %v10921_v26 }
 0x969   : > { %6292 = vmatmul.bf16.vlgmr.msra.gmra.mxu1 %v12030_v13  ;;  %6461 = vmatmul.bf16.vlgmr.msra.gmra.mxu2 %v12031_v11  ;;  %v11063_v53 = vpack.c.bf16 %v5493_v49, %v5489_v0 }
 0x96b   : > { %12032 = vst [vmem:[#allocation89_spill] sm:$0xff] %v11063_v53  ;;  %v12067_v53 = vld [vmem:[#allocation78_spill] sm:$0xff] }
 0x96c   : > { %v5262_v36 = vpop.f32.mrf.mxu2 }
 0x96d   : > { %v5263_v12 = vadd.f32 %v5262_v36, %v5094_v40  ;;  %v6134_v34 = vpop.f32.mrf.mxu0 }
 0x96e   : > { %v11068_v35 = vadd.f32 %v6134_v34, %v5966_v23  ;;  %v5095_v33 = vpop.f32.mrf.mxu1  ;;  %6049 = vmatmul.bf16.gmra.mxu3 %v12033_v20  ;;  %v12035_v34 = vld [vmem:[#allocation122_spill] sm:$0xff] }
 0x96f   : > { %v5096_v0 = vadd.f32 %v5095_v33, %v10618_v32  ;;  %v5497_v23 = vmax.f32 %v5263_v12, 0.0 }
 0x970   : > { %6173 = vmatmul.bf16.gmra.mxu0 %v12034_v21  ;;  %v11083_v21 = vpop.f32.mrf.mxu3 }
 0x974   : > { %v5264_v49 = vpop.f32.mrf.mxu2 }
 0x975   : > { %v5265_v13 = vadd.f32 %v5264_v49, %v5096_v0  ;;  %v6136_v24 = vpop.f32.mrf.mxu0 }
 0x976   : > { %v11077_v11 = vadd.f32 %v6136_v24, %v5968_v42  ;;  %v5098_v40 = vpop.f32.mrf.mxu1 }
 0x977   : > { %v5501_v36 = vmax.f32 %v5265_v13, 0.0  ;;  %v5099_v33 = vadd.f32 %v5098_v40, %v10618_v32  ;;  %v12037_v13 = vld [vmem:[#allocation113_spill] sm:$0xff] }
 0x979   : > { %6297 = vmatmul.bf16.gmra.mxu1 %v12035_v34  ;;  %6466 = vmatmul.bf16.gmra.mxu2 %v10660_v39  ;;  %v11081_v20 = vpack.c.bf16 %v5501_v36, %v5497_v23  ;;  %v12038_v34 = vld [vmem:[#allocation64_spill] sm:$0xff]  ;;  %v5973_v23 = vadd.f32 %v11017_v47, %v10928_v45  ;;  %v11095_v36 = vpop.f32.mrf.mxu3  ;;  %v5976_v45 = vadd.f32 %v11017_v47, %v10939_v8 }
 0x97b   : > { %12036 = vst [vmem:[#allocation91_spill] sm:$0xff] %v11081_v20 }
 0x97c   : > { %v5267_v0 = vpop.f32.mrf.mxu2 }
 0x97d   : > { %v5268_v49 = vadd.f32 %v5267_v0, %v5099_v33  ;;  %v6139_v42 = vpop.f32.mrf.mxu0 }
 0x97e   : > { %v11088_v24 = vadd.f32 %v6139_v42, %v5971_v28  ;;  %v5100_v12 = vpop.f32.mrf.mxu1  ;;  %6054 = vmatmul.bf16.gmra.mxu3 %v12037_v13  ;;  %v12039_v42 = vld [vmem:[#allocation123_spill] sm:$0xff] }
 0x97f   : > { %v5101_v39 = vadd.f32 %v5100_v12, %v10618_v32  ;;  %v5505_v28 = vmax.f32 %v5268_v49, 0.0 }
 0x980   : > { %6178 = vmatmul.bf16.gmra.mxu0 %v12038_v34 }
 0x984   : > { %v5269_v40 = vpop.f32.mrf.mxu2 }
 0x985   : > { %v5270_v25 = vadd.f32 %v5269_v40, %v5101_v39  ;;  %v6141_v26 = vpop.f32.mrf.mxu0  ;;  %v11106_v40 = vpop.f32.mrf.mxu3 }
 0x986   : > { %v11097_v37 = vadd.f32 %v6141_v26, %v5973_v23  ;;  %v5103_v33 = vpop.f32.mrf.mxu1  ;;  %v12042_v26 = vld [vmem:[#allocation66_spill] sm:$0xff] }
 0x987   : > { %v5509_v0 = vmax.f32 %v5270_v25, 0.0  ;;  %v5104_v12 = vadd.f32 %v5103_v33, %v10618_v32  ;;  %v12041_v25 = vld [vmem:[#allocation114_spill] sm:$0xff]  ;;  %v5978_v33 = vadd.f32 %v11017_v47, %v10946_v38  ;;  %v5981_v38 = vadd.f32 %v11017_v47, %v10957_v6 }
 0x989   : > { %6302 = vmatmul.bf16.gmra.mxu1 %v12039_v42  ;;  %6471 = vmatmul.bf16.gmra.mxu2 %v10678_v61  ;;  %v11101_v13 = vpack.c.bf16 %v5509_v0, %v5505_v28 }
 0x98b   : > { %12040 = vst [vmem:[#allocation92_spill] sm:$0xff] %v11101_v13 }
 0x98c   : > { %v5272_v34 = vpop.f32.mrf.mxu2 }
 0x98d   : > { %v5273_v62 = vadd.f32 %v5272_v34, %v5104_v12  ;;  %v6144_v39 = vpop.f32.mrf.mxu0 }
 0x98e   : > { %v11108_v23 = vadd.f32 %v6144_v39, %v5976_v45  ;;  %v5105_v49 = vpop.f32.mrf.mxu1  ;;  %6059 = vmatmul.bf16.gmra.mxu3 %v12041_v25  ;;  %v11117_v45 = vpop.f32.mrf.mxu3  ;;  %v12043_v39 = vld [vmem:[#allocation124_spill] sm:$0xff]  ;;  %v12044_v25 = vld [vmem:[#allocation63_spill] sm:$0xff] }
 0x98f   : > { %v5106_v61 = vadd.f32 %v5105_v49, %v10618_v32  ;;  %v5513_v34 = vmax.f32 %v5273_v62, 0.0 }
 0x990   : > { %6183 = vmatmul.bf16.gmra.mxu0 %v12042_v26 }
 0x994   : > { %v5274_v28 = vpop.f32.mrf.mxu2 }
 0x995   : > { %v5275_v0 = vadd.f32 %v5274_v28, %v5106_v61  ;;  %v6146_v8 = vpop.f32.mrf.mxu0 }
 0x996   : > { %v11115_v42 = vadd.f32 %v6146_v8, %v5978_v33  ;;  %v5108_v12 = vpop.f32.mrf.mxu1 }
 0x997   : > { %v5517_v29 = vmax.f32 %v5275_v0, 0.0  ;;  %v5109_v49 = vadd.f32 %v5108_v12, %v10618_v32  ;;  %v12046_v0 = vld [vmem:[#allocation115_spill] sm:$0xff]  ;;  %v5983_v12 = vadd.f32 %v11017_v47, %v10964_v9 }
 0x999   : > { %6307 = vmatmul.bf16.gmra.mxu1 %v12043_v39  ;;  %6476 = vmatmul.bf16.gmra.mxu2 %v12044_v25  ;;  %v11121_v26 = vpack.c.bf16 %v5517_v29, %v5513_v34  ;;  %v11130_v39 = vpop.f32.mrf.mxu3 }
 0x99b   : > { %12045 = vst [vmem:[#allocation93_spill] sm:$0xff] %v11121_v26 }
 0x99c   : > { %v5277_v61 = vpop.f32.mrf.mxu2 }
 0x99d   : > { %v5278_v28 = vadd.f32 %v5277_v61, %v5109_v49  ;;  %v6149_v33 = vpop.f32.mrf.mxu0 }
 0x99e   : > { %v11126_v8 = vadd.f32 %v6149_v33, %v5981_v38  ;;  %v5110_v62 = vpop.f32.mrf.mxu1  ;;  %6064 = vmatmul.bf16.gmra.mxu3 %v12046_v0  ;;  %v12048_v33 = vld [vmem:[#allocation37_spill] sm:$0xff] }
 0x99f   : > { %v5111_v29 = vadd.f32 %v5110_v62, %v10618_v32  ;;  %v5521_v38 = vmax.f32 %v5278_v28, 0.0  ;;  %v12049_v0 = vld [vmem:[#allocation65_spill] sm:$0xff]  ;;  %v5986_v62 = vadd.f32 %v11017_v47, %v10975_v1 }
 0x9a0   : > { %6188 = vmatmul.bf16.gmra.mxu0 %v12047_v46 }
 0x9a1   : > { %v11144_v9 = vpop.f32.mrf.mxu3 }
 0x9a4   : > { %v5279_v34 = vpop.f32.mrf.mxu2 }
 0x9a5   : > { %v5280_v25 = vadd.f32 %v5279_v34, %v5111_v29  ;;  %v6151_v6 = vpop.f32.mrf.mxu0 }
 0x9a6   : > { %v11135_v26 = vadd.f32 %v6151_v6, %v5983_v12  ;;  %v5113_v49 = vpop.f32.mrf.mxu1 }
 0x9a7   : > { %v5525_v61 = vmax.f32 %v5280_v25, 0.0  ;;  %v5114_v13 = vadd.f32 %v5113_v49, %v10618_v32  ;;  %v12051_v25 = vld [vmem:[#allocation117_spill] sm:$0xff]  ;;  %v5988_v49 = vadd.f32 %v11017_v47, %v10984_v10  ;;  %v5991_v10 = vadd.f32 %v11017_v47, %v10996_v55 }
 0x9a9   : > { %6312 = vmatmul.bf16.gmra.mxu1 %v12048_v33  ;;  %6481 = vmatmul.bf16.gmra.mxu2 %v12049_v0  ;;  %v11139_v46 = vpack.c.bf16 %v5525_v61, %v5521_v38  ;;  %v12052_v33 = vld [vmem:[#allocation33_spill] sm:$0xff] }
 0x9ab   : > { %12050 = vst [vmem:[#allocation94_spill] sm:$0xff] %v11139_v46  ;;  %v11153_v46 = vpop.f32.mrf.mxu3 }
 0x9ac   : > { %v5282_v29 = vpop.f32.mrf.mxu2 }
 0x9ad   : > { %v5283_v34 = vadd.f32 %v5282_v29, %v5114_v13  ;;  %v6154_v12 = vpop.f32.mrf.mxu0 }
 0x9ae   : > { %v11146_v6 = vadd.f32 %v6154_v12, %v5986_v62  ;;  %v5115_v28 = vpop.f32.mrf.mxu1  ;;  %6069 = vmatmul.bf16.gmra.mxu3 %v12051_v25  ;;  %v12053_v12 = vld [vmem:[#allocation32_spill] sm:$0xff] }
 0x9af   : > { %v5116_v38 = vadd.f32 %v5115_v28, %v10618_v32  ;;  %v5529_v62 = vmax.f32 %v5283_v34, 0.0 }
 0x9b0   : > { %6193 = vmatmul.bf16.gmra.mxu0 %v12052_v33 }
 0x9b3   : > { %v11167_v34 = vpop.f32.mrf.mxu3 }
 0x9b4   : > { %v5284_v61 = vpop.f32.mrf.mxu2 }
 0x9b5   : > { %v5285_v0 = vadd.f32 %v5284_v61, %v5116_v38  ;;  %v6156_v1 = vpop.f32.mrf.mxu0 }
 0x9b6   : > { %v11155_v30 = vadd.f32 %v6156_v1, %v5988_v49  ;;  %v5118_v13 = vpop.f32.mrf.mxu1  ;;  %v12055_v1 = vld [vmem:[#allocation72_spill] sm:$0xff] }
 0x9b7   : > { %v5533_v29 = vmax.f32 %v5285_v0, 0.0  ;;  %v5119_v28 = vadd.f32 %v5118_v13, %v10618_v32  ;;  %v12056_v0 = vld [vmem:[#allocation34_spill] sm:$0xff]  ;;  %v5993_v13 = vadd.f32 %v11017_v47, %v11007_v2  ;;  %v5996_v2 = vadd.f32 %v11017_v47, %v11019_v58 }
 0x9b9   : > { %6317 = vmatmul.bf16.gmra.mxu1 %v12053_v12  ;;  %6486 = vmatmul.bf16.gmra.mxu2 %v10732_v16  ;;  %v11159_v25 = vpack.c.bf16 %v5533_v29, %v5529_v62 }
 0x9bb   : > { %12054 = vst [vmem:[#allocation67_spill] sm:$0xff] %v11159_v25 }
 0x9bc   : > { %v5287_v33 = vpop.f32.mrf.mxu2 }
 0x9bd   : > { %v5288_v38 = vadd.f32 %v5287_v33, %v5119_v28  ;;  %v6159_v61 = vpop.f32.mrf.mxu0 }
 0x9be   : > { %v11164_v20 = vadd.f32 %v6159_v61, %v5991_v10  ;;  %v5120_v49 = vpop.f32.mrf.mxu1  ;;  %6074 = vmatmul.bf16.gmra.mxu3 %v12055_v1  ;;  %v12057_v61 = vld [vmem:[#allocation53_spill] sm:$0xff] }
 0x9bf   : > { %v5121_v16 = vadd.f32 %v5120_v49, %v10618_v32  ;;  %v5537_v10 = vmax.f32 %v5288_v38, 0.0 }
 0x9c0   : > { %6198 = vmatmul.bf16.gmra.mxu0 %v12056_v0  ;;  %v11179_v0 = vpop.f32.mrf.mxu3 }
 0x9c4   : > { %v5289_v62 = vpop.f32.mrf.mxu2 }
 0x9c5   : > { %v5290_v29 = vadd.f32 %v5289_v62, %v5121_v16  ;;  %v6161_v55 = vpop.f32.mrf.mxu0 }
 0x9c6   : > { %v11173_v12 = vadd.f32 %v6161_v55, %v5993_v13  ;;  %v5123_v28 = vpop.f32.mrf.mxu1 }
 0x9c7   : > { %v5541_v33 = vmax.f32 %v5290_v29, 0.0  ;;  %v5124_v49 = vadd.f32 %v5123_v28, %v10618_v32  ;;  %v12059_v29 = vld [vmem:[#allocation118_spill] sm:$0xff] }
 0x9c9   : > { %6322 = vmatmul.bf16.gmra.mxu1 %v12057_v61  ;;  %6491 = vmatmul.bf16.gmra.mxu2 %v10750_v57  ;;  %v11177_v1 = vpack.c.bf16 %v5541_v33, %v5537_v10  ;;  %v12060_v61 = vld [vmem:[#allocation36_spill] sm:$0xff]  ;;  %v5998_v10 = vadd.f32 %v11017_v47, %v11034_v3  ;;  %v11191_v33 = vpop.f32.mrf.mxu3  ;;  %v6001_v3 = vadd.f32 %v11017_v47, %v11048_v18 }
 0x9cb   : > { %12058 = vst [vmem:[#allocation95_spill] sm:$0xff] %v11177_v1 }
 0x9cc   : > { %v5292_v16 = vpop.f32.mrf.mxu2 }
 0x9cd   : > { %v5293_v62 = vadd.f32 %v5292_v16, %v5124_v49  ;;  %v6164_v13 = vpop.f32.mrf.mxu0 }
 0x9ce   : > { %v11184_v55 = vadd.f32 %v6164_v13, %v5996_v2  ;;  %v5125_v38 = vpop.f32.mrf.mxu1  ;;  %6079 = vmatmul.bf16.gmra.mxu3 %v12059_v29  ;;  %v12061_v13 = vld [vmem:[#allocation55_spill] sm:$0xff]  ;;  %v12062_v29 = vld [vmem:[#allocation70_spill] sm:$0xff] }
 0x9cf   : > { %v5126_v57 = vadd.f32 %v5125_v38, %v10618_v32  ;;  %v5545_v2 = vmax.f32 %v5293_v62, 0.0  ;;  %v12065_v62 = vld [vmem:[#allocation119_spill] sm:$0xff] }
 0x9d0   : > { %6203 = vmatmul.bf16.gmra.mxu0 %v12060_v61 }
 0x9d4   : > { %v5294_v28 = vpop.f32.mrf.mxu2 }
 0x9d5   : > { %v5295_v1 = vadd.f32 %v5294_v28, %v5126_v57  ;;  %v6166_v58 = vpop.f32.mrf.mxu0 }
 0x9d6   : > { %v11193_v25 = vadd.f32 %v6166_v58, %v5998_v10  ;;  %v5128_v49 = vpop.f32.mrf.mxu1  ;;  %v11202_v10 = vpop.f32.mrf.mxu3 }
 0x9d7   : > { %v5549_v16 = vmax.f32 %v5295_v1, 0.0  ;;  %v5129_v38 = vadd.f32 %v5128_v49, %v10618_v32  ;;  %v6003_v49 = vadd.f32 %v11017_v47, %v11057_v60 }
 0x9d9   : > { %6327 = vmatmul.bf16.gmra.mxu1 %v12061_v13  ;;  %6496 = vmatmul.bf16.gmra.mxu2 %v12062_v29  ;;  %v11197_v61 = vpack.c.bf16 %v5549_v16, %v5545_v2  ;;  %v12066_v13 = vld [vmem:[#allocation38_spill] sm:$0xff] }
 0x9db   : > { %12063 = vst [vmem:[#allocation96_spill] sm:$0xff] %v11197_v61 }
 0x9dc   : > { %v5297_v51 = vpop.f32.mrf.mxu2 }
 0x9dd   : > { %v5298_v57 = vadd.f32 %v5297_v51, %v5129_v38  ;;  %v6169_v28 = vpop.f32.mrf.mxu0 }
 0x9de   : > { %v11204_v58 = vadd.f32 %v6169_v28, %v6001_v3  ;;  %v5130_v1 = vpop.f32.mrf.mxu1  ;;  %6084 = vmatmul.bf16.gmra.mxu3 %v12065_v62  ;;  %v11214_v61 = vpop.f32.mrf.mxu3  ;;  %v12068_v62 = vld [vmem:[#allocation71_spill] sm:$0xff] }
 0x9df   : > { %v5131_v2 = vadd.f32 %v5130_v1, %v10618_v32  ;;  %v5553_v3 = vmax.f32 %v5298_v57, 0.0  ;;  %v6006_v1 = vadd.f32 %v11017_v47, %v11071_v4  ;;  %v6008_v4 = vadd.f32 %v11017_v47, %v11083_v21 }
 0x9e0   : > { %6208 = vmatmul.bf16.gmra.mxu0 %v12066_v13 }
 0x9e4   : > { %v5299_v18 = vpop.f32.mrf.mxu2 }
 0x9e5   : > { %v5300_v16 = vadd.f32 %v5299_v18, %v5131_v2  ;;  %v6171_v29 = vpop.f32.mrf.mxu0  ;;  %v12069_v18 = vld [vmem:[#allocation81_spill] sm:$0xff] }
 0x9e6   : > { %v11211_v51 = vadd.f32 %v6171_v29, %v6003_v49  ;;  %v6293_v38 = vpop.f32.mrf.mxu1  ;;  %v11232_v29 = vpop.f32.mrf.mxu3 }
 0x9e7   : > { %v5557_v28 = vmax.f32 %v5300_v16, 0.0  ;;  %v6294_v60 = vadd.f32 %v6293_v38, %v11030_v52 }
 0x9e9   : > { %6332 = vmatmul.bf16.gmra.mxu1 %v12067_v53  ;;  %6501 = vmatmul.bf16.gmra.mxu2 %v12068_v62  ;;  %v11220_v32 = vpack.c.bf16 %v5557_v28, %v5553_v3  ;;  %v12070_v53 = vld [vmem:[#allocation40_spill] sm:$0xff] }
 0x9ec   : > { %v6462_v13 = vpop.f32.mrf.mxu2 }
 0x9ed   : > { %v6463_v2 = vadd.f32 %v6462_v13, %v6294_v60  ;;  %v6174_v49 = vpop.f32.mrf.mxu0 }
 0x9ee   : > { %v11225_v57 = vadd.f32 %v6174_v49, %v6006_v1  ;;  %6089 = vmatmul.bf16.gmra.mxu3 %v12069_v18  ;;  %v6295_v16 = vpop.f32.mrf.mxu1  ;;  %v12071_v1 = vld [vmem:[#allocation45_spill] sm:$0xff] }
 0x9ef   : > { %6622 = vst [vmem:[%s11228_s22] sm:$0xff] %v6463_v2  ;;  %v6296_v52 = vadd.f32 %v6295_v16, %v11039_v41  ;;  %v6011_v41 = vadd.f32 %v11017_v47, %v11095_v36  ;;  %v11245_v2 = vpop.f32.mrf.mxu3 }
 0x9f0   : > { %6213 = vmatmul.bf16.gmra.mxu0 %v12070_v53  ;;  %v12072_v53 = vld [vmem:[#allocation84_spill] sm:$0xff] }
 0x9f4   : > { %v6464_v38 = vpop.f32.mrf.mxu2 }
 0x9f5   : > { %v6465_v3 = vadd.f32 %v6464_v38, %v6296_v52  ;;  %v6176_v28 = vpop.f32.mrf.mxu0 }
 0x9f6   : > { %v11237_v62 = vadd.f32 %v6176_v28, %v6008_v4  ;;  %v6298_v60 = vpop.f32.mrf.mxu1  ;;  %v12073_v4 = vld [vmem:[#allocation42_spill] sm:$0xff] }
 0x9f7   : > { %6623 = vst [vmem:[%s11228_s22 + $0x8] sm:$0xff] %v6465_v3  ;;  %v6299_v13 = vadd.f32 %v6298_v60, %v11050_v5  ;;  %v6013_v5 = vadd.f32 %v11017_v47, %v11106_v40  ;;  %v11255_v28 = vpop.f32.mrf.mxu3 }
 0x9f9   : > { %6337 = vmatmul.bf16.gmra.mxu1 %v12071_v1  ;;  %6506 = vmatmul.bf16.gmra.mxu2 %v10804_v27 }
 0x9fc   : > { %v6467_v21 = vpop.f32.mrf.mxu2 }
 0x9fd   : > { %v6468_v49 = vadd.f32 %v6467_v21, %v6299_v13  ;;  %v6179_v18 = vpop.f32.mrf.mxu0  ;;  %v12074_v13 = vld [vmem:[#allocation47_spill] sm:$0xff] }
 0x9fe   : > { %v11247_v16 = vadd.f32 %v6179_v18, %v6011_v41  ;;  %6094 = vmatmul.bf16.gmra.mxu3 %v12072_v53  ;;  %v6300_v52 = vpop.f32.mrf.mxu1  ;;  %v12075_v53 = vld [vmem:[#allocation87_spill] sm:$0xff] }
 0x9ff   : > { %6624 = vst [vmem:[%s11228_s22 + $0x10] sm:$0xff] %v6468_v49  ;;  %v6301_v27 = vadd.f32 %v6300_v52, %v11059_v63  ;;  %v6016_v63 = vadd.f32 %v11017_v47, %v11117_v45 }
 0xa00   : > { %6218 = vmatmul.bf16.gmra.mxu0 %v12073_v4  ;;  %v11269_v4 = vpop.f32.mrf.mxu3 }
 0xa04   : > { %v6469_v36 = vpop.f32.mrf.mxu2 }
 0xa05   : > { %v6470_v38 = vadd.f32 %v6469_v36, %v6301_v27  ;;  %v6181_v3 = vpop.f32.mrf.mxu0  ;;  %v12076_v27 = vld [vmem:[#allocation44_spill] sm:$0xff] }
 0xa06   : > { %v11257_v60 = vadd.f32 %v6181_v3, %v6013_v5  ;;  %v6303_v1 = vpop.f32.mrf.mxu1 }
 0xa07   : > { %6625 = vst [vmem:[%s11228_s22 + $0x18] sm:$0xff] %v6470_v38  ;;  %v6304_v41 = vadd.f32 %v6303_v1, %v11068_v35  ;;  %v6018_v35 = vadd.f32 %v11017_v47, %v11130_v39  ;;  %v12077_v1 = vld [vmem:[#allocation61_spill] sm:$0xff] }
 0xa09   : > { %6342 = vmatmul.bf16.gmra.mxu1 %v12074_v13  ;;  %6511 = vmatmul.bf16.gmra.mxu2 %v10822_v19  ;;  %v11280_v13 = vpop.f32.mrf.mxu3 }
 0xa0c   : > { %v6472_v40 = vpop.f32.mrf.mxu2 }
 0xa0d   : > { %v6473_v21 = vadd.f32 %v6472_v40, %v6304_v41  ;;  %v6184_v49 = vpop.f32.mrf.mxu0 }
 0xa0e   : > { %v11265_v18 = vadd.f32 %v6184_v49, %v6016_v63  ;;  %6099 = vmatmul.bf16.gmra.mxu3 %v12075_v53  ;;  %v6305_v52 = vpop.f32.mrf.mxu1  ;;  %v12078_v49 = vld [vmem:[#allocation90_spill] sm:$0xff] }
 0xa0f   : > { %6626 = vst [vmem:[%s11228_s22 + $0x20] sm:$0xff] %v6473_v21  ;;  %v6306_v19 = vadd.f32 %v6305_v52, %v11077_v11  ;;  %v6021_v11 = vadd.f32 %v11017_v47, %v11144_v9  ;;  %v12079_v52 = vld [vmem:[#allocation46_spill] sm:$0xff] }
 0xa10   : > { %6223 = vmatmul.bf16.gmra.mxu0 %v12076_v27 }
 0xa11   : > { %v11293_v27 = vpop.f32.mrf.mxu3 }
 0xa14   : > { %v6474_v45 = vpop.f32.mrf.mxu2 }
 0xa15   : > { %v6475_v5 = vadd.f32 %v6474_v45, %v6306_v19  ;;  %v6186_v36 = vpop.f32.mrf.mxu0 }
 0xa16   : > { %v11275_v38 = vadd.f32 %v6186_v36, %v6018_v35  ;;  %v6308_v3 = vpop.f32.mrf.mxu1  ;;  %v12080_v36 = vld [vmem:[#allocation49_spill] sm:$0xff] }
 0xa17   : > { %6627 = vst [vmem:[%s11228_s22 + $0x28] sm:$0xff] %v6475_v5  ;;  %v6309_v41 = vadd.f32 %v6308_v3, %v11088_v24  ;;  %v6023_v24 = vadd.f32 %v11017_v47, %v11153_v46 }
 0xa19   : > { %6347 = vmatmul.bf16.gmra.mxu1 %v12077_v1  ;;  %6516 = vmatmul.bf16.gmra.mxu2 %v10840_v43 }
 0xa1c   : > { %v6477_v39 = vpop.f32.mrf.mxu2 }
 0xa1d   : > { %v6478_v63 = vadd.f32 %v6477_v39, %v6309_v41  ;;  %v6189_v40 = vpop.f32.mrf.mxu0 }
 0xa1e   : > { %v11285_v21 = vadd.f32 %v6189_v40, %v6021_v11  ;;  %6104 = vmatmul.bf16.gmra.mxu3 %v12078_v49  ;;  %v6310_v53 = vpop.f32.mrf.mxu1  ;;  %v11303_v11 = vpop.f32.mrf.mxu3  ;;  %v12082_v49 = vld [vmem:[#allocation48_spill] sm:$0xff] }
 0xa1f   : > { %6628 = vst [vmem:[%s11228_s22 + $0x30] sm:$0xff] %v6478_v63  ;;  %v6311_v43 = vadd.f32 %v6310_v53, %v11097_v37  ;;  %v6026_v37 = vadd.f32 %v11017_v47, %v11167_v34  ;;  %v12081_v63 = vld [vmem:[#allocation120_spill] sm:$0xff] }
 0xa20   : > { %6228 = vmatmul.bf16.gmra.mxu0 %v12079_v52 }
 0xa24   : > { %v6479_v9 = vpop.f32.mrf.mxu2 }
 0xa25   : > { %v6480_v19 = vadd.f32 %v6479_v9, %v6311_v43  ;;  %v6191_v35 = vpop.f32.mrf.mxu0  ;;  %v12083_v9 = vld [vmem:[#allocation51_spill] sm:$0xff] }
 0xa26   : > { %v11295_v45 = vadd.f32 %v6191_v35, %v6023_v24  ;;  %v6313_v5 = vpop.f32.mrf.mxu1 }
 0xa27   : > { %6629 = vst [vmem:[%s11228_s22 + $0x38] sm:$0xff] %v6480_v19  ;;  %v6314_v3 = vadd.f32 %v6313_v5, %v11108_v23  ;;  %v6028_v23 = vadd.f32 %v11017_v47, %v11179_v0 }
 0xa29   : > { %6352 = vmatmul.bf16.gmra.mxu1 %v12080_v36  ;;  %6521 = vmatmul.bf16.gmra.mxu2 %v10858_v48 }
 0xa2c   : > { %v6482_v46 = vpop.f32.mrf.mxu2 }
 0xa2d   : > { %v6483_v1 = vadd.f32 %v6482_v46, %v6314_v3  ;;  %v6194_v41 = vpop.f32.mrf.mxu0 }
 0xa2e   : > { %v11305_v39 = vadd.f32 %v6194_v41, %v6026_v37  ;;  %6109 = vmatmul.bf16.gmra.mxu3 %v12081_v63  ;;  %v6315_v40 = vpop.f32.mrf.mxu1  ;;  %v12084_v37 = vld [vmem:[#allocation50_spill] sm:$0xff] }
 0xa2f   : > { %6630 = vst [vmem:[%s11228_s22 + $0x40] sm:$0xff] %v6483_v1  ;;  %v6316_v48 = vadd.f32 %v6315_v40, %v11115_v42  ;;  %v6031_v42 = vadd.f32 %v11017_v47, %v11191_v33  ;;  %v12085_v40 = vld [vmem:[#allocation28_spill] sm:$0xff] }
 0xa30   : > { %6233 = vmatmul.bf16.gmra.mxu0 %v12082_v49 }
 0xa34   : > { %v6484_v34 = vpop.f32.mrf.mxu2 }
 0xa35   : > { %v6485_v53 = vadd.f32 %v6484_v34, %v6316_v48  ;;  %v6196_v52 = vpop.f32.mrf.mxu0 }
 0xa36   : > { %v11313_v43 = vadd.f32 %v6196_v52, %v6028_v23  ;;  %v6318_v24 = vpop.f32.mrf.mxu1  ;;  %v12086_v52 = vld [vmem:[#allocation27_spill] sm:$0xff] }
 0xa37   : > { %6631 = vst [vmem:[%s11228_s22 + $0x48] sm:$0xff] %v6485_v53  ;;  %v6319_v19 = vadd.f32 %v6318_v24, %v11126_v8 }
 0xa39   : > { %6357 = vmatmul.bf16.gmra.mxu1 %v12083_v9  ;;  %6526 = vmatmul.bf16.gmra.mxu2 %v10876_v31  ;;  %v6033_v31 = vadd.f32 %v11017_v47, %v11202_v10 }
 0xa3c   : > { %v6487_v35 = vpop.f32.mrf.mxu2 }
 0xa3d   : > { %v6488_v0 = vadd.f32 %v6487_v35, %v6319_v19  ;;  %v6199_v5 = vpop.f32.mrf.mxu0  ;;  %v12087_v35 = vld [vmem:[#allocation68_spill] sm:$0xff] }
 0xa3e   : > { %v11321_v36 = vadd.f32 %v6199_v5, %v6031_v42  ;;  %v6320_v3 = vpop.f32.mrf.mxu1 }
 0xa3f   : > { %6632 = vst [vmem:[%s11228_s22 + $0x50] sm:$0xff] %v6488_v0  ;;  %v6321_v46 = vadd.f32 %v6320_v3, %v11135_v26  ;;  %v6036_v26 = vadd.f32 %v11017_v47, %v11214_v61 }
 0xa40   : > { %6238 = vmatmul.bf16.gmra.mxu0 %v12084_v37 }
 0xa44   : > { %v6489_v8 = vpop.f32.mrf.mxu2 }
 0xa45   : > { %v6490_v1 = vadd.f32 %v6489_v8, %v6321_v46  ;;  %v6201_v41 = vpop.f32.mrf.mxu0 }
 0xa46   : > { %v11328_v63 = vadd.f32 %v6201_v41, %v6033_v31  ;;  %v6323_v33 = vpop.f32.mrf.mxu1  ;;  %v12088_v31 = vld [vmem:[#allocation35_spill] sm:$0xff] }
 0xa47   : > { %6633 = vst [vmem:[%s11228_s22 + $0x58] sm:$0xff] %v6490_v1  ;;  %v6324_v49 = vadd.f32 %v6323_v33, %v11146_v6 }
 0xa49   : > { %6362 = vmatmul.bf16.gmra.mxu1 %v12085_v40  ;;  %6531 = vmatmul.bf16.gmra.mxu2 %v10894_v17  ;;  %v6038_v17 = vadd.f32 %v11017_v47, %v11232_v29  ;;  %v12089_v40 = vld [vmem:[#allocation29_spill] sm:$0xff] }
 0xa4c   : > { %v6492_v48 = vpop.f32.mrf.mxu2 }
 0xa4d   : > { %v6493_v10 = vadd.f32 %v6492_v48, %v6324_v49  ;;  %v6204_v23 = vpop.f32.mrf.mxu0 }
 0xa4e   : > { %v11336_v34 = vadd.f32 %v6204_v23, %v6036_v26  ;;  %v6325_v53 = vpop.f32.mrf.mxu1 }
 0xa4f   : > { %6634 = vst [vmem:[%s11228_s22 + $0x60] sm:$0xff] %v6493_v10  ;;  %v6326_v24 = vadd.f32 %v6325_v53, %v11155_v30  ;;  %v6041_v30 = vadd.f32 %v11017_v47, %v11245_v2  ;;  %v12090_v53 = vld [vmem:[#allocation30_spill] sm:$0xff] }
 0xa50   : > { %6243 = vmatmul.bf16.gmra.mxu0 %v12086_v52 }
 0xa54   : > { %v6494_v6 = vpop.f32.mrf.mxu2 }
 0xa55   : > { %v6495_v9 = vadd.f32 %v6494_v6, %v6326_v24  ;;  %v6206_v19 = vpop.f32.mrf.mxu0 }
 0xa56   : > { %v11343_v42 = vadd.f32 %v6206_v19, %v6038_v17  ;;  %v6328_v61 = vpop.f32.mrf.mxu1 }
 0xa57   : > { %6635 = vst [vmem:[%s11228_s22 + $0x68] sm:$0xff] %v6495_v9  ;;  %v6329_v0 = vadd.f32 %v6328_v61, %v11164_v20  ;;  %v12091_v9 = vld [vmem:[#allocation31_spill] sm:$0xff] }
 0xa59   : > { %6367 = vmatmul.bf16.gmra.mxu1 %v12087_v35  ;;  %6536 = vmatmul.bf16.gmra.mxu2 %v10912_v44  ;;  %v6043_v44 = vadd.f32 %v11017_v47, %v11255_v28 }
 0xa5c   : > { %v6497_v5 = vpop.f32.mrf.mxu2 }
 0xa5d   : > { %v6498_v29 = vadd.f32 %v6497_v5, %v6329_v0  ;;  %v6209_v3 = vpop.f32.mrf.mxu0  ;;  %v12092_v5 = vld [vmem:[#allocation69_spill] sm:$0xff] }
 0xa5e   : > { %v11351_v37 = vadd.f32 %v6209_v3, %v6041_v30  ;;  %v6330_v46 = vpop.f32.mrf.mxu1 }
 0xa5f   : > { %6636 = vst [vmem:[%s11228_s22 + $0x70] sm:$0xff] %v6498_v29  ;;  %v6331_v8 = vadd.f32 %v6330_v46, %v11173_v12  ;;  %v6046_v12 = vadd.f32 %v11017_v47, %v11269_v4 }
 0xa60   : > { %6248 = vmatmul.bf16.gmra.mxu0 %v12088_v31 }
 0xa64   : > { %v6499_v20 = vpop.f32.mrf.mxu2 }
 0xa65   : > { %v6500_v1 = vadd.f32 %v6499_v20, %v6331_v8  ;;  %v6211_v41 = vpop.f32.mrf.mxu0  ;;  %v12093_v8 = vld [vmem:[#allocation73_spill] sm:$0xff] }
 0xa66   : > { %v11358_v33 = vadd.f32 %v6211_v41, %v6043_v44  ;;  %v6333_v2 = vpop.f32.mrf.mxu1 }
 0xa67   : > { %6637 = vst [vmem:[%s11228_s22 + $0x78] sm:$0xff] %v6500_v1  ;;  %v6334_v49 = vadd.f32 %v6333_v2, %v11184_v55 }
 0xa69   : > { %6372 = vmatmul.bf16.gmra.mxu1 %v12089_v40  ;;  %6541 = vmatmul.bf16.gmra.mxu2 %v10930_v50  ;;  %v6048_v50 = vadd.f32 %v11017_v47, %v11280_v13 }
 0xa6c   : > { %v6502_v26 = vpop.f32.mrf.mxu2 }
 0xa6d   : > { %v6503_v28 = vadd.f32 %v6502_v26, %v6334_v49  ;;  %v6214_v48 = vpop.f32.mrf.mxu0  ;;  %v12095_v49 = vld [vmem:[#allocation74_spill] sm:$0xff] }
 0xa6e   : > { %v11366_v10 = vadd.f32 %v6214_v48, %v6046_v12  ;;  %v6335_v23 = vpop.f32.mrf.mxu1 }
 0xa6f   : > { %6638 = vst [vmem:[%s11228_s22 + $0x80] sm:$0xff] %v6503_v28  ;;  %v6336_v52 = vadd.f32 %v6335_v23, %v11193_v25  ;;  %v6051_v25 = vadd.f32 %v11017_v47, %v11293_v27  ;;  %v12096_v28 = vld [vmem:[#allocation41_spill] sm:$0xff] }
 0xa70   : > { %6253 = vmatmul.bf16.gmra.mxu0 %v12090_v53 }
 0xa74   : > { %v6504_v55 = vpop.f32.mrf.mxu2 }
 0xa75   : > { %v6505_v24 = vadd.f32 %v6504_v55, %v6336_v52  ;;  %v6216_v17 = vpop.f32.mrf.mxu0  ;;  %v12097_v52 = vld [vmem:[#allocation76_spill] sm:$0xff] }
 0xa76   : > { %v11373_v6 = vadd.f32 %v6216_v17, %v6048_v50  ;;  %v6338_v4 = vpop.f32.mrf.mxu1 }
 0xa77   : > { %6639 = vst [vmem:[%s11228_s22 + $0x88] sm:$0xff] %v6505_v24  ;;  %v6339_v19 = vadd.f32 %v6338_v4, %v11204_v58  ;;  %v12098_v24 = vld [vmem:[#allocation43_spill] sm:$0xff] }
 0xa79   : > { %6377 = vmatmul.bf16.gmra.mxu1 %v12091_v9  ;;  %6546 = vmatmul.bf16.gmra.mxu2 %v10948_v22  ;;  %v6053_v22 = vadd.f32 %v11017_v47, %v11303_v11  ;;  %v12094_v47 = vld [vmem:[#allocation39_spill] sm:$0xff] }
 0xa7c   : > { %v6507_v61 = vpop.f32.mrf.mxu2 }
 0xa7d   : > { %v6508_v13 = vadd.f32 %v6507_v61, %v6339_v19  ;;  %v6219_v35 = vpop.f32.mrf.mxu0  ;;  %v12099_v19 = vld [vmem:[#allocation54_spill] sm:$0xff] }
 0xa7e   : > { %v11381_v0 = vadd.f32 %v6219_v35, %v6051_v25  ;;  %v6340_v30 = vpop.f32.mrf.mxu1 }
 0xa7f   : > { %6640 = vst [vmem:[%s11228_s22 + $0x90] sm:$0xff] %v6508_v13  ;;  %v6341_v29 = vadd.f32 %v6340_v30, %v11211_v51  ;;  %v12100_v13 = vld [vmem:[#allocation57_spill] sm:$0xff] }
 0xa80   : > { %6258 = vmatmul.bf16.gmra.mxu0 %v12092_v5 }
 0xa84   : > { %v6509_v58 = vpop.f32.mrf.mxu2 }
 0xa85   : > { %v6510_v3 = vadd.f32 %v6509_v58, %v6341_v29  ;;  %v6221_v46 = vpop.f32.mrf.mxu0  ;;  %v12101_v29 = vld [vmem:[#allocation77_spill] sm:$0xff] }
 0xa86   : > { %v11388_v27 = vadd.f32 %v6221_v46, %v6053_v22  ;;  %v6343_v31 = vpop.f32.mrf.mxu1 }
 0xa87   : > { %6641 = vst [vmem:[%s11228_s22 + $0x98] sm:$0xff] %v6510_v3  ;;  %v6344_v44 = vadd.f32 %v6343_v31, %v11225_v57 }
 0xa89   : > { %6382 = vmatmul.bf16.gmra.mxu1 %v12093_v8  ;;  %6551 = vmatmul.bf16.gmra.mxu2 %v10966_v56  ;;  %v12102_v8 = vld [vmem:[#allocation89_spill] sm:$0xff] }
 0xa8c   : > { %v6512_v20 = vpop.f32.mrf.mxu2 }
 0xa8d   : > { %v6513_v51 = vadd.f32 %v6512_v20, %v6344_v44 }
 0xa8e   : > { %v6345_v1 = vpop.f32.mrf.mxu1 }
 0xa8f   : > { %6642 = vst [vmem:[%s11228_s22 + $0xa0] sm:$0xff] %v6513_v51  ;;  %v6346_v11 = vadd.f32 %v6345_v1, %v11237_v62 }
 0xa90   : > { %6263 = vmatmul.bf16.gmra.mxu0 %v12094_v47 }
 0xa94   : > { %v6514_v41 = vpop.f32.mrf.mxu2 }
 0xa95   : > { %v6515_v2 = vadd.f32 %v6514_v41, %v6346_v11  ;;  %v12103_v11 = vld [vmem:[#allocation79_spill] sm:$0xff] }
 0xa96   : > { %v6348_v40 = vpop.f32.mrf.mxu1  ;;  %v12104_v41 = vld [vmem:[#allocation91_spill] sm:$0xff] }
 0xa97   : > { %6643 = vst [vmem:[%s11228_s22 + $0xa8] sm:$0xff] %v6515_v2  ;;  %v6349_v56 = vadd.f32 %v6348_v40, %v11247_v16 }
 0xa99   : > { %6387 = vmatmul.bf16.gmra.mxu1 %v12095_v49  ;;  %6556 = vmatmul.bf16.gmra.mxu2 %v10982_v7 }
 0xa9c   : > { %v6517_v57 = vpop.f32.mrf.mxu2 }
 0xa9d   : > { %v6518_v12 = vadd.f32 %v6517_v57, %v6349_v56  ;;  %v6055_v57 = vpop.f32.mrf.mxu3 }
 0xa9e   : > { %v6350_v26 = vpop.f32.mrf.mxu1 }
 0xa9f   : > { %6644 = vst [vmem:[%s11228_s22 + $0xb0] sm:$0xff] %v6518_v12  ;;  %v6351_v62 = vadd.f32 %v6350_v26, %v11257_v60  ;;  %v6224_v26 = vpop.f32.mrf.mxu0 }
 0xaa0   : > { %6268 = vmatmul.bf16.gmra.mxu0 %v12096_v28  ;;  %v12105_v28 = vld [vmem:[#allocation80_spill] sm:$0xff] }
 0xaa4   : > { %v6519_v48 = vpop.f32.mrf.mxu2 }
 0xaa5   : > { %v6520_v23 = vadd.f32 %v6519_v48, %v6351_v62  ;;  %v12106_v62 = vld [vmem:[#allocation92_spill] sm:$0xff] }
 0xaa6   : > { %v6353_v53 = vpop.f32.mrf.mxu1 }
 0xaa7   : > { %6645 = vst [vmem:[%s11228_s22 + $0xb8] sm:$0xff] %v6520_v23  ;;  %v6354_v7 = vadd.f32 %v6353_v53, %v11265_v18 }
 0xaa9   : > { %6392 = vmatmul.bf16.gmra.mxu1 %v12097_v52  ;;  %6561 = vmatmul.bf16.gmra.mxu2 %v11000_v59  ;;  %v6057_v52 = vpop.f32.mrf.mxu3 }
 0xaac   : > { %v6522_v16 = vpop.f32.mrf.mxu2 }
 0xaad   : > { %v6523_v50 = vadd.f32 %v6522_v16, %v6354_v7 }
 0xaae   : > { %v6355_v55 = vpop.f32.mrf.mxu1 }
 0xaaf   : > { %6646 = vst [vmem:[%s11228_s22 + $0xc0] sm:$0xff] %v6523_v50  ;;  %v6356_v60 = vadd.f32 %v6355_v55, %v11275_v38 }
 0xab0   : > { %6273 = vmatmul.bf16.gmra.mxu0 %v12098_v24  ;;  %v12107_v24 = vld [vmem:[#allocation82_spill] sm:$0xff] }
 0xab4   : > { %v6524_v17 = vpop.f32.mrf.mxu2 }
 0xab5   : > { %v6525_v4 = vadd.f32 %v6524_v17, %v6356_v60  ;;  %v12108_v60 = vld [vmem:[#allocation93_spill] sm:$0xff]  ;;  %v6060_v17 = vpop.f32.mrf.mxu3 }
 0xab6   : > { %v6358_v9 = vpop.f32.mrf.mxu1 }
 0xab7   : > { %6647 = vst [vmem:[%s11228_s22 + $0xc8] sm:$0xff] %v6525_v4  ;;  %v6359_v59 = vadd.f32 %v6358_v9, %v11285_v21 }
 0xab9   : > { %6397 = vmatmul.bf16.gmra.mxu1 %v12099_v19  ;;  %6566 = vmatmul.bf16.gmra.mxu2 %v11023_v54 }
 0xabc   : > { %v6527_v18 = vpop.f32.mrf.mxu2 }
 0xabd   : > { %v6528_v25 = vadd.f32 %v6527_v18, %v6359_v59  ;;  %v6062_v18 = vpop.f32.mrf.mxu3 }
 0xabe   : > { %v6360_v61 = vpop.f32.mrf.mxu1 }
 0xabf   : > { %6648 = vst [vmem:[%s11228_s22 + $0xd0] sm:$0xff] %v6528_v25  ;;  %v6361_v38 = vadd.f32 %v6360_v61, %v11295_v45 }
 0xac0   : > { %6278 = vmatmul.bf16.gmra.mxu0 %v12100_v13 }
 0xac4   : > { %v6529_v35 = vpop.f32.mrf.mxu2 }
 0xac5   : > { %v6530_v30 = vadd.f32 %v6529_v35, %v6361_v38  ;;  %v12109_v35 = vld [vmem:[#allocation58_spill] sm:$0xff] }
 0xac6   : > { %v6363_v5 = vpop.f32.mrf.mxu1 }
 0xac7   : > { %6649 = vst [vmem:[%s11228_s22 + $0xd8] sm:$0xff] %v6530_v30  ;;  %v6364_v54 = vadd.f32 %v6363_v5, %v11305_v39  ;;  %v12110_v30 = vld [vmem:[#allocation94_spill] sm:$0xff] }
 0xac9   : > { %6402 = vmatmul.bf16.gmra.mxu1 %v12101_v29  ;;  %6571 = vmatmul.bf16.gmra.mxu2 %v11043_v14 }
 0xacc   : > { %v6532_v21 = vpop.f32.mrf.mxu2 }
 0xacd   : > { %v6533_v22 = vadd.f32 %v6532_v21, %v6364_v54  ;;  %v6065_v54 = vpop.f32.mrf.mxu3 }
 0xace   : > { %v6365_v58 = vpop.f32.mrf.mxu1 }
 0xacf   : > { %6650 = vst [vmem:[%s11228_s22 + $0xe0] sm:$0xff] %v6533_v22  ;;  %v6366_v3 = vadd.f32 %v6365_v58, %v11313_v43 }
 0xad4   : > { %v6534_v45 = vpop.f32.mrf.mxu2 }
 0xad5   : > { %v6535_v46 = vadd.f32 %v6534_v45, %v6366_v3 }
 0xad6   : > { %v6368_v31 = vpop.f32.mrf.mxu1 }
 0xad7   : > { %6651 = vst [vmem:[%s11228_s22 + $0xe8] sm:$0xff] %v6535_v46  ;;  %v6369_v14 = vadd.f32 %v6368_v31, %v11321_v36  ;;  %v11457_v46 = vld [vmem:[%s11563_s13] ss:$0 sm:$0xff] }
 0xad8   : > { %v6056_v31 = vadd.f32 %v11457_v46, %v6055_v57  ;;  %v12114_v57 = vld [vmem:[#allocation95_spill] sm:$0xff] }
 0xad9   : > { %6407 = vmatmul.bf16.gmra.mxu1 %v10878_v15  ;;  %6576 = vmatmul.bf16.gmra.mxu2 %v12102_v8 }
 0xada   : > { %v6225_v8 = vadd.f32 %v6224_v26, %v6056_v31 }
 0xadc   : > { %v6537_v39 = vpop.f32.mrf.mxu2 }
 0xadd   : > { %v6538_v44 = vadd.f32 %v6537_v39, %v6369_v14  ;;  %v12111_v14 = vld [vmem:[#allocation83_spill] sm:$0xff] }
 0xade   : > { %v6370_v20 = vpop.f32.mrf.mxu1  ;;  %v12112_v39 = vld [vmem:[#allocation67_spill] sm:$0xff] }
 0xadf   : > { %6652 = vst [vmem:[%s11228_s22 + $0xf0] sm:$0xff] %v6538_v44  ;;  %v6371_v51 = vadd.f32 %v6370_v20, %v11328_v63 }
 0xae4   : > { %v6539_v1 = vpop.f32.mrf.mxu2 }
 0xae5   : > { %v6540_v43 = vadd.f32 %v6539_v1, %v6371_v51 }
 0xae6   : > { %v6373_v47 = vpop.f32.mrf.mxu1 }
 0xae7   : > { %6653 = vst [vmem:[%s11228_s22 + $0xf8] sm:$0xff] %v6540_v43  ;;  %v6374_v15 = vadd.f32 %v6373_v47, %v11336_v34  ;;  %v6058_v43 = vadd.f32 %v11457_v46, %v6057_v52 }
 0xae9   : > { %6412 = vmatmul.bf16.gmra.mxu1 %v12103_v11  ;;  %6581 = vmatmul.bf16.gmra.mxu2 %v12104_v41 }
 0xaec   : > { %v6542_v2 = vpop.f32.mrf.mxu2 }
 0xaed   : > { %v6543_v36 = vadd.f32 %v6542_v2, %v6374_v15 }
 0xaee   : > { %v6375_v40 = vpop.f32.mrf.mxu1 }
 0xaef   : > { %6654 = vst [vmem:[%s11228_s22 + $0x100] sm:$0xff] %v6543_v36  ;;  %v6376_v49 = vadd.f32 %v6375_v40, %v11343_v42  ;;  %v6226_v42 = vpop.f32.mrf.mxu0 }
 0xaf0   : > { %v6227_v47 = vadd.f32 %v6226_v42, %v6058_v43 }
 0xaf4   : > { %v6544_v56 = vpop.f32.mrf.mxu2 }
 0xaf5   : > { %v6545_v63 = vadd.f32 %v6544_v56, %v6376_v49  ;;  %v6061_v49 = vadd.f32 %v11457_v46, %v6060_v17  ;;  %v12115_v17 = vld [vmem:[#allocation86_spill] sm:$0xff] }
 0xaf6   : > { %v6378_v12 = vpop.f32.mrf.mxu1 }
 0xaf7   : > { %6655 = vst [vmem:[%s11228_s22 + $0x108] sm:$0xff] %v6545_v63  ;;  %v6379_v34 = vadd.f32 %v6378_v12, %v11351_v37  ;;  %v6229_v4 = vpop.f32.mrf.mxu0  ;;  %v12113_v63 = vld [vmem:[#allocation85_spill] sm:$0xff] }
 0xaf8   : > { %v6230_v56 = vadd.f32 %v6229_v4, %v6061_v49 }
 0xaf9   : > { %6417 = vmatmul.bf16.gmra.mxu1 %v12105_v28  ;;  %6586 = vmatmul.bf16.gmra.mxu2 %v12106_v62 }
 0xafc   : > { %v6547_v48 = vpop.f32.mrf.mxu2 }
 0xafd   : > { %v6548_v23 = vadd.f32 %v6547_v48, %v6379_v34 }
 0xafe   : > { %v6380_v53 = vpop.f32.mrf.mxu1 }
 0xaff   : > { %6656 = vst [vmem:[%s11228_s22 + $0x110] sm:$0xff] %v6548_v23  ;;  %v6381_v7 = vadd.f32 %v6380_v53, %v11358_v33  ;;  %v6231_v13 = vpop.f32.mrf.mxu0  ;;  %v6063_v23 = vadd.f32 %v11457_v46, %v6062_v18 }
 0xb01   : > { %v6232_v53 = vadd.f32 %v6231_v13, %v6063_v23 }
 0xb04   : > { %v6549_v16 = vpop.f32.mrf.mxu2 }
 0xb05   : > { %v6550_v50 = vadd.f32 %v6549_v16, %v6381_v7 }
 0xb06   : > { %v6383_v55 = vpop.f32.mrf.mxu1 }
 0xb07   : > { %6657 = vst [vmem:[%s11228_s22 + $0x118] sm:$0xff] %v6550_v50  ;;  %v6384_v37 = vadd.f32 %v6383_v55, %v11366_v10  ;;  %v6234_v22 = vpop.f32.mrf.mxu0  ;;  %v6066_v55 = vadd.f32 %v11457_v46, %v6065_v54 }
 0xb09   : > { %6422 = vmatmul.bf16.gmra.mxu1 %v12107_v24  ;;  %6591 = vmatmul.bf16.gmra.mxu2 %v12108_v60  ;;  %v6235_v60 = vadd.f32 %v6234_v22, %v6066_v55 }
 0xb0c   : > { %v6552_v9 = vpop.f32.mrf.mxu2 }
 0xb0d   : > { %v6553_v19 = vadd.f32 %v6552_v9, %v6384_v37  ;;  %v12116_v37 = vld [vmem:[#allocation96_spill] sm:$0xff] }
 0xb0e   : > { %v6385_v59 = vpop.f32.mrf.mxu1 }
 0xb0f   : > { %6658 = vst [vmem:[%s11228_s22 + $0x120] sm:$0xff] %v6553_v19  ;;  %v6386_v33 = vadd.f32 %v6385_v59, %v11373_v6 }
 0xb14   : > { %v6554_v25 = vpop.f32.mrf.mxu2 }
 0xb15   : > { %v6555_v61 = vadd.f32 %v6554_v25, %v6386_v33 }
 0xb16   : > { %v6388_v38 = vpop.f32.mrf.mxu1 }
 0xb17   : > { %6659 = vst [vmem:[%s11228_s22 + $0x128] sm:$0xff] %v6555_v61  ;;  %v6389_v10 = vadd.f32 %v6388_v38, %v11381_v0  ;;  %v6067_v0 = vpop.f32.mrf.mxu3 }
 0xb18   : > { %v6068_v33 = vadd.f32 %v11457_v46, %v6067_v0 }
 0xb19   : > { %6427 = vmatmul.bf16.gmra.mxu1 %v12109_v35  ;;  %6596 = vmatmul.bf16.gmra.mxu2 %v12110_v30 }
 0xb1c   : > { %v6557_v5 = vpop.f32.mrf.mxu2 }
 0xb1d   : > { %v6558_v29 = vadd.f32 %v6557_v5, %v6389_v10 }
 0xb1e   : > { %v6390_v21 = vpop.f32.mrf.mxu1 }
 0xb1f   : > { %6660 = vst [vmem:[%s11228_s22 + $0x130] sm:$0xff] %v6558_v29  ;;  %v6391_v6 = vadd.f32 %v6390_v21, %v11388_v27  ;;  %v6236_v27 = vpop.f32.mrf.mxu0  ;;  %v6070_v11 = vpop.f32.mrf.mxu3  ;;  %v12117_v29 = vld [vmem:[#allocation88_spill] sm:$0xff] }
 0xb20   : > { %v6237_v25 = vadd.f32 %v6236_v27, %v6068_v33  ;;  %v6071_v10 = vadd.f32 %v11457_v46, %v6070_v11 }
 0xb24   : > { %v6559_v58 = vpop.f32.mrf.mxu2 }
 0xb25   : > { %v6560_v3 = vadd.f32 %v6559_v58, %v6391_v6 }
 0xb26   : > { %v6393_v45 = vpop.f32.mrf.mxu1 }
 0xb27   : > { %6661 = vst [vmem:[%s11228_s22 + $0x138] sm:$0xff] %v6560_v3  ;;  %v6394_v44 = vadd.f32 %v6393_v45, %v6225_v8  ;;  %v6239_v15 = vpop.f32.mrf.mxu0  ;;  %v6072_v26 = vpop.f32.mrf.mxu3 }
 0xb28   : > { %v6240_v5 = vadd.f32 %v6239_v15, %v6071_v10  ;;  %v6073_v45 = vadd.f32 %v11457_v46, %v6072_v26 }
 0xb29   : > { %6432 = vmatmul.bf16.gmra.mxu1 %v12111_v14  ;;  %6601 = vmatmul.bf16.gmra.mxu2 %v12112_v39 }
 0xb2c   : > { %v6562_v20 = vpop.f32.mrf.mxu2 }
 0xb2d   : > { %v6563_v51 = vadd.f32 %v6562_v20, %v6394_v44 }
 0xb2e   : > { %v6395_v1 = vpop.f32.mrf.mxu1 }
 0xb2f   : > { %6662 = vst [vmem:[%s11228_s22 + $0x140] sm:$0xff] %v6563_v51  ;;  %v6396_v41 = vadd.f32 %v6395_v1, %v6227_v47  ;;  %v6241_v34 = vpop.f32.mrf.mxu0  ;;  %v6075_v16 = vpop.f32.mrf.mxu3 }
 0xb30   : > { %v6242_v31 = vadd.f32 %v6241_v34, %v6073_v45 }
 0xb34   : > { %v6564_v2 = vpop.f32.mrf.mxu2 }
 0xb35   : > { %v6565_v36 = vadd.f32 %v6564_v2, %v6396_v41 }
 0xb36   : > { %v6398_v40 = vpop.f32.mrf.mxu1 }
 0xb37   : > { %6663 = vst [vmem:[%s11228_s22 + $0x148] sm:$0xff] %v6565_v36  ;;  %v6399_v12 = vadd.f32 %v6398_v40, %v6230_v56  ;;  %v6244_v24 = vpop.f32.mrf.mxu0  ;;  %v6077_v18 = vpop.f32.mrf.mxu3 }
 0xb38   : > { %v6078_v41 = vadd.f32 %v11457_v46, %v6077_v18 }
 0xb39   : > { %6437 = vmatmul.bf16.gmra.mxu1 %v12113_v63  ;;  %6606 = vmatmul.bf16.gmra.mxu2 %v12114_v57 }
 0xb3c   : > { %v6567_v28 = vpop.f32.mrf.mxu2 }
 0xb3d   : > { %v6568_v62 = vadd.f32 %v6567_v28, %v6399_v12 }
 0xb3e   : > { %v6400_v48 = vpop.f32.mrf.mxu1 }
 0xb3f   : > { %6664 = vst [vmem:[%s11228_s22 + $0x150] sm:$0xff] %v6568_v62  ;;  %v6401_v52 = vadd.f32 %v6400_v48, %v6232_v53  ;;  %v6246_v61 = vpop.f32.mrf.mxu0  ;;  %v6080_v54 = vpop.f32.mrf.mxu3 }
 0xb40   : > { %v6247_v2 = vadd.f32 %v6246_v61, %v6078_v41  ;;  %v6081_v63 = vadd.f32 %v11457_v46, %v6080_v54 }
 0xb44   : > { %v6569_v42 = vpop.f32.mrf.mxu2 }
 0xb45   : > { %v6570_v7 = vadd.f32 %v6569_v42, %v6401_v52 }
 0xb46   : > { %v6403_v50 = vpop.f32.mrf.mxu1 }
 0xb47   : > { %6665 = vst [vmem:[%s11228_s22 + $0x158] sm:$0xff] %v6570_v7  ;;  %v6404_v4 = vadd.f32 %v6403_v50, %v6235_v60  ;;  %v6249_v22 = vpop.f32.mrf.mxu0  ;;  %v6082_v8 = vpop.f32.mrf.mxu3 }
 0xb48   : > { %v6250_v12 = vadd.f32 %v6249_v22, %v6081_v63  ;;  %v6083_v23 = vadd.f32 %v11457_v46, %v6082_v8 }
 0xb49   : > { %6442 = vmatmul.bf16.gmra.mxu1 %v12115_v17  ;;  %6611 = vmatmul.bf16.gmra.mxu2 %v12116_v37 }
 0xb4c   : > { %v6572_v9 = vpop.f32.mrf.mxu2 }
 0xb4d   : > { %v6573_v19 = vadd.f32 %v6572_v9, %v6404_v4 }
 0xb4e   : > { %v6405_v59 = vpop.f32.mrf.mxu1 }
 0xb4f   : > { %6666 = vst [vmem:[%s11228_s22 + $0x160] sm:$0xff] %v6573_v19  ;;  %v6406_v13 = vadd.f32 %v6405_v59, %v6237_v25  ;;  %v6251_v27 = vpop.f32.mrf.mxu0  ;;  %v6085_v47 = vpop.f32.mrf.mxu3 }
 0xb50   : > { %v6252_v53 = vadd.f32 %v6251_v27, %v6083_v23 }
 0xb54   : > { %v6574_v38 = vpop.f32.mrf.mxu2 }
 0xb55   : > { %v6575_v35 = vadd.f32 %v6574_v38, %v6406_v13 }
 0xb56   : > { %v6408_v30 = vpop.f32.mrf.mxu1 }
 0xb57   : > { %6667 = vst [vmem:[%s11228_s22 + $0x168] sm:$0xff] %v6575_v35  ;;  %v6409_v21 = vadd.f32 %v6408_v30, %v6240_v5  ;;  %v6254_v15 = vpop.f32.mrf.mxu0  ;;  %v6087_v57 = vpop.f32.mrf.mxu3 }
 0xb58   : > { %v6088_v33 = vadd.f32 %v11457_v46, %v6087_v57 }
 0xb59   : > { %6447 = vmatmul.bf16.gmra.mxu1 %v12117_v29  ;;  %6616 = vmatmul.bf16.gmra.mxu2 %v11220_v32  ;;  %v6076_v32 = vadd.f32 %v11457_v46, %v6075_v16 }
 0xb5b   : > { %v6245_v20 = vadd.f32 %v6244_v24, %v6076_v32  ;;  %v6086_v24 = vadd.f32 %v11457_v46, %v6085_v47 }
 0xb5c   : > { %v6577_v6 = vpop.f32.mrf.mxu2 }
 0xb5d   : > { %v6578_v58 = vadd.f32 %v6577_v6, %v6409_v21  ;;  %v6255_v60 = vadd.f32 %v6254_v15, %v6086_v24 }
 0xb5e   : > { %v6410_v3 = vpop.f32.mrf.mxu1 }
 0xb5f   : > { %6668 = vst [vmem:[%s11228_s22 + $0x170] sm:$0xff] %v6578_v58  ;;  %v6411_v0 = vadd.f32 %v6410_v3, %v6242_v31  ;;  %v6256_v26 = vpop.f32.mrf.mxu0  ;;  %v6090_v52 = vpop.f32.mrf.mxu3 }
 0xb60   : > { %v6257_v18 = vadd.f32 %v6256_v26, %v6088_v33  ;;  %v6091_v30 = vadd.f32 %v11457_v46, %v6090_v52 }
 0xb64   : > { %v6579_v14 = vpop.f32.mrf.mxu2 }
 0xb65   : > { %v6580_v39 = vadd.f32 %v6579_v14, %v6411_v0 }
 0xb66   : > { %v6413_v44 = vpop.f32.mrf.mxu1 }
 0xb67   : > { %6669 = vst [vmem:[%s11228_s22 + $0x178] sm:$0xff] %v6580_v39  ;;  %v6414_v51 = vadd.f32 %v6413_v44, %v6245_v20  ;;  %v6259_v7 = vpop.f32.mrf.mxu0  ;;  %v6092_v37 = vpop.f32.mrf.mxu3 }
 0xb68   : > { %v6260_v5 = vadd.f32 %v6259_v7, %v6091_v30  ;;  %v6093_v6 = vadd.f32 %v11457_v46, %v6092_v37 }
 0xb6c   : > { %v6582_v1 = vpop.f32.mrf.mxu2 }
 0xb6d   : > { %v6583_v43 = vadd.f32 %v6582_v1, %v6414_v51 }
 0xb6e   : > { %v6415_v11 = vpop.f32.mrf.mxu1 }
 0xb6f   : > { %6670 = vst [vmem:[%s11228_s22 + $0x180] sm:$0xff] %v6583_v43  ;;  %v6416_v36 = vadd.f32 %v6415_v11, %v6247_v2  ;;  %v6261_v19 = vpop.f32.mrf.mxu0  ;;  %v6095_v38 = vpop.f32.mrf.mxu3 }
 0xb70   : > { %v6262_v3 = vadd.f32 %v6261_v19, %v6093_v6  ;;  %v6096_v39 = vadd.f32 %v11457_v46, %v6095_v38 }
 0xb74   : > { %v6584_v40 = vpop.f32.mrf.mxu2 }
 0xb75   : > { %v6585_v49 = vadd.f32 %v6584_v40, %v6416_v36 }
 0xb76   : > { %v6418_v56 = vpop.f32.mrf.mxu1 }
 0xb77   : > { %6671 = vst [vmem:[%s11228_s22 + $0x188] sm:$0xff] %v6585_v49  ;;  %v6419_v28 = vadd.f32 %v6418_v56, %v6250_v12  ;;  %v6264_v10 = vpop.f32.mrf.mxu0  ;;  %v6097_v58 = vpop.f32.mrf.mxu3 }
 0xb78   : > { %v6265_v27 = vadd.f32 %v6264_v10, %v6096_v39  ;;  %v6098_v47 = vadd.f32 %v11457_v46, %v6097_v58 }
 0xb7c   : > { %v6587_v62 = vpop.f32.mrf.mxu2 }
 0xb7d   : > { %v6588_v34 = vadd.f32 %v6587_v62, %v6419_v28 }
 0xb7e   : > { %v6420_v48 = vpop.f32.mrf.mxu1 }
 0xb7f   : > { %6672 = vst [vmem:[%s11228_s22 + $0x190] sm:$0xff] %v6588_v34  ;;  %v6421_v42 = vadd.f32 %v6420_v48, %v6252_v53  ;;  %v6266_v45 = vpop.f32.mrf.mxu0  ;;  %v6100_v44 = vpop.f32.mrf.mxu3 }
 0xb80   : > { %v6267_v11 = vadd.f32 %v6266_v45, %v6098_v47  ;;  %v6101_v56 = vadd.f32 %v11457_v46, %v6100_v44 }
 0xb84   : > { %v6589_v16 = vpop.f32.mrf.mxu2 }
 0xb85   : > { %v6590_v50 = vadd.f32 %v6589_v16, %v6421_v42 }
 0xb86   : > { %v6423_v55 = vpop.f32.mrf.mxu1 }
 0xb87   : > { %6673 = vst [vmem:[%s11228_s22 + $0x198] sm:$0xff] %v6590_v50  ;;  %v6424_v17 = vadd.f32 %v6423_v55, %v6255_v60  ;;  %v6269_v20 = vpop.f32.mrf.mxu0  ;;  %v6102_v15 = vpop.f32.mrf.mxu3 }
 0xb88   : > { %v6270_v63 = vadd.f32 %v6269_v20, %v6101_v56  ;;  %v6103_v34 = vadd.f32 %v11457_v46, %v6102_v15 }
 0xb8c   : > { %v6592_v4 = vpop.f32.mrf.mxu2 }
 0xb8d   : > { %v6593_v9 = vadd.f32 %v6592_v4, %v6424_v17 }
 0xb8e   : > { %v6425_v59 = vpop.f32.mrf.mxu1 }
 0xb8f   : > { %6674 = vst [vmem:[%s11228_s22 + $0x1a0] sm:$0xff] %v6593_v9  ;;  %v6426_v25 = vadd.f32 %v6425_v59, %v6257_v18  ;;  %v6271_v40 = vpop.f32.mrf.mxu0  ;;  %v6105_v28 = vpop.f32.mrf.mxu3 }
 0xb90   : > { %v6272_v23 = vadd.f32 %v6271_v40, %v6103_v34  ;;  %v6106_v16 = vadd.f32 %v11457_v46, %v6105_v28 }
 0xb94   : > { %v6594_v61 = vpop.f32.mrf.mxu2 }
 0xb95   : > { %v6595_v13 = vadd.f32 %v6594_v61, %v6426_v25 }
 0xb96   : > { %v6428_v35 = vpop.f32.mrf.mxu1 }
 0xb97   : > { %6675 = vst [vmem:[%s11228_s22 + $0x1a8] sm:$0xff] %v6595_v13  ;;  %v6429_v29 = vadd.f32 %v6428_v35, %v6260_v5  ;;  %v6274_v48 = vpop.f32.mrf.mxu0  ;;  %v6107_v50 = vpop.f32.mrf.mxu3 }
 0xb98   : > { %v6275_v55 = vadd.f32 %v6274_v48, %v6106_v16  ;;  %v6108_v9 = vadd.f32 %v11457_v46, %v6107_v50 }
 0xb9c   : > { %v6597_v54 = vpop.f32.mrf.mxu2 }
 0xb9d   : > { %v6598_v21 = vadd.f32 %v6597_v54, %v6429_v29 }
 0xb9e   : > { %v6430_v22 = vpop.f32.mrf.mxu1 }
 0xb9f   : > { %6676 = vst [vmem:[%s11228_s22 + $0x1b0] sm:$0xff] %v6598_v21  ;;  %v6431_v31 = vadd.f32 %v6430_v22, %v6262_v3  ;;  %v6276_v24 = vpop.f32.mrf.mxu0  ;;  %v6110_v59 = vpop.f32.mrf.mxu3 }
 0xba0   : > { %v6277_v19 = vadd.f32 %v6276_v24, %v6108_v9  ;;  %v6111_v38 = vadd.f32 %v11457_v46, %v6110_v59 }
 0xba4   : > { %v6599_v0 = vpop.f32.mrf.mxu2 }
 0xba5   : > { %v6600_v8 = vadd.f32 %v6599_v0, %v6431_v31 }
 0xba6   : > { %v6433_v14 = vpop.f32.mrf.mxu1 }
 0xba7   : > { %6677 = vst [vmem:[%s11228_s22 + $0x1b8] sm:$0xff] %v6600_v8  ;;  %v6434_v32 = vadd.f32 %v6433_v14, %v6265_v27  ;;  %v6279_v18 = vpop.f32.mrf.mxu0  ;;  %v6112_v10 = vpop.f32.mrf.mxu3 }
 0xba8   : > { %v6280_v35 = vadd.f32 %v6279_v18, %v6111_v38  ;;  %v6113_v21 = vadd.f32 %v11457_v46, %v6112_v10 }
 0xbac   : > { %v6602_v51 = vpop.f32.mrf.mxu2 }
 0xbad   : > { %v6603_v1 = vadd.f32 %v6602_v51, %v6434_v32 }
 0xbae   : > { %v6435_v43 = vpop.f32.mrf.mxu1 }
 0xbaf   : > { %6678 = vst [vmem:[%s11228_s22 + $0x1c0] sm:$0xff] %v6603_v1  ;;  %v6436_v41 = vadd.f32 %v6435_v43, %v6267_v11  ;;  %v6281_v54 = vpop.f32.mrf.mxu0 }
 0xbb0   : > { %v6282_v6 = vadd.f32 %v6281_v54, %v6113_v21 }
 0xbb4   : > { %v6604_v2 = vpop.f32.mrf.mxu2 }
 0xbb5   : > { %v6605_v36 = vadd.f32 %v6604_v2, %v6436_v41 }
 0xbb6   : > { %v6438_v49 = vpop.f32.mrf.mxu1 }
 0xbb7   : > { %6679 = vst [vmem:[%s11228_s22 + $0x1c8] sm:$0xff] %v6605_v36  ;;  %v6439_v57 = vadd.f32 %v6438_v49, %v6270_v63 }
 0xbbc   : > { %v6607_v12 = vpop.f32.mrf.mxu2 }
 0xbbd   : > { %v6608_v26 = vadd.f32 %v6607_v12, %v6439_v57 }
 0xbbe   : > { %v6440_v62 = vpop.f32.mrf.mxu1 }
 0xbbf   : > { %6680 = vst [vmem:[%s11228_s22 + $0x1d0] sm:$0xff] %v6608_v26  ;;  %v6441_v53 = vadd.f32 %v6440_v62, %v6272_v23 }
 0xbc4   : > { %v6609_v52 = vpop.f32.mrf.mxu2 }
 0xbc5   : > { %v6610_v42 = vadd.f32 %v6609_v52, %v6441_v53 }
 0xbc6   : > { %v6443_v7 = vpop.f32.mrf.mxu1 }
 0xbc7   : > { %6681 = vst [vmem:[%s11228_s22 + $0x1d8] sm:$0xff] %v6610_v42  ;;  %v6444_v60 = vadd.f32 %v6443_v7, %v6275_v55 }
 0xbcc   : > { %v6612_v17 = vpop.f32.mrf.mxu2 }
 0xbcd   : > { %v6613_v37 = vadd.f32 %v6612_v17, %v6444_v60 }
 0xbce   : > { %v6445_v4 = vpop.f32.mrf.mxu1 }
 0xbcf   : > { %6682 = vst [vmem:[%s11228_s22 + $0x1e0] sm:$0xff] %v6613_v37  ;;  %v6446_v33 = vadd.f32 %v6445_v4, %v6277_v19 }
 0xbd4   : > { %v6614_v25 = vpop.f32.mrf.mxu2 }
 0xbd5   : > { %v6615_v61 = vadd.f32 %v6614_v25, %v6446_v33 }
 0xbd6   : > { %v6448_v13 = vpop.f32.mrf.mxu1 }
 0xbd7   : > { %6683 = vst [vmem:[%s11228_s22 + $0x1e8] sm:$0xff] %v6615_v61  ;;  %v6449_v30 = vadd.f32 %v6448_v13, %v6280_v35 }
 0xbdc   : > { %v6617_v5 = vpop.f32.mrf.mxu2 }
 0xbdd   : > { %v6618_v29 = vadd.f32 %v6617_v5, %v6449_v30 }
 0xbde   : > { %v6450_v22 = vpop.f32.mrf.mxu1 }
 0xbdf   : > { %6684 = vst [vmem:[%s11228_s22 + $0x1f0] sm:$0xff] %v6618_v29  ;;  %v6451_v58 = vadd.f32 %v6450_v22, %v6282_v6 }
 0xbe4   : > { %v6619_v3 = vpop.f32.mrf.mxu2 }
 0xbe5   : > { %v6620_v45 = vadd.f32 %v6619_v3, %v6451_v58 }
 0xbe7   : > { %6685 = vst [vmem:[%s11228_s22 + $0x1f8] sm:$0xff] %v6620_v45 }
 0xbe8   : > { %8296 = shalt.err (!%p8293_p8)
}
 0xbe9   : > { %s8363_s23 = smov 128   ;;  %s8364_s16 = smov 8  }
 0xbea   : > { %7863 = dma.vmem_to_hbm [thread:$0]  (%p8478_p5), %s6700_s20, 8192, %s6702_s18, %s6687_s17, %s8363_s23, %s8363_s23, %s8364_s16  }
 0xbeb PF: > { %s12120_s22 = sld [smem:[#allocation22_spill]] }
 0xbec   : > { %s12121_s14 = sld [smem:[#allocation19_spill]] }
 0xbf1   : > { %p7900_p9 = scmp.ge.s32.totalorder %s12120_s22, 2 }
 0xbf2   : > { %s6716_s21 = sand.u32 1, %s12121_s14  }
 0xbf3   : > { %p7885_p10 = pnand %p7900_p9, %p8482_p6  ;;  %s6717_s27 = scalar_lea.sflag [#allocation4], %s6716_s21 }
 0xbf5   : > { %p7886_p11 = pneg %p7885_p10 }
 0xbf7   : > { %8330 = dma.done.wait (%p7886_p11), %s6717_s27, 8192  }
 0xbf8   : > { %8332 = vsyncadd (%p7886_p11), %s6717_s27, 4294959104  ;;  %s12123_s16 = sld [smem:[#allocation23_spill]] }
 0xbf9   : > { %s12124_s29 = sld [smem:[#allocation20_spill]] }
 0xbfa   : > { %s12125_s30 = sld [smem:[#allocation21_spill]] }
 0xbfb   : > { %s12126_s15 = sld [smem:[#allocation24_spill]] }
 0xbfe   : > { %p28_p12 = scmp.ge.s32.totalorder %s12123_s16, 6  }
 0xc00   :  { %30 = sbr.rel (!%p28_p12) target bundleno = 11 (0xb), region = 139 }
 0xc05   :  { %6723 = vsyncpa [#allocation3], 1 }
 0xc06   :  { %6725 = vsyncpa [#allocation3 + $0x1], 1 }
 0xc07   :  { %6726 = vsyncpa [#allocation6], 1 }
 0xc08   :  { %6727 = vsyncpa [#allocation9], 1 }
 0xc09   :  { %6728 = vsyncpa [#allocation12], 1 }
 0xc0a   :  { %6729 = vsyncpa [#allocation4], 1 }
 0xc0b   :  { %6731 = vsyncpa [#allocation4 + $0x1], 1 }

</bundles_post_ra>
